<compile_context>
chip_gen: v6e
topology: v6e:2x2x1
jax: 0.10.0
libtpu: 0.0.40
codegen_flags: <defaults>
</compile_context>

<pallas_src>
import math

import jax
import jax.numpy as jnp
from jax.experimental import pallas as pl
from jax.experimental.pallas import tpu as pltpu


def _gff_kernel(bt_ref, x_ref, out_ref):
    # bt_ref : (M, C)       resident, already scaled by 2*pi
    # x_ref  : (1, C, Tp)   one batch, one pixel tile (Tp lane-dense)
    # out_ref: (1, 2M, Tp)  sin in rows [0, M), cos in rows [M, 2M)
    m = bt_ref.shape[0]
    y = jnp.dot(bt_ref[...], x_ref[0], preferred_element_type=jnp.float32)
    out_ref[0, :m, :] = jnp.sin(y)
    out_ref[0, m:, :] = jnp.cos(y)


def _pick_pixel_tile(p, target=1024):
    """Largest pixel tile <= target that divides p and is a multiple of 128."""
    if p <= target:
        return p
    best = None
    for t in range(128, target + 1, 128):
        if p % t == 0:
            best = t
    # Fallback: whole pixel row (always a legal block shape; uses more VMEM).
    return best if best is not None else p


def gaussian_fourier_feature_transform(x, B_mat, *, pixel_tile=1024):
    """x: (B, C, W, H) float32 (NCHW).  B_mat: (C, M).  Returns (B, 2*M, W, H)."""
    b, c, w, h = x.shape
    cc, m = B_mat.shape
    assert c == cc, f"Expected {cc} channels, got {c}"

    p = w * h
    x3 = x.reshape(b, c, p)            # free reshape, layout unchanged
    bt = (2.0 * math.pi) * B_mat.T     # (M, C): fold 2*pi once, outside the loop

    tp = _pick_pixel_tile(p, pixel_tile)
    grid = (b, p // tp)                # both axes independent -> parallel

    out = pl.pallas_call(
        _gff_kernel,
        out_shape=jax.ShapeDtypeStruct((b, 2 * m, p), jnp.float32),
        grid_spec=pltpu.PrefetchScalarGridSpec(
            num_scalar_prefetch=0,
            grid=grid,
            in_specs=[
                pl.BlockSpec((m, c), lambda bi, pi: (0, 0)),          # Bt resident
                pl.BlockSpec((1, c, tp), lambda bi, pi: (bi, 0, pi)),  # x tile
            ],
            out_specs=pl.BlockSpec((1, 2 * m, tp), lambda bi, pi: (bi, 0, pi)),
        ),
        compiler_params=pltpu.CompilerParams(
            dimension_semantics=("parallel", "parallel")),
    )(bt, x3)

    return out.reshape(b, 2 * m, w, h)  # free reshape back to (B, 2M, W, H)


def _reference(x, B_mat):
    # Faithful to the torch module: permute -> matmul -> 2*pi -> sin/cos -> cat.
    b, c, w, h = x.shape
    m = B_mat.shape[1]
    xf = jnp.transpose(x, (0, 2, 3, 1)).reshape(b * w * h, c)
    y = 2.0 * math.pi * (xf @ B_mat)
    y = jnp.transpose(y.reshape(b, w, h, m), (0, 3, 1, 2))
    return jnp.concatenate([jnp.sin(y), jnp.cos(y)], axis=1)


if __name__ == "__main__":
    # Module config: num_input_channels=4, mapping_size=256, scale=10
    num_input_channels = 4
    mapping_size = 256
    scale = 10.0

    key = jax.random.PRNGKey(0)
    k_x, k_b = jax.random.split(key)

    # Deterministic parameter init (stands in for torch.manual_seed(42); torch.randn * scale)
    B_mat = jax.random.normal(
        k_b, (num_input_channels, mapping_size), dtype=jnp.float32) * scale

    # Input: batch=2, channels=4, width=16, height=16 (NCHW)
    x = jax.random.normal(k_x, (2, num_input_channels, 16, 16), dtype=jnp.float32)

    out = gaussian_fourier_feature_transform(x, B_mat)
    out = jax.block_until_ready(out)

    ref = _reference(x, B_mat)
    assert out.shape == (2, 2 * mapping_size, 16, 16), out.shape
    # 2*pi is folded into B before the matmul (the reference scales after it);
    # with |arguments| reaching a few hundred radians this costs a few 1e-4 of
    # sin/cos parity in f32, hence the slightly relaxed tolerance.
    assert jnp.allclose(out, ref, atol=2e-3, rtol=1e-3), "mismatch vs reference"

    print("KERNEL_OK")
</pallas_src>

<mosaic_0001>
module attributes {stable_mosaic.version = 11 : i64} {
  func.func @_gff_kernel(%arg0: i32, %arg1: i32, %arg2: memref<256x4xf32, #tpu.memory_space<vmem>>, %arg3: memref<1x4x256xf32, #tpu.memory_space<vmem>>, %arg4: memref<1x512x256xf32, #tpu.memory_space<vmem>>) attributes {dimension_semantics = [#tpu.dimension_semantics<parallel>, #tpu.dimension_semantics<parallel>], iteration_bounds = array<i64: 2, 1>, scalar_prefetch = 0 : i64, scratch_operands = 0 : i64, tpu.core_type = #tpu.core_type<tc>, window_params = [{pipeline_mode = #tpu.pipeline_mode<synchronous>, transform_indices = @transform_0, window_bounds = array<i64: 256, 4>}, {transform_indices = @transform_1, window_bounds = array<i64: 1, 4, 256>}, {transform_indices = @transform_2, window_bounds = array<i64: 1, 512, 256>}]} {
    %c0 = arith.constant 0 : index
    %c0_0 = arith.constant 0 : index
    %0 = vector.load %arg2[%c0, %c0_0] : memref<256x4xf32, #tpu.memory_space<vmem>>, vector<256x4xf32>
    %c0_1 = arith.constant 0 : index
    %c0_2 = arith.constant 0 : index
    %c0_3 = arith.constant 0 : index
    %1 = vector.load %arg3[%c0_1, %c0_2, %c0_3] : memref<1x4x256xf32, #tpu.memory_space<vmem>>, vector<1x4x256xf32>
    %2 = vector.shape_cast %1 : vector<1x4x256xf32> to vector<4x256xf32>
    %cst = arith.constant dense<0.000000e+00> : vector<256x256xf32>
    %3 = tpu.matmul %0, %2, %cst {dimension_numbers = #tpu.dot_dimension_numbers<[1], [0], [0], [1], [0, 0, 1, 1], [], []>} : vector<256x4xf32>, vector<4x256xf32>, vector<256x256xf32> -> vector<256x256xf32>
    %4 = math.sin %3 : vector<256x256xf32>
    %c0_4 = arith.constant 0 : index
    %c0_5 = arith.constant 0 : index
    %c0_6 = arith.constant 0 : index
    %5 = vector.load %arg4[%c0_4, %c0_5, %c0_6] : memref<1x512x256xf32, #tpu.memory_space<vmem>>, vector<1x256x256xf32>
    %6 = vector.shape_cast %5 : vector<1x256x256xf32> to vector<256x256xf32>
    %7 = vector.shape_cast %4 : vector<256x256xf32> to vector<1x256x256xf32>
    tpu.vector_store %arg4[%c0_4, %c0_5, %c0_6], %7 {strides = array<i32>} : memref<1x512x256xf32, #tpu.memory_space<vmem>>, vector<1x256x256xf32>,
    %8 = math.cos %3 : vector<256x256xf32>
    %c0_7 = arith.constant 0 : index
    %c256 = arith.constant 256 : index
    %c0_8 = arith.constant 0 : index
    %9 = vector.load %arg4[%c0_7, %c256, %c0_8] : memref<1x512x256xf32, #tpu.memory_space<vmem>>, vector<1x256x256xf32>
    %10 = vector.shape_cast %9 : vector<1x256x256xf32> to vector<256x256xf32>
    %11 = vector.shape_cast %8 : vector<256x256xf32> to vector<1x256x256xf32>
    tpu.vector_store %arg4[%c0_7, %c256, %c0_8], %11 {strides = array<i32>} : memref<1x512x256xf32, #tpu.memory_space<vmem>>, vector<1x256x256xf32>,
    return
  }
  func.func @transform_0(%arg0: i32, %arg1: i32) -> (i32, i32) {
    %c0_i32 = arith.constant 0 : i32
    %c0_i32_0 = arith.constant 0 : i32
    %c0_i32_1 = arith.constant 0 : i32
    return %c0_i32, %c0_i32_0 : i32, i32
  }
  func.func @transform_1(%arg0: i32, %arg1: i32) -> (i32, i32, i32) {
    %c0_i32 = arith.constant 0 : i32
    %c0_i32_0 = arith.constant 0 : i32
    return %arg0, %c0_i32, %arg1 : i32, i32, i32
  }
  func.func @transform_2(%arg0: i32, %arg1: i32) -> (i32, i32, i32) {
    %c0_i32 = arith.constant 0 : i32
    %c0_i32_0 = arith.constant 0 : i32
    return %arg0, %c0_i32, %arg1 : i32, i32, i32
  }
}

</mosaic_0001>

<bundles_post_ra>
// kernel: tpu_custom_call.1
= control target key start
LH: loop header
LB: loop body
LE: loop exit
PB: predicated region body
PF: predicated region fallthrough
CT: control target
= control target key end

     0   :  { %7 = vsyncpa [#allocation3], 0  ;;  %s21590_s0 = inlined_call_operand.vmem [shape: f32[256,4], index: 0, kind: input, shape index: {}]   ;;  %s21591_s1 = inlined_call_operand.vmem [shape: f32[2,4,256], index: 1, kind: input, shape index: {}]   ;;  %s21592_s2 = inlined_call_operand.hbm [shape: f32[2,512,256], index: 2, kind: output, shape index: {}]  }
   0x1   :  { %9 = vsyncpa [#allocation3 + $0x1], 0  ;;  %s15281_s9 = smov 0   ;;  %s15283_s10 = smov 0  }
   0x2   :  { %s15285_s11 = smov 0   ;;  %s15287_s12 = smov 0  }
   0x3   :  { %s15289_s13 = smov 0   ;;  %s15291_s14 = smov 0  }
   0x4 LB: > { %s14038_s15 = sadd.s32 4294967295, %s15254_s14   ;;  %s14039_s16 = sadd.s32 4294967294, %s15254_s14   ;;  %s15254_s14 = sphi %s15291_s14, %s15_s14   ;;  %s15250_s13 = sphi %s15289_s13, %s21721_s13   ;;  %s15246_s12 = sphi %s15287_s12, %s21720_s12   ;;  %s15242_s11 = sphi %s15285_s11, %s21719_s11   ;;  %s15238_s10 = sphi %s15283_s10, %s21718_s10   ;;  %s15234_s9 = sphi %s15281_s9, %s21717_s9  }
   0x5   : > { %s27_s17 = sadd.s32 1, %s15250_s13  ;;  %s85_s18 = sadd.s32 1, %s15242_s11 }
   0x6   : > { %p29_p0 = scmp.ge.s32.totalorder %s27_s17, 2  ;;  %p95_p1 = scmp.ne.s32.totalorder %s15242_s11, %s15238_s10 }
   0x7   : > { %p96_p2 = scmp.eq.s32.totalorder %s14038_s15, 1  ;;  %p101_p3 = scmp.ne.s32.totalorder %s15238_s10, %s15234_s9 }
   0x8   : > { %s21723_s17 = smov (%p29_p0, %s27_s17), 0  ;;  %p102_p5 = scmp.eq.s32.totalorder %s14039_s16, 1 }
   0x9   : > { %p15321_p4 = por %p96_p2, %p95_p1  ;;  %s80_s20 = ssub.s32 %s15250_s13, %s21723_s17 }
   0xa   : > { %p14042_p6 = scmp.ge.s32.totalorder %s15254_s14, 1  ;;  %p83_p7 = scmp.eq.s32.totalorder %s80_s20, 0 }
   0xb   : > { %p15328_p8 = por %p102_p5, %p101_p3  ;;  %p136_p9 = scmp.lt.s32.totalorder %s15254_s14, 3 }
   0xc   : > { %s15334_s22 = scalar_select %p83_p7, %s15242_s11, %s85_s18  }
   0xd   : > { %p137_p10 = pnand %p14042_p6, %p136_p9 }
   0xe   : > { %p163_p11 = scmp.lt.s32.totalorder (!%p137_p10), %s15246_s12, 1  ;;  %s159_s16 = sand.u32 (!%p137_p10), 1, %s15238_s10  }
   0xf   : > { %140 = sbr.rel (%p137_p10) target bundleno = 1968 (0x7b0), region = 28  ;;  %s14043_s18 = sshll.u32 (!%p137_p10), %s159_s16, 10 }
  0x10   : > { %s15815_s20 = scalar_lea.vmem (!%p137_p10), [#allocation2], %s14043_s18  ;;  %s15263_s29 = smov (!%p137_p10), [#allocation2]  }
  0x11   : > { %s15182_s30 = sshll.u32 (!%p137_p10), %s15263_s29, 4  ;;  %s15183_s30 = int_to_ptr.vmem [resolvable:$false] %s15182_s30 }
  0x12   : > { %s15184_s3 = scalar_lea.vmem (!%p137_p10), %s15183_s30, 32768 }
  0x14   : > { %v15256_v0 = vmov 0.0   ;;  %s164_s23 = scalar_select %p163_p11, %s15246_s12, 1  ;;  %vm305_vm0 = vcmask 1043456   ;;  %v173_v3 = vld [vmem:[%s21590_s0] sm:$0xff]  ;;  %vm208_vm1 = vcmask 31744   ;;  %v174_v5 = vld [vmem:[%s21590_s0 + $0x8] sm:$0xff] }
  0x15   : > { %374 = vmatprep.mubr.f32.mxu0 %v15256_v0  ;;  %470 = vmatprep.mubr.f32.mxu1 %v15256_v0  ;;  %v189_v4 = vld [vmem:[%s21590_s0 + $0x80] sm:$0xff]  ;;  %v190_v6 = vld [vmem:[%s21590_s0 + $0x88] sm:$0xff]  ;;  %v175_v7 = vld [vmem:[%s21590_s0 + $0x10] sm:$0xff] }
  0x16   : > { %s14597_s24 = sshll.u32 %s164_s23, 3  ;;  %v191_v8 = vld [vmem:[%s21590_s0 + $0x90] sm:$0xff]  ;;  %v176_v9 = vld [vmem:[%s21590_s0 + $0x18] sm:$0xff]  ;;  %v177_v11 = vld [vmem:[%s21590_s0 + $0x20] sm:$0xff]  ;;  %s14598_s23 = sshll.u32 %s15246_s12, 14 }
  0x17   : > { %s170_s27 = scalar_lea.vmem %s21591_s1, %s14597_s24  ;;  %v192_v10 = vld [vmem:[%s21590_s0 + $0x98] sm:$0xff]  ;;  %v193_v12 = vld [vmem:[%s21590_s0 + $0xa0] sm:$0xff]  ;;  %v178_v13 = vld [vmem:[%s21590_s0 + $0x28] sm:$0xff]  ;;  %s13959_s24 = sshll.u32 %s15815_s20, 4  ;;  %s21538_s24 = int_to_ptr.vmem [resolvable:$true] %s13959_s24 }
  0x18   : > { %v205_v1 = vld [vmem:[%s170_s27] sm:$0xff]  ;;  %v194_v14 = vld [vmem:[%s21590_s0 + $0xa8] sm:$0xff]  ;;  %v179_v15 = vld [vmem:[%s21590_s0 + $0x30] sm:$0xff]  ;;  %s21536_s12 = scalar_lea.hbm %s21592_s2, %s14598_s23  ;;  %s21545_s27 = scalar_lea.sflag [#allocation3], %s159_s16 }
  0x19   : > { %v207_v2 = vcombine.high %v205_v1, %v205_v1  ;;  %v195_v16 = vld [vmem:[%s21590_s0 + $0xb0] sm:$0xff]  ;;  %v180_v17 = vld [vmem:[%s21590_s0 + $0x38] sm:$0xff]  ;;  %v181_v19 = vld [vmem:[%s21590_s0 + $0x40] sm:$0xff]  ;;  %s15178_s28 = scalar_lea.vmem %s21538_s24, 16384  ;;  %p15185_p1 = scmp.lt.s32.totalorder %s21538_s24, %s15183_s30 }
  0x1a   : > { %v196_v18 = vld [vmem:[%s21590_s0 + $0xb8] sm:$0xff]  ;;  %v197_v20 = vld [vmem:[%s21590_s0 + $0xc0] sm:$0xff]  ;;  %v182_v21 = vld [vmem:[%s21590_s0 + $0x48] sm:$0xff]  ;;  %p15179_p12 = scmp.ne.s32.totalorder %s21538_s24, %s15178_s28  ;;  %p15186_p2 = scmp.lt.s32.totalorder %s15184_s3, %s15178_s28 }
  0x1b   : > { %14046 = vmatprep.subr.msk.mxu0 %vm305_vm0, %v207_v2  ;;  %14599 = vmatprep.subr.msk.mxu1 %vm305_vm0, %v207_v2  ;;  %v198_v22 = vld [vmem:[%s21590_s0 + $0xc8] sm:$0xff]  ;;  %v183_v23 = vld [vmem:[%s21590_s0 + $0x50] sm:$0xff]  ;;  %v184_v25 = vld [vmem:[%s21590_s0 + $0x58] sm:$0xff] }
  0x1c   : > { %14047 = vmatpush1.msk.msra.mxu0 %vm305_vm0, %v205_v1  ;;  %14600 = vmatpush1.msk.msra.mxu1 %vm305_vm0, %v205_v1  ;;  %v199_v24 = vld [vmem:[%s21590_s0 + $0xd0] sm:$0xff]  ;;  %v200_v26 = vld [vmem:[%s21590_s0 + $0xd8] sm:$0xff]  ;;  %v185_v27 = vld [vmem:[%s21590_s0 + $0x60] sm:$0xff]  ;;  %p15180_p13 = pnand %p15179_p12, %p15321_p4  ;;  %p15187_p3 = por %p15186_p2, %p15185_p1 }
  0x1d   : > { %14048 = vmatmul.mubr.msk.f32.vlgmr.msra.gmra.mxu0 %vm208_vm1, %v173_v3  ;;  %14064 = vmatmul.mubr.msk.f32.vlgmr.msra.gmra.mxu1 %vm208_vm1, %v189_v4  ;;  %v201_v28 = vld [vmem:[%s21590_s0 + $0xe0] sm:$0xff]  ;;  %v186_v29 = vld [vmem:[%s21590_s0 + $0x68] sm:$0xff]  ;;  %v187_v31 = vld [vmem:[%s21590_s0 + $0x70] sm:$0xff]  ;;  %v15258_v4 = vmov 2475754826  }
  0x1e   : > { %380 = vmatprep.mubr.f32.mxu0 %v15256_v0  ;;  %476 = vmatprep.mubr.f32.mxu1 %v15256_v0  ;;  %v202_v30 = vld [vmem:[%s21590_s0 + $0xe8] sm:$0xff]  ;;  %v203_v32 = vld [vmem:[%s21590_s0 + $0xf0] sm:$0xff]  ;;  %v188_v33 = vld [vmem:[%s21590_s0 + $0x78] sm:$0xff]  ;;  %p15181_p0 = pneg %p15180_p13 }
  0x1f   : > { %v204_v34 = vld [vmem:[%s21590_s0 + $0xf8] sm:$0xff] }
  0x20   : > { %p15188_p5 = pnand %p15187_p3, %p15181_p0 }
  0x21   : > { %14049 = vmatmul.mubr.msk.f32.gmra.mxu0 %vm208_vm1, %v174_v5  ;;  %14065 = vmatmul.mubr.msk.f32.gmra.mxu1 %vm208_vm1, %v190_v6  ;;  %v15259_v6 = vmov 2131351028  }
  0x22   : > { %386 = vmatprep.mubr.f32.mxu0 %v15256_v0  ;;  %482 = vmatprep.mubr.f32.mxu1 %v15256_v0 }
  0x25   : > { %14050 = vmatmul.mubr.msk.f32.gmra.mxu0 %vm208_vm1, %v175_v7  ;;  %14066 = vmatmul.mubr.msk.f32.gmra.mxu1 %vm208_vm1, %v191_v8  ;;  %v15260_v8 = vmov 2102212464  }
  0x26   : > { %392 = vmatprep.mubr.f32.mxu0 %v15256_v0  ;;  %488 = vmatprep.mubr.f32.mxu1 %v15256_v0 }
  0x29   : > { %14051 = vmatmul.mubr.msk.f32.gmra.mxu0 %vm208_vm1, %v176_v9  ;;  %14067 = vmatmul.mubr.msk.f32.gmra.mxu1 %vm208_vm1, %v192_v10  ;;  %v15261_v10 = vmov 920167782  }
  0x2a   : > { %398 = vmatprep.mubr.f32.mxu0 %v15256_v0  ;;  %494 = vmatprep.mubr.f32.mxu1 %v15256_v0 }
  0x2d   : > { %14052 = vmatmul.mubr.msk.f32.gmra.mxu0 %vm208_vm1, %v177_v11  ;;  %14068 = vmatmul.mubr.msk.f32.gmra.mxu1 %vm208_vm1, %v193_v12 }
  0x2e   : > { %404 = vmatprep.mubr.f32.mxu0 %v15256_v0  ;;  %500 = vmatprep.mubr.f32.mxu1 %v15256_v0 }
  0x31   : > { %14053 = vmatmul.mubr.msk.f32.gmra.mxu0 %vm208_vm1, %v178_v13  ;;  %14069 = vmatmul.mubr.msk.f32.gmra.mxu1 %vm208_vm1, %v194_v14 }
  0x32   : > { %410 = vmatprep.mubr.f32.mxu0 %v15256_v0  ;;  %506 = vmatprep.mubr.f32.mxu1 %v15256_v0 }
  0x35   : > { %14054 = vmatmul.mubr.msk.f32.gmra.mxu0 %vm208_vm1, %v179_v15  ;;  %14070 = vmatmul.mubr.msk.f32.gmra.mxu1 %vm208_vm1, %v195_v16 }
  0x36   : > { %416 = vmatprep.mubr.f32.mxu0 %v15256_v0  ;;  %512 = vmatprep.mubr.f32.mxu1 %v15256_v0 }
  0x39   : > { %14055 = vmatmul.mubr.msk.f32.gmra.mxu0 %vm208_vm1, %v180_v17  ;;  %14071 = vmatmul.mubr.msk.f32.gmra.mxu1 %vm208_vm1, %v196_v18  ;;  %v15262_v17 = vmov 1326507024  }
  0x3a   : > { %422 = vmatprep.mubr.f32.mxu0 %v15256_v0  ;;  %518 = vmatprep.mubr.f32.mxu1 %v15256_v0 }
  0x3d   : > { %14056 = vmatmul.mubr.msk.f32.gmra.mxu0 %vm208_vm1, %v181_v19  ;;  %14072 = vmatmul.mubr.msk.f32.gmra.mxu1 %vm208_vm1, %v197_v20 }
  0x3e   : > { %428 = vmatprep.mubr.f32.mxu0 %v15256_v0  ;;  %524 = vmatprep.mubr.f32.mxu1 %v15256_v0 }
  0x41   : > { %14057 = vmatmul.mubr.msk.f32.gmra.mxu0 %vm208_vm1, %v182_v21  ;;  %14073 = vmatmul.mubr.msk.f32.gmra.mxu1 %vm208_vm1, %v198_v22 }
  0x42   : > { %434 = vmatprep.mubr.f32.mxu0 %v15256_v0  ;;  %530 = vmatprep.mubr.f32.mxu1 %v15256_v0 }
  0x45   : > { %14058 = vmatmul.mubr.msk.f32.gmra.mxu0 %vm208_vm1, %v183_v23  ;;  %14074 = vmatmul.mubr.msk.f32.gmra.mxu1 %vm208_vm1, %v199_v24 }
  0x46   : > { %440 = vmatprep.mubr.f32.mxu0 %v15256_v0  ;;  %536 = vmatprep.mubr.f32.mxu1 %v15256_v0 }
  0x49   : > { %14059 = vmatmul.mubr.msk.f32.gmra.mxu0 %vm208_vm1, %v184_v25  ;;  %14075 = vmatmul.mubr.msk.f32.gmra.mxu1 %vm208_vm1, %v200_v26 }
  0x4a   : > { %446 = vmatprep.mubr.f32.mxu0 %v15256_v0  ;;  %542 = vmatprep.mubr.f32.mxu1 %v15256_v0 }
  0x4d   : > { %14060 = vmatmul.mubr.msk.f32.gmra.mxu0 %vm208_vm1, %v185_v27  ;;  %14076 = vmatmul.mubr.msk.f32.gmra.mxu1 %vm208_vm1, %v201_v28 }
  0x4e   : > { %452 = vmatprep.mubr.f32.mxu0 %v15256_v0  ;;  %548 = vmatprep.mubr.f32.mxu1 %v15256_v0 }
  0x51   : > { %14061 = vmatmul.mubr.msk.f32.gmra.mxu0 %vm208_vm1, %v186_v29  ;;  %14077 = vmatmul.mubr.msk.f32.gmra.mxu1 %vm208_vm1, %v202_v30 }
  0x52   : > { %458 = vmatprep.mubr.f32.mxu0 %v15256_v0  ;;  %554 = vmatprep.mubr.f32.mxu1 %v15256_v0 }
  0x55   : > { %14062 = vmatmul.mubr.msk.f32.gmra.mxu0 %vm208_vm1, %v187_v31  ;;  %14078 = vmatmul.mubr.msk.f32.gmra.mxu1 %vm208_vm1, %v203_v32 }
  0x56   : > { %464 = vmatprep.mubr.f32.mxu0 %v15256_v0  ;;  %560 = vmatprep.mubr.f32.mxu1 %v15256_v0  ;;  %v15257_v0 = vmov 683565275  }
  0x59   : > { %14063 = vmatmul.mubr.msk.f32.gmra.mxu0 %vm208_vm1, %v188_v33  ;;  %14079 = vmatmul.mubr.msk.f32.gmra.mxu1 %vm208_vm1, %v204_v34 }
  0xdd   : > { %v15501_v35 = vpop.f32.mrf.mxu0  ;;  %v15503_v36 = vpop.f32.mrf.mxu1 }
  0xde   : > { %v567_v37 = vand.u32 2147483647, %v15501_v35  ;;  %v570_v38 = vand.u32 2139095040, %v15501_v35  ;;  %v3895_v39 = vand.u32 2147483647, %v15503_v36  ;;  %v3898_v40 = vand.u32 2139095040, %v15503_v36 }
  0xdf   : > { %v15509_v41 = vpop.f32.mrf.mxu0  ;;  %vm569_vm15 = vcmp.lt.s32.totalorder %v15501_v35, 0 }
  0xe0   : > { %v571_v42 = vshrl.u32 %v570_v38, 23  ;;  %v574_v43 = vand.u32 8388607, %v567_v37  ;;  %v3899_v44 = vshrl.u32 %v3898_v40, 23  ;;  %v3902_v45 = vand.u32 8388607, %v3895_v39 }
  0xe1   : > { %v674_v46 = vand.u32 2139095040, %v15509_v41  ;;  %v671_v61 = vand.u32 2147483647, %v15509_v41 }
  0xe2   : > { %v14080_v47 = vadd.s32 4294967169, %v571_v42  ;;  %v14208_v48 = vadd.s32 4294967169, %v3899_v44  ;;  %v575_v51 = vor.u32 8388608, %v574_v43  ;;  %v3903_v52 = vor.u32 8388608, %v3902_v45 }
  0xe3   : > { %v675_v49 = vshrl.u32 %v674_v46, 23 }
  0xe4   : > { %v577_v50 = vadd.s32 1, %v14080_v47  ;;  %v3905_v53 = vadd.s32 1, %v14208_v48  ;;  %v15516_v59 = vshll.u32 %v575_v51, 8  ;;  %v15518_v60 = vshll.u32 %v3903_v52, 8 }
  0xe5   : > { %v14084_v54 = vadd.s32 4294967169, %v675_v49 }
  0xe6   : > { %vm578_vm2 = vcmp.gt.s32.totalorder %v577_v50, 0  ;;  %vm3906_vm3 = vcmp.gt.s32.totalorder %v3905_v53, 0 }
  0xe7   : > { %v579_v55 = vsel %vm578_vm2, %v577_v50, 0  ;;  %v3907_v58 = vsel %vm3906_vm3, %v3905_v53, 0  ;;  %v15521_v62 = vadd.s32 1, %v14084_v54 }
  0xe8   : > { %v580_v56 = vshrl.u32 %v579_v55, 5  ;;  %v581_v57 = vand.u32 31, %v579_v55  ;;  %v15524_v2 = vshrl.u32 %v3907_v58, 5  ;;  %v3909_v3 = vand.u32 31, %v3907_v58 }
  0xe9   : > { %vm682_vm8 = vcmp.gt.s32.totalorder %v15521_v62, 0 }
  0xea   : > { %v582_v63 = vsub.s32 32, %v581_v57  ;;  %v584_v1 = vshll.u32 %v15257_v0, %v581_v57  ;;  %v587_v5 = vshll.u32 %v15258_v4, %v581_v57  ;;  %v590_v7 = vshll.u32 %v15259_v6, %v581_v57 }
  0xeb   : > { %v593_v9 = vshll.u32 %v15260_v8, %v581_v57  ;;  %v596_v11 = vshll.u32 %v15261_v10, %v581_v57  ;;  %vm599_vm4 = vcmp.lt.s32.totalorder %v580_v56, 1  ;;  %vm600_vm5 = vcmp.lt.s32.totalorder %v580_v56, 2 }
  0xec   : > { %v585_v12 = vshrl.u32 %v15258_v4, %v582_v63  ;;  %v588_v13 = vshrl.u32 %v15259_v6, %v582_v63  ;;  %v591_v14 = vshrl.u32 %v15260_v8, %v582_v63  ;;  %v583_v15 = vshrl.u32 %v15257_v0, %v582_v63 }
  0xed   : > { %v594_v16 = vshrl.u32 %v15261_v10, %v582_v63  ;;  %v597_v18 = vshrl.u32 %v15262_v17, %v582_v63  ;;  %v3910_v22 = vsub.s32 32, %v3909_v3  ;;  %vm601_vm6 = vcmp.lt.s32.totalorder %v580_v56, 3 }
  0xee   : > { %v586_v19 = vor.u32 %v585_v12, %v584_v1  ;;  %v589_v20 = vor.u32 %v588_v13, %v587_v5  ;;  %v592_v21 = vor.u32 %v591_v14, %v590_v7  ;;  %vm602_vm7 = vcmp.lt.s32.totalorder %v580_v56, 4 }
  0xef   : > { %v595_v23 = vor.u32 %v594_v16, %v593_v9  ;;  %v598_v24 = vor.u32 %v597_v18, %v596_v11  ;;  %v3912_v32 = vshll.u32 %v15257_v0, %v3909_v3  ;;  %v3913_v38 = vshrl.u32 %v15258_v4, %v3910_v22 }
  0xf0   : > { %v603_v25 = vsel %vm599_vm4, %v583_v15, %v586_v19  ;;  %v604_v26 = vsel %vm602_vm7, %v592_v21, 2102212464  ;;  %v607_v27 = vsel %vm599_vm4, %v586_v19, %v589_v20  ;;  %v611_v28 = vsel %vm599_vm4, %v589_v20, %v592_v21 }
  0xf1   : > { %v605_v29 = vsel %vm601_vm6, %v589_v20, %v604_v26  ;;  %v608_v30 = vsel %vm602_vm7, %v595_v23, 920167782  ;;  %v612_v31 = vsel %vm602_vm7, %v598_v24, 1326507024  ;;  %v3915_v40 = vshll.u32 %v15258_v4, %v3909_v3 }
  0xf2   : > { %v609_v33 = vsel %vm601_vm6, %v592_v21, %v608_v30  ;;  %v613_v34 = vsel %vm601_vm6, %v595_v23, %v612_v31  ;;  %v606_v42 = vsel %vm600_vm5, %v603_v25, %v605_v29  ;;  %v3916_v45 = vshrl.u32 %v15259_v6, %v3910_v22  ;;  %v15586_v29 = vpop.f32.mrf.mxu1 }
  0xf3   : > { %v610_v43 = vsel %vm600_vm5, %v607_v27, %v609_v33  ;;  %v614_v44 = vsel %vm600_vm5, %v611_v28, %v613_v34  ;;  %v3914_v50 = vor.u32 %v3913_v38, %v3912_v32  ;;  %v3918_v52 = vshll.u32 %v15259_v6, %v3909_v3 }
  0xf4   : > { %v15548_v46 = vmul.u32.u64.low %v15516_v59, %v614_v44  ;;  %v15549_v47 = vmul.u32.u64.high %v15516_v59, %v614_v44, %v15548_v46  ;;  %v15552_v48 = vmul.u32.u64.low %v15516_v59, %v610_v43  ;;  %v15553_v49 = vmul.u32.u64.high %v15516_v59, %v610_v43, %v15552_v48 }
  0xf5   : > { %v3917_v51 = vor.u32 %v3916_v45, %v3915_v40  ;;  %v3919_v53 = vshrl.u32 %v15260_v8, %v3910_v22  ;;  %v3911_v54 = vshrl.u32 %v15257_v0, %v3910_v22  ;;  %v3921_v55 = vshll.u32 %v15260_v8, %v3909_v3 }
  0xf6   : > { %v3922_v56 = vshrl.u32 %v15261_v10, %v3910_v22  ;;  %v3925_v57 = vshrl.u32 %v15262_v17, %v3910_v22  ;;  %v622_v58 = vmul.u32 %v15516_v59, %v606_v42  ;;  %v3924_v1 = vshll.u32 %v15261_v10, %v3909_v3 }
  0xf7   : > { %v3920_v63 = vor.u32 %v3919_v53, %v3918_v52  ;;  %vm3927_vm9 = vcmp.lt.s32.totalorder %v15524_v2, 1  ;;  %vm624_vm10 = vc.u32 %v15549_v47, %v15552_v48  ;;  %v625_v5 = vadd.s32 1, %v15553_v49 }
  0xf8   : > { %v3923_v7 = vor.u32 %v3922_v56, %v3921_v55  ;;  %vm3928_vm11 = vcmp.lt.s32.totalorder %v15524_v2, 2  ;;  %v3926_v9 = vor.u32 %v3925_v57, %v3924_v1  ;;  %vm3929_vm12 = vcmp.lt.s32.totalorder %v15524_v2, 3 }
  0xf9   : > { %vm3930_vm13 = vcmp.lt.s32.totalorder %v15524_v2, 4  ;;  %v3935_v11 = vsel %vm3927_vm9, %v3914_v50, %v3917_v51  ;;  %v626_v59 = vsel %vm624_vm10, %v625_v5, %v15553_v49  ;;  %v3939_v3 = vsel %vm3927_vm9, %v3917_v51, %v3920_v63 }
  0xfa   : > { %v3932_v12 = vsel %vm3930_vm13, %v3920_v63, 2102212464  ;;  %v3936_v13 = vsel %vm3930_vm13, %v3923_v7, 920167782  ;;  %v627_v14 = vadd.s32 %v626_v59, %v622_v58  ;;  %v3931_v15 = vsel %vm3927_vm9, %v3911_v54, %v3914_v50 }
  0xfb   : > { %v3937_v16 = vsel %vm3929_vm12, %v3920_v63, %v3936_v13  ;;  %v3940_v18 = vsel %vm3930_vm13, %v3926_v9, 1326507024  ;;  %v3933_v19 = vsel %vm3929_vm12, %v3917_v51, %v3932_v12  ;;  %v683_v22 = vsel %vm682_vm8, %v15521_v62, 0 }
  0xfc   : > { %v3938_v20 = vsel %vm3928_vm11, %v3935_v11, %v3937_v16  ;;  %v3941_v21 = vsel %vm3929_vm12, %v3923_v7, %v3940_v18  ;;  %v628_v23 = vadd.s32 536870912, %v627_v14  ;;  %v3934_v62 = vsel %vm3928_vm11, %v3931_v15, %v3933_v19 }
  0xfd   : > { %v3942_v24 = vsel %vm3928_vm11, %v3939_v3, %v3941_v21  ;;  %v15578_v25 = vmul.u32.u64.low %v15518_v60, %v3938_v20  ;;  %v15579_v26 = vmul.u32.u64.high %v15518_v60, %v3938_v20, %v15578_v25  ;;  %v678_v31 = vand.u32 8388607, %v671_v61 }
  0xfe   : > { %v15583_v27 = vmul.u32.u64.low %v15518_v60, %v3942_v24  ;;  %v15584_v28 = vmul.u32.u64.high %v15518_v60, %v3942_v24, %v15583_v27  ;;  %v15588_v30 = vshrl.u32 %v628_v23, 30  ;;  %v685_v32 = vand.u32 31, %v683_v22 }
  0xff   : > { %v3953_v34 = vadd.s32 1, %v15579_v26  ;;  %v4002_v38 = vand.u32 2139095040, %v15586_v29  ;;  %v3950_v40 = vmul.u32 %v15518_v60, %v3934_v62  ;;  %v679_v44 = vor.u32 8388608, %v678_v31 }
 0x100   : > { %v630_v33 = vshll.u32 %v15588_v30, 30  ;;  %vm3952_vm14 = vc.u32 %v15584_v28, %v15578_v25  ;;  %v686_v45 = vsub.s32 32, %v685_v32  ;;  %v15601_v51 = vshrl.u32 %v683_v22, 5 }
 0x101   : > { %v3954_v43 = vsel %vm3952_vm14, %v3953_v34, %v15579_v26  ;;  %v4003_v49 = vshrl.u32 %v4002_v38, 23  ;;  %v3999_v53 = vand.u32 2147483647, %v15586_v29  ;;  %v623_v54 = vadd.s32 %v15552_v48, %v15549_v47 }
 0x102   : > { %v631_v42 = vsub.s32 %v627_v14, %v630_v33  ;;  %v3955_v2 = vadd.s32 %v3954_v43, %v3950_v40  ;;  %v695_v55 = vshrl.u32 %v15260_v8, %v686_v45  ;;  %v15608_v56 = vshll.u32 %v679_v44, 8 }
 0x103   : > { %v689_v58 = vshrl.u32 %v15258_v4, %v686_v45  ;;  %v692_v63 = vshrl.u32 %v15259_v6, %v686_v45  ;;  %v14212_v1 = vadd.s32 4294967169, %v4003_v49  ;;  %v694_v7 = vshll.u32 %v15259_v6, %v685_v32 }
 0x104   : > { %v633_v46 = vsub.s32 0, %v631_v42  ;;  %v3956_v50 = vadd.s32 536870912, %v3955_v2  ;;  %v698_v47 = vshrl.u32 %v15261_v10, %v686_v45  ;;  %vm703_vm0 = vcmp.lt.s32.totalorder %v15601_v51, 1 }
 0x105   : > { %v688_v9 = vshll.u32 %v15257_v0, %v685_v32  ;;  %v691_v11 = vshll.u32 %v15258_v4, %v685_v32  ;;  %v697_v59 = vshll.u32 %v15260_v8, %v685_v32  ;;  %vm704_vm1 = vcmp.lt.s32.totalorder %v15601_v51, 2 }
 0x106   : > { %v14081_v52 = vmin.u32 %v633_v46, %v631_v42  ;;  %v15605_v60 = vshrl.u32 %v3956_v50, 30  ;;  %v696_v13 = vor.u32 %v695_v55, %v694_v7  ;;  %v701_v3 = vshrl.u32 %v15262_v17, %v686_v45 }
 0x107   : > { %vm705_vm2 = vcmp.lt.s32.totalorder %v15601_v51, 3  ;;  %v690_v14 = vor.u32 %v689_v58, %v688_v9  ;;  %v693_v15 = vor.u32 %v692_v63, %v691_v11  ;;  %v699_v16 = vor.u32 %v698_v47, %v697_v59 }
 0x108   : > { %v635_v57 = vclz %v14081_v52  ;;  %v3958_v5 = vshll.u32 %v15605_v60, 30  ;;  %v653_v19 = vsub.s32 4, %v15588_v30  ;;  %v700_v21 = vshll.u32 %v15261_v10, %v685_v32 }
 0x109   : > { %v687_v24 = vshrl.u32 %v15257_v0, %v686_v45  ;;  %vm706_vm4 = vcmp.lt.s32.totalorder %v15601_v51, 4  ;;  %vm15632_vm5 = vcmp.le.f32.partialorder %v567_v37, 0.7853982  ;;  %v711_v38 = vsel %vm703_vm0, %v690_v14, %v693_v15 }
 0x10a   : > { %v14082_v48 = vadd.s32 4294967294, %v635_v57  ;;  %v15621_v12 = vsub.s32 %v3955_v2, %v3958_v5  ;;  %v702_v31 = vor.u32 %v701_v3, %v700_v21  ;;  %v708_v33 = vsel %vm706_vm4, %v696_v13, 2102212464 }
 0x10b   : > { %v712_v40 = vsel %vm706_vm4, %v699_v16, 920167782  ;;  %v654_v37 = vsel %vm569_vm15, %v653_v19, %v15588_v30  ;;  %v707_v2 = vsel %vm703_vm0, %v687_v24, %v690_v14  ;;  %v715_v49 = vsel %vm703_vm0, %v693_v15, %v696_v13 }
 0x10c   : > { %vm14083_vm3 = vcmp.lt.s32.totalorder %v14082_v48, 0  ;;  %v3961_v20 = vsub.s32 0, %v15621_v12  ;;  %v713_v46 = vsel %vm705_vm2, %v696_v13, %v712_v40  ;;  %v709_v52 = vsel %vm705_vm2, %v693_v15, %v708_v33 }
 0x10d   : > { %v638_v18 = vsel %vm14083_vm3, 0, %v14082_v48  ;;  %v714_v30 = vsel %vm704_vm1, %v711_v38, %v713_v46  ;;  %v4009_v57 = vadd.s32 1, %v14212_v1  ;;  %v710_v1 = vsel %vm704_vm1, %v707_v2, %v709_v52 }
 0x10e   : > { %v639_v22 = vsub.s32 32, %v638_v18  ;;  %v643_v23 = vsub.s32 4294967266, %v638_v18  ;;  %v640_v27 = vshll.u32 %v631_v42, %v638_v18  ;;  %v14209_v62 = vmin.u32 %v3961_v20, %v15621_v12 }
 0x10f   : > { %v3951_v42 = vadd.s32 %v15578_v25, %v15584_v28  ;;  %v716_v25 = vsel %vm706_vm4, %v702_v31, 1326507024  ;;  %v15665_v63 = vmul.u32.u64.low %v15608_v56, %v714_v30  ;;  %v15666_v5 = vmul.u32.u64.high %v15608_v56, %v714_v30, %v15665_v63 }
 0x110   : > { %v641_v32 = vshrl.u32 %v623_v54, %v639_v22  ;;  %v644_v34 = vadd.s32 127, %v643_v23  ;;  %v3963_v43 = vclz %v14209_v62  ;;  %v717_v55 = vsel %vm705_vm2, %v699_v16, %v716_v25 }
 0x111   : > { %v718_v58 = vsel %vm704_vm1, %v715_v49, %v717_v55  ;;  %vm4010_vm7 = vcmp.gt.s32.totalorder %v4009_v57, 0  ;;  %v656_v3 = vsel %vm15632_vm5, 0, %v654_v37  ;;  %v3981_v14 = vsub.s32 4, %v15605_v60 }
 0x112   : > { %v642_v44 = vor.u32 %v641_v32, %v640_v27  ;;  %v645_v45 = vshll.u32 %v644_v34, 23  ;;  %v14210_v50 = vadd.s32 4294967294, %v3963_v43  ;;  %v4011_v15 = vsel %vm4010_vm7, %v4009_v57, 0 }
 0x113   : > { %v15670_v48 = vmul.u32.u64.low %v15608_v56, %v718_v58  ;;  %v15671_v9 = vmul.u32.u64.high %v15608_v56, %v718_v58, %v15670_v48  ;;  %v729_v20 = vadd.s32 1, %v15666_v5  ;;  %v726_v22 = vmul.u32 %v15608_v56, %v710_v1 }
 0x114   : > { %v646_v28 = vor.u32 4788187, %v645_v45  ;;  %v649_v54 = vcvt.s32.f32 %v642_v44  ;;  %vm14211_vm6 = vcmp.lt.s32.totalorder %v14210_v50, 0  ;;  %v4013_v51 = vand.u32 31, %v4011_v15 }
 0x115   : > { %v3966_v47 = vsel %vm14211_vm6, 0, %v14210_v50  ;;  %vm728_vm8 = vc.u32 %v15671_v9, %v15665_v63  ;;  %v660_v23 = vadd.s32 3, %v656_v3  ;;  %vm3897_vm9 = vcmp.lt.s32.totalorder %v15503_v36, 0 }
 0x116   : > { %v647_v7 = vand.u32 2147483647, %v646_v28  ;;  %v3967_v11 = vsub.s32 32, %v3966_v47  ;;  %v3971_v59 = vsub.s32 4294967266, %v3966_v47  ;;  %v3968_v16 = vshll.u32 %v15621_v12, %v3966_v47 }
 0x117   : > { %v730_v62 = vsel %vm728_vm8, %v729_v20, %v15666_v5  ;;  %v15687_v33 = vsub.s32 32, %v4013_v51  ;;  %vm15694_vm10 = vcmp.le.f32.partialorder %v3895_v39, 0.7853982  ;;  %v3982_v38 = vsel %vm3897_vm9, %v3981_v14, %v15605_v60 }
 0x118   : > { %v650_v13 = vmul.f32 %v649_v54, %v647_v7  ;;  %v3969_v18 = vshrl.u32 %v3951_v42, %v3967_v11  ;;  %v3972_v19 = vadd.s32 127, %v3971_v59  ;;  %v731_v12 = vadd.s32 %v730_v62, %v726_v22 }
 0x119   : > { %v15701_v40 = vand.u32 3, %v656_v3  ;;  %v4006_v42 = vand.u32 8388607, %v3999_v53  ;;  %v15705_v26 = vand.u32 3, %v660_v23  ;;  %v3984_v2 = vsel %vm15694_vm10, 0, %v3982_v38 }
 0x11a   : > { %v651_v21 = vxor.u32 2147483648, %v650_v13  ;;  %v3970_v24 = vor.u32 %v3969_v18, %v3968_v16  ;;  %v3973_v27 = vshll.u32 %v3972_v19, 23  ;;  %v732_v37 = vadd.s32 536870912, %v731_v12 }
 0x11b   : > { %v4017_v60 = vshrl.u32 %v15258_v4, %v15687_v33  ;;  %v4020_v45 = vshrl.u32 %v15259_v6, %v15687_v33  ;;  %v4023_v49 = vshrl.u32 %v15260_v8, %v15687_v33  ;;  %v4025_v50 = vshll.u32 %v15260_v8, %v4013_v51 }
 0x11c   : > { %v652_v31 = vsel %vm569_vm15, %v651_v21, %v650_v13  ;;  %v3974_v34 = vor.u32 4788187, %v3973_v27  ;;  %v3977_v39 = vcvt.s32.f32 %v3970_v24  ;;  %v15709_v44 = vshrl.u32 %v732_v37, 30 }
 0x11d   : > { %v655_v56 = vsel %vm15632_vm5, %v15501_v35, %v652_v31  ;;  %v4026_v52 = vshrl.u32 %v15261_v10, %v15687_v33  ;;  %v15721_v25 = vshrl.u32 %v4011_v15, 5  ;;  %v4016_v28 = vshll.u32 %v15257_v0, %v4013_v51 }
 0x11e   : > { %14922 = vcosq.f32 %v655_v56  ;;  %v3975_v43 = vand.u32 2147483647, %v3974_v34  ;;  %v734_v30 = vshll.u32 %v15709_v44, 30  ;;  %v4019_v54 = vshll.u32 %v15258_v4, %v4013_v51 }
 0x11f   : > { %14924 = vsinq.f32 %v655_v56  ;;  %v4022_v57 = vshll.u32 %v15259_v6, %v4013_v51  ;;  %v4027_v58 = vor.u32 %v4026_v52, %v4025_v50  ;;  %v4029_v5 = vshrl.u32 %v15262_v17, %v15687_v33 }
 0x120   : > { %v3978_v46 = vmul.f32 %v3977_v39, %v3975_v43  ;;  %v15728_v7 = vsub.s32 %v731_v12, %v734_v30  ;;  %v4007_v47 = vor.u32 8388608, %v4006_v42  ;;  %v4018_v48 = vor.u32 %v4017_v60, %v4016_v28  ;;  %v15800_v30 = vpop.f32.mrf.mxu0 }
 0x121   : > { %v4021_v11 = vor.u32 %v4020_v45, %v4019_v54  ;;  %vm7385_vm11 = vcmp.eq.s32.totalorder %v15701_v40, 2  ;;  %v3988_v1 = vadd.s32 3, %v3984_v2  ;;  %v4024_v13 = vor.u32 %v4023_v49, %v4022_v57 }
 0x122   : > { %v3979_v55 = vxor.u32 2147483648, %v3978_v46  ;;  %v4028_v3 = vshll.u32 %v15261_v10, %v4013_v51  ;;  %vm663_vm12 = vcmp.eq.s32.totalorder %v15705_v26, 0  ;;  %vm7382_vm13 = vcmp.eq.s32.totalorder %v15701_v40, 0 }
 0x123   : > { %v737_v15 = vsub.s32 0, %v15728_v7  ;;  %vm4034_vm14 = vcmp.lt.s32.totalorder %v15721_v25, 4  ;;  %vm662_vm15 = vcmp.lt.s32.totalorder %v15705_v26, 2  ;;  %vm7381_vm0 = vcmp.lt.s32.totalorder %v15701_v40, 2 }
 0x124   : > { %v3980_v59 = vsel %vm3897_vm9, %v3979_v55, %v3978_v46  ;;  %v4030_v16 = vor.u32 %v4029_v5, %v4028_v3  ;;  %vm4031_vm1 = vcmp.lt.s32.totalorder %v15721_v25, 1  ;;  %v4040_v18 = vsel %vm4034_vm14, %v4027_v58, 920167782 }
 0x125   : > { %v3983_v14 = vsel %vm15694_vm10, %v15503_v36, %v3980_v59  ;;  %vm659_vm2 = vweird.f32 %v15501_v35  ;;  %v14085_v19 = vmin.u32 %v737_v15, %v15728_v7  ;;  %vm4033_vm3 = vcmp.lt.s32.totalorder %v15721_v25, 3 }
 0x126   : > { %14926 = vcosq.f32 %v3983_v14  ;;  %v4039_v20 = vsel %vm4031_vm1, %v4018_v48, %v4021_v11  ;;  %vm666_vm4 = vcmp.eq.s32.totalorder %v15705_v26, 2  ;;  %v15753_v21 = vand.u32 3, %v3988_v1 }
 0x127   : > { %14928 = vsinq.f32 %v3983_v14  ;;  %v15755_v22 = vand.u32 3, %v3984_v2  ;;  %v4041_v51 = vsel %vm4033_vm3, %v4024_v13, %v4040_v18  ;;  %v727_v23 = vadd.s32 %v15665_v63, %v15671_v9 }
 0x128   : > { %v739_v24 = vclz %v14085_v19  ;;  %vm4032_vm5 = vcmp.lt.s32.totalorder %v15721_v25, 2  ;;  %v15762_v27 = vshll.u32 %v4007_v47, 8  ;;  %vm673_vm6 = vcmp.lt.s32.totalorder %v15509_v41, 0 }
 0x129   : > { %v4015_v31 = vshrl.u32 %v15257_v0, %v15687_v33  ;;  %v4036_v12 = vsel %vm4034_vm14, %v4024_v13, 2102212464  ;;  %v4042_v56 = vsel %vm4032_vm5, %v4039_v20, %v4041_v51  ;;  %v4044_v63 = vsel %vm4034_vm14, %v4030_v16, 1326507024 }
 0x12a   : > { %v14086_v34 = vadd.s32 4294967294, %v739_v24  ;;  %v4043_v38 = vsel %vm4031_vm1, %v4021_v11, %v4024_v13  ;;  %v4045_v33 = vsel %vm4033_vm3, %v4027_v58, %v4044_v63  ;;  %vm10681_vm7 = vcmp.eq.s32.totalorder %v15755_v22, 2  ;;  %v15827_v13 = vpop.f32.mrf.mxu1 }
 0x12b   : > { %v14923_v62 = vpop.eup %14922  ;;  %v4035_v42 = vsel %vm4031_vm1, %v4015_v31, %v4018_v48  ;;  %v15782_v43 = vmul.u32.u64.low %v15762_v27, %v4042_v56  ;;  %v15783_v39 = vmul.u32.u64.high %v15762_v27, %v4042_v56, %v15782_v43  ;;  %v4037_v45 = vsel %vm4033_vm3, %v4021_v11, %v4036_v12 }
 0x12c   : > { %v14925_v9 = vpop.eup %14924  ;;  %v667_v32 = vxor.u32 2147483648, %v14923_v62  ;;  %vm14087_vm8 = vcmp.lt.s32.totalorder %v14086_v34, 0  ;;  %vm10678_vm9 = vcmp.eq.s32.totalorder %v15755_v22, 0  ;;  %v4046_v52 = vsel %vm4032_vm5, %v4043_v38, %v4045_v33 }
 0x12d   : > { %v664_v37 = vxor.u32 2147483648, %v14925_v9  ;;  %v742_v50 = vsel %vm14087_vm8, 0, %v14086_v34  ;;  %vm10677_vm10 = vcmp.lt.s32.totalorder %v15755_v22, 2  ;;  %v757_v57 = vsub.s32 4, %v15709_v44 }
 0x12e   : > { %v668_v2 = vsel %vm666_vm4, %v667_v32, %v14925_v9  ;;  %v7387_v60 = vsel %vm7385_vm11, %v667_v32, %v14925_v9  ;;  %v743_v55 = vsub.s32 32, %v742_v50  ;;  %vm3987_vm11 = vweird.f32 %v15503_v36 }
 0x12f   : > { %v665_v46 = vsel %vm663_vm12, %v14923_v62, %v664_v37  ;;  %v7384_v49 = vsel %vm7382_vm13, %v14923_v62, %v664_v37  ;;  %v747_v47 = vsub.s32 4294967266, %v742_v50  ;;  %v4038_v26 = vsel %vm4032_vm5, %v4035_v42, %v4037_v45 }
 0x130   : > { %v669_v28 = vsel %vm662_vm15, %v665_v46, %v668_v2  ;;  %v7388_v54 = vsel %vm7381_vm0, %v7384_v49, %v7387_v60  ;;  %v745_v40 = vshrl.u32 %v727_v23, %v743_v55  ;;  %v778_v35 = vand.u32 2139095040, %v15800_v30 }
 0x131   : > { %v670_v58 = vsel %vm659_vm2, nan, %v669_v28  ;;  %v7389_v5 = vsel %vm659_vm2, nan, %v7388_v54  ;;  %v15820_v48 = vmul.u32.u64.low %v15762_v27, %v4046_v52  ;;  %v15821_v11 = vmul.u32.u64.high %v15762_v27, %v4046_v52, %v15820_v48 }
 0x132   : > { %7223 = vst [vmem:[%s15815_s20] sm:$0xff] %v670_v58  ;;  %13879 = vst [vmem:[%s15815_s20 + $0x200] sm:$0xff] %v7389_v5  ;;  %vm3990_vm12 = vcmp.lt.s32.totalorder %v15753_v21, 2  ;;  %v744_v59 = vshll.u32 %v15728_v7, %v742_v50  ;;  %v748_v1 = vadd.s32 127, %v747_v47  ;;  %v4057_v25 = vadd.s32 1, %v15783_v39 }
 0x133   : > { %v14927_v3 = vpop.eup %14926  ;;  %vm3991_vm13 = vcmp.eq.s32.totalorder %v15753_v21, 0  ;;  %vm3994_vm14 = vcmp.eq.s32.totalorder %v15753_v21, 2  ;;  %v758_v14 = vsel %vm673_vm6, %v757_v57, %v15709_v44  ;;  %v779_v15 = vshrl.u32 %v778_v35, 23 }
 0x134   : > { %v14929_v16 = vpop.eup %14928  ;;  %v3995_v18 = vxor.u32 2147483648, %v14927_v3  ;;  %v746_v19 = vor.u32 %v745_v40, %v744_v59  ;;  %v749_v20 = vshll.u32 %v748_v1, 23  ;;  %v4054_v7 = vmul.u32 %v15762_v27, %v4038_v26 }
 0x135   : > { %v3992_v51 = vxor.u32 2147483648, %v14929_v16  ;;  %vm4056_vm15 = vc.u32 %v15821_v11, %v15782_v43  ;;  %v775_v23 = vand.u32 2147483647, %v15800_v30  ;;  %v4106_v24 = vand.u32 2139095040, %v15827_v13 }
 0x136   : > { %v3996_v62 = vsel %vm3994_vm14, %v3995_v18, %v14929_v16  ;;  %v10683_v44 = vsel %vm10681_vm7, %v3995_v18, %v14929_v16  ;;  %v750_v31 = vor.u32 4788187, %v749_v20  ;;  %v4058_v12 = vsel %vm4056_vm15, %v4057_v25, %v15783_v39 }
 0x137   : > { %v3993_v27 = vsel %vm3991_vm13, %v14927_v3, %v3992_v51  ;;  %v10680_v56 = vsel %vm10678_vm9, %v14927_v3, %v3992_v51  ;;  %v4059_v63 = vadd.s32 %v4058_v12, %v4054_v7  ;;  %v14088_v9 = vadd.s32 4294967169, %v779_v15 }
 0x138   : > { %v3997_v32 = vsel %vm3990_vm12, %v3993_v27, %v3996_v62  ;;  %v10684_v34 = vsel %vm10677_vm10, %v10680_v56, %v10683_v44  ;;  %v751_v38 = vand.u32 2147483647, %v750_v31  ;;  %v753_v33 = vcvt.s32.f32 %v746_v19 }
 0x139   : > { %v3998_v37 = vsel %vm3987_vm11, nan, %v3997_v32  ;;  %v10685_v42 = vsel %vm3987_vm11, nan, %v10684_v34  ;;  %v4060_v39 = vadd.s32 536870912, %v4059_v63  ;;  %v785_v2 = vadd.s32 1, %v14088_v9 }
 0x13a   : > { %7255 = vst [vmem:[%s15815_s20 + $0x100] sm:$0xff] %v3998_v37  ;;  %13911 = vst [vmem:[%s15815_s20 + $0x300] sm:$0xff] %v10685_v42  ;;  %vm672_vm0 = vcmp.le.f32.partialorder %v671_v61, 0.7853982  ;;  %v754_v21 = vmul.f32 %v753_v33, %v751_v38  ;;  %v782_v22 = vand.u32 8388607, %v775_v23  ;;  %v4055_v59 = vadd.s32 %v15782_v43, %v15821_v11 }
 0x13b   : > { %v760_v60 = vsel %vm672_vm0, 0, %v758_v14  ;;  %v4061_v45 = vshrl.u32 %v4060_v39, 30  ;;  %vm786_vm1 = vcmp.gt.s32.totalorder %v785_v2, 0  ;;  %v4107_v36 = vshrl.u32 %v4106_v24, 23 }
 0x13c   : > { %v755_v46 = vxor.u32 2147483648, %v754_v21  ;;  %v787_v49 = vsel %vm786_vm1, %v785_v2, 0  ;;  %v764_v54 = vadd.s32 3, %v760_v60  ;;  %v4103_v55 = vand.u32 2147483647, %v15827_v13 }
 0x13d   : > { %v4062_v50 = vshll.u32 %v4061_v45, 30  ;;  %v789_v52 = vand.u32 31, %v787_v49  ;;  %v783_v58 = vor.u32 8388608, %v782_v22  ;;  %v15866_v47 = vand.u32 3, %v760_v60 }
 0x13e   : > { %v756_v28 = vsel %vm673_vm6, %v755_v46, %v754_v21  ;;  %vm4001_vm2 = vcmp.lt.s32.totalorder %v15586_v29, 0  ;;  %v4085_v40 = vsub.s32 4, %v4061_v45  ;;  %v14216_v48 = vadd.s32 4294967169, %v4107_v36 }
 0x13f   : > { %v759_v61 = vsel %vm672_vm0, %v15509_v41, %v756_v28  ;;  %v15864_v57 = vsub.s32 %v4059_v63, %v4062_v50  ;;  %v790_v5 = vsub.s32 32, %v789_v52  ;;  %v15870_v35 = vand.u32 3, %v764_v54 }
 0x140   : > { %14930 = vcosq.f32 %v759_v61  ;;  %v792_v14 = vshll.u32 %v15257_v0, %v789_v52  ;;  %v15878_v15 = vshll.u32 %v783_v58, 8  ;;  %v15882_v16 = vand.u32 8388607, %v4103_v55 }
 0x141   : > { %14932 = vsinq.f32 %v759_v61  ;;  %v4065_v26 = vsub.s32 0, %v15864_v57  ;;  %v793_v1 = vshrl.u32 %v15258_v4, %v790_v5  ;;  %v796_v25 = vshrl.u32 %v15259_v6, %v790_v5 }
 0x142   : > { %v15884_v18 = vshrl.u32 %v787_v49, 5  ;;  %v795_v19 = vshll.u32 %v15258_v4, %v789_v52  ;;  %v798_v43 = vshll.u32 %v15259_v6, %v789_v52  ;;  %v799_v11 = vshrl.u32 %v15260_v8, %v790_v5 }
 0x143   : > { %v14213_v3 = vmin.u32 %v4065_v26, %v15864_v57  ;;  %v15891_v7 = vsel %vm4001_vm2, %v4085_v40, %v4061_v45  ;;  %v794_v51 = vor.u32 %v793_v1, %v792_v14  ;;  %v4113_v24 = vadd.s32 1, %v14216_v48 }
 0x144   : > { %v797_v62 = vor.u32 %v796_v25, %v795_v19  ;;  %v800_v44 = vor.u32 %v799_v11, %v798_v43  ;;  %v801_v31 = vshll.u32 %v15260_v8, %v789_v52  ;;  %v802_v12 = vshrl.u32 %v15261_v10, %v790_v5 }
 0x145   : > { %v4067_v20 = vclz %v14213_v3  ;;  %vm770_vm3 = vcmp.eq.s32.totalorder %v15870_v35, 2  ;;  %vm7488_vm4 = vcmp.eq.s32.totalorder %v15866_v47, 2  ;;  %v791_v56 = vshrl.u32 %v15257_v0, %v790_v5 }
 0x146   : > { %v804_v63 = vshll.u32 %v15261_v10, %v789_v52  ;;  %v805_v9 = vshrl.u32 %v15262_v17, %v790_v5  ;;  %vm767_vm5 = vcmp.eq.s32.totalorder %v15870_v35, 0  ;;  %vm7485_vm6 = vcmp.eq.s32.totalorder %v15866_v47, 0 }
 0x147   : > { %v14214_v27 = vadd.s32 4294967294, %v4067_v20  ;;  %v803_v32 = vor.u32 %v802_v12, %v801_v31  ;;  %vm807_vm7 = vcmp.lt.s32.totalorder %v15884_v18, 1  ;;  %vm808_vm8 = vcmp.lt.s32.totalorder %v15884_v18, 2 }
 0x148   : > { %vm810_vm9 = vcmp.lt.s32.totalorder %v15884_v18, 4  ;;  %vm766_vm10 = vcmp.lt.s32.totalorder %v15870_v35, 2  ;;  %vm7484_vm11 = vcmp.lt.s32.totalorder %v15866_v47, 2  ;;  %v806_v34 = vor.u32 %v805_v9, %v804_v63 }
 0x149   : > { %vm14215_vm12 = vcmp.lt.s32.totalorder %v14214_v27, 0  ;;  %vm809_vm13 = vcmp.lt.s32.totalorder %v15884_v18, 3  ;;  %v812_v38 = vsel %vm810_vm9, %v800_v44, 2102212464  ;;  %vm763_vm14 = vweird.f32 %v15509_v41 }
 0x14a   : > { %v4070_v33 = vsel %vm14215_vm12, 0, %v14214_v27  ;;  %v811_v37 = vsel %vm807_vm7, %v791_v56, %v794_v51  ;;  %v815_v42 = vsel %vm807_vm7, %v794_v51, %v797_v62  ;;  %v816_v39 = vsel %vm810_vm9, %v803_v32, 920167782 }
 0x14b   : > { %vm15919_vm15 = vcmp.le.f32.partialorder %v3999_v53, 0.7853982  ;;  %v4071_v21 = vsub.s32 32, %v4070_v33  ;;  %v4075_v60 = vsub.s32 4294967266, %v4070_v33  ;;  %v813_v45 = vsel %vm809_vm13, %v797_v62, %v812_v38 }
 0x14c   : > { %v819_v22 = vsel %vm807_vm7, %v797_v62, %v800_v44  ;;  %v4072_v46 = vshll.u32 %v15864_v57, %v4070_v33  ;;  %v817_v49 = vsel %vm809_vm13, %v800_v44, %v816_v39  ;;  %v820_v50 = vsel %vm810_vm9, %v806_v34, 1326507024 }
 0x14d   : > { %vm4114_vm0 = vcmp.gt.s32.totalorder %v4113_v24, 0  ;;  %v14931_v53 = vpop.eup %14930  ;;  %v4073_v52 = vshrl.u32 %v4055_v59, %v4071_v21  ;;  %v4076_v36 = vadd.s32 127, %v4075_v60  ;;  %v818_v28 = vsel %vm808_vm8, %v815_v42, %v817_v49 }
 0x14e   : > { %v821_v54 = vsel %vm809_vm13, %v803_v32, %v820_v50  ;;  %v14933_v61 = vpop.eup %14932  ;;  %v771_v58 = vxor.u32 2147483648, %v14931_v53  ;;  %v15939_v5 = vmul.u32.u64.low %v15878_v15, %v818_v28  ;;  %v15940_v26 = vmul.u32.u64.high %v15878_v15, %v818_v28, %v15939_v5 }
 0x14f   : > { %v822_v57 = vsel %vm808_vm8, %v819_v22, %v821_v54  ;;  %v768_v40 = vxor.u32 2147483648, %v14933_v61  ;;  %v4074_v48 = vor.u32 %v4073_v52, %v4072_v46  ;;  %v4077_v59 = vshll.u32 %v4076_v36, 23 }
 0x150   : > { %v4115_v1 = vsel %vm4114_vm0, %v4113_v24, 0  ;;  %v772_v25 = vsel %vm770_vm3, %v771_v58, %v14933_v61  ;;  %v7490_v3 = vsel %vm7488_vm4, %v771_v58, %v14933_v61  ;;  %v814_v51 = vsel %vm808_vm8, %v811_v37, %v813_v45 }
 0x151   : > { %v15948_v14 = vmul.u32.u64.low %v15878_v15, %v822_v57  ;;  %v15949_v19 = vmul.u32.u64.high %v15878_v15, %v822_v57, %v15948_v14  ;;  %v769_v43 = vsel %vm767_vm5, %v14931_v53, %v768_v40  ;;  %v7487_v11 = vsel %vm7485_vm6, %v14931_v53, %v768_v40 }
 0x152   : > { %v4078_v20 = vor.u32 4788187, %v4077_v59  ;;  %v773_v24 = vsel %vm766_vm10, %v769_v43, %v772_v25  ;;  %v7491_v62 = vsel %vm7484_vm11, %v7487_v11, %v7490_v3  ;;  %v4081_v44 = vcvt.s32.f32 %v4074_v48 }
 0x153   : > { %v833_v31 = vadd.s32 1, %v15940_v26  ;;  %v774_v12 = vsel %vm763_vm14, nan, %v773_v24  ;;  %v7492_v27 = vsel %vm763_vm14, nan, %v7491_v62  ;;  %v4117_v63 = vand.u32 31, %v4115_v1 }
 0x154   : > { %v4079_v56 = vand.u32 2147483647, %v4078_v20  ;;  %7224 = vst [vmem:[%s15815_s20 + $0x8] sm:$0xff] %v774_v12  ;;  %13880 = vst [vmem:[%s15815_s20 + $0x208] sm:$0xff] %v7492_v27  ;;  %v4088_v35 = vsel %vm15919_vm15, 0, %v15891_v7  ;;  %v830_v47 = vmul.u32 %v15878_v15, %v814_v51  ;;  %vm832_vm1 = vc.u32 %v15949_v19, %v15939_v5 }
 0x155   : > { %v4111_v18 = vor.u32 8388608, %v15882_v16  ;;  %v834_v32 = vsel %vm832_vm1, %v833_v31, %v15940_v26  ;;  %v4116_v41 = vshrl.u32 %v4115_v1, 5  ;;  %v4118_v34 = vsub.s32 32, %v4117_v63 }
 0x156   : > { %v4082_v9 = vmul.f32 %v4081_v44, %v4079_v56  ;;  %v835_v38 = vadd.s32 %v834_v32, %v830_v47  ;;  %v4120_v33 = vshll.u32 %v15257_v0, %v4117_v63  ;;  %v4123_v37 = vshll.u32 %v15258_v4, %v4117_v63  ;;  %v16001_v44 = vpop.f32.mrf.mxu0 }
 0x157   : > { %v4126_v42 = vshll.u32 %v15259_v6, %v4117_v63  ;;  %v4121_v15 = vshrl.u32 %v15258_v4, %v4118_v34  ;;  %v4124_v39 = vshrl.u32 %v15259_v6, %v4118_v34  ;;  %v4129_v21 = vshll.u32 %v15260_v8, %v4117_v63 }
 0x158   : > { %v4083_v7 = vxor.u32 2147483648, %v4082_v9  ;;  %v836_v16 = vadd.s32 536870912, %v835_v38  ;;  %v4127_v60 = vshrl.u32 %v15260_v8, %v4118_v34  ;;  %v4130_v45 = vshrl.u32 %v15261_v10, %v4118_v34 }
 0x159   : > { %v4132_v22 = vshll.u32 %v15261_v10, %v4117_v63  ;;  %v4122_v49 = vor.u32 %v4121_v15, %v4120_v33  ;;  %v4125_v50 = vor.u32 %v4124_v39, %v4123_v37  ;;  %v4133_v53 = vshrl.u32 %v15262_v17, %v4118_v34 }
 0x15a   : > { %v4084_v46 = vsel %vm4001_vm2, %v4083_v7, %v4082_v9  ;;  %v837_v36 = vshrl.u32 %v836_v16, 30  ;;  %v4128_v28 = vor.u32 %v4127_v60, %v4126_v42  ;;  %v4131_v54 = vor.u32 %v4130_v45, %v4129_v21 }
 0x15b   : > { %v4087_v52 = vsel %vm15919_vm15, %v15586_v29, %v4084_v46  ;;  %v4092_v61 = vadd.s32 3, %v4088_v35  ;;  %v4134_v58 = vor.u32 %v4133_v53, %v4132_v22  ;;  %vm4135_vm3 = vcmp.lt.s32.totalorder %v4116_v41, 1 }
 0x15c   : > { %14934 = vcosq.f32 %v4087_v52  ;;  %v838_v57 = vshll.u32 %v837_v36, 30  ;;  %vm4136_vm4 = vcmp.lt.s32.totalorder %v4116_v41, 2  ;;  %vm4138_vm5 = vcmp.lt.s32.totalorder %v4116_v41, 4 }
 0x15d   : > { %14936 = vsinq.f32 %v4087_v52  ;;  %v4119_v26 = vshrl.u32 %v15257_v0, %v4118_v34  ;;  %vm4137_vm2 = vcmp.lt.s32.totalorder %v4116_v41, 3  ;;  %v4143_v40 = vsel %vm4135_vm3, %v4122_v49, %v4125_v50 }
 0x15e   : > { %v4144_v48 = vsel %vm4138_vm5, %v4131_v54, 920167782  ;;  %v15993_v59 = vsub.s32 %v835_v38, %v838_v57  ;;  %v4140_v2 = vsel %vm4138_vm5, %v4128_v28, 2102212464  ;;  %v4147_v25 = vsel %vm4135_vm3, %v4125_v50, %v4128_v28 }
 0x15f   : > { %v4145_v1 = vsel %vm4137_vm2, %v4128_v28, %v4144_v48  ;;  %v10779_v3 = vand.u32 3, %v4088_v35  ;;  %v4148_v43 = vsel %vm4138_vm5, %v4134_v58, 1326507024  ;;  %v4151_v11 = vshll.u32 %v4111_v18, 8 }
 0x160   : > { %v4146_v14 = vsel %vm4136_vm4, %v4143_v40, %v4145_v1  ;;  %v841_v20 = vsub.s32 0, %v15993_v59  ;;  %v861_v51 = vsub.s32 4, %v837_v36  ;;  %v4139_v24 = vsel %vm4135_vm3, %v4119_v26, %v4122_v49 }
 0x161   : > { %v4149_v62 = vsel %vm4137_vm2, %v4131_v54, %v4148_v43  ;;  %v4141_v31 = vsel %vm4137_vm2, %v4125_v50, %v4140_v2  ;;  %v16005_v27 = vmul.u32.u64.low %v4151_v11, %v4146_v14  ;;  %v16006_v56 = vmul.u32.u64.high %v4151_v11, %v4146_v14, %v16005_v27 }
 0x162   : > { %v4150_v12 = vsel %vm4136_vm4, %v4147_v25, %v4149_v62  ;;  %v4093_v63 = vand.u32 3, %v4092_v61  ;;  %vm16011_vm6 = vcmp.le.f32.partialorder %v775_v23, 0.7853982  ;;  %v14089_v47 = vmin.u32 %v841_v20, %v15993_v59 }
 0x163   : > { %vm777_vm7 = vcmp.lt.s32.totalorder %v15800_v30, 0  ;;  %v16017_v18 = vmul.u32.u64.low %v4151_v11, %v4150_v12  ;;  %v16018_v9 = vmul.u32.u64.high %v4151_v11, %v4150_v12, %v16017_v18  ;;  %v882_v32 = vand.u32 2139095040, %v16001_v44 }
 0x164   : > { %vm10780_vm8 = vcmp.lt.s32.totalorder %v10779_v3, 2  ;;  %v843_v34 = vclz %v14089_v47  ;;  %v4142_v38 = vsel %vm4136_vm4, %v4139_v24, %v4141_v31  ;;  %v879_v33 = vand.u32 2147483647, %v16001_v44 }
 0x165   : > { %vm4091_vm9 = vweird.f32 %v15586_v29  ;;  %vm10781_vm10 = vcmp.eq.s32.totalorder %v10779_v3, 0  ;;  %v862_v23 = vsel %vm777_vm7, %v861_v51, %v837_v36  ;;  %v4161_v37 = vadd.s32 1, %v16006_v56 }
 0x166   : > { %v883_v42 = vshrl.u32 %v882_v32, 23  ;;  %vm4094_vm11 = vcmp.lt.s32.totalorder %v4093_v63, 2  ;;  %vm4095_vm12 = vcmp.eq.s32.totalorder %v4093_v63, 0  ;;  %vm10784_vm13 = vcmp.eq.s32.totalorder %v10779_v3, 2 }
 0x167   : > { %v14090_v7 = vadd.s32 4294967294, %v843_v34  ;;  %vm4098_vm14 = vcmp.eq.s32.totalorder %v4093_v63, 2  ;;  %v4158_v15 = vmul.u32 %v4151_v11, %v4142_v38  ;;  %vm4160_vm15 = vc.u32 %v16018_v9, %v16005_v27  ;;  %v16045_v11 = vpop.f32.mrf.mxu1 }
 0x168   : > { %v14092_v41 = vadd.s32 4294967169, %v883_v42  ;;  %v831_v21 = vadd.s32 %v15939_v5, %v15949_v19  ;;  %v864_v16 = vsel %vm16011_vm6, 0, %v862_v23  ;;  %v4162_v60 = vsel %vm4160_vm15, %v4161_v37, %v16006_v56 }
 0x169   : > { %v14935_v39 = vpop.eup %14934  ;;  %vm14091_vm0 = vcmp.lt.s32.totalorder %v14090_v7, 0  ;;  %v4163_v49 = vadd.s32 %v4162_v60, %v4158_v15  ;;  %v868_v20 = vadd.s32 3, %v864_v16  ;;  %v886_v3 = vand.u32 8388607, %v879_v33 }
 0x16a   : > { %v14937_v45 = vpop.eup %14936  ;;  %v4099_v22 = vxor.u32 2147483648, %v14935_v39  ;;  %v846_v46 = vsel %vm14091_vm0, 0, %v14090_v7  ;;  %v889_v50 = vadd.s32 1, %v14092_v41  ;;  %v4210_v56 = vand.u32 2139095040, %v16045_v11 }
 0x16b   : > { %v4096_v53 = vxor.u32 2147483648, %v14937_v45  ;;  %v847_v52 = vsub.s32 32, %v846_v46  ;;  %v848_v36 = vshll.u32 %v15993_v59, %v846_v46  ;;  %v851_v28 = vsub.s32 4294967266, %v846_v46 }
 0x16c   : > { %v4100_v54 = vsel %vm4098_vm14, %v4099_v22, %v14937_v45  ;;  %v10786_v5 = vsel %vm10784_vm13, %v4099_v22, %v14937_v45  ;;  %v4164_v19 = vadd.s32 536870912, %v4163_v49  ;;  %vm890_vm1 = vcmp.gt.s32.totalorder %v889_v50, 0 }
 0x16d   : > { %v4097_v61 = vsel %vm4095_vm12, %v14935_v39, %v4096_v53  ;;  %v10783_v58 = vsel %vm10781_vm10, %v14935_v39, %v4096_v53  ;;  %v849_v57 = vshrl.u32 %v831_v21, %v847_v52  ;;  %v852_v26 = vadd.s32 127, %v851_v28 }
 0x16e   : > { %v4101_v40 = vsel %vm4094_vm11, %v4097_v61, %v4100_v54  ;;  %v10787_v48 = vsel %vm10780_vm8, %v10783_v58, %v10786_v5  ;;  %v4165_v59 = vshrl.u32 %v4164_v19, 30  ;;  %v891_v2 = vsel %vm890_vm1, %v889_v50, 0 }
 0x16f   : > { %v4102_v1 = vsel %vm4091_vm9, nan, %v4101_v40  ;;  %v10788_v25 = vsel %vm4091_vm9, nan, %v10787_v48  ;;  %v850_v14 = vor.u32 %v849_v57, %v848_v36  ;;  %v853_v43 = vshll.u32 %v852_v26, 23 }
 0x170   : > { %7256 = vst [vmem:[%s15815_s20 + $0x108] sm:$0xff] %v4102_v1  ;;  %13912 = vst [vmem:[%s15815_s20 + $0x308] sm:$0xff] %v10788_v25  ;;  %v4166_v51 = vshll.u32 %v4165_v59, 30  ;;  %v893_v24 = vand.u32 31, %v891_v2  ;;  %v16054_v47 = vand.u32 3, %v864_v16  ;;  %vm4105_vm3 = vcmp.lt.s32.totalorder %v15827_v13, 0 }
 0x171   : > { %v854_v62 = vor.u32 4788187, %v853_v43  ;;  %v857_v63 = vcvt.s32.f32 %v850_v14  ;;  %v16057_v18 = vand.u32 3, %v868_v20  ;;  %v4159_v32 = vadd.s32 %v16005_v27, %v16018_v9 }
 0x172   : > { %v16051_v31 = vsub.s32 %v4163_v49, %v4166_v51  ;;  %v894_v12 = vsub.s32 32, %v893_v24  ;;  %v887_v38 = vor.u32 8388608, %v886_v3  ;;  %v896_v41 = vshll.u32 %v15257_v0, %v893_v24 }
 0x173   : > { %v855_v29 = vand.u32 2147483647, %v854_v62  ;;  %v899_v39 = vshll.u32 %v15258_v4, %v893_v24  ;;  %v4211_v21 = vshrl.u32 %v4210_v56, 23  ;;  %v4189_v60 = vsub.s32 4, %v4165_v59 }
 0x174   : > { %v4169_v34 = vsub.s32 0, %v16051_v31  ;;  %v897_v37 = vshrl.u32 %v15258_v4, %v894_v12  ;;  %v900_v42 = vshrl.u32 %v15259_v6, %v894_v12  ;;  %v903_v7 = vshrl.u32 %v15260_v8, %v894_v12 }
 0x175   : > { %v858_v23 = vmul.f32 %v857_v63, %v855_v29  ;;  %v892_v27 = vshrl.u32 %v891_v2, 5  ;;  %v902_v9 = vshll.u32 %v15259_v6, %v893_v24  ;;  %v16069_v49 = vshll.u32 %v887_v38, 8 }
 0x176   : > { %v14217_v15 = vmin.u32 %v4169_v34, %v16051_v31  ;;  %v898_v22 = vor.u32 %v897_v37, %v896_v41  ;;  %v901_v46 = vor.u32 %v900_v42, %v899_v39  ;;  %v905_v52 = vshll.u32 %v15260_v8, %v893_v24 }
 0x177   : > { %v859_v16 = vxor.u32 2147483648, %v858_v23  ;;  %v904_v53 = vor.u32 %v903_v7, %v902_v9  ;;  %v906_v36 = vshrl.u32 %v15261_v10, %v894_v12  ;;  %v908_v5 = vshll.u32 %v15261_v10, %v893_v24 }
 0x178   : > { %v4171_v45 = vclz %v14217_v15  ;;  %v909_v19 = vshrl.u32 %v15262_v17, %v894_v12  ;;  %v4190_v61 = vsel %vm4105_vm3, %v4189_v60, %v4165_v59  ;;  %v14220_v57 = vadd.s32 4294967169, %v4211_v21 }
 0x179   : > { %v860_v50 = vsel %vm777_vm7, %v859_v16, %v858_v23  ;;  %v907_v58 = vor.u32 %v906_v36, %v905_v52  ;;  %vm16084_vm4 = vcmp.le.f32.partialorder %v4103_v55, 0.7853982  ;;  %v895_v35 = vshrl.u32 %v15257_v0, %v894_v12 }
 0x17a   : > { %v863_v28 = vsel %vm16011_vm6, %v15800_v30, %v860_v50  ;;  %v14218_v54 = vadd.s32 4294967294, %v4171_v45  ;;  %v910_v40 = vor.u32 %v909_v19, %v908_v5  ;;  %vm911_vm2 = vcmp.lt.s32.totalorder %v892_v27, 1 }
 0x17b   : > { %14938 = vcosq.f32 %v863_v28  ;;  %vm912_vm6 = vcmp.lt.s32.totalorder %v892_v27, 2  ;;  %vm914_vm7 = vcmp.lt.s32.totalorder %v892_v27, 4  ;;  %v919_v25 = vsel %vm911_vm2, %v898_v22, %v901_v46 }
 0x17c   : > { %14940 = vsinq.f32 %v863_v28  ;;  %vm14219_vm5 = vcmp.lt.s32.totalorder %v14218_v54, 0  ;;  %v916_v59 = vsel %vm914_vm7, %v904_v53, 2102212464  ;;  %vm913_vm8 = vcmp.lt.s32.totalorder %v892_v27, 3 }
 0x17d   : > { %v4174_v48 = vsel %vm14219_vm5, 0, %v14218_v54  ;;  %v920_v14 = vsel %vm914_vm7, %v907_v58, 920167782  ;;  %v923_v43 = vsel %vm911_vm2, %v901_v46, %v904_v53  ;;  %v924_v20 = vsel %vm914_vm7, %v910_v40, 1326507024 }
 0x17e   : > { %v4175_v2 = vsub.s32 32, %v4174_v48  ;;  %v4179_v1 = vsub.s32 4294967266, %v4174_v48  ;;  %v4176_v55 = vshll.u32 %v16051_v31, %v4174_v48  ;;  %v921_v24 = vsel %vm913_vm8, %v904_v53, %v920_v14 }
 0x17f   : > { %v915_v62 = vsel %vm911_vm2, %v895_v35, %v898_v22  ;;  %v917_v12 = vsel %vm913_vm8, %v901_v46, %v916_v59  ;;  %v922_v56 = vsel %vm912_vm6, %v919_v25, %v921_v24  ;;  %v925_v29 = vsel %vm913_vm8, %v907_v58, %v924_v20 }
 0x180   : > { %v4177_v51 = vshrl.u32 %v4159_v32, %v4175_v2  ;;  %v4180_v3 = vadd.s32 127, %v4179_v1  ;;  %v926_v38 = vsel %vm912_vm6, %v923_v43, %v925_v29  ;;  %v4217_v23 = vadd.s32 1, %v14220_v57 }
 0x181   : > { %v16093_v37 = vmul.u32.u64.low %v16069_v49, %v926_v38  ;;  %v16094_v42 = vmul.u32.u64.high %v16069_v49, %v926_v38, %v16093_v37  ;;  %v16097_v7 = vmul.u32.u64.low %v16069_v49, %v922_v56  ;;  %v16098_v31 = vmul.u32.u64.high %v16069_v49, %v922_v56, %v16097_v7 }
 0x182   : > { %v4178_v63 = vor.u32 %v4177_v51, %v4176_v55  ;;  %v4181_v34 = vshll.u32 %v4180_v3, 23  ;;  %vm7587_vm9 = vcmp.lt.s32.totalorder %v16054_v47, 2  ;;  %vm7588_vm10 = vcmp.eq.s32.totalorder %v16054_v47, 0 }
 0x183   : > { %vm7591_vm11 = vcmp.eq.s32.totalorder %v16054_v47, 2  ;;  %vm4218_vm12 = vcmp.gt.s32.totalorder %v4217_v23, 0  ;;  %vm867_vm13 = vweird.f32 %v15800_v30  ;;  %v4192_v15 = vsel %vm16084_vm4, 0, %v4190_v61 }
 0x184   : > { %v4182_v32 = vor.u32 4788187, %v4181_v34  ;;  %v918_v41 = vsel %vm912_vm6, %v915_v62, %v917_v12  ;;  %v4207_v39 = vand.u32 2147483647, %v16045_v11  ;;  %v4219_v21 = vsel %vm4218_vm12, %v4217_v23, 0 }
 0x185   : > { %vm870_vm14 = vcmp.lt.s32.totalorder %v16057_v18, 2  ;;  %v4185_v60 = vcvt.s32.f32 %v4178_v63  ;;  %v4221_v9 = vand.u32 31, %v4219_v21  ;;  %vm871_vm15 = vcmp.eq.s32.totalorder %v16057_v18, 0 }
 0x186   : > { %v4183_v16 = vand.u32 2147483647, %v4182_v32  ;;  %vm874_vm0 = vcmp.eq.s32.totalorder %v16057_v18, 2  ;;  %vm936_vm1 = vc.u32 %v16094_v42, %v16097_v7  ;;  %v937_v45 = vadd.s32 1, %v16098_v31 }
 0x187   : > { %v4196_v46 = vadd.s32 3, %v4192_v15  ;;  %v934_v50 = vmul.u32 %v16069_v49, %v918_v41  ;;  %v4222_v53 = vsub.s32 32, %v4221_v9  ;;  %v4214_v54 = vand.u32 8388607, %v4207_v39 }
 0x188   : > { %v14939_v22 = vpop.eup %14938  ;;  %v4186_v27 = vmul.f32 %v4185_v60, %v4183_v16  ;;  %v938_v28 = vsel %vm936_vm1, %v937_v45, %v16098_v31  ;;  %v16119_v5 = vshrl.u32 %v4219_v21, 5  ;;  %v4224_v57 = vshll.u32 %v15257_v0, %v4221_v9 }
 0x189   : > { %v14941_v52 = vpop.eup %14940  ;;  %v875_v36 = vxor.u32 2147483648, %v14939_v22  ;;  %v939_v58 = vadd.s32 %v938_v28, %v934_v50  ;;  %v4225_v40 = vshrl.u32 %v15258_v4, %v4222_v53  ;;  %v4227_v48 = vshll.u32 %v15258_v4, %v4221_v9 }
 0x18a   : > { %v872_v19 = vxor.u32 2147483648, %v14941_v52  ;;  %v4187_v61 = vxor.u32 2147483648, %v4186_v27  ;;  %v4228_v55 = vshrl.u32 %v15259_v6, %v4222_v53  ;;  %v4231_v47 = vshrl.u32 %v15260_v8, %v4222_v53 }
 0x18b   : > { %v876_v35 = vsel %vm874_vm0, %v875_v36, %v14941_v52  ;;  %v7593_v49 = vsel %vm7591_vm11, %v875_v36, %v14941_v52  ;;  %v940_v25 = vadd.s32 536870912, %v939_v58  ;;  %v4233_v18 = vshll.u32 %v15260_v8, %v4221_v9 }
 0x18c   : > { %v873_v2 = vsel %vm871_vm15, %v14939_v22, %v872_v19  ;;  %v7590_v1 = vsel %vm7588_vm10, %v14939_v22, %v872_v19  ;;  %v4188_v59 = vsel %vm4105_vm3, %v4187_v61, %v4186_v27  ;;  %v4234_v26 = vshrl.u32 %v15261_v10, %v4222_v53  ;;  %v16172_v22 = vpop.f32.mrf.mxu0 }
 0x18d   : > { %v877_v14 = vsel %vm870_vm14, %v873_v2, %v876_v35  ;;  %v7594_v43 = vsel %vm7587_vm9, %v7590_v1, %v7593_v49  ;;  %v4191_v20 = vsel %vm16084_vm4, %v15827_v13, %v4188_v59  ;;  %v16146_v24 = vshrl.u32 %v940_v25, 30 }
 0x18e   : > { %v878_v51 = vsel %vm867_vm13, nan, %v877_v14  ;;  %v7595_v3 = vsel %vm867_vm13, nan, %v7594_v43  ;;  %14942 = vcosq.f32 %v4191_v20  ;;  %v4230_v12 = vshll.u32 %v15259_v6, %v4221_v9 }
 0x18f   : > { %7225 = vst [vmem:[%s15815_s20 + $0x10] sm:$0xff] %v878_v51  ;;  %13881 = vst [vmem:[%s15815_s20 + $0x210] sm:$0xff] %v7595_v3  ;;  %14944 = vsinq.f32 %v4191_v20  ;;  %v942_v62 = vshll.u32 %v16146_v24, 30  ;;  %v4236_v56 = vshll.u32 %v15261_v10, %v4221_v9  ;;  %v4237_v30 = vshrl.u32 %v15262_v17, %v4222_v53 }
 0x190   : > { %v16157_v29 = vand.u32 3, %v4192_v15  ;;  %v4226_v63 = vor.u32 %v4225_v40, %v4224_v57  ;;  %v4235_v34 = vor.u32 %v4234_v26, %v4233_v18  ;;  %v4229_v23 = vor.u32 %v4228_v55, %v4227_v48 }
 0x191   : > { %v16159_v38 = vsub.s32 %v939_v58, %v942_v62  ;;  %v4232_v37 = vor.u32 %v4231_v47, %v4230_v12  ;;  %v4238_v31 = vor.u32 %v4237_v30, %v4236_v56  ;;  %v4197_v32 = vand.u32 3, %v4196_v46 }
 0x192   : > { %v4215_v21 = vor.u32 8388608, %v4214_v54  ;;  %vm4242_vm3 = vcmp.lt.s32.totalorder %v16119_v5, 4  ;;  %vm10887_vm4 = vcmp.eq.s32.totalorder %v16157_v29, 2  ;;  %vm4239_vm5 = vcmp.lt.s32.totalorder %v16119_v5, 1 }
 0x193   : > { %v945_v41 = vsub.s32 0, %v16159_v38  ;;  %v4248_v16 = vsel %vm4242_vm3, %v4235_v34, 920167782  ;;  %v4252_v15 = vsel %vm4242_vm3, %v4238_v31, 1326507024  ;;  %vm10884_vm2 = vcmp.eq.s32.totalorder %v16157_v29, 0 }
 0x194   : > { %vm4241_vm6 = vcmp.lt.s32.totalorder %v16119_v5, 3  ;;  %v4247_v9 = vsel %vm4239_vm5, %v4226_v63, %v4229_v23  ;;  %v4251_v45 = vsel %vm4239_vm5, %v4229_v23, %v4232_v37  ;;  %vm10883_vm7 = vcmp.lt.s32.totalorder %v16157_v29, 2 }
 0x195   : > { %v14093_v60 = vmin.u32 %v945_v41, %v16159_v38  ;;  %v4223_v27 = vshrl.u32 %v15257_v0, %v4222_v53  ;;  %v4244_v46 = vsel %vm4242_vm3, %v4232_v37, 2102212464  ;;  %v4249_v50 = vsel %vm4241_vm6, %v4232_v37, %v4248_v16 }
 0x196   : > { %v4253_v52 = vsel %vm4241_vm6, %v4235_v34, %v4252_v15  ;;  %vm4195_vm8 = vweird.f32 %v15827_v13  ;;  %vm4198_vm9 = vcmp.lt.s32.totalorder %v4197_v32, 2  ;;  %vm4240_vm10 = vcmp.lt.s32.totalorder %v16119_v5, 2  ;;  %v16227_v15 = vpop.f32.mrf.mxu1 }
 0x197   : > { %v947_v36 = vclz %v14093_v60  ;;  %v4255_v28 = vshll.u32 %v4215_v21, 8  ;;  %v4243_v54 = vsel %vm4239_vm5, %v4223_v27, %v4226_v63  ;;  %v4250_v53 = vsel %vm4240_vm10, %v4247_v9, %v4249_v50 }
 0x198   : > { %v4254_v19 = vsel %vm4240_vm10, %v4251_v45, %v4253_v52  ;;  %v986_v61 = vand.u32 2139095040, %v16172_v22  ;;  %v4245_v57 = vsel %vm4241_vm6, %v4229_v23, %v4244_v46  ;;  %vm4199_vm11 = vcmp.eq.s32.totalorder %v4197_v32, 0 }
 0x199   : > { %v14094_v58 = vadd.s32 4294967294, %v947_v36  ;;  %v16191_v35 = vmul.u32.u64.low %v4255_v28, %v4254_v19  ;;  %v16192_v49 = vmul.u32.u64.high %v4255_v28, %v4254_v19, %v16191_v35  ;;  %vm4202_vm12 = vcmp.eq.s32.totalorder %v4197_v32, 2 }
 0x19a   : > { %v16194_v48 = vmul.u32.u64.low %v4255_v28, %v4250_v53  ;;  %v16195_v2 = vmul.u32.u64.high %v4255_v28, %v4250_v53, %v16194_v48  ;;  %v987_v1 = vshrl.u32 %v986_v61, 23  ;;  %v935_v14 = vadd.s32 %v16097_v7, %v16094_v42 }
 0x19b   : > { %v14943_v40 = vpop.eup %14942  ;;  %vm14095_vm13 = vcmp.lt.s32.totalorder %v14094_v58, 0  ;;  %v965_v55 = vsub.s32 4, %v16146_v24  ;;  %v4246_v51 = vsel %vm4240_vm10, %v4243_v54, %v4245_v57  ;;  %v983_v31 = vand.u32 2147483647, %v16172_v22 }
 0x19c   : > { %v14945_v59 = vpop.eup %14944  ;;  %v4203_v25 = vxor.u32 2147483648, %v14943_v40  ;;  %v950_v20 = vsel %vm14095_vm13, 0, %v14094_v58  ;;  %v14096_v26 = vadd.s32 4294967169, %v987_v1  ;;  %vm4264_vm14 = vc.u32 %v16192_v49, %v16194_v48 }
 0x19d   : > { %v4200_v43 = vxor.u32 2147483648, %v14945_v59  ;;  %v951_v18 = vsub.s32 32, %v950_v20  ;;  %v952_v7 = vshll.u32 %v16159_v38, %v950_v20  ;;  %v955_v12 = vsub.s32 4294967266, %v950_v20 }
 0x19e   : > { %v4204_v3 = vsel %vm4202_vm12, %v4203_v25, %v14945_v59  ;;  %v10889_v47 = vsel %vm10887_vm4, %v4203_v25, %v14945_v59  ;;  %v4265_v37 = vadd.s32 1, %v16195_v2  ;;  %v4262_v38 = vmul.u32 %v4255_v28, %v4246_v51 }
 0x19f   : > { %v4201_v62 = vsel %vm4199_vm11, %v14943_v40, %v4200_v43  ;;  %v10886_v42 = vsel %vm10884_vm2, %v14943_v40, %v4200_v43  ;;  %v953_v30 = vshrl.u32 %v935_v14, %v951_v18  ;;  %v956_v23 = vadd.s32 127, %v955_v12 }
 0x1a0   : > { %v4205_v56 = vsel %vm4198_vm9, %v4201_v62, %v4204_v3  ;;  %v10890_v5 = vsel %vm10883_vm7, %v10886_v42, %v10889_v47  ;;  %v993_v29 = vadd.s32 1, %v14096_v26  ;;  %vm881_vm15 = vcmp.lt.s32.totalorder %v16001_v44, 0 }
 0x1a1   : > { %v4206_v63 = vsel %vm4195_vm8, nan, %v4205_v56  ;;  %v10891_v34 = vsel %vm4195_vm8, nan, %v10890_v5  ;;  %v954_v32 = vor.u32 %v953_v30, %v952_v7  ;;  %v957_v41 = vshll.u32 %v956_v23, 23 }
 0x1a2   : > { %7257 = vst [vmem:[%s15815_s20 + $0x110] sm:$0xff] %v4206_v63  ;;  %13913 = vst [vmem:[%s15815_s20 + $0x310] sm:$0xff] %v10891_v34  ;;  %v4266_v21 = vsel %vm4264_vm14, %v4265_v37, %v16195_v2  ;;  %v966_v13 = vsel %vm881_vm15, %v965_v55, %v16146_v24  ;;  %vm994_vm0 = vcmp.gt.s32.totalorder %v993_v29, 0  ;;  %vm16231_vm1 = vcmp.le.f32.partialorder %v879_v33, 0.7853982 }
 0x1a3   : > { %v4267_v16 = vadd.s32 %v4266_v21, %v4262_v38  ;;  %v958_v60 = vor.u32 4788187, %v957_v41  ;;  %v995_v9 = vsel %vm994_vm0, %v993_v29, 0  ;;  %v990_v46 = vand.u32 8388607, %v983_v31 }
 0x1a4   : > { %v997_v50 = vand.u32 31, %v995_v9  ;;  %v961_v36 = vcvt.s32.f32 %v954_v32  ;;  %v968_v24 = vsel %vm16231_vm1, 0, %v966_v13  ;;  %v4314_v28 = vand.u32 2139095040, %v16227_v15 }
 0x1a5   : > { %v4268_v27 = vadd.s32 536870912, %v4267_v16  ;;  %v959_v52 = vand.u32 2147483647, %v958_v60  ;;  %v972_v33 = vadd.s32 3, %v968_v24  ;;  %v16242_v61 = vand.u32 3, %v968_v24 }
 0x1a6   : > { %v998_v53 = vsub.s32 32, %v997_v50  ;;  %v991_v57 = vor.u32 8388608, %v990_v46  ;;  %v4315_v1 = vshrl.u32 %v4314_v28, 23  ;;  %v996_v25 = vshrl.u32 %v995_v9, 5 }
 0x1a7   : > { %v16240_v54 = vshrl.u32 %v4268_v27, 30  ;;  %v962_v19 = vmul.f32 %v961_v36, %v959_v52  ;;  %v1000_v55 = vshll.u32 %v15257_v0, %v997_v50  ;;  %v1003_v51 = vshll.u32 %v15258_v4, %v997_v50 }
 0x1a8   : > { %v1001_v40 = vshrl.u32 %v15258_v4, %v998_v53  ;;  %v1004_v2 = vshrl.u32 %v15259_v6, %v998_v53  ;;  %v1007_v14 = vshrl.u32 %v15260_v8, %v998_v53  ;;  %v1010_v43 = vshrl.u32 %v15261_v10, %v998_v53 }
 0x1a9   : > { %v4270_v58 = vshll.u32 %v16240_v54, 30  ;;  %v963_v35 = vxor.u32 2147483648, %v962_v19  ;;  %v1013_v3 = vshrl.u32 %v15262_v17, %v998_v53  ;;  %v1006_v26 = vshll.u32 %v15259_v6, %v997_v50 }
 0x1aa   : > { %v1009_v62 = vshll.u32 %v15260_v8, %v997_v50  ;;  %v1002_v42 = vor.u32 %v1001_v40, %v1000_v55  ;;  %v1005_v7 = vor.u32 %v1004_v2, %v1003_v51  ;;  %v1012_v12 = vshll.u32 %v15261_v10, %v997_v50 }
 0x1ab   : > { %v16247_v59 = vsub.s32 %v4267_v16, %v4270_v58  ;;  %v964_v20 = vsel %vm881_vm15, %v963_v35, %v962_v19  ;;  %v1008_v5 = vor.u32 %v1007_v14, %v1006_v26  ;;  %v16264_v63 = vand.u32 3, %v972_v33 }
 0x1ac   : > { %v967_v47 = vsel %vm16231_vm1, %v16001_v44, %v964_v20  ;;  %v1011_v30 = vor.u32 %v1010_v43, %v1009_v62  ;;  %v1014_v34 = vor.u32 %v1013_v3, %v1012_v12  ;;  %v16266_v23 = vshll.u32 %v991_v57, 8 }
 0x1ad   : > { %v4273_v18 = vsub.s32 0, %v16247_v59  ;;  %14946 = vcosq.f32 %v967_v47  ;;  %v14224_v37 = vadd.s32 4294967169, %v4315_v1  ;;  %vm4209_vm3 = vcmp.lt.s32.totalorder %v16045_v11, 0 }
 0x1ae   : > { %14948 = vsinq.f32 %v967_v47  ;;  %v4293_v29 = vsub.s32 4, %v16240_v54  ;;  %v999_v32 = vshrl.u32 %v15257_v0, %v998_v53  ;;  %vm1015_vm4 = vcmp.lt.s32.totalorder %v996_v25, 1 }
 0x1af   : > { %v14221_v56 = vmin.u32 %v4273_v18, %v16247_v59  ;;  %vm1016_vm5 = vcmp.lt.s32.totalorder %v996_v25, 2  ;;  %vm1017_vm2 = vcmp.lt.s32.totalorder %v996_v25, 3  ;;  %vm1018_vm6 = vcmp.lt.s32.totalorder %v996_v25, 4 }
 0x1b0   : > { %v1023_v41 = vsel %vm1015_vm4, %v1002_v42, %v1005_v7  ;;  %v1020_v13 = vsel %vm1018_vm6, %v1008_v5, 2102212464  ;;  %v1024_v16 = vsel %vm1018_vm6, %v1011_v30, 920167782  ;;  %v1027_v60 = vsel %vm1015_vm4, %v1005_v7, %v1008_v5 }
 0x1b1   : > { %v4275_v38 = vclz %v14221_v56  ;;  %vm16273_vm7 = vcmp.le.f32.partialorder %v4207_v39, 0.7853982  ;;  %v1019_v45 = vsel %vm1015_vm4, %v999_v32, %v1002_v42  ;;  %v1025_v27 = vsel %vm1017_vm2, %v1008_v5, %v1024_v16 }
 0x1b2   : > { %v1028_v46 = vsel %vm1018_vm6, %v1014_v34, 1326507024  ;;  %v4321_v50 = vadd.s32 1, %v14224_v37  ;;  %vm7694_vm8 = vcmp.eq.s32.totalorder %v16242_v61, 2  ;;  %v1021_v52 = vsel %vm1017_vm2, %v1005_v7, %v1020_v13  ;;  %v16325_v13 = vpop.f32.mrf.mxu0 }
 0x1b3   : > { %v14222_v21 = vadd.s32 4294967294, %v4275_v38  ;;  %v1026_v36 = vsel %vm1016_vm5, %v1023_v41, %v1025_v27  ;;  %v1029_v24 = vsel %vm1017_vm2, %v1011_v30, %v1028_v46  ;;  %vm7691_vm10 = vcmp.eq.s32.totalorder %v16242_v61, 0 }
 0x1b4   : > { %v1030_v28 = vsel %vm1016_vm5, %v1027_v60, %v1029_v24  ;;  %v16285_v53 = vmul.u32.u64.low %v16266_v23, %v1026_v36  ;;  %v16286_v19 = vmul.u32.u64.high %v16266_v23, %v1026_v36, %v16285_v53  ;;  %vm7690_vm11 = vcmp.lt.s32.totalorder %v16242_v61, 2 }
 0x1b5   : > { %vm14223_vm9 = vcmp.lt.s32.totalorder %v14222_v21, 0  ;;  %v4263_v33 = vadd.s32 %v16194_v48, %v16192_v49  ;;  %v4311_v35 = vand.u32 2147483647, %v16227_v15  ;;  %v1022_v40 = vsel %vm1016_vm5, %v1019_v45, %v1021_v52 }
 0x1b6   : > { %v4278_v39 = vsel %vm14223_vm9, 0, %v14222_v21  ;;  %v16295_v2 = vmul.u32.u64.low %v16266_v23, %v1030_v28  ;;  %v16296_v1 = vmul.u32.u64.high %v16266_v23, %v1030_v28, %v16295_v2  ;;  %vm4322_vm12 = vcmp.gt.s32.totalorder %v4321_v50, 0 }
 0x1b7   : > { %v4279_v58 = vsub.s32 32, %v4278_v39  ;;  %v4283_v57 = vsub.s32 4294967266, %v4278_v39  ;;  %v4280_v14 = vshll.u32 %v16247_v59, %v4278_v39  ;;  %v4323_v55 = vsel %vm4322_vm12, %v4321_v50, 0 }
 0x1b8   : > { %vm974_vm13 = vcmp.lt.s32.totalorder %v16264_v63, 2  ;;  %v4294_v49 = vsel %vm4209_vm3, %v4293_v29, %v16240_v54  ;;  %v1041_v48 = vadd.s32 1, %v16286_v19  ;;  %v4325_v25 = vand.u32 31, %v4323_v55 }
 0x1b9   : > { %v4281_v43 = vshrl.u32 %v4263_v33, %v4279_v58  ;;  %v4284_v20 = vadd.s32 127, %v4283_v57  ;;  %vm975_vm14 = vcmp.eq.s32.totalorder %v16264_v63, 0  ;;  %vm978_vm15 = vcmp.eq.s32.totalorder %v16264_v63, 2 }
 0x1ba   : > { %v14947_v51 = vpop.eup %14946  ;;  %v1038_v26 = vmul.u32 %v16266_v23, %v1022_v40  ;;  %vm1040_vm0 = vc.u32 %v16296_v1, %v16285_v53  ;;  %v4318_v54 = vand.u32 8388607, %v4311_v35  ;;  %v4296_v7 = vsel %vm16273_vm7, 0, %v4294_v49 }
 0x1bb   : > { %v4282_v3 = vor.u32 %v4281_v43, %v4280_v14  ;;  %v4285_v47 = vshll.u32 %v4284_v20, 23  ;;  %v14949_v59 = vpop.eup %14948  ;;  %v979_v18 = vxor.u32 2147483648, %v14947_v51  ;;  %v1042_v12 = vsel %vm1040_vm0, %v1041_v48, %v16286_v19 }
 0x1bc   : > { %v976_v62 = vxor.u32 2147483648, %v14949_v59  ;;  %v1043_v30 = vadd.s32 %v1042_v12, %v1038_v26  ;;  %v4326_v34 = vsub.s32 32, %v4325_v25  ;;  %vm971_vm1 = vweird.f32 %v16001_v44 }
 0x1bd   : > { %v4286_v42 = vor.u32 4788187, %v4285_v47  ;;  %v980_v56 = vsel %vm978_vm15, %v979_v18, %v14949_v59  ;;  %v7696_v5 = vsel %vm7694_vm8, %v979_v18, %v14949_v59  ;;  %v4289_v29 = vcvt.s32.f32 %v4282_v3 }
 0x1be   : > { %v977_v23 = vsel %vm975_vm14, %v14947_v51, %v976_v62  ;;  %v7693_v37 = vsel %vm7691_vm10, %v14947_v51, %v976_v62  ;;  %v1044_v21 = vadd.s32 536870912, %v1043_v30  ;;  %v4319_v27 = vor.u32 8388608, %v4318_v54 }
 0x1bf   : > { %v4287_v38 = vand.u32 2147483647, %v4286_v42  ;;  %v981_v32 = vsel %vm974_vm13, %v977_v23, %v980_v56  ;;  %v7697_v41 = vsel %vm7690_vm11, %v7693_v37, %v7696_v5  ;;  %v4300_v46 = vadd.s32 3, %v4296_v7 }
 0x1c0   : > { %v982_v16 = vsel %vm971_vm1, nan, %v981_v32  ;;  %v7698_v60 = vsel %vm971_vm1, nan, %v7697_v41  ;;  %v16329_v50 = vshrl.u32 %v1044_v21, 30  ;;  %v4329_v44 = vshrl.u32 %v15258_v4, %v4326_v34 }
 0x1c1   : > { %v4290_v45 = vmul.f32 %v4289_v29, %v4287_v38  ;;  %7226 = vst [vmem:[%s15815_s20 + $0x18] sm:$0xff] %v982_v16  ;;  %13882 = vst [vmem:[%s15815_s20 + $0x218] sm:$0xff] %v7698_v60  ;;  %v4332_v63 = vshrl.u32 %v15259_v6, %v4326_v34  ;;  %v4335_v61 = vshrl.u32 %v15260_v8, %v4326_v34  ;;  %v1090_v24 = vand.u32 2139095040, %v16325_v13 }
 0x1c2   : > { %v4338_v36 = vshrl.u32 %v15261_v10, %v4326_v34  ;;  %v1046_v39 = vshll.u32 %v16329_v50, 30  ;;  %v4324_v28 = vshrl.u32 %v4323_v55, 5  ;;  %v4328_v19 = vshll.u32 %v15257_v0, %v4325_v25 }
 0x1c3   : > { %v4291_v52 = vxor.u32 2147483648, %v4290_v45  ;;  %v4331_v33 = vshll.u32 %v15258_v4, %v4325_v25  ;;  %v4334_v57 = vshll.u32 %v15259_v6, %v4325_v25  ;;  %v4337_v40 = vshll.u32 %v15260_v8, %v4325_v25 }
 0x1c4   : > { %v4341_v2 = vshrl.u32 %v15262_v17, %v4326_v34  ;;  %v16347_v43 = vsub.s32 %v1043_v30, %v1046_v39  ;;  %v4330_v20 = vor.u32 %v4329_v44, %v4328_v19  ;;  %v4340_v51 = vshll.u32 %v15261_v10, %v4325_v25 }
 0x1c5   : > { %v4292_v58 = vsel %vm4209_vm3, %v4291_v52, %v4290_v45  ;;  %v4333_v55 = vor.u32 %v4332_v63, %v4331_v33  ;;  %v4336_v49 = vor.u32 %v4335_v61, %v4334_v57  ;;  %v4339_v48 = vor.u32 %v4338_v36, %v4337_v40 }
 0x1c6   : > { %v4295_v14 = vsel %vm16273_vm7, %v16045_v11, %v4292_v58  ;;  %v1049_v3 = vsub.s32 0, %v16347_v43  ;;  %v16351_v47 = vshll.u32 %v4319_v27, 8  ;;  %v16353_v59 = vand.u32 3, %v4300_v46 }
 0x1c7   : > { %14950 = vcosq.f32 %v4295_v14  ;;  %v16355_v18 = vand.u32 3, %v4296_v7  ;;  %v4342_v9 = vor.u32 %v4341_v2, %v4340_v51  ;;  %v1091_v26 = vshrl.u32 %v1090_v24, 23 }
 0x1c8   : > { %14952 = vsinq.f32 %v4295_v14  ;;  %v14097_v54 = vmin.u32 %v1049_v3, %v16347_v43  ;;  %v4327_v62 = vshrl.u32 %v15257_v0, %v4326_v34  ;;  %vm4343_vm3 = vcmp.lt.s32.totalorder %v4324_v28, 1 }
 0x1c9   : > { %vm4346_vm4 = vcmp.lt.s32.totalorder %v4324_v28, 4  ;;  %vm4344_vm5 = vcmp.lt.s32.totalorder %v4324_v28, 2  ;;  %v4351_v25 = vsel %vm4343_vm3, %v4330_v20, %v4333_v55  ;;  %vm985_vm2 = vcmp.lt.s32.totalorder %v16172_v22, 0 }
 0x1ca   : > { %v4348_v42 = vsel %vm4346_vm4, %v4336_v49, 2102212464  ;;  %v4352_v12 = vsel %vm4346_vm4, %v4339_v48, 920167782  ;;  %v1051_v56 = vclz %v14097_v54  ;;  %vm4345_vm6 = vcmp.lt.s32.totalorder %v4324_v28, 3 }
 0x1cb   : > { %v4347_v5 = vsel %vm4343_vm3, %v4327_v62, %v4330_v20  ;;  %v4355_v30 = vsel %vm4343_vm3, %v4333_v55, %v4336_v49  ;;  %v4349_v7 = vsel %vm4345_vm6, %v4333_v55, %v4348_v42  ;;  %v4353_v23 = vsel %vm4345_vm6, %v4336_v49, %v4352_v12 }
 0x1cc   : > { %v4356_v37 = vsel %vm4346_vm4, %v4342_v9, 1326507024  ;;  %v14100_v38 = vadd.s32 4294967169, %v1091_v26  ;;  %v14098_v29 = vadd.s32 4294967294, %v1051_v56  ;;  %v4354_v32 = vsel %vm4344_vm5, %v4351_v25, %v4353_v23 }
 0x1cd   : > { %v4357_v34 = vsel %vm4345_vm6, %v4339_v48, %v4356_v37  ;;  %v1087_v41 = vand.u32 2147483647, %v16325_v13  ;;  %vm10987_vm7 = vcmp.eq.s32.totalorder %v16355_v18, 0  ;;  %vm16365_vm8 = vcmp.le.f32.partialorder %v983_v31, 0.7853982 }
 0x1ce   : > { %v4350_v16 = vsel %vm4344_vm5, %v4347_v5, %v4349_v7  ;;  %v4358_v60 = vsel %vm4344_vm5, %v4355_v30, %v4357_v34  ;;  %v16372_v45 = vmul.u32.u64.low %v16351_v47, %v4354_v32  ;;  %v16373_v27 = vmul.u32.u64.high %v16351_v47, %v4354_v32, %v16372_v45 }
 0x1cf   : > { %vm10986_vm9 = vcmp.lt.s32.totalorder %v16355_v18, 2  ;;  %vm14099_vm10 = vcmp.lt.s32.totalorder %v14098_v29, 0  ;;  %v16378_v46 = vmul.u32.u64.low %v16351_v47, %v4358_v60  ;;  %v16379_v44 = vmul.u32.u64.high %v16351_v47, %v4358_v60, %v16378_v46 }
 0x1d0   : > { %v1097_v31 = vadd.s32 1, %v14100_v38  ;;  %vm4299_vm11 = vweird.f32 %v16045_v11  ;;  %vm4302_vm12 = vcmp.lt.s32.totalorder %v16353_v59, 2  ;;  %vm10990_vm13 = vcmp.eq.s32.totalorder %v16355_v18, 2 }
 0x1d1   : > { %v1054_v63 = vsel %vm14099_vm10, 0, %v14098_v29  ;;  %v1069_v52 = vsub.s32 4, %v16329_v50  ;;  %v1039_v61 = vadd.s32 %v16285_v53, %v16296_v1  ;;  %vm4306_vm15 = vcmp.eq.s32.totalorder %v16353_v59, 2 }
 0x1d2   : > { %v1055_v36 = vsub.s32 32, %v1054_v63  ;;  %v1059_v24 = vsub.s32 4294967266, %v1054_v63  ;;  %vm1098_vm14 = vcmp.gt.s32.totalorder %v1097_v31, 0  ;;  %v4366_v39 = vmul.u32 %v16351_v47, %v4350_v16 }
 0x1d3   : > { %v4369_v28 = vadd.s32 1, %v16373_v27  ;;  %v1099_v19 = vsel %vm1098_vm14, %v1097_v31, 0  ;;  %v1056_v58 = vshll.u32 %v16347_v43, %v1054_v63  ;;  %vm4368_vm0 = vc.u32 %v16379_v44, %v16372_v45 }
 0x1d4   : > { %v14951_v33 = vpop.eup %14950  ;;  %v1057_v57 = vshrl.u32 %v1039_v61, %v1055_v36  ;;  %v1060_v40 = vadd.s32 127, %v1059_v24  ;;  %v1070_v1 = vsel %vm985_vm2, %v1069_v52, %v16329_v50  ;;  %v1101_v20 = vand.u32 31, %v1099_v19 }
 0x1d5   : > { %v14953_v2 = vpop.eup %14952  ;;  %v4307_v53 = vxor.u32 2147483648, %v14951_v33  ;;  %v4370_v14 = vsel %vm4368_vm0, %v4369_v28, %v16373_v27  ;;  %vm4303_vm1 = vcmp.eq.s32.totalorder %v16353_v59, 0  ;;  %v1094_v50 = vand.u32 8388607, %v1087_v41 }
 0x1d6   : > { %v4304_v55 = vxor.u32 2147483648, %v14953_v2  ;;  %v1058_v49 = vor.u32 %v1057_v57, %v1056_v58  ;;  %v1061_v48 = vshll.u32 %v1060_v40, 23  ;;  %v4371_v51 = vadd.s32 %v4370_v14, %v4366_v39  ;;  %v16441_v57 = vpop.f32.mrf.mxu1 }
 0x1d7   : > { %v4308_v43 = vsel %vm4306_vm15, %v4307_v53, %v14953_v2  ;;  %v10992_v3 = vsel %vm10990_vm13, %v4307_v53, %v14953_v2  ;;  %v1072_v54 = vsel %vm16365_vm8, 0, %v1070_v1  ;;  %v1102_v12 = vsub.s32 32, %v1101_v20 }
 0x1d8   : > { %v4305_v47 = vsel %vm4303_vm1, %v14951_v33, %v4304_v55  ;;  %v10989_v9 = vsel %vm10987_vm7, %v14951_v33, %v4304_v55  ;;  %v1062_v26 = vor.u32 4788187, %v1061_v48  ;;  %v4372_v25 = vadd.s32 536870912, %v4371_v51 }
 0x1d9   : > { %v4309_v62 = vsel %vm4302_vm12, %v4305_v47, %v4308_v43  ;;  %v10993_v42 = vsel %vm10986_vm9, %v10989_v9, %v10992_v3  ;;  %v1065_v7 = vcvt.s32.f32 %v1058_v49  ;;  %v1076_v59 = vadd.s32 3, %v1072_v54 }
 0x1da   : > { %v4310_v56 = vsel %vm4299_vm11, nan, %v4309_v62  ;;  %v10994_v5 = vsel %vm4299_vm11, nan, %v10993_v42  ;;  %v1063_v30 = vand.u32 2147483647, %v1062_v26  ;;  %v16418_v23 = vshrl.u32 %v4372_v25, 30 }
 0x1db   : > { %7258 = vst [vmem:[%s15815_s20 + $0x118] sm:$0xff] %v4310_v56  ;;  %13914 = vst [vmem:[%s15815_s20 + $0x318] sm:$0xff] %v10994_v5  ;;  %v1095_v38 = vor.u32 8388608, %v1094_v50  ;;  %v16420_v29 = vand.u32 3, %v1072_v54  ;;  %v1105_v32 = vshrl.u32 %v15258_v4, %v1102_v12  ;;  %v1108_v34 = vshrl.u32 %v15259_v6, %v1102_v12 }
 0x1dc   : > { %v1066_v37 = vmul.f32 %v1065_v7, %v1063_v30  ;;  %v4374_v18 = vshll.u32 %v16418_v23, 30  ;;  %v1111_v11 = vshrl.u32 %v15260_v8, %v1102_v12  ;;  %v1114_v60 = vshrl.u32 %v15261_v10, %v1102_v12 }
 0x1dd   : > { %v1117_v27 = vshrl.u32 %v15262_v17, %v1102_v12  ;;  %v1100_v31 = vshrl.u32 %v1099_v19, 5  ;;  %v1104_v63 = vshll.u32 %v15257_v0, %v1101_v20  ;;  %v1107_v52 = vshll.u32 %v15258_v4, %v1101_v20 }
 0x1de   : > { %v1067_v16 = vxor.u32 2147483648, %v1066_v37  ;;  %v16428_v46 = vsub.s32 %v4371_v51, %v4374_v18  ;;  %v1110_v36 = vshll.u32 %v15259_v6, %v1101_v20  ;;  %v1113_v24 = vshll.u32 %v15260_v8, %v1101_v20 }
 0x1df   : > { %v1116_v39 = vshll.u32 %v15261_v10, %v1101_v20  ;;  %v1106_v19 = vor.u32 %v1105_v32, %v1104_v63  ;;  %v1109_v58 = vor.u32 %v1108_v34, %v1107_v52  ;;  %v16443_v1 = vand.u32 3, %v1076_v59 }
 0x1e0   : > { %v1068_v61 = vsel %vm985_vm2, %v1067_v16, %v1066_v37  ;;  %v4377_v33 = vsub.s32 0, %v16428_v46  ;;  %v1112_v40 = vor.u32 %v1111_v11, %v1110_v36  ;;  %v1115_v2 = vor.u32 %v1114_v60, %v1113_v24 }
 0x1e1   : > { %v1071_v28 = vsel %vm16365_vm8, %v16172_v22, %v1068_v61  ;;  %v1118_v53 = vor.u32 %v1117_v27, %v1116_v39  ;;  %vm4313_vm3 = vcmp.lt.s32.totalorder %v16227_v15, 0  ;;  %v1135_v20 = vshll.u32 %v1095_v38, 8 }
 0x1e2   : > { %14954 = vcosq.f32 %v1071_v28  ;;  %v14225_v14 = vmin.u32 %v4377_v33, %v16428_v46  ;;  %v4397_v21 = vsub.s32 4, %v16418_v23  ;;  %v1103_v55 = vshrl.u32 %v15257_v0, %v1102_v12 }
 0x1e3   : > { %14956 = vsinq.f32 %v1071_v28  ;;  %vm1119_vm4 = vcmp.lt.s32.totalorder %v1100_v31, 1  ;;  %v4418_v49 = vand.u32 2139095040, %v16441_v57  ;;  %vm1121_vm5 = vcmp.lt.s32.totalorder %v1100_v31, 3 }
 0x1e4   : > { %v4379_v48 = vclz %v14225_v14  ;;  %vm1122_vm2 = vcmp.lt.s32.totalorder %v1100_v31, 4  ;;  %v1127_v51 = vsel %vm1119_vm4, %v1106_v19, %v1109_v58  ;;  %v1131_v50 = vsel %vm1119_vm4, %v1109_v58, %v1112_v40 }
 0x1e5   : > { %v1124_v43 = vsel %vm1122_vm2, %v1112_v40, 2102212464  ;;  %v1128_v3 = vsel %vm1122_vm2, %v1115_v2, 920167782  ;;  %v1132_v47 = vsel %vm1122_vm2, %v1118_v53, 1326507024  ;;  %v1123_v42 = vsel %vm1119_vm4, %v1103_v55, %v1106_v19 }
 0x1e6   : > { %vm16452_vm6 = vcmp.le.f32.partialorder %v4311_v35, 0.7853982  ;;  %v14226_v26 = vadd.s32 4294967294, %v4379_v48  ;;  %vm1120_vm7 = vcmp.lt.s32.totalorder %v1100_v31, 2  ;;  %v1129_v54 = vsel %vm1121_vm5, %v1112_v40, %v1128_v3 }
 0x1e7   : > { %v1133_v62 = vsel %vm1121_vm5, %v1115_v2, %v1132_v47  ;;  %v1130_v25 = vsel %vm1120_vm7, %v1127_v51, %v1129_v54  ;;  %v4419_v56 = vshrl.u32 %v4418_v49, 23  ;;  %vm7797_vm8 = vcmp.eq.s32.totalorder %v16420_v29, 2 }
 0x1e8   : > { %v1134_v12 = vsel %vm1120_vm7, %v1131_v50, %v1133_v62  ;;  %vm14227_vm9 = vcmp.lt.s32.totalorder %v14226_v26, 0  ;;  %v1125_v35 = vsel %vm1121_vm5, %v1109_v58, %v1124_v43  ;;  %vm7794_vm10 = vcmp.eq.s32.totalorder %v16420_v29, 0 }
 0x1e9   : > { %v16462_v5 = vmul.u32.u64.low %v1135_v20, %v1134_v12  ;;  %v16463_v30 = vmul.u32.u64.high %v1135_v20, %v1134_v12, %v16462_v5  ;;  %v4382_v7 = vsel %vm14227_vm9, 0, %v14226_v26  ;;  %v14228_v38 = vadd.s32 4294967169, %v4419_v56 }
 0x1ea   : > { %v16466_v37 = vmul.u32.u64.low %v1135_v20, %v1130_v25  ;;  %v16467_v59 = vmul.u32.u64.high %v1135_v20, %v1130_v25, %v16466_v37  ;;  %vm1078_vm11 = vcmp.lt.s32.totalorder %v16443_v1, 2  ;;  %vm7793_vm12 = vcmp.lt.s32.totalorder %v16420_v29, 2 }
 0x1eb   : > { %v4367_v18 = vadd.s32 %v16372_v45, %v16379_v44  ;;  %v4383_v32 = vsub.s32 32, %v4382_v7  ;;  %v4387_v34 = vsub.s32 4294967266, %v4382_v7  ;;  %v4398_v16 = vsel %vm4313_vm3, %v4397_v21, %v16418_v23 }
 0x1ec   : > { %v1126_v11 = vsel %vm1120_vm7, %v1123_v42, %v1125_v35  ;;  %v4415_v60 = vand.u32 2147483647, %v16441_v57  ;;  %v4425_v27 = vadd.s32 1, %v14228_v38  ;;  %v4384_v63 = vshll.u32 %v16428_v46, %v4382_v7 }
 0x1ed   : > { %v4385_v52 = vshrl.u32 %v4367_v18, %v4383_v32  ;;  %v4388_v61 = vadd.s32 127, %v4387_v34  ;;  %vm1144_vm13 = vc.u32 %v16463_v30, %v16466_v37  ;;  %vm1079_vm14 = vcmp.eq.s32.totalorder %v16443_v1, 0 }
 0x1ee   : > { %vm1082_vm15 = vcmp.eq.s32.totalorder %v16443_v1, 2  ;;  %v1145_v45 = vadd.s32 1, %v16467_v59  ;;  %vm4426_vm0 = vcmp.gt.s32.totalorder %v4425_v27, 0  ;;  %v1142_v36 = vmul.u32 %v1135_v20, %v1126_v11 }
 0x1ef   : > { %v14955_v44 = vpop.eup %14954  ;;  %v4386_v23 = vor.u32 %v4385_v52, %v4384_v63  ;;  %v4389_v31 = vshll.u32 %v4388_v61, 23  ;;  %v4427_v24 = vsel %vm4426_vm0, %v4425_v27, 0  ;;  %v4400_v46 = vsel %vm16452_vm6, 0, %v4398_v16 }
 0x1f0   : > { %v14957_v39 = vpop.eup %14956  ;;  %v1083_v28 = vxor.u32 2147483648, %v14955_v44  ;;  %v1146_v33 = vsel %vm1144_vm13, %v1145_v45, %v16467_v59  ;;  %v4429_v19 = vand.u32 31, %v4427_v24  ;;  %v4422_v53 = vand.u32 8388607, %v4415_v60  ;;  %v16528_v45 = vpop.f32.mrf.mxu0 }
 0x1f1   : > { %v1080_v58 = vxor.u32 2147483648, %v14957_v39  ;;  %v4390_v40 = vor.u32 4788187, %v4389_v31  ;;  %v1147_v2 = vadd.s32 %v1146_v33, %v1142_v36  ;;  %v4393_v21 = vcvt.s32.f32 %v4386_v23 }
 0x1f2   : > { %v1084_v14 = vsel %vm1082_vm15, %v1083_v28, %v14957_v39  ;;  %v7799_v20 = vsel %vm7797_vm8, %v1083_v28, %v14957_v39  ;;  %v4430_v55 = vsub.s32 32, %v4429_v19  ;;  %vm1075_vm1 = vweird.f32 %v16172_v22 }
 0x1f3   : > { %v1081_v49 = vsel %vm1079_vm14, %v14955_v44, %v1080_v58  ;;  %v7796_v48 = vsel %vm7794_vm10, %v14955_v44, %v1080_v58  ;;  %v4391_v51 = vand.u32 2147483647, %v4390_v40  ;;  %v1148_v43 = vadd.s32 536870912, %v1147_v2 }
 0x1f4   : > { %v1085_v3 = vsel %vm1078_vm11, %v1081_v49, %v1084_v14  ;;  %v7800_v50 = vsel %vm7793_vm12, %v7796_v48, %v7799_v20  ;;  %v4404_v42 = vadd.s32 3, %v4400_v46  ;;  %v16507_v25 = vand.u32 3, %v4400_v46 }
 0x1f5   : > { %v1086_v47 = vsel %vm1075_vm1, nan, %v1085_v3  ;;  %v7801_v26 = vsel %vm1075_vm1, nan, %v7800_v50  ;;  %v4394_v54 = vmul.f32 %v4393_v21, %v4391_v51  ;;  %v16503_v62 = vshrl.u32 %v1148_v43, 30 }
 0x1f6   : > { %7227 = vst [vmem:[%s15815_s20 + $0x20] sm:$0xff] %v1086_v47  ;;  %13883 = vst [vmem:[%s15815_s20 + $0x220] sm:$0xff] %v7801_v26  ;;  %v4423_v22 = vor.u32 8388608, %v4422_v53  ;;  %v4433_v1 = vshrl.u32 %v15258_v4, %v4430_v55  ;;  %v4428_v35 = vshrl.u32 %v4427_v24, 5  ;;  %v4436_v29 = vshrl.u32 %v15259_v6, %v4430_v55 }
 0x1f7   : > { %v4395_v12 = vxor.u32 2147483648, %v4394_v54  ;;  %v1150_v56 = vshll.u32 %v16503_v62, 30  ;;  %v4439_v5 = vshrl.u32 %v15260_v8, %v4430_v55  ;;  %v4442_v7 = vshrl.u32 %v15261_v10, %v4430_v55 }
 0x1f8   : > { %v4432_v18 = vshll.u32 %v15257_v0, %v4429_v19  ;;  %v4435_v32 = vshll.u32 %v15258_v4, %v4429_v19  ;;  %v4438_v16 = vshll.u32 %v15259_v6, %v4429_v19  ;;  %v4441_v11 = vshll.u32 %v15260_v8, %v4429_v19 }
 0x1f9   : > { %v4396_v59 = vsel %vm4313_vm3, %v4395_v12, %v4394_v54  ;;  %v16516_v38 = vsub.s32 %v1147_v2, %v1150_v56  ;;  %v4445_v27 = vshrl.u32 %v15262_v17, %v4430_v55  ;;  %v4444_v61 = vshll.u32 %v15261_v10, %v4429_v19 }
 0x1fa   : > { %v4399_v34 = vsel %vm16452_vm6, %v16227_v15, %v4396_v59  ;;  %v4434_v52 = vor.u32 %v4433_v1, %v4432_v18  ;;  %v4437_v44 = vor.u32 %v4436_v29, %v4435_v32  ;;  %v4440_v23 = vor.u32 %v4439_v5, %v4438_v16 }
 0x1fb   : > { %14958 = vcosq.f32 %v4399_v34  ;;  %v1153_v63 = vsub.s32 0, %v16516_v38  ;;  %v4443_v31 = vor.u32 %v4442_v7, %v4441_v11  ;;  %v16530_v9 = vand.u32 3, %v4404_v42 }
 0x1fc   : > { %14960 = vsinq.f32 %v4399_v34  ;;  %vm1089_vm3 = vcmp.lt.s32.totalorder %v16325_v13, 0  ;;  %v4446_v24 = vor.u32 %v4445_v27, %v4444_v61  ;;  %v4463_v39 = vshll.u32 %v4423_v22, 8 }
 0x1fd   : > { %v14101_v36 = vmin.u32 %v1153_v63, %v16516_v38  ;;  %v1173_v28 = vsub.s32 4, %v16503_v62  ;;  %v4431_v46 = vshrl.u32 %v15257_v0, %v4430_v55  ;;  %vm4447_vm4 = vcmp.lt.s32.totalorder %v4428_v35, 1 }
 0x1fe   : > { %v1194_v33 = vand.u32 2139095040, %v16528_v45  ;;  %vm4448_vm5 = vcmp.lt.s32.totalorder %v4428_v35, 2  ;;  %vm4449_vm2 = vcmp.lt.s32.totalorder %v4428_v35, 3  ;;  %vm4450_vm6 = vcmp.lt.s32.totalorder %v4428_v35, 4 }
 0x1ff   : > { %v1155_v19 = vclz %v14101_v36  ;;  %v4452_v58 = vsel %vm4450_vm6, %v4440_v23, 2102212464  ;;  %v4455_v40 = vsel %vm4447_vm4, %v4434_v52, %v4437_v44  ;;  %v4456_v2 = vsel %vm4450_vm6, %v4443_v31, 920167782 }
 0x200   : > { %v4459_v53 = vsel %vm4447_vm4, %v4437_v44, %v4440_v23  ;;  %vm16539_vm7 = vcmp.le.f32.partialorder %v1087_v41, 0.7853982  ;;  %v4451_v21 = vsel %vm4447_vm4, %v4431_v46, %v4434_v52  ;;  %v4457_v55 = vsel %vm4449_vm2, %v4440_v23, %v4456_v2 }
 0x201   : > { %v14102_v20 = vadd.s32 4294967294, %v1155_v19  ;;  %v4460_v49 = vsel %vm4450_vm6, %v4446_v24, 1326507024  ;;  %vm11093_vm8 = vcmp.eq.s32.totalorder %v16507_v25, 2  ;;  %v4453_v48 = vsel %vm4449_vm2, %v4437_v44, %v4452_v58 }
 0x202   : > { %v4458_v51 = vsel %vm4448_vm5, %v4455_v40, %v4457_v55  ;;  %v4461_v43 = vsel %vm4449_vm2, %v4443_v31, %v4460_v49  ;;  %v1195_v3 = vshrl.u32 %v1194_v33, 23  ;;  %vm11090_vm9 = vcmp.eq.s32.totalorder %v16507_v25, 0 }
 0x203   : > { %vm14103_vm10 = vcmp.lt.s32.totalorder %v14102_v20, 0  ;;  %v4462_v50 = vsel %vm4448_vm5, %v4459_v53, %v4461_v43  ;;  %v16547_v41 = vmul.u32.u64.low %v4463_v39, %v4458_v51  ;;  %v16548_v47 = vmul.u32.u64.high %v4463_v39, %v4458_v51, %v16547_v41 }
 0x204   : > { %vm11089_vm11 = vcmp.lt.s32.totalorder %v16507_v25, 2  ;;  %v1143_v26 = vadd.s32 %v16466_v37, %v16463_v30  ;;  %v1158_v54 = vsel %vm14103_vm10, 0, %v14102_v20  ;;  %vm4403_vm12 = vweird.f32 %v16227_v15 }
 0x205   : > { %v16554_v42 = vmul.u32.u64.low %v4463_v39, %v4462_v50  ;;  %v16555_v12 = vmul.u32.u64.high %v4463_v39, %v4462_v50, %v16554_v42  ;;  %v1159_v56 = vsub.s32 32, %v1158_v54  ;;  %v1163_v22 = vsub.s32 4294967266, %v1158_v54 }
 0x206   : > { %v4454_v1 = vsel %vm4448_vm5, %v4451_v21, %v4453_v48  ;;  %v14104_v29 = vadd.s32 4294967169, %v1195_v3  ;;  %vm4406_vm13 = vcmp.lt.s32.totalorder %v16530_v9, 2  ;;  %v1160_v5 = vshll.u32 %v16516_v38, %v1158_v54 }
 0x207   : > { %v1174_v7 = vsel %vm1089_vm3, %v1173_v28, %v16503_v62  ;;  %v1191_v30 = vand.u32 2147483647, %v16528_v45  ;;  %v1161_v37 = vshrl.u32 %v1143_v26, %v1159_v56  ;;  %v1164_v59 = vadd.s32 127, %v1163_v22 }
 0x208   : > { %v4473_v18 = vadd.s32 1, %v16548_v47  ;;  %v1201_v32 = vadd.s32 1, %v14104_v29  ;;  %v14959_v34 = vpop.eup %14958  ;;  %vm4407_vm14 = vcmp.eq.s32.totalorder %v16530_v9, 0  ;;  %vm4410_vm15 = vcmp.eq.s32.totalorder %v16530_v9, 2 }
 0x209   : > { %v4470_v35 = vmul.u32 %v4463_v39, %v4454_v1  ;;  %vm4472_vm0 = vc.u32 %v16555_v12, %v16547_v41  ;;  %v14961_v38 = vpop.eup %14960  ;;  %v4411_v16 = vxor.u32 2147483648, %v14959_v34  ;;  %v1162_v11 = vor.u32 %v1161_v37, %v1160_v5 }
 0x20a   : > { %v1165_v62 = vshll.u32 %v1164_v59, 23  ;;  %v4474_v27 = vsel %vm4472_vm0, %v4473_v18, %v16548_v47  ;;  %v4408_v63 = vxor.u32 2147483648, %v14961_v38  ;;  %v1176_v52 = vsel %vm16539_vm7, 0, %v1174_v7  ;;  %v16601_v47 = vpop.f32.mrf.mxu1 }
 0x20b   : > { %v4475_v61 = vadd.s32 %v4474_v27, %v4470_v35  ;;  %vm1202_vm1 = vcmp.gt.s32.totalorder %v1201_v32, 0  ;;  %v4412_v44 = vsel %vm4410_vm15, %v4411_v16, %v14961_v38  ;;  %v11095_v23 = vsel %vm11093_vm8, %v4411_v16, %v14961_v38 }
 0x20c   : > { %v1166_v31 = vor.u32 4788187, %v1165_v62  ;;  %v1198_v36 = vand.u32 8388607, %v1191_v30  ;;  %v4409_v24 = vsel %vm4407_vm14, %v14959_v34, %v4408_v63  ;;  %v11092_v39 = vsel %vm11090_vm9, %v14959_v34, %v4408_v63 }
 0x20d   : > { %v4476_v28 = vadd.s32 536870912, %v4475_v61  ;;  %v1203_v46 = vsel %vm1202_vm1, %v1201_v32, 0  ;;  %v4413_v33 = vsel %vm4406_vm13, %v4409_v24, %v4412_v44  ;;  %v11096_v19 = vsel %vm11089_vm11, %v11092_v39, %v11095_v23 }
 0x20e   : > { %v1167_v58 = vand.u32 2147483647, %v1166_v31  ;;  %v1169_v40 = vcvt.s32.f32 %v1162_v11  ;;  %v4414_v2 = vsel %vm4403_vm12, nan, %v4413_v33  ;;  %v11097_v53 = vsel %vm4403_vm12, nan, %v11096_v19 }
 0x20f   : > { %v16589_v20 = vshrl.u32 %v4476_v28, 30  ;;  %v1205_v21 = vand.u32 31, %v1203_v46  ;;  %7259 = vst [vmem:[%s15815_s20 + $0x120] sm:$0xff] %v4414_v2  ;;  %13915 = vst [vmem:[%s15815_s20 + $0x320] sm:$0xff] %v11097_v53  ;;  %v1180_v25 = vadd.s32 3, %v1176_v52  ;;  %v16594_v51 = vand.u32 3, %v1176_v52 }
 0x210   : > { %v1170_v55 = vmul.f32 %v1169_v40, %v1167_v58  ;;  %v1199_v3 = vor.u32 8388608, %v1198_v36  ;;  %v16598_v50 = vshrl.u32 %v1203_v46, 5  ;;  %v4519_v59 = vand.u32 2147483647, %v16601_v47 }
 0x211   : > { %v4478_v9 = vshll.u32 %v16589_v20, 30  ;;  %v1206_v49 = vsub.s32 32, %v1205_v21  ;;  %v1208_v54 = vshll.u32 %v15257_v0, %v1205_v21  ;;  %v1211_v29 = vshll.u32 %v15258_v4, %v1205_v21 }
 0x212   : > { %v1171_v48 = vxor.u32 2147483648, %v1170_v55  ;;  %v1214_v5 = vshll.u32 %v15259_v6, %v1205_v21  ;;  %v16614_v7 = vand.u32 3, %v1180_v25  ;;  %v4471_v14 = vadd.s32 %v16547_v41, %v16555_v12 }
 0x213   : > { %v16596_v43 = vsub.s32 %v4475_v61, %v4478_v9  ;;  %v1209_v15 = vshrl.u32 %v15258_v4, %v1206_v49  ;;  %v1212_v42 = vshrl.u32 %v15259_v6, %v1206_v49  ;;  %v1215_v56 = vshrl.u32 %v15260_v8, %v1206_v49 }
 0x214   : > { %v1172_v26 = vsel %vm1089_vm3, %v1171_v48, %v1170_v55  ;;  %v1217_v35 = vshll.u32 %v15260_v8, %v1205_v21  ;;  %v1218_v38 = vshrl.u32 %v15261_v10, %v1206_v49  ;;  %v16622_v16 = vshll.u32 %v1199_v3, 8 }
 0x215   : > { %v1175_v22 = vsel %vm16539_vm7, %v16325_v13, %v1172_v26  ;;  %v4481_v1 = vsub.s32 0, %v16596_v43  ;;  %v1210_v37 = vor.u32 %v1209_v15, %v1208_v54  ;;  %v1213_v32 = vor.u32 %v1212_v42, %v1211_v29 }
 0x216   : > { %14962 = vcosq.f32 %v1175_v22  ;;  %v1216_v34 = vor.u32 %v1215_v56, %v1214_v5  ;;  %vm1223_vm3 = vcmp.lt.s32.totalorder %v16598_v50, 1  ;;  %vm1224_vm4 = vcmp.lt.s32.totalorder %v16598_v50, 2 }
 0x217   : > { %14964 = vsinq.f32 %v1175_v22  ;;  %v14229_v18 = vmin.u32 %v4481_v1, %v16596_v43  ;;  %vm1225_vm5 = vcmp.lt.s32.totalorder %v16598_v50, 3  ;;  %vm4417_vm2 = vcmp.lt.s32.totalorder %v16441_v57, 0 }
 0x218   : > { %v1219_v62 = vor.u32 %v1218_v38, %v1217_v35  ;;  %v1220_v27 = vshll.u32 %v15261_v10, %v1205_v21  ;;  %v1221_v41 = vshrl.u32 %v15262_v17, %v1206_v49  ;;  %vm1226_vm6 = vcmp.lt.s32.totalorder %v16598_v50, 4 }
 0x219   : > { %v4483_v11 = vclz %v14229_v18  ;;  %v1207_v63 = vshrl.u32 %v15257_v0, %v1206_v49  ;;  %v1228_v52 = vsel %vm1226_vm6, %v1216_v34, 2102212464  ;;  %v1231_v61 = vsel %vm1223_vm3, %v1210_v37, %v1213_v32 }
 0x21a   : > { %v4501_v44 = vsub.s32 4, %v16589_v20  ;;  %v1222_v23 = vor.u32 %v1221_v41, %v1220_v27  ;;  %v1232_v31 = vsel %vm1226_vm6, %v1219_v62, 920167782  ;;  %v4522_v36 = vand.u32 2139095040, %v16601_v47 }
 0x21b   : > { %v14230_v12 = vadd.s32 4294967294, %v4483_v11  ;;  %vm7900_vm7 = vcmp.eq.s32.totalorder %v16594_v51, 2  ;;  %v1227_v24 = vsel %vm1223_vm3, %v1207_v63, %v1210_v37  ;;  %v1233_v39 = vsel %vm1225_vm5, %v1216_v34, %v1232_v31 }
 0x21c   : > { %v1235_v28 = vsel %vm1223_vm3, %v1213_v32, %v1216_v34  ;;  %vm7897_vm9 = vcmp.eq.s32.totalorder %v16594_v51, 0  ;;  %v1229_v33 = vsel %vm1225_vm5, %v1213_v32, %v1228_v52  ;;  %v1234_v19 = vsel %vm1224_vm4, %v1231_v61, %v1233_v39 }
 0x21d   : > { %vm14231_vm8 = vcmp.lt.s32.totalorder %v14230_v12, 0  ;;  %v1236_v58 = vsel %vm1226_vm6, %v1222_v23, 1326507024  ;;  %vm7896_vm10 = vcmp.lt.s32.totalorder %v16594_v51, 2  ;;  %vm1179_vm11 = vweird.f32 %v16325_v13 }
 0x21e   : > { %v4486_v46 = vsel %vm14231_vm8, 0, %v14230_v12  ;;  %v1237_v21 = vsel %vm1225_vm5, %v1219_v62, %v1236_v58  ;;  %vm16661_vm12 = vcmp.le.f32.partialorder %v4415_v60, 0.7853982  ;;  %v4523_v25 = vshrl.u32 %v4522_v36, 23 }
 0x21f   : > { %v4487_v40 = vsub.s32 32, %v4486_v46  ;;  %v4488_v2 = vshll.u32 %v16596_v43, %v4486_v46  ;;  %v4491_v53 = vsub.s32 4294967266, %v4486_v46  ;;  %v1238_v9 = vsel %vm1224_vm4, %v1235_v28, %v1237_v21 }
 0x220   : > { %v16668_v49 = vmul.u32.u64.low %v16622_v16, %v1234_v19  ;;  %v16669_v48 = vmul.u32.u64.high %v16622_v16, %v1234_v19, %v16668_v49  ;;  %v16673_v15 = vmul.u32.u64.low %v16622_v16, %v1238_v9  ;;  %v16674_v26 = vmul.u32.u64.high %v16622_v16, %v1238_v9, %v16673_v15 }
 0x221   : > { %v4489_v43 = vshrl.u32 %v4471_v14, %v4487_v40  ;;  %v4492_v3 = vadd.s32 127, %v4491_v53  ;;  %vm1182_vm13 = vcmp.lt.s32.totalorder %v16614_v7, 2  ;;  %vm1183_vm14 = vcmp.eq.s32.totalorder %v16614_v7, 0 }
 0x222   : > { %v1230_v60 = vsel %vm1224_vm4, %v1227_v24, %v1229_v33  ;;  %v14232_v54 = vadd.s32 4294967169, %v4523_v25  ;;  %vm1186_vm15 = vcmp.eq.s32.totalorder %v16614_v7, 2  ;;  %v4502_v1 = vsel %vm4417_vm2, %v4501_v44, %v16589_v20  ;;  %v16709_v24 = vpop.f32.mrf.mxu0 }
 0x223   : > { %v14963_v42 = vpop.eup %14962  ;;  %v4490_v56 = vor.u32 %v4489_v43, %v4488_v2  ;;  %v4493_v22 = vshll.u32 %v4492_v3, 23  ;;  %v1249_v37 = vadd.s32 1, %v16669_v48  ;;  %v4526_v18 = vand.u32 8388607, %v4519_v59 }
 0x224   : > { %v14965_v29 = vpop.eup %14964  ;;  %v1187_v5 = vxor.u32 2147483648, %v14963_v42  ;;  %v4529_v32 = vadd.s32 1, %v14232_v54  ;;  %v1246_v35 = vmul.u32 %v16622_v16, %v1230_v60  ;;  %vm1248_vm0 = vc.u32 %v16674_v26, %v16668_v49 }
 0x225   : > { %v1184_v50 = vxor.u32 2147483648, %v14965_v29  ;;  %v4494_v34 = vor.u32 4788187, %v4493_v22  ;;  %v4497_v14 = vcvt.s32.f32 %v4490_v56  ;;  %v1250_v41 = vsel %vm1248_vm0, %v1249_v37, %v16669_v48 }
 0x226   : > { %v1188_v38 = vsel %vm1186_vm15, %v1187_v5, %v14965_v29  ;;  %v7902_v11 = vsel %vm7900_vm7, %v1187_v5, %v14965_v29  ;;  %vm4530_vm1 = vcmp.gt.s32.totalorder %v4529_v32, 0  ;;  %v1251_v63 = vadd.s32 %v1250_v41, %v1246_v35 }
 0x227   : > { %v1185_v20 = vsel %vm1183_vm14, %v14963_v42, %v1184_v50  ;;  %v7899_v62 = vsel %vm7897_vm9, %v14963_v42, %v1184_v50  ;;  %v4495_v27 = vand.u32 2147483647, %v4494_v34  ;;  %v4531_v52 = vsel %vm4530_vm1, %v4529_v32, 0 }
 0x228   : > { %v1189_v16 = vsel %vm1182_vm13, %v1185_v20, %v1188_v38  ;;  %v7903_v12 = vsel %vm7896_vm10, %v7899_v62, %v7902_v11  ;;  %v4504_v31 = vsel %vm16661_vm12, 0, %v4502_v1  ;;  %v1252_v36 = vadd.s32 536870912, %v1251_v63 }
 0x229   : > { %v1190_v61 = vsel %vm1179_vm11, nan, %v1189_v16  ;;  %v7904_v44 = vsel %vm1179_vm11, nan, %v7903_v12  ;;  %v4498_v23 = vmul.f32 %v4497_v14, %v4495_v27  ;;  %v4533_v7 = vand.u32 31, %v4531_v52 }
 0x22a   : > { %7228 = vst [vmem:[%s15815_s20 + $0x28] sm:$0xff] %v1190_v61  ;;  %13884 = vst [vmem:[%s15815_s20 + $0x228] sm:$0xff] %v7904_v44  ;;  %v4508_v39 = vadd.s32 3, %v4504_v31  ;;  %v16711_v28 = vshrl.u32 %v1252_v36, 30  ;;  %v4527_v46 = vor.u32 8388608, %v4526_v18  ;;  %v4532_v19 = vshrl.u32 %v4531_v52, 5 }
 0x22b   : > { %v4499_v51 = vxor.u32 2147483648, %v4498_v23  ;;  %v4534_v33 = vsub.s32 32, %v4533_v7  ;;  %v4536_v58 = vshll.u32 %v15257_v0, %v4533_v7  ;;  %v1298_v40 = vand.u32 2139095040, %v16709_v24 }
 0x22c   : > { %v1254_v53 = vshll.u32 %v16711_v28, 30  ;;  %v4539_v21 = vshll.u32 %v15258_v4, %v4533_v7  ;;  %v4542_v9 = vshll.u32 %v15259_v6, %v4533_v7  ;;  %v4545_v15 = vshll.u32 %v15260_v8, %v4533_v7 }
 0x22d   : > { %v4500_v13 = vsel %vm4417_vm2, %v4499_v51, %v4498_v23  ;;  %v4537_v48 = vshrl.u32 %v15258_v4, %v4534_v33  ;;  %v4540_v25 = vshrl.u32 %v15259_v6, %v4534_v33  ;;  %v4543_v43 = vshrl.u32 %v15260_v8, %v4534_v33 }
 0x22e   : > { %v4503_v2 = vsel %vm16661_vm12, %v16441_v57, %v4500_v13  ;;  %v16726_v3 = vsub.s32 %v1251_v63, %v1254_v53  ;;  %v4546_v55 = vshrl.u32 %v15261_v10, %v4534_v33  ;;  %v16730_v56 = vand.u32 3, %v4508_v39 }
 0x22f   : > { %14966 = vcosq.f32 %v4503_v2  ;;  %v4538_v60 = vor.u32 %v4537_v48, %v4536_v58  ;;  %v4541_v54 = vor.u32 %v4540_v25, %v4539_v21  ;;  %v4544_v42 = vor.u32 %v4543_v43, %v4542_v9 }
 0x230   : > { %14968 = vsinq.f32 %v4503_v2  ;;  %v16732_v22 = vand.u32 3, %v4504_v31  ;;  %v1257_v1 = vsub.s32 0, %v16726_v3  ;;  %v4547_v29 = vor.u32 %v4546_v55, %v4545_v15 }
 0x231   : > { %v4548_v5 = vshll.u32 %v15261_v10, %v4533_v7  ;;  %v4549_v37 = vshrl.u32 %v15262_v17, %v4534_v33  ;;  %v16737_v18 = vshll.u32 %v4527_v46, 8  ;;  %v1299_v32 = vshrl.u32 %v1298_v40, 23 }
 0x232   : > { %vm1193_vm3 = vcmp.lt.s32.totalorder %v16528_v45, 0  ;;  %v14105_v50 = vmin.u32 %v1257_v1, %v16726_v3  ;;  %v4535_v34 = vshrl.u32 %v15257_v0, %v4534_v33  ;;  %vm4551_vm4 = vcmp.lt.s32.totalorder %v4532_v19, 1 }
 0x233   : > { %vm4554_vm5 = vcmp.lt.s32.totalorder %v4532_v19, 4  ;;  %v4550_v14 = vor.u32 %v4549_v37, %v4548_v5  ;;  %v4559_v38 = vsel %vm4551_vm4, %v4538_v60, %v4541_v54  ;;  %vm11196_vm2 = vcmp.eq.s32.totalorder %v16732_v22, 2 }
 0x234   : > { %v4556_v35 = vsel %vm4554_vm5, %v4544_v42, 2102212464  ;;  %v4560_v11 = vsel %vm4554_vm5, %v4547_v29, 920167782  ;;  %v1259_v20 = vclz %v14105_v50  ;;  %vm4552_vm6 = vcmp.lt.s32.totalorder %v4532_v19, 2 }
 0x235   : > { %vm4553_vm7 = vcmp.lt.s32.totalorder %v4532_v19, 3  ;;  %v4555_v62 = vsel %vm4551_vm4, %v4535_v34, %v4538_v60  ;;  %vm11193_vm8 = vcmp.eq.s32.totalorder %v16732_v22, 0  ;;  %v4563_v16 = vsel %vm4551_vm4, %v4541_v54, %v4544_v42 }
 0x236   : > { %v4557_v27 = vsel %vm4553_vm7, %v4541_v54, %v4556_v35  ;;  %v4561_v41 = vsel %vm4553_vm7, %v4544_v42, %v4560_v11  ;;  %v4564_v12 = vsel %vm4554_vm5, %v4550_v14, 1326507024  ;;  %vm4510_vm9 = vcmp.lt.s32.totalorder %v16730_v56, 2 }
 0x237   : > { %vm11192_vm10 = vcmp.lt.s32.totalorder %v16732_v22, 2  ;;  %v14106_v63 = vadd.s32 4294967294, %v1259_v20  ;;  %v1277_v52 = vsub.s32 4, %v16711_v28  ;;  %v4562_v61 = vsel %vm4552_vm6, %v4559_v38, %v4561_v41  ;;  %v16802_v41 = vpop.f32.mrf.mxu1 }
 0x238   : > { %v4565_v44 = vsel %vm4553_vm7, %v4547_v29, %v4564_v12  ;;  %vm4507_vm11 = vweird.f32 %v16441_v57  ;;  %v4558_v23 = vsel %vm4552_vm6, %v4555_v62, %v4557_v27  ;;  %v14108_v46 = vadd.s32 4294967169, %v1299_v32 }
 0x239   : > { %v4566_v31 = vsel %vm4552_vm6, %v4563_v16, %v4565_v44  ;;  %v16752_v36 = vmul.u32.u64.low %v16737_v18, %v4562_v61  ;;  %v16753_v7 = vmul.u32.u64.high %v16737_v18, %v4562_v61, %v16752_v36  ;;  %vm14107_vm12 = vcmp.lt.s32.totalorder %v14106_v63, 0 }
 0x23a   : > { %v16757_v51 = vmul.u32.u64.low %v16737_v18, %v4566_v31  ;;  %v16758_v39 = vmul.u32.u64.high %v16737_v18, %v4566_v31, %v16757_v51  ;;  %vm4511_vm13 = vcmp.eq.s32.totalorder %v16730_v56, 0  ;;  %vm4514_vm14 = vcmp.eq.s32.totalorder %v16730_v56, 2 }
 0x23b   : > { %v1262_v33 = vsel %vm14107_vm12, 0, %v14106_v63  ;;  %v1295_v13 = vand.u32 2147483647, %v16709_v24  ;;  %v1247_v58 = vadd.s32 %v16668_v49, %v16674_v26  ;;  %v1305_v53 = vadd.s32 1, %v14108_v46 }
 0x23c   : > { %v14967_v19 = vpop.eup %14966  ;;  %v1263_v40 = vsub.s32 32, %v1262_v33  ;;  %v1267_v2 = vsub.s32 4294967266, %v1262_v33  ;;  %v1278_v48 = vsel %vm1193_vm3, %v1277_v52, %v16711_v28  ;;  %v4574_v25 = vmul.u32 %v16737_v18, %v4558_v23 }
 0x23d   : > { %v14969_v21 = vpop.eup %14968  ;;  %v4515_v9 = vxor.u32 2147483648, %v14967_v19  ;;  %v4577_v43 = vadd.s32 1, %v16753_v7  ;;  %v1264_v55 = vshll.u32 %v16726_v3, %v1262_v33  ;;  %vm4576_vm15 = vc.u32 %v16758_v39, %v16752_v36 }
 0x23e   : > { %v4512_v15 = vxor.u32 2147483648, %v14969_v21  ;;  %v1265_v60 = vshrl.u32 %v1247_v58, %v1263_v40  ;;  %v1268_v54 = vadd.s32 127, %v1267_v2  ;;  %vm1306_vm0 = vcmp.gt.s32.totalorder %v1305_v53, 0 }
 0x23f   : > { %v4516_v49 = vsel %vm4514_vm14, %v4515_v9, %v14969_v21  ;;  %v11198_v26 = vsel %vm11196_vm2, %v4515_v9, %v14969_v21  ;;  %v4578_v37 = vsel %vm4576_vm15, %v4577_v43, %v16753_v7  ;;  %v1307_v18 = vsel %vm1306_vm0, %v1305_v53, 0 }
 0x240   : > { %v4513_v28 = vsel %vm4511_vm13, %v14967_v19, %v4512_v15  ;;  %v11195_v3 = vsel %vm11193_vm8, %v14967_v19, %v4512_v15  ;;  %v1266_v42 = vor.u32 %v1265_v60, %v1264_v55  ;;  %v1269_v1 = vshll.u32 %v1268_v54, 23 }
 0x241   : > { %v4517_v29 = vsel %vm4510_vm9, %v4513_v28, %v4516_v49  ;;  %v11199_v5 = vsel %vm11192_vm10, %v11195_v3, %v11198_v26  ;;  %vm16792_vm1 = vcmp.le.f32.partialorder %v1191_v30, 0.7853982  ;;  %v4579_v14 = vadd.s32 %v4578_v37, %v4574_v25 }
 0x242   : > { %v4518_v32 = vsel %vm4507_vm11, nan, %v4517_v29  ;;  %v11200_v50 = vsel %vm4507_vm11, nan, %v11199_v5  ;;  %v1270_v56 = vor.u32 4788187, %v1269_v1  ;;  %v1280_v22 = vsel %vm16792_vm1, 0, %v1278_v48 }
 0x243   : > { %7260 = vst [vmem:[%s15815_s20 + $0x128] sm:$0xff] %v4518_v32  ;;  %13916 = vst [vmem:[%s15815_s20 + $0x328] sm:$0xff] %v11200_v50  ;;  %v1302_v35 = vand.u32 8388607, %v1295_v13  ;;  %v1309_v38 = vand.u32 31, %v1307_v18  ;;  %v1273_v57 = vcvt.s32.f32 %v1266_v42  ;;  %v4580_v20 = vadd.s32 536870912, %v4579_v14 }
 0x244   : > { %v1271_v11 = vand.u32 2147483647, %v1270_v56  ;;  %v1284_v30 = vadd.s32 3, %v1280_v22  ;;  %v1308_v63 = vshrl.u32 %v1307_v18, 5  ;;  %v4626_v33 = vand.u32 2139095040, %v16802_v41 }
 0x245   : > { %v1310_v62 = vsub.s32 32, %v1309_v38  ;;  %v16804_v16 = vshrl.u32 %v4580_v20, 30  ;;  %v1303_v12 = vor.u32 8388608, %v1302_v35  ;;  %v1312_v51 = vshll.u32 %v15257_v0, %v1309_v38 }
 0x246   : > { %v1274_v27 = vmul.f32 %v1273_v57, %v1271_v11  ;;  %v1315_v46 = vshll.u32 %v15258_v4, %v1309_v38  ;;  %v1318_v58 = vshll.u32 %v15259_v6, %v1309_v38  ;;  %v1321_v40 = vshll.u32 %v15260_v8, %v1309_v38 }
 0x247   : > { %v1313_v52 = vshrl.u32 %v15258_v4, %v1310_v62  ;;  %v1316_v44 = vshrl.u32 %v15259_v6, %v1310_v62  ;;  %v1319_v23 = vshrl.u32 %v15260_v8, %v1310_v62  ;;  %v1322_v31 = vshrl.u32 %v15261_v10, %v1310_v62 }
 0x248   : > { %v1275_v61 = vxor.u32 2147483648, %v1274_v27  ;;  %v4582_v7 = vshll.u32 %v16804_v16, 30  ;;  %v1325_v2 = vshrl.u32 %v15262_v17, %v1310_v62  ;;  %v1324_v48 = vshll.u32 %v15261_v10, %v1309_v38 }
 0x249   : > { %v1314_v9 = vor.u32 %v1313_v52, %v1312_v51  ;;  %v1317_v25 = vor.u32 %v1316_v44, %v1315_v46  ;;  %v1320_v43 = vor.u32 %v1319_v23, %v1318_v58  ;;  %v1323_v15 = vor.u32 %v1322_v31, %v1321_v40 }
 0x24a   : > { %v1276_v19 = vsel %vm1193_vm3, %v1275_v61, %v1274_v27  ;;  %v16822_v21 = vsub.s32 %v4579_v14, %v4582_v7  ;;  %v16825_v55 = vand.u32 3, %v1280_v22  ;;  %v16828_v54 = vand.u32 3, %v1284_v30 }
 0x24b   : > { %v1279_v53 = vsel %vm16792_vm1, %v16528_v45, %v1276_v19  ;;  %vm4521_vm3 = vcmp.lt.s32.totalorder %v16601_v47, 0  ;;  %v1311_v49 = vshrl.u32 %v15257_v0, %v1310_v62  ;;  %v1326_v26 = vor.u32 %v1325_v2, %v1324_v48 }
 0x24c   : > { %14970 = vcosq.f32 %v1279_v53  ;;  %v4585_v60 = vsub.s32 0, %v16822_v21  ;;  %v1343_v28 = vshll.u32 %v1303_v12, 8  ;;  %vm1327_vm4 = vcmp.lt.s32.totalorder %v1308_v63, 1 }
 0x24d   : > { %14972 = vsinq.f32 %v1279_v53  ;;  %vm1328_vm5 = vcmp.lt.s32.totalorder %v1308_v63, 2  ;;  %vm1330_vm2 = vcmp.lt.s32.totalorder %v1308_v63, 4  ;;  %v1335_v1 = vsel %vm1327_vm4, %v1314_v9, %v1317_v25 }
 0x24e   : > { %v14233_v3 = vmin.u32 %v4585_v60, %v16822_v21  ;;  %v1332_v42 = vsel %vm1330_vm2, %v1320_v43, 2102212464  ;;  %v1336_v29 = vsel %vm1330_vm2, %v1323_v15, 920167782  ;;  %v4627_v5 = vshrl.u32 %v4626_v33, 23 }
 0x24f   : > { %vm16835_vm6 = vcmp.le.f32.partialorder %v4519_v59, 0.7853982  ;;  %vm1329_vm7 = vcmp.lt.s32.totalorder %v1308_v63, 3  ;;  %v1331_v32 = vsel %vm1327_vm4, %v1311_v49, %v1314_v9  ;;  %v1339_v50 = vsel %vm1327_vm4, %v1317_v25, %v1320_v43 }
 0x250   : > { %v4587_v18 = vclz %v14233_v3  ;;  %v1333_v34 = vsel %vm1329_vm7, %v1317_v25, %v1332_v42  ;;  %v1337_v56 = vsel %vm1329_vm7, %v1320_v43, %v1336_v29  ;;  %v1340_v22 = vsel %vm1330_vm2, %v1326_v26, 1326507024 }
 0x251   : > { %v14236_v14 = vadd.s32 4294967169, %v4627_v5  ;;  %v4605_v38 = vsub.s32 4, %v16804_v16  ;;  %v1338_v11 = vsel %vm1328_vm5, %v1335_v1, %v1337_v56  ;;  %v1341_v57 = vsel %vm1329_vm7, %v1323_v15, %v1340_v22 }
 0x252   : > { %v14234_v35 = vadd.s32 4294967294, %v4587_v18  ;;  %vm8000_vm8 = vcmp.eq.s32.totalorder %v16825_v55, 0  ;;  %vm8003_vm9 = vcmp.eq.s32.totalorder %v16825_v55, 2  ;;  %v1342_v59 = vsel %vm1328_vm5, %v1339_v50, %v1341_v57 }
 0x253   : > { %v16844_v20 = vmul.u32.u64.low %v1343_v28, %v1338_v11  ;;  %v16845_v62 = vmul.u32.u64.high %v1343_v28, %v1338_v11, %v16844_v20  ;;  %vm1286_vm10 = vcmp.lt.s32.totalorder %v16828_v54, 2  ;;  %vm7999_vm11 = vcmp.lt.s32.totalorder %v16825_v55, 2 }
 0x254   : > { %vm14235_vm12 = vcmp.lt.s32.totalorder %v14234_v35, 0  ;;  %v1334_v27 = vsel %vm1328_vm5, %v1331_v32, %v1333_v34  ;;  %v16851_v30 = vmul.u32.u64.low %v1343_v28, %v1342_v59  ;;  %v16852_v12 = vmul.u32.u64.high %v1343_v28, %v1342_v59, %v16851_v30 }
 0x255   : > { %vm1283_vm13 = vweird.f32 %v16528_v45  ;;  %vm1287_vm14 = vcmp.eq.s32.totalorder %v16828_v54, 0  ;;  %vm1290_vm15 = vcmp.eq.s32.totalorder %v16828_v54, 2  ;;  %v4590_v52 = vsel %vm14235_vm12, 0, %v14234_v35 }
 0x256   : > { %v4633_v61 = vadd.s32 1, %v14236_v14  ;;  %v4575_v44 = vadd.s32 %v16752_v36, %v16758_v39  ;;  %v4591_v23 = vsub.s32 32, %v4590_v52  ;;  %v4595_v31 = vsub.s32 4294967266, %v4590_v52 }
 0x257   : > { %v4606_v63 = vsel %vm4521_vm3, %v4605_v38, %v16804_v16  ;;  %v1350_v7 = vmul.u32 %v1343_v28, %v1334_v27  ;;  %v1353_v51 = vadd.s32 1, %v16845_v62  ;;  %v4623_v46 = vand.u32 2147483647, %v16802_v41 }
 0x258   : > { %vm4634_vm0 = vcmp.gt.s32.totalorder %v4633_v61, 0  ;;  %v4592_v19 = vshll.u32 %v16822_v21, %v4590_v52  ;;  %v4593_v58 = vshrl.u32 %v4575_v44, %v4591_v23  ;;  %v4596_v40 = vadd.s32 127, %v4595_v31 }
 0x259   : > { %v14971_v33 = vpop.eup %14970  ;;  %vm1352_vm1 = vc.u32 %v16852_v12, %v16844_v20  ;;  %v4608_v2 = vsel %vm16835_vm6, 0, %v4606_v63  ;;  %v4635_v53 = vsel %vm4634_vm0, %v4633_v61, 0  ;;  %v4630_v60 = vand.u32 8388607, %v4623_v46 }
 0x25a   : > { %v14973_v36 = vpop.eup %14972  ;;  %v1291_v39 = vxor.u32 2147483648, %v14971_v33  ;;  %v1354_v16 = vsel %vm1352_vm1, %v1353_v51, %v16845_v62  ;;  %v4594_v48 = vor.u32 %v4593_v58, %v4592_v19  ;;  %v4597_v25 = vshll.u32 %v4596_v40, 23  ;;  %v16915_v58 = vpop.f32.mrf.mxu0 }
 0x25b   : > { %v1288_v9 = vxor.u32 2147483648, %v14973_v36  ;;  %v1355_v43 = vadd.s32 %v1354_v16, %v1350_v7  ;;  %v4637_v49 = vand.u32 31, %v4635_v53  ;;  %v4612_v42 = vadd.s32 3, %v4608_v2 }
 0x25c   : > { %v1292_v21 = vsel %vm1290_vm15, %v1291_v39, %v14973_v36  ;;  %v8005_v15 = vsel %vm8003_vm9, %v1291_v39, %v14973_v36  ;;  %v4598_v3 = vor.u32 4788187, %v4597_v25  ;;  %v4601_v56 = vcvt.s32.f32 %v4594_v48 }
 0x25d   : > { %v1289_v26 = vsel %vm1287_vm14, %v14971_v33, %v1288_v9  ;;  %v8002_v28 = vsel %vm8000_vm8, %v14971_v33, %v1288_v9  ;;  %v1356_v5 = vadd.s32 536870912, %v1355_v43  ;;  %v4638_v18 = vsub.s32 32, %v4637_v49 }
 0x25e   : > { %v1293_v1 = vsel %vm1286_vm10, %v1289_v26, %v1292_v21  ;;  %v8006_v29 = vsel %vm7999_vm11, %v8002_v28, %v8005_v15  ;;  %v4599_v34 = vand.u32 2147483647, %v4598_v3  ;;  %v16892_v54 = vand.u32 3, %v4608_v2 }
 0x25f   : > { %v1294_v32 = vsel %vm1283_vm13, nan, %v1293_v1  ;;  %v8007_v50 = vsel %vm1283_vm13, nan, %v8006_v29  ;;  %v16890_v22 = vshrl.u32 %v1356_v5, 30  ;;  %v16894_v35 = vand.u32 3, %v4612_v42 }
 0x260   : > { %7229 = vst [vmem:[%s15815_s20 + $0x30] sm:$0xff] %v1294_v32  ;;  %13885 = vst [vmem:[%s15815_s20 + $0x230] sm:$0xff] %v8007_v50  ;;  %v4602_v14 = vmul.f32 %v4601_v56, %v4599_v34  ;;  %v4631_v38 = vor.u32 8388608, %v4630_v60  ;;  %v4641_v11 = vshrl.u32 %v15258_v4, %v4638_v18  ;;  %v4644_v45 = vshrl.u32 %v15259_v6, %v4638_v18 }
 0x261   : > { %v1358_v55 = vshll.u32 %v16890_v22, 30  ;;  %v4647_v59 = vshrl.u32 %v15260_v8, %v4638_v18  ;;  %v4650_v62 = vshrl.u32 %v15261_v10, %v4638_v18  ;;  %v4636_v30 = vshrl.u32 %v4635_v53, 5 }
 0x262   : > { %v4603_v57 = vxor.u32 2147483648, %v4602_v14  ;;  %v4640_v52 = vshll.u32 %v15257_v0, %v4637_v49  ;;  %v4653_v61 = vshrl.u32 %v15262_v17, %v4638_v18  ;;  %v4643_v23 = vshll.u32 %v15258_v4, %v4637_v49 }
 0x263   : > { %v16901_v27 = vsub.s32 %v1355_v43, %v1358_v55  ;;  %v4646_v31 = vshll.u32 %v15259_v6, %v4637_v49  ;;  %v4649_v63 = vshll.u32 %v15260_v8, %v4637_v49  ;;  %v4652_v19 = vshll.u32 %v15261_v10, %v4637_v49 }
 0x264   : > { %v4604_v44 = vsel %vm4521_vm3, %v4603_v57, %v4602_v14  ;;  %v4642_v33 = vor.u32 %v4641_v11, %v4640_v52  ;;  %v4645_v40 = vor.u32 %v4644_v45, %v4643_v23  ;;  %v4671_v53 = vshll.u32 %v4631_v38, 8 }
 0x265   : > { %v4607_v7 = vsel %vm16835_vm6, %v16601_v47, %v4604_v44  ;;  %v1361_v51 = vsub.s32 0, %v16901_v27  ;;  %v4648_v36 = vor.u32 %v4647_v59, %v4646_v31  ;;  %v4651_v39 = vor.u32 %v4650_v62, %v4649_v63 }
 0x266   : > { %14974 = vcosq.f32 %v4607_v7  ;;  %v4654_v16 = vor.u32 %v4653_v61, %v4652_v19  ;;  %v1351_v37 = vadd.s32 %v16844_v20, %v16852_v12  ;;  %v4639_v9 = vshrl.u32 %v15257_v0, %v4638_v18 }
 0x267   : > { %14976 = vsinq.f32 %v4607_v7  ;;  %v14109_v2 = vmin.u32 %v1361_v51, %v16901_v27  ;;  %vm4655_vm3 = vcmp.lt.s32.totalorder %v4636_v30, 1  ;;  %v1402_v48 = vand.u32 2139095040, %v16915_v58 }
 0x268   : > { %vm1297_vm4 = vcmp.lt.s32.totalorder %v16709_v24, 0  ;;  %vm4656_vm5 = vcmp.lt.s32.totalorder %v4636_v30, 2  ;;  %vm4657_vm2 = vcmp.lt.s32.totalorder %v4636_v30, 3  ;;  %vm4658_vm6 = vcmp.lt.s32.totalorder %v4636_v30, 4 }
 0x269   : > { %v1363_v25 = vclz %v14109_v2  ;;  %v4660_v43 = vsel %vm4658_vm6, %v4648_v36, 2102212464  ;;  %v4663_v21 = vsel %vm4655_vm3, %v4642_v33, %v4645_v40  ;;  %v4664_v15 = vsel %vm4658_vm6, %v4651_v39, 920167782 }
 0x26a   : > { %v4667_v60 = vsel %vm4655_vm3, %v4645_v40, %v4648_v36  ;;  %v4659_v26 = vsel %vm4655_vm3, %v4639_v9, %v4642_v33  ;;  %v4665_v28 = vsel %vm4657_vm2, %v4648_v36, %v4664_v15  ;;  %v4668_v3 = vsel %vm4658_vm6, %v4654_v16, 1326507024 }
 0x26b   : > { %v14110_v49 = vadd.s32 4294967294, %v1363_v25  ;;  %vm16925_vm7 = vcmp.le.f32.partialorder %v1295_v13, 0.7853982  ;;  %v4661_v12 = vsel %vm4657_vm2, %v4645_v40, %v4660_v43  ;;  %v4666_v42 = vsel %vm4656_vm5, %v4663_v21, %v4665_v28 }
 0x26c   : > { %v4669_v1 = vsel %vm4657_vm2, %v4651_v39, %v4668_v3  ;;  %v1403_v29 = vshrl.u32 %v1402_v48, 23  ;;  %v16931_v18 = vmul.u32.u64.low %v4671_v53, %v4666_v42  ;;  %v16932_v32 = vmul.u32.u64.high %v4671_v53, %v4666_v42, %v16931_v18 }
 0x26d   : > { %vm14111_vm8 = vcmp.lt.s32.totalorder %v14110_v49, 0  ;;  %v4670_v5 = vsel %vm4656_vm5, %v4667_v60, %v4669_v1  ;;  %vm11296_vm9 = vcmp.eq.s32.totalorder %v16892_v54, 0  ;;  %v1381_v13 = vsub.s32 4, %v16890_v22 }
 0x26e   : > { %v1366_v50 = vsel %vm14111_vm8, 0, %v14110_v49  ;;  %v16937_v34 = vmul.u32.u64.low %v4671_v53, %v4670_v5  ;;  %v16938_v56 = vmul.u32.u64.high %v4671_v53, %v4670_v5, %v16937_v34  ;;  %vm11295_vm10 = vcmp.lt.s32.totalorder %v16892_v54, 2 }
 0x26f   : > { %v1367_v14 = vsub.s32 32, %v1366_v50  ;;  %v1371_v55 = vsub.s32 4294967266, %v1366_v50  ;;  %v4662_v38 = vsel %vm4656_vm5, %v4659_v26, %v4661_v12  ;;  %v14112_v11 = vadd.s32 4294967169, %v1403_v29 }
 0x270   : > { %vm4611_vm11 = vweird.f32 %v16601_v47  ;;  %vm4614_vm12 = vcmp.lt.s32.totalorder %v16894_v35, 2  ;;  %vm11299_vm13 = vcmp.eq.s32.totalorder %v16892_v54, 2  ;;  %v1368_v57 = vshll.u32 %v16901_v27, %v1366_v50 }
 0x271   : > { %v1399_v45 = vand.u32 2147483647, %v16915_v58  ;;  %v1369_v59 = vshrl.u32 %v1351_v37, %v1367_v14  ;;  %v1372_v62 = vadd.s32 127, %v1371_v55  ;;  %v4681_v52 = vadd.s32 1, %v16932_v32 }
 0x272   : > { %v1409_v61 = vadd.s32 1, %v14112_v11  ;;  %vm4615_vm14 = vcmp.eq.s32.totalorder %v16894_v35, 0  ;;  %v1382_v30 = vsel %vm1297_vm4, %v1381_v13, %v16890_v22  ;;  %v4678_v44 = vmul.u32 %v4671_v53, %v4662_v38 }
 0x273   : > { %vm4680_vm15 = vc.u32 %v16938_v56, %v16931_v18  ;;  %v14975_v23 = vpop.eup %14974  ;;  %v1370_v31 = vor.u32 %v1369_v59, %v1368_v57  ;;  %v1373_v27 = vshll.u32 %v1372_v62, 23  ;;  %vm4618_vm1 = vcmp.eq.s32.totalorder %v16894_v35, 2 }
 0x274   : > { %v4682_v63 = vsel %vm4680_vm15, %v4681_v52, %v16932_v32  ;;  %vm1410_vm0 = vcmp.gt.s32.totalorder %v1409_v61, 0  ;;  %v14977_v7 = vpop.eup %14976  ;;  %v4619_v51 = vxor.u32 2147483648, %v14975_v23  ;;  %v1384_v22 = vsel %vm16925_vm7, 0, %v1382_v30 }
 0x275   : > { %v4683_v33 = vadd.s32 %v4682_v63, %v4678_v44  ;;  %v1411_v19 = vsel %vm1410_vm0, %v1409_v61, 0  ;;  %v4616_v40 = vxor.u32 2147483648, %v14977_v7  ;;  %v1374_v36 = vor.u32 4788187, %v1373_v27 }
 0x276   : > { %v1406_v39 = vand.u32 8388607, %v1399_v45  ;;  %v4620_v2 = vsel %vm4618_vm1, %v4619_v51, %v14977_v7  ;;  %v11301_v16 = vsel %vm11299_vm13, %v4619_v51, %v14977_v7  ;;  %v1413_v37 = vand.u32 31, %v1411_v19 }
 0x277   : > { %v4684_v53 = vadd.s32 536870912, %v4683_v33  ;;  %v4617_v9 = vsel %vm4615_vm14, %v14975_v23, %v4616_v40  ;;  %v11298_v48 = vsel %vm11296_vm9, %v14975_v23, %v4616_v40  ;;  %v1375_v25 = vand.u32 2147483647, %v1374_v36 }
 0x278   : > { %v1377_v43 = vcvt.s32.f32 %v1370_v31  ;;  %v4621_v21 = vsel %vm4614_vm12, %v4617_v9, %v4620_v2  ;;  %v11302_v15 = vsel %vm11295_vm10, %v11298_v48, %v11301_v16  ;;  %v1414_v49 = vsub.s32 32, %v1413_v37 }
 0x279   : > { %v4685_v60 = vshrl.u32 %v4684_v53, 30  ;;  %v4622_v26 = vsel %vm4611_vm11, nan, %v4621_v21  ;;  %v11303_v28 = vsel %vm4611_vm11, nan, %v11302_v15  ;;  %v1388_v1 = vadd.s32 3, %v1384_v22  ;;  %v17022_v53 = vpop.f32.mrf.mxu1 }
 0x27a   : > { %v1378_v3 = vmul.f32 %v1377_v43, %v1375_v25  ;;  %7261 = vst [vmem:[%s15815_s20 + $0x130] sm:$0xff] %v4622_v26  ;;  %13917 = vst [vmem:[%s15815_s20 + $0x330] sm:$0xff] %v11303_v28  ;;  %v16976_v29 = vand.u32 3, %v1384_v22  ;;  %vm4625_vm3 = vcmp.lt.s32.totalorder %v16802_v41, 0  ;;  %v1407_v35 = vor.u32 8388608, %v1406_v39 }
 0x27b   : > { %v4686_v12 = vshll.u32 %v4685_v60, 30  ;;  %v1417_v5 = vshrl.u32 %v15258_v4, %v1414_v49  ;;  %v1420_v32 = vshrl.u32 %v15259_v6, %v1414_v49  ;;  %v16985_v50 = vshrl.u32 %v1411_v19, 5 }
 0x27c   : > { %v1379_v42 = vxor.u32 2147483648, %v1378_v3  ;;  %v1416_v13 = vshll.u32 %v15257_v0, %v1413_v37  ;;  %v1423_v34 = vshrl.u32 %v15260_v8, %v1414_v49  ;;  %v4709_v38 = vsub.s32 4, %v4685_v60 }
 0x27d   : > { %v16979_v54 = vsub.s32 %v4683_v33, %v4686_v12  ;;  %v1419_v11 = vshll.u32 %v15258_v4, %v1413_v37  ;;  %v1422_v57 = vshll.u32 %v15259_v6, %v1413_v37  ;;  %v1425_v59 = vshll.u32 %v15260_v8, %v1413_v37 }
 0x27e   : > { %v1380_v47 = vsel %vm1297_vm4, %v1379_v42, %v1378_v3  ;;  %v1426_v62 = vshrl.u32 %v15261_v10, %v1414_v49  ;;  %v1418_v61 = vor.u32 %v1417_v5, %v1416_v13  ;;  %v1428_v23 = vshll.u32 %v15261_v10, %v1413_v37 }
 0x27f   : > { %v1383_v14 = vsel %vm16925_vm7, %v16709_v24, %v1380_v47  ;;  %v4689_v55 = vsub.s32 0, %v16979_v54  ;;  %v1421_v30 = vor.u32 %v1420_v32, %v1419_v11  ;;  %v1424_v44 = vor.u32 %v1423_v34, %v1422_v57 }
 0x280   : > { %14978 = vcosq.f32 %v1383_v14  ;;  %v1427_v20 = vor.u32 %v1426_v62, %v1425_v59  ;;  %v1429_v31 = vshrl.u32 %v15262_v17, %v1414_v49  ;;  %v17000_v27 = vand.u32 3, %v1388_v1 }
 0x281   : > { %14980 = vsinq.f32 %v1383_v14  ;;  %v14237_v52 = vmin.u32 %v4689_v55, %v16979_v54  ;;  %v4679_v63 = vadd.s32 %v16931_v18, %v16938_v56  ;;  %v17004_v51 = vshll.u32 %v1407_v35, 8 }
 0x282   : > { %v4710_v33 = vsel %vm4625_vm3, %v4709_v38, %v4685_v60  ;;  %v1415_v19 = vshrl.u32 %v15257_v0, %v1414_v49  ;;  %v1430_v40 = vor.u32 %v1429_v31, %v1428_v23  ;;  %vm1431_vm4 = vcmp.lt.s32.totalorder %v16985_v50, 1 }
 0x283   : > { %v4691_v7 = vclz %v14237_v52  ;;  %vm17012_vm5 = vcmp.le.f32.partialorder %v4623_v46, 0.7853982  ;;  %vm1433_vm2 = vcmp.lt.s32.totalorder %v16985_v50, 3  ;;  %vm1434_vm6 = vcmp.lt.s32.totalorder %v16985_v50, 4 }
 0x284   : > { %v1439_v18 = vsel %vm1431_vm4, %v1418_v61, %v1421_v30  ;;  %v1436_v56 = vsel %vm1434_vm6, %v1424_v44, 2102212464  ;;  %v1440_v39 = vsel %vm1434_vm6, %v1427_v20, 920167782  ;;  %v1443_v2 = vsel %vm1431_vm4, %v1421_v30, %v1424_v44 }
 0x285   : > { %v14238_v22 = vadd.s32 4294967294, %v4691_v7  ;;  %v1444_v16 = vsel %vm1434_vm6, %v1430_v40, 1326507024  ;;  %vm8106_vm7 = vcmp.eq.s32.totalorder %v16976_v29, 2  ;;  %vm1432_vm9 = vcmp.lt.s32.totalorder %v16985_v50, 2 }
 0x286   : > { %v1441_v46 = vsel %vm1433_vm2, %v1424_v44, %v1440_v39  ;;  %v1445_v37 = vsel %vm1433_vm2, %v1427_v20, %v1444_v16  ;;  %vm8103_vm10 = vcmp.eq.s32.totalorder %v16976_v29, 0  ;;  %v1435_v48 = vsel %vm1431_vm4, %v1415_v19, %v1418_v61 }
 0x287   : > { %vm14239_vm8 = vcmp.lt.s32.totalorder %v14238_v22, 0  ;;  %v1442_v25 = vsel %vm1432_vm9, %v1439_v18, %v1441_v46  ;;  %v1446_v43 = vsel %vm1432_vm9, %v1443_v2, %v1445_v37  ;;  %vm8102_vm11 = vcmp.lt.s32.totalorder %v16976_v29, 2 }
 0x288   : > { %v4694_v9 = vsel %vm14239_vm8, 0, %v14238_v22  ;;  %v1437_v60 = vsel %vm1433_vm2, %v1421_v30, %v1436_v56  ;;  %v4730_v49 = vand.u32 2139095040, %v17022_v53  ;;  %vm1390_vm12 = vcmp.lt.s32.totalorder %v17000_v27, 2  ;;  %v17077_v56 = vpop.f32.mrf.mxu0 }
 0x289   : > { %v4695_v21 = vsub.s32 32, %v4694_v9  ;;  %v4699_v15 = vsub.s32 4294967266, %v4694_v9  ;;  %v17042_v26 = vmul.u32.u64.low %v17004_v51, %v1446_v43  ;;  %v17043_v28 = vmul.u32.u64.high %v17004_v51, %v1446_v43, %v17042_v26 }
 0x28a   : > { %v17046_v3 = vmul.u32.u64.low %v17004_v51, %v1442_v25  ;;  %v17047_v12 = vmul.u32.u64.high %v17004_v51, %v1442_v25, %v17046_v3  ;;  %v4696_v42 = vshll.u32 %v16979_v54, %v4694_v9  ;;  %v4731_v5 = vshrl.u32 %v4730_v49, 23 }
 0x28b   : > { %v4697_v1 = vshrl.u32 %v4679_v63, %v4695_v21  ;;  %v4700_v35 = vadd.s32 127, %v4699_v15  ;;  %vm1391_vm13 = vcmp.eq.s32.totalorder %v17000_v27, 0  ;;  %vm1394_vm14 = vcmp.eq.s32.totalorder %v17000_v27, 2 }
 0x28c   : > { %v1438_v32 = vsel %vm1432_vm9, %v1435_v48, %v1437_v60  ;;  %v4727_v14 = vand.u32 2147483647, %v17022_v53  ;;  %v14240_v55 = vadd.s32 4294967169, %v4731_v5  ;;  %v4712_v11 = vsel %vm17012_vm5, 0, %v4710_v33 }
 0x28d   : > { %v14979_v47 = vpop.eup %14978  ;;  %v4698_v13 = vor.u32 %v4697_v1, %v4696_v42  ;;  %v4701_v34 = vshll.u32 %v4700_v35, 23  ;;  %vm1456_vm15 = vc.u32 %v17043_v28, %v17046_v3  ;;  %v1457_v57 = vadd.s32 1, %v17047_v12 }
 0x28e   : > { %v14981_v38 = vpop.eup %14980  ;;  %v1395_v54 = vxor.u32 2147483648, %v14979_v47  ;;  %v1454_v50 = vmul.u32 %v17004_v51, %v1438_v32  ;;  %v4737_v52 = vadd.s32 1, %v14240_v55  ;;  %vm1387_vm0 = vweird.f32 %v16709_v24 }
 0x28f   : > { %v1392_v59 = vxor.u32 2147483648, %v14981_v38  ;;  %v4702_v62 = vor.u32 4788187, %v4701_v34  ;;  %v4705_v44 = vcvt.s32.f32 %v4698_v13  ;;  %v1458_v20 = vsel %vm1456_vm15, %v1457_v57, %v17047_v12 }
 0x290   : > { %v1396_v61 = vsel %vm1394_vm14, %v1395_v54, %v14981_v38  ;;  %v8108_v30 = vsel %vm8106_vm7, %v1395_v54, %v14981_v38  ;;  %v1459_v7 = vadd.s32 %v1458_v20, %v1454_v50  ;;  %vm4738_vm1 = vcmp.gt.s32.totalorder %v4737_v52, 0 }
 0x291   : > { %v1393_v23 = vsel %vm1391_vm13, %v14979_v47, %v1392_v59  ;;  %v8105_v31 = vsel %vm8103_vm10, %v14979_v47, %v1392_v59  ;;  %v4703_v63 = vand.u32 2147483647, %v4702_v62  ;;  %v4716_v39 = vadd.s32 3, %v4712_v11 }
 0x292   : > { %v1397_v51 = vsel %vm1390_vm12, %v1393_v23, %v1396_v61  ;;  %v8109_v33 = vsel %vm8102_vm11, %v8105_v31, %v8108_v30  ;;  %v1460_v18 = vadd.s32 536870912, %v1459_v7  ;;  %v4739_v2 = vsel %vm4738_vm1, %v4737_v52, 0 }
 0x293   : > { %v1398_v19 = vsel %vm1387_vm0, nan, %v1397_v51  ;;  %v8110_v40 = vsel %vm1387_vm0, nan, %v8109_v33  ;;  %v4706_v22 = vmul.f32 %v4705_v44, %v4703_v63  ;;  %v4734_v24 = vand.u32 8388607, %v4727_v14 }
 0x294   : > { %7230 = vst [vmem:[%s15815_s20 + $0x38] sm:$0xff] %v1398_v19  ;;  %13886 = vst [vmem:[%s15815_s20 + $0x238] sm:$0xff] %v8110_v40  ;;  %v17081_v46 = vshrl.u32 %v1460_v18, 30  ;;  %v4741_v27 = vand.u32 31, %v4739_v2  ;;  %v1506_v29 = vand.u32 2139095040, %v17077_v56  ;;  %v17092_v43 = vand.u32 3, %v4712_v11 }
 0x295   : > { %v4707_v16 = vxor.u32 2147483648, %v4706_v22  ;;  %v17094_v21 = vand.u32 3, %v4716_v39  ;;  %v4735_v60 = vor.u32 8388608, %v4734_v24  ;;  %v4740_v5 = vshrl.u32 %v4739_v2, 5 }
 0x296   : > { %v1462_v9 = vshll.u32 %v17081_v46, 30  ;;  %v4742_v48 = vsub.s32 32, %v4741_v27  ;;  %v1507_v12 = vshrl.u32 %v1506_v29, 23  ;;  %v4744_v1 = vshll.u32 %v15257_v0, %v4741_v27 }
 0x297   : > { %v4708_v37 = vsel %vm4625_vm3, %v4707_v16, %v4706_v22  ;;  %v4747_v36 = vshll.u32 %v15258_v4, %v4741_v27  ;;  %v4750_v32 = vshll.u32 %v15259_v6, %v4741_v27  ;;  %v4753_v47 = vshll.u32 %v15260_v8, %v4741_v27 }
 0x298   : > { %v4711_v25 = vsel %vm17012_vm5, %v16802_v41, %v4708_v37  ;;  %v17096_v15 = vsub.s32 %v1459_v7, %v1462_v9  ;;  %v4745_v49 = vshrl.u32 %v15258_v4, %v4742_v48  ;;  %v4748_v26 = vshrl.u32 %v15259_v6, %v4742_v48 }
 0x299   : > { %14982 = vcosq.f32 %v4711_v25  ;;  %v4751_v35 = vshrl.u32 %v15260_v8, %v4742_v48  ;;  %v4754_v13 = vshrl.u32 %v15261_v10, %v4742_v48  ;;  %v1455_v54 = vadd.s32 %v17046_v3, %v17043_v28 }
 0x29a   : > { %14984 = vsinq.f32 %v4711_v25  ;;  %v1465_v42 = vsub.s32 0, %v17096_v15  ;;  %v4746_v55 = vor.u32 %v4745_v49, %v4744_v1  ;;  %v4749_v38 = vor.u32 %v4748_v26, %v4747_v36 }
 0x29b   : > { %v4752_v11 = vor.u32 %v4751_v35, %v4750_v32  ;;  %v4755_v57 = vor.u32 %v4754_v13, %v4753_v47  ;;  %v1503_v59 = vand.u32 2147483647, %v17077_v56  ;;  %v1485_v50 = vsub.s32 4, %v17081_v46 }
 0x29c   : > { %v14113_v34 = vmin.u32 %v1465_v42, %v17096_v15  ;;  %v17112_v52 = vshll.u32 %v4735_v60, 8  ;;  %v14116_v61 = vadd.s32 4294967169, %v1507_v12  ;;  %vm4722_vm3 = vcmp.eq.s32.totalorder %v17094_v21, 2 }
 0x29d   : > { %vm11402_vm4 = vcmp.eq.s32.totalorder %v17092_v43, 2  ;;  %v4743_v30 = vshrl.u32 %v15257_v0, %v4742_v48  ;;  %v4756_v44 = vshll.u32 %v15261_v10, %v4741_v27  ;;  %v4757_v28 = vshrl.u32 %v15262_v17, %v4742_v48 }
 0x29e   : > { %v1467_v62 = vclz %v14113_v34  ;;  %vm4759_vm5 = vcmp.lt.s32.totalorder %v4740_v5, 1  ;;  %vm4719_vm2 = vcmp.eq.s32.totalorder %v17094_v21, 0  ;;  %vm11399_vm6 = vcmp.eq.s32.totalorder %v17092_v43, 0 }
 0x29f   : > { %vm4760_vm7 = vcmp.lt.s32.totalorder %v4740_v5, 2  ;;  %vm4762_vm8 = vcmp.lt.s32.totalorder %v4740_v5, 4  ;;  %v4767_v20 = vsel %vm4759_vm5, %v4746_v55, %v4749_v38  ;;  %vm4718_vm9 = vcmp.lt.s32.totalorder %v17094_v21, 2 }
 0x2a0   : > { %v14114_v3 = vadd.s32 4294967294, %v1467_v62  ;;  %vm11398_vm10 = vcmp.lt.s32.totalorder %v17092_v43, 2  ;;  %vm1401_vm11 = vcmp.lt.s32.totalorder %v16915_v58, 0  ;;  %v4758_v23 = vor.u32 %v4757_v28, %v4756_v44 }
 0x2a1   : > { %vm4761_vm12 = vcmp.lt.s32.totalorder %v4740_v5, 3  ;;  %v4764_v31 = vsel %vm4762_vm8, %v4752_v11, 2102212464  ;;  %v4768_v63 = vsel %vm4762_vm8, %v4755_v57, 920167782  ;;  %vm4715_vm13 = vweird.f32 %v16802_v41 }
 0x2a2   : > { %vm14115_vm14 = vcmp.lt.s32.totalorder %v14114_v3, 0  ;;  %v4769_v7 = vsel %vm4761_vm12, %v4752_v11, %v4768_v63  ;;  %v4771_v51 = vsel %vm4759_vm5, %v4749_v38, %v4752_v11  ;;  %v1513_v33 = vadd.s32 1, %v14116_v61 }
 0x2a3   : > { %v1470_v19 = vsel %vm14115_vm14, 0, %v14114_v3  ;;  %v4763_v40 = vsel %vm4759_vm5, %v4743_v30, %v4746_v55  ;;  %v4770_v22 = vsel %vm4760_vm7, %v4767_v20, %v4769_v7  ;;  %v4772_v18 = vsel %vm4762_vm8, %v4758_v23, 1326507024 }
 0x2a4   : > { %v1471_v39 = vsub.s32 32, %v1470_v19  ;;  %v1475_v2 = vsub.s32 4294967266, %v1470_v19  ;;  %v4765_v16 = vsel %vm4761_vm12, %v4749_v38, %v4764_v31  ;;  %v4773_v24 = vsel %vm4761_vm12, %v4755_v57, %v4772_v18 }
 0x2a5   : > { %v1472_v29 = vshll.u32 %v17096_v15, %v1470_v19  ;;  %v4774_v37 = vsel %vm4760_vm7, %v4771_v51, %v4773_v24  ;;  %v17135_v9 = vmul.u32.u64.low %v17112_v52, %v4770_v22  ;;  %v17136_v48 = vmul.u32.u64.high %v17112_v52, %v4770_v22, %v17135_v9 }
 0x2a6   : > { %v14983_v27 = vpop.eup %14982  ;;  %v1473_v49 = vshrl.u32 %v1455_v54, %v1471_v39  ;;  %v1476_v26 = vadd.s32 127, %v1475_v2  ;;  %vm1514_vm15 = vcmp.gt.s32.totalorder %v1513_v33, 0  ;;  %v4766_v42 = vsel %vm4760_vm7, %v4763_v40, %v4765_v16 }
 0x2a7   : > { %v14985_v25 = vpop.eup %14984  ;;  %v4723_v60 = vxor.u32 2147483648, %v14983_v27  ;;  %v17141_v1 = vmul.u32.u64.low %v17112_v52, %v4774_v37  ;;  %v17142_v36 = vmul.u32.u64.high %v17112_v52, %v4774_v37, %v17141_v1  ;;  %v4785_v34 = vadd.s32 1, %v17136_v48 }
 0x2a8   : > { %v4720_v12 = vxor.u32 2147483648, %v14985_v25  ;;  %v1474_v32 = vor.u32 %v1473_v49, %v1472_v29  ;;  %v1477_v47 = vshll.u32 %v1476_v26, 23  ;;  %v1515_v55 = vsel %vm1514_vm15, %v1513_v33, 0 }
 0x2a9   : > { %v4724_v15 = vsel %vm4722_vm3, %v4723_v60, %v14985_v25  ;;  %v11404_v35 = vsel %vm11402_vm4, %v4723_v60, %v14985_v25  ;;  %v1486_v57 = vsel %vm1401_vm11, %v1485_v50, %v17081_v46  ;;  %v4782_v30 = vmul.u32 %v17112_v52, %v4766_v42  ;;  %v17197_v25 = vpop.f32.mrf.mxu1 }
 0x2aa   : > { %v4721_v13 = vsel %vm4719_vm2, %v14983_v27, %v4720_v12  ;;  %v11401_v5 = vsel %vm11399_vm6, %v14983_v27, %v4720_v12  ;;  %v1478_v11 = vor.u32 4788187, %v1477_v47  ;;  %vm4784_vm0 = vc.u32 %v17142_v36, %v17135_v9 }
 0x2ab   : > { %v4725_v38 = vsel %vm4718_vm9, %v4721_v13, %v4724_v15  ;;  %v11405_v54 = vsel %vm11398_vm10, %v11401_v5, %v11404_v35  ;;  %v1481_v21 = vcvt.s32.f32 %v1474_v32  ;;  %v4786_v44 = vsel %vm4784_vm0, %v4785_v34, %v17136_v48 }
 0x2ac   : > { %v4726_v62 = vsel %vm4715_vm13, nan, %v4725_v38  ;;  %v11406_v61 = vsel %vm4715_vm13, nan, %v11405_v54  ;;  %v1479_v43 = vand.u32 2147483647, %v1478_v11  ;;  %v1517_v28 = vand.u32 31, %v1515_v55 }
 0x2ad   : > { %7262 = vst [vmem:[%s15815_s20 + $0x138] sm:$0xff] %v4726_v62  ;;  %13918 = vst [vmem:[%s15815_s20 + $0x338] sm:$0xff] %v11406_v61  ;;  %v4787_v3 = vadd.s32 %v4786_v44, %v4782_v30  ;;  %vm17172_vm1 = vcmp.le.f32.partialorder %v1399_v45, 0.7853982  ;;  %v1510_v50 = vand.u32 8388607, %v1503_v59  ;;  %vm1491_vm10 = vweird.f32 %v16915_v58 }
 0x2ae   : > { %v1482_v41 = vmul.f32 %v1481_v21, %v1479_v43  ;;  %v1518_v52 = vsub.s32 32, %v1517_v28  ;;  %v1488_v20 = vsel %vm17172_vm1, 0, %v1486_v57  ;;  %v17180_v31 = vshrl.u32 %v1515_v55, 5 }
 0x2af   : > { %v4788_v23 = vadd.s32 536870912, %v4787_v3  ;;  %v1520_v63 = vshll.u32 %v15257_v0, %v1517_v28  ;;  %v1523_v45 = vshll.u32 %v15258_v4, %v1517_v28  ;;  %v1526_v2 = vshll.u32 %v15259_v6, %v1517_v28 }
 0x2b0   : > { %v1483_v7 = vxor.u32 2147483648, %v1482_v41  ;;  %v1521_v51 = vshrl.u32 %v15258_v4, %v1518_v52  ;;  %v1524_v33 = vshrl.u32 %v15259_v6, %v1518_v52  ;;  %v1527_v40 = vshrl.u32 %v15260_v8, %v1518_v52 }
 0x2b1   : > { %v4789_v19 = vshrl.u32 %v4788_v23, 30  ;;  %v1530_v22 = vshrl.u32 %v15261_v10, %v1518_v52  ;;  %v1533_v18 = vshrl.u32 %v15262_v17, %v1518_v52  ;;  %v1529_v16 = vshll.u32 %v15260_v8, %v1517_v28 }
 0x2b2   : > { %v1484_v39 = vsel %vm1401_vm11, %v1483_v7, %v1482_v41  ;;  %v1532_v24 = vshll.u32 %v15261_v10, %v1517_v28  ;;  %v1522_v37 = vor.u32 %v1521_v51, %v1520_v63  ;;  %v1525_v48 = vor.u32 %v1524_v33, %v1523_v45 }
 0x2b3   : > { %v1487_v27 = vsel %vm17172_vm1, %v16915_v58, %v1484_v39  ;;  %v4790_v29 = vshll.u32 %v4789_v19, 30  ;;  %v1528_v60 = vor.u32 %v1527_v40, %v1526_v2  ;;  %v1531_v49 = vor.u32 %v1530_v22, %v1529_v16 }
 0x2b4   : > { %14986 = vcosq.f32 %v1487_v27  ;;  %v1534_v26 = vor.u32 %v1533_v18, %v1532_v24  ;;  %vm4729_vm3 = vcmp.lt.s32.totalorder %v17022_v53, 0  ;;  %vm1538_vm4 = vcmp.lt.s32.totalorder %v17180_v31, 4 }
 0x2b5   : > { %14988 = vsinq.f32 %v1487_v27  ;;  %v17200_v12 = vsub.s32 %v4787_v3, %v4790_v29  ;;  %v1511_v42 = vor.u32 8388608, %v1510_v50  ;;  %vm1535_vm5 = vcmp.lt.s32.totalorder %v17180_v31, 1 }
 0x2b6   : > { %v1544_v1 = vsel %vm1538_vm4, %v1531_v49, 920167782  ;;  %v4831_v15 = vand.u32 2147483647, %v17197_v25  ;;  %v1492_v35 = vadd.s32 3, %v1488_v20  ;;  %vm1537_vm2 = vcmp.lt.s32.totalorder %v17180_v31, 3 }
 0x2b7   : > { %v4793_v32 = vsub.s32 0, %v17200_v12  ;;  %v1543_v47 = vsel %vm1535_vm5, %v1522_v37, %v1525_v48  ;;  %v17209_v13 = vand.u32 3, %v1488_v20  ;;  %vm17213_vm6 = vcmp.le.f32.partialorder %v4727_v14, 0.7853982 }
 0x2b8   : > { %v1540_v34 = vsel %vm1538_vm4, %v1528_v60, 2102212464  ;;  %v1545_v55 = vsel %vm1537_vm2, %v1528_v60, %v1544_v1  ;;  %v1548_v38 = vsel %vm1538_vm4, %v1534_v26, 1326507024  ;;  %v1519_v11 = vshrl.u32 %v15257_v0, %v1518_v52 }
 0x2b9   : > { %v14241_v54 = vmin.u32 %v4793_v32, %v17200_v12  ;;  %vm1536_vm7 = vcmp.lt.s32.totalorder %v17180_v31, 2  ;;  %v1547_v57 = vsel %vm1535_vm5, %v1525_v48, %v1528_v60  ;;  %v4813_v62 = vsub.s32 4, %v4789_v19 }
 0x2ba   : > { %v1546_v14 = vsel %vm1536_vm7, %v1543_v47, %v1545_v55  ;;  %v1549_v61 = vsel %vm1537_vm2, %v1531_v49, %v1548_v38  ;;  %v1551_v30 = vshll.u32 %v1511_v42, 8  ;;  %v1493_v43 = vand.u32 3, %v1492_v35 }
 0x2bb   : > { %v4795_v21 = vclz %v14241_v54  ;;  %v1539_v44 = vsel %vm1535_vm5, %v1519_v11, %v1522_v37  ;;  %v1541_v28 = vsel %vm1537_vm2, %v1525_v48, %v1540_v34  ;;  %v1550_v3 = vsel %vm1536_vm7, %v1547_v57, %v1549_v61 }
 0x2bc   : > { %v17234_v46 = vmul.u32.u64.low %v1551_v30, %v1546_v14  ;;  %v17235_v41 = vmul.u32.u64.high %v1551_v30, %v1546_v14, %v17234_v46  ;;  %v4834_v50 = vand.u32 2139095040, %v17197_v25  ;;  %vm8205_vm8 = vcmp.lt.s32.totalorder %v17209_v13, 2 }
 0x2bd   : > { %vm8206_vm9 = vcmp.eq.s32.totalorder %v17209_v13, 0  ;;  %v14242_v52 = vadd.s32 4294967294, %v4795_v21  ;;  %v17241_v20 = vmul.u32.u64.low %v1551_v30, %v1550_v3  ;;  %v17242_v23 = vmul.u32.u64.high %v1551_v30, %v1550_v3, %v17241_v20 }
 0x2be   : > { %vm8209_vm11 = vcmp.eq.s32.totalorder %v17209_v13, 2  ;;  %v4814_v63 = vsel %vm4729_vm3, %v4813_v62, %v4789_v19  ;;  %v1542_v7 = vsel %vm1536_vm7, %v1539_v44, %v1541_v28  ;;  %v4835_v51 = vshrl.u32 %v4834_v50, 23 }
 0x2bf   : > { %vm1494_vm12 = vcmp.lt.s32.totalorder %v1493_v43, 2  ;;  %vm1495_vm13 = vcmp.eq.s32.totalorder %v1493_v43, 0  ;;  %vm1498_vm14 = vcmp.eq.s32.totalorder %v1493_v43, 2  ;;  %vm14243_vm15 = vcmp.lt.s32.totalorder %v14242_v52, 0  ;;  %v17278_v43 = vpop.f32.mrf.mxu0 }
 0x2c0   : > { %v4783_v45 = vadd.s32 %v17135_v9, %v17142_v36  ;;  %v4798_v33 = vsel %vm14243_vm15, 0, %v14242_v52  ;;  %v1561_v40 = vadd.s32 1, %v17235_v41  ;;  %v14244_v22 = vadd.s32 4294967169, %v4835_v51 }
 0x2c1   : > { %v14987_v18 = vpop.eup %14986  ;;  %v4799_v39 = vsub.s32 32, %v4798_v33  ;;  %v4803_v2 = vsub.s32 4294967266, %v4798_v33  ;;  %v4816_v19 = vsel %vm17213_vm6, 0, %v4814_v63  ;;  %v1558_v31 = vmul.u32 %v1551_v30, %v1542_v7 }
 0x2c2   : > { %v14989_v16 = vpop.eup %14988  ;;  %v1499_v24 = vxor.u32 2147483648, %v14987_v18  ;;  %v4800_v27 = vshll.u32 %v17200_v12, %v4798_v33  ;;  %vm1560_vm0 = vc.u32 %v17242_v23, %v17234_v46  ;;  %v4841_v29 = vadd.s32 1, %v14244_v22 }
 0x2c3   : > { %v1496_v9 = vxor.u32 2147483648, %v14989_v16  ;;  %v4801_v36 = vshrl.u32 %v4783_v45, %v4799_v39  ;;  %v4804_v37 = vadd.s32 127, %v4803_v2  ;;  %v1562_v48 = vsel %vm1560_vm0, %v1561_v40, %v17235_v41 }
 0x2c4   : > { %v1500_v60 = vsel %vm1498_vm14, %v1499_v24, %v14989_v16  ;;  %v8211_v49 = vsel %vm8209_vm11, %v1499_v24, %v14989_v16  ;;  %v1563_v26 = vadd.s32 %v1562_v48, %v1558_v31  ;;  %vm4842_vm1 = vcmp.gt.s32.totalorder %v4841_v29, 0 }
 0x2c5   : > { %v1497_v12 = vsel %vm1495_vm13, %v14987_v18, %v1496_v9  ;;  %v8208_v42 = vsel %vm8206_vm9, %v14987_v18, %v1496_v9  ;;  %v4802_v1 = vor.u32 %v4801_v36, %v4800_v27  ;;  %v4805_v35 = vshll.u32 %v4804_v37, 23 }
 0x2c6   : > { %v1501_v32 = vsel %vm1494_vm12, %v1497_v12, %v1500_v60  ;;  %v8212_v47 = vsel %vm8205_vm8, %v8208_v42, %v8211_v49  ;;  %v1564_v34 = vadd.s32 536870912, %v1563_v26  ;;  %v4843_v55 = vsel %vm4842_vm1, %v4841_v29, 0 }
 0x2c7   : > { %v1502_v38 = vsel %vm1491_vm10, nan, %v1501_v32  ;;  %v8213_v54 = vsel %vm1491_vm10, nan, %v8212_v47  ;;  %v4806_v11 = vor.u32 4788187, %v4805_v35  ;;  %v4820_v57 = vadd.s32 3, %v4816_v19 }
 0x2c8   : > { %7231 = vst [vmem:[%s15815_s20 + $0x40] sm:$0xff] %v1502_v38  ;;  %13887 = vst [vmem:[%s15815_s20 + $0x240] sm:$0xff] %v8213_v54  ;;  %v17274_v62 = vshrl.u32 %v1564_v34, 30  ;;  %v4838_v14 = vand.u32 8388607, %v4831_v15  ;;  %v4845_v61 = vand.u32 31, %v4843_v55  ;;  %v4809_v30 = vcvt.s32.f32 %v4802_v1 }
 0x2c9   : > { %v4807_v13 = vand.u32 2147483647, %v4806_v11  ;;  %v17281_v58 = vand.u32 3, %v4816_v19  ;;  %v17283_v3 = vand.u32 3, %v4820_v57  ;;  %v1607_v52 = vand.u32 2147483647, %v17278_v43 }
 0x2ca   : > { %v1566_v21 = vshll.u32 %v17274_v62, 30  ;;  %v4846_v44 = vsub.s32 32, %v4845_v61  ;;  %v4839_v50 = vor.u32 8388608, %v4838_v14  ;;  %v1559_v45 = vadd.s32 %v17234_v46, %v17242_v23 }
 0x2cb   : > { %v4810_v28 = vmul.f32 %v4809_v30, %v4807_v13  ;;  %v4848_v40 = vshll.u32 %v15257_v0, %v4845_v61  ;;  %v1610_v22 = vand.u32 2139095040, %v17278_v43  ;;  %v4851_v39 = vshll.u32 %v15258_v4, %v4845_v61 }
 0x2cc   : > { %v17285_v41 = vsub.s32 %v1563_v26, %v1566_v21  ;;  %v4849_v63 = vshrl.u32 %v15258_v4, %v4846_v44  ;;  %v4852_v7 = vshrl.u32 %v15259_v6, %v4846_v44  ;;  %v4855_v51 = vshrl.u32 %v15260_v8, %v4846_v44 }
 0x2cd   : > { %v4811_v20 = vxor.u32 2147483648, %v4810_v28  ;;  %v4854_v2 = vshll.u32 %v15259_v6, %v4845_v61  ;;  %v4858_v19 = vshrl.u32 %v15261_v10, %v4846_v44  ;;  %v4844_v23 = vshrl.u32 %v4843_v55, 5 }
 0x2ce   : > { %v1569_v33 = vsub.s32 0, %v17285_v41  ;;  %v4857_v16 = vshll.u32 %v15260_v8, %v4845_v61  ;;  %v4850_v24 = vor.u32 %v4849_v63, %v4848_v40  ;;  %v4853_v27 = vor.u32 %v4852_v7, %v4851_v39 }
 0x2cf   : > { %v4812_v18 = vsel %vm4729_vm3, %v4811_v20, %v4810_v28  ;;  %v4856_v29 = vor.u32 %v4855_v51, %v4854_v2  ;;  %v17306_v37 = vshll.u32 %v4839_v50, 8  ;;  %v1589_v48 = vsub.s32 4, %v17274_v62 }
 0x2d0   : > { %v4815_v31 = vsel %vm17213_vm6, %v17022_v53, %v4812_v18  ;;  %v14117_v46 = vmin.u32 %v1569_v33, %v17285_v41  ;;  %v4859_v36 = vor.u32 %v4858_v19, %v4857_v16  ;;  %v4860_v60 = vshll.u32 %v15261_v10, %v4845_v61 }
 0x2d1   : > { %14990 = vcosq.f32 %v4815_v31  ;;  %v4861_v5 = vshrl.u32 %v15262_v17, %v4846_v44  ;;  %v1611_v49 = vshrl.u32 %v1610_v22, 23  ;;  %v4847_v12 = vshrl.u32 %v15257_v0, %v4846_v44 }
 0x2d2   : > { %14992 = vsinq.f32 %v4815_v31  ;;  %v1571_v9 = vclz %v14117_v46  ;;  %vm4863_vm3 = vcmp.lt.s32.totalorder %v4844_v23, 1  ;;  %vm4866_vm4 = vcmp.lt.s32.totalorder %v4844_v23, 4 }
 0x2d3   : > { %vm1505_vm5 = vcmp.lt.s32.totalorder %v17077_v56, 0  ;;  %v4862_v42 = vor.u32 %v4861_v5, %v4860_v60  ;;  %vm4864_vm2 = vcmp.lt.s32.totalorder %v4844_v23, 2  ;;  %v4868_v1 = vsel %vm4866_vm4, %v4856_v29, 2102212464 }
 0x2d4   : > { %v14118_v26 = vadd.s32 4294967294, %v1571_v9  ;;  %v4871_v35 = vsel %vm4863_vm3, %v4850_v24, %v4853_v27  ;;  %vm4865_vm7 = vcmp.lt.s32.totalorder %v4844_v23, 3  ;;  %v4867_v32 = vsel %vm4863_vm3, %v4847_v12, %v4850_v24 }
 0x2d5   : > { %v4872_v47 = vsel %vm4866_vm4, %v4859_v36, 920167782  ;;  %v4875_v38 = vsel %vm4863_vm3, %v4853_v27, %v4856_v29  ;;  %v4876_v54 = vsel %vm4866_vm4, %v4862_v42, 1326507024  ;;  %v4869_v14 = vsel %vm4865_vm7, %v4853_v27, %v4868_v1 }
 0x2d6   : > { %vm14119_vm6 = vcmp.lt.s32.totalorder %v14118_v26, 0  ;;  %v4873_v55 = vsel %vm4865_vm7, %v4856_v29, %v4872_v47  ;;  %vm17316_vm8 = vcmp.le.f32.partialorder %v1503_v59, 0.7853982  ;;  %v4877_v21 = vsel %vm4865_vm7, %v4859_v36, %v4876_v54 }
 0x2d7   : > { %v1574_v34 = vsel %vm14119_vm6, 0, %v14118_v26  ;;  %v4874_v61 = vsel %vm4864_vm2, %v4871_v35, %v4873_v55  ;;  %vm11501_vm9 = vcmp.lt.s32.totalorder %v17281_v58, 2  ;;  %v4878_v63 = vsel %vm4864_vm2, %v4875_v38, %v4877_v21 }
 0x2d8   : > { %v1575_v11 = vsub.s32 32, %v1574_v34  ;;  %v1579_v57 = vsub.s32 4294967266, %v1574_v34  ;;  %v1576_v30 = vshll.u32 %v17285_v41, %v1574_v34  ;;  %v14120_v7 = vadd.s32 4294967169, %v1611_v49 }
 0x2d9   : > { %v17322_v44 = vmul.u32.u64.low %v17306_v37, %v4874_v61  ;;  %v17323_v28 = vmul.u32.u64.high %v17306_v37, %v4874_v61, %v17322_v44  ;;  %vm4819_vm10 = vweird.f32 %v17022_v53  ;;  %vm11502_vm11 = vcmp.eq.s32.totalorder %v17281_v58, 0 }
 0x2da   : > { %v1577_v50 = vshrl.u32 %v1559_v45, %v1575_v11  ;;  %v1580_v20 = vadd.s32 127, %v1579_v57  ;;  %vm11505_vm12 = vcmp.eq.s32.totalorder %v17281_v58, 2  ;;  %v4870_v40 = vsel %vm4864_vm2, %v4867_v32, %v4869_v14 }
 0x2db   : > { %v17332_v59 = vmul.u32.u64.low %v17306_v37, %v4878_v63  ;;  %v17333_v41 = vmul.u32.u64.high %v17306_v37, %v4878_v63, %v17332_v59  ;;  %v1617_v22 = vadd.s32 1, %v14120_v7  ;;  %vm4822_vm13 = vcmp.lt.s32.totalorder %v17283_v3, 2 }
 0x2dc   : > { %v1578_v51 = vor.u32 %v1577_v50, %v1576_v30  ;;  %v1581_v33 = vshll.u32 %v1580_v20, 23  ;;  %vm4823_vm14 = vcmp.eq.s32.totalorder %v17283_v3, 0  ;;  %vm4826_vm15 = vcmp.eq.s32.totalorder %v17283_v3, 2  ;;  %v17383_v20 = vpop.f32.mrf.mxu1 }
 0x2dd   : > { %v4889_v45 = vadd.s32 1, %v17323_v28  ;;  %v1590_v2 = vsel %vm1505_vm5, %v1589_v48, %v17274_v62  ;;  %v1614_v19 = vand.u32 8388607, %v1607_v52  ;;  %vm1618_vm0 = vcmp.gt.s32.totalorder %v1617_v22, 0 }
 0x2de   : > { %v14991_v18 = vpop.eup %14990  ;;  %v1582_v39 = vor.u32 4788187, %v1581_v33  ;;  %v4886_v23 = vmul.u32 %v17306_v37, %v4870_v40  ;;  %vm4888_vm1 = vc.u32 %v17333_v41, %v17322_v44  ;;  %v1619_v16 = vsel %vm1618_vm0, %v1617_v22, 0 }
 0x2df   : > { %v14993_v31 = vpop.eup %14992  ;;  %v4827_v46 = vxor.u32 2147483648, %v14991_v18  ;;  %v1585_v29 = vcvt.s32.f32 %v1578_v51  ;;  %v4890_v9 = vsel %vm4888_vm1, %v4889_v45, %v17323_v28  ;;  %v1621_v60 = vand.u32 31, %v1619_v16 }
 0x2e0   : > { %v4824_v24 = vxor.u32 2147483648, %v14993_v31  ;;  %v1583_v27 = vand.u32 2147483647, %v1582_v39  ;;  %v4891_v48 = vadd.s32 %v4890_v9, %v4886_v23  ;;  %v1592_v26 = vsel %vm17316_vm8, 0, %v1590_v2 }
 0x2e1   : > { %v4828_v62 = vsel %vm4826_vm15, %v4827_v46, %v14993_v31  ;;  %v11507_v36 = vsel %vm11505_vm12, %v4827_v46, %v14993_v31  ;;  %v1622_v35 = vsub.s32 32, %v1621_v60  ;;  %v1596_v55 = vadd.s32 3, %v1592_v26 }
 0x2e2   : > { %v4825_v37 = vsel %vm4823_vm14, %v14991_v18, %v4824_v24  ;;  %v11504_v5 = vsel %vm11502_vm11, %v14991_v18, %v4824_v24  ;;  %v1586_v49 = vmul.f32 %v1585_v29, %v1583_v27  ;;  %v4892_v1 = vadd.s32 536870912, %v4891_v48 }
 0x2e3   : > { %v4829_v12 = vsel %vm4822_vm13, %v4825_v37, %v4828_v62  ;;  %v11508_v42 = vsel %vm11501_vm9, %v11504_v5, %v11507_v36  ;;  %v1625_v3 = vshrl.u32 %v15258_v4, %v1622_v35  ;;  %v1624_v54 = vshll.u32 %v15257_v0, %v1621_v60 }
 0x2e4   : > { %v4830_v32 = vsel %vm4819_vm10, nan, %v4829_v12  ;;  %v11509_v47 = vsel %vm4819_vm10, nan, %v11508_v42  ;;  %v1587_v34 = vxor.u32 2147483648, %v1586_v49  ;;  %v17369_v38 = vshrl.u32 %v4892_v1, 30 }
 0x2e5   : > { %7263 = vst [vmem:[%s15815_s20 + $0x140] sm:$0xff] %v4830_v32  ;;  %13919 = vst [vmem:[%s15815_s20 + $0x340] sm:$0xff] %v11509_v47  ;;  %v1628_v11 = vshrl.u32 %v15259_v6, %v1622_v35  ;;  %v1631_v57 = vshrl.u32 %v15260_v8, %v1622_v35  ;;  %v1615_v61 = vor.u32 8388608, %v1614_v19  ;;  %v1620_v30 = vshrl.u32 %v1619_v16, 5 }
 0x2e6   : > { %v1588_v58 = vsel %vm1505_vm5, %v1587_v34, %v1586_v49  ;;  %v4894_v14 = vshll.u32 %v17369_v38, 30  ;;  %v1626_v21 = vor.u32 %v1625_v3, %v1624_v54  ;;  %v1627_v28 = vshll.u32 %v15258_v4, %v1621_v60 }
 0x2e7   : > { %v1591_v53 = vsel %vm17316_vm8, %v17077_v56, %v1588_v58  ;;  %v1630_v50 = vshll.u32 %v15259_v6, %v1621_v60  ;;  %v1633_v7 = vshll.u32 %v15260_v8, %v1621_v60  ;;  %v1634_v13 = vshrl.u32 %v15261_v10, %v1622_v35 }
 0x2e8   : > { %14994 = vcosq.f32 %v1591_v53  ;;  %v17385_v63 = vsub.s32 %v4891_v48, %v4894_v14  ;;  %v1629_v59 = vor.u32 %v1628_v11, %v1627_v28  ;;  %v1636_v33 = vshll.u32 %v15261_v10, %v1621_v60 }
 0x2e9   : > { %14996 = vsinq.f32 %v1591_v53  ;;  %v1632_v51 = vor.u32 %v1631_v57, %v1630_v50  ;;  %v1637_v40 = vshrl.u32 %v15262_v17, %v1622_v35  ;;  %v1635_v45 = vor.u32 %v1634_v13, %v1633_v7 }
 0x2ea   : > { %v4897_v22 = vsub.s32 0, %v17385_v63  ;;  %v4935_v18 = vand.u32 2147483647, %v17383_v20  ;;  %v17393_v39 = vand.u32 3, %v1596_v55  ;;  %v17395_v2 = vand.u32 3, %v1592_v26 }
 0x2eb   : > { %v1638_v19 = vor.u32 %v1637_v40, %v1636_v33  ;;  %v17397_v31 = vshll.u32 %v1615_v61, 8  ;;  %v1623_v23 = vshrl.u32 %v15257_v0, %v1622_v35  ;;  %vm1639_vm3 = vcmp.lt.s32.totalorder %v1620_v30, 1 }
 0x2ec   : > { %v14245_v46 = vmin.u32 %v4897_v22, %v17385_v63  ;;  %vm1642_vm4 = vcmp.lt.s32.totalorder %v1620_v30, 4  ;;  %v1647_v24 = vsel %vm1639_vm3, %v1626_v21, %v1629_v59  ;;  %v4938_v29 = vand.u32 2139095040, %v17383_v20 }
 0x2ed   : > { %v1644_v16 = vsel %vm1642_vm4, %v1632_v51, 2102212464  ;;  %v1648_v27 = vsel %vm1642_vm4, %v1635_v45, 920167782  ;;  %vm1640_vm5 = vcmp.lt.s32.totalorder %v1620_v30, 2  ;;  %vm1641_vm2 = vcmp.lt.s32.totalorder %v1620_v30, 3 }
 0x2ee   : > { %v4899_v9 = vclz %v14245_v46  ;;  %v1643_v62 = vsel %vm1639_vm3, %v1623_v23, %v1626_v21  ;;  %vm8309_vm6 = vcmp.eq.s32.totalorder %v17395_v2, 0  ;;  %v1645_v36 = vsel %vm1641_vm2, %v1629_v59, %v1644_v16 }
 0x2ef   : > { %v1649_v48 = vsel %vm1641_vm2, %v1632_v51, %v1648_v27  ;;  %v1651_v60 = vsel %vm1639_vm3, %v1629_v59, %v1632_v51  ;;  %v1652_v37 = vsel %vm1642_vm4, %v1638_v19, 1326507024  ;;  %vm8308_vm7 = vcmp.lt.s32.totalorder %v17395_v2, 2 }
 0x2f0   : > { %vm8312_vm8 = vcmp.eq.s32.totalorder %v17395_v2, 2  ;;  %v14246_v5 = vadd.s32 4294967294, %v4899_v9  ;;  %v1650_v49 = vsel %vm1640_vm5, %v1647_v24, %v1649_v48  ;;  %v1653_v26 = vsel %vm1641_vm2, %v1635_v45, %v1652_v37 }
 0x2f1   : > { %vm1595_vm9 = vweird.f32 %v17077_v56  ;;  %vm4833_vm10 = vcmp.lt.s32.totalorder %v17197_v25, 0  ;;  %v1646_v12 = vsel %vm1640_vm5, %v1643_v62, %v1645_v36  ;;  %v1654_v42 = vsel %vm1640_vm5, %v1651_v60, %v1653_v26 }
 0x2f2   : > { %v17411_v1 = vmul.u32.u64.low %v17397_v31, %v1650_v49  ;;  %v17412_v35 = vmul.u32.u64.high %v17397_v31, %v1650_v49, %v17411_v1  ;;  %vm14247_vm11 = vcmp.lt.s32.totalorder %v14246_v5, 0  ;;  %v4939_v34 = vshrl.u32 %v4938_v29, 23 }
 0x2f3   : > { %v17416_v32 = vmul.u32.u64.low %v17397_v31, %v1654_v42  ;;  %v17417_v47 = vmul.u32.u64.high %v17397_v31, %v1654_v42, %v17416_v32  ;;  %vm1598_vm12 = vcmp.lt.s32.totalorder %v17393_v39, 2  ;;  %vm1599_vm13 = vcmp.eq.s32.totalorder %v17393_v39, 0 }
 0x2f4   : > { %vm1602_vm14 = vcmp.eq.s32.totalorder %v17393_v39, 2  ;;  %v4902_v55 = vsel %vm14247_vm11, 0, %v14246_v5  ;;  %v4887_v58 = vadd.s32 %v17322_v44, %v17333_v41  ;;  %v14248_v57 = vadd.s32 4294967169, %v4939_v34 }
 0x2f5   : > { %v14995_v3 = vpop.eup %14994  ;;  %v4903_v54 = vsub.s32 32, %v4902_v55  ;;  %v4907_v11 = vsub.s32 4294967266, %v4902_v55  ;;  %v4917_v61 = vsub.s32 4, %v17369_v38  ;;  %v1662_v30 = vmul.u32 %v17397_v31, %v1646_v12  ;;  %v17443_v31 = vpop.f32.mrf.mxu0 }
 0x2f6   : > { %v14997_v53 = vpop.eup %14996  ;;  %v1603_v14 = vxor.u32 2147483648, %v14995_v3  ;;  %v1665_v21 = vadd.s32 1, %v17412_v35  ;;  %v4904_v50 = vshll.u32 %v17385_v63, %v4902_v55  ;;  %vm1664_vm15 = vc.u32 %v17417_v47, %v17411_v1 }
 0x2f7   : > { %v1600_v28 = vxor.u32 2147483648, %v14997_v53  ;;  %v4905_v7 = vshrl.u32 %v4887_v58, %v4903_v54  ;;  %v4908_v13 = vadd.s32 127, %v4907_v11  ;;  %v4945_v41 = vadd.s32 1, %v14248_v57 }
 0x2f8   : > { %v1604_v59 = vsel %vm1602_vm14, %v1603_v14, %v14997_v53  ;;  %v8314_v44 = vsel %vm8312_vm8, %v1603_v14, %v14997_v53  ;;  %v1666_v19 = vsel %vm1664_vm15, %v1665_v21, %v17412_v35  ;;  %v4918_v39 = vsel %vm4833_vm10, %v4917_v61, %v17369_v38 }
 0x2f9   : > { %v1601_v51 = vsel %vm1599_vm13, %v14995_v3, %v1600_v28  ;;  %v8311_v63 = vsel %vm8309_vm6, %v14995_v3, %v1600_v28  ;;  %v4906_v33 = vor.u32 %v4905_v7, %v4904_v50  ;;  %v4909_v40 = vshll.u32 %v4908_v13, 23 }
 0x2fa   : > { %v1605_v22 = vsel %vm1598_vm12, %v1601_v51, %v1604_v59  ;;  %v8315_v45 = vsel %vm8308_vm7, %v8311_v63, %v8314_v44  ;;  %vm4946_vm0 = vcmp.gt.s32.totalorder %v4945_v41, 0  ;;  %vm17456_vm1 = vcmp.le.f32.partialorder %v4831_v15, 0.7853982 }
 0x2fb   : > { %v1606_v46 = vsel %vm1595_vm9, nan, %v1605_v22  ;;  %v8316_v23 = vsel %vm1595_vm9, nan, %v8315_v45  ;;  %v4910_v16 = vor.u32 4788187, %v4909_v40  ;;  %v1667_v24 = vadd.s32 %v1666_v19, %v1662_v30 }
 0x2fc   : > { %7232 = vst [vmem:[%s15815_s20 + $0x48] sm:$0xff] %v1606_v46  ;;  %13888 = vst [vmem:[%s15815_s20 + $0x248] sm:$0xff] %v8316_v23  ;;  %v4942_v27 = vand.u32 8388607, %v4935_v18  ;;  %v4947_v29 = vsel %vm4946_vm0, %v4945_v41, 0  ;;  %v4913_v9 = vcvt.s32.f32 %v4906_v33  ;;  %v1714_v36 = vand.u32 2139095040, %v17443_v31 }
 0x2fd   : > { %v4911_v56 = vand.u32 2147483647, %v4910_v16  ;;  %v4949_v62 = vand.u32 31, %v4947_v29  ;;  %v4920_v38 = vsel %vm17456_vm1, 0, %v4918_v39  ;;  %v1668_v48 = vadd.s32 536870912, %v1667_v24 }
 0x2fe   : > { %v4924_v49 = vadd.s32 3, %v4920_v38  ;;  %v4943_v26 = vor.u32 8388608, %v4942_v27  ;;  %v1715_v12 = vshrl.u32 %v1714_v36, 23  ;;  %v17468_v35 = vshrl.u32 %v4947_v29, 5 }
 0x2ff   : > { %v4914_v60 = vmul.f32 %v4913_v9, %v4911_v56  ;;  %v4950_v37 = vsub.s32 32, %v4949_v62  ;;  %v17465_v15 = vshrl.u32 %v1668_v48, 30  ;;  %v4952_v53 = vshll.u32 %v15257_v0, %v4949_v62 }
 0x300   : > { %v4955_v14 = vshll.u32 %v15258_v4, %v4949_v62  ;;  %v4958_v61 = vshll.u32 %v15259_v6, %v4949_v62  ;;  %v4961_v30 = vshll.u32 %v15260_v8, %v4949_v62  ;;  %v4964_v21 = vshll.u32 %v15261_v10, %v4949_v62 }
 0x301   : > { %v4915_v5 = vxor.u32 2147483648, %v4914_v60  ;;  %v1670_v42 = vshll.u32 %v17465_v15, 30  ;;  %v4953_v32 = vshrl.u32 %v15258_v4, %v4950_v37  ;;  %v4956_v34 = vshrl.u32 %v15259_v6, %v4950_v37 }
 0x302   : > { %v4959_v3 = vshrl.u32 %v15260_v8, %v4950_v37  ;;  %v4962_v58 = vshrl.u32 %v15261_v10, %v4950_v37  ;;  %v4965_v54 = vshrl.u32 %v15262_v17, %v4950_v37  ;;  %v17488_v41 = vand.u32 3, %v4924_v49 }
 0x303   : > { %v4916_v55 = vsel %vm4833_vm10, %v4915_v5, %v4914_v60  ;;  %v17480_v57 = vsub.s32 %v1667_v24, %v1670_v42  ;;  %v4954_v50 = vor.u32 %v4953_v32, %v4952_v53  ;;  %v4957_v7 = vor.u32 %v4956_v34, %v4955_v14 }
 0x304   : > { %v4919_v11 = vsel %vm17456_vm1, %v17197_v25, %v4916_v55  ;;  %v4960_v13 = vor.u32 %v4959_v3, %v4958_v61  ;;  %v4963_v59 = vor.u32 %v4962_v58, %v4961_v30  ;;  %v4966_v44 = vor.u32 %v4965_v54, %v4964_v21 }
 0x305   : > { %14998 = vcosq.f32 %v4919_v11  ;;  %v1673_v28 = vsub.s32 0, %v17480_v57  ;;  %v17490_v51 = vand.u32 3, %v4920_v38  ;;  %v1711_v33 = vand.u32 2147483647, %v17443_v31 }
 0x306   : > { %15000 = vsinq.f32 %v4919_v11  ;;  %v4951_v40 = vshrl.u32 %v15257_v0, %v4950_v37  ;;  %vm4967_vm3 = vcmp.lt.s32.totalorder %v17468_v35, 1  ;;  %v17496_v22 = vshll.u32 %v4943_v26, 8 }
 0x307   : > { %v14121_v63 = vmin.u32 %v1673_v28, %v17480_v57  ;;  %v14124_v45 = vadd.s32 4294967169, %v1715_v12  ;;  %vm4969_vm4 = vcmp.lt.s32.totalorder %v17468_v35, 3  ;;  %vm4970_vm5 = vcmp.lt.s32.totalorder %v17468_v35, 4 }
 0x308   : > { %v4975_v46 = vsel %vm4967_vm3, %v4954_v50, %v4957_v7  ;;  %v4972_v23 = vsel %vm4970_vm5, %v4960_v13, 2102212464  ;;  %v4976_v16 = vsel %vm4970_vm5, %v4963_v59, 920167782  ;;  %v4979_v39 = vsel %vm4967_vm3, %v4957_v7, %v4960_v13 }
 0x309   : > { %v1675_v19 = vclz %v14121_v63  ;;  %v4980_v2 = vsel %vm4970_vm5, %v4966_v44, 1326507024  ;;  %vm11608_vm2 = vcmp.eq.s32.totalorder %v17490_v51, 2  ;;  %vm4968_vm6 = vcmp.lt.s32.totalorder %v17468_v35, 2 }
 0x30a   : > { %v4977_v27 = vsel %vm4969_vm4, %v4960_v13, %v4976_v16  ;;  %v4981_v29 = vsel %vm4969_vm4, %v4963_v59, %v4980_v2  ;;  %vm11605_vm7 = vcmp.eq.s32.totalorder %v17490_v51, 0  ;;  %v4971_v56 = vsel %vm4967_vm3, %v4951_v40, %v4954_v50 }
 0x30b   : > { %v14122_v24 = vadd.s32 4294967294, %v1675_v19  ;;  %v4978_v9 = vsel %vm4968_vm6, %v4975_v46, %v4977_v27  ;;  %v4982_v62 = vsel %vm4968_vm6, %v4979_v39, %v4981_v29  ;;  %v1721_v36 = vadd.s32 1, %v14124_v45 }
 0x30c   : > { %vm11604_vm8 = vcmp.lt.s32.totalorder %v17490_v51, 2  ;;  %vm1609_vm9 = vcmp.lt.s32.totalorder %v17278_v43, 0  ;;  %v4973_v38 = vsel %vm4969_vm4, %v4957_v7, %v4972_v23  ;;  %vm4923_vm11 = vweird.f32 %v17197_v25 }
 0x30d   : > { %vm14123_vm10 = vcmp.lt.s32.totalorder %v14122_v24, 0  ;;  %v17522_v48 = vmul.u32.u64.low %v17496_v22, %v4982_v62  ;;  %v17523_v60 = vmul.u32.u64.high %v17496_v22, %v4982_v62, %v17522_v48  ;;  %vm1722_vm12 = vcmp.gt.s32.totalorder %v1721_v36, 0 }
 0x30e   : > { %v1678_v37 = vsel %vm14123_vm10, 0, %v14122_v24  ;;  %v17527_v5 = vmul.u32.u64.low %v17496_v22, %v4978_v9  ;;  %v17528_v49 = vmul.u32.u64.high %v17496_v22, %v4978_v9, %v17527_v5  ;;  %v1663_v26 = vadd.s32 %v17411_v1, %v17417_v47 }
 0x30f   : > { %v1679_v12 = vsub.s32 32, %v1678_v37  ;;  %v1683_v42 = vsub.s32 4294967266, %v1678_v37  ;;  %v1723_v32 = vsel %vm1722_vm12, %v1721_v36, 0  ;;  %vm4926_vm13 = vcmp.lt.s32.totalorder %v17488_v41, 2 }
 0x310   : > { %vm4927_vm14 = vcmp.eq.s32.totalorder %v17488_v41, 0  ;;  %v4974_v34 = vsel %vm4968_vm6, %v4971_v56, %v4973_v38  ;;  %v1725_v55 = vand.u32 31, %v1723_v32  ;;  %v1680_v58 = vshll.u32 %v17480_v57, %v1678_v37 }
 0x311   : > { %v1681_v54 = vshrl.u32 %v1663_v26, %v1679_v12  ;;  %v1684_v11 = vadd.s32 127, %v1683_v42  ;;  %vm4992_vm15 = vc.u32 %v17523_v60, %v17527_v5  ;;  %vm4930_vm0 = vcmp.eq.s32.totalorder %v17488_v41, 2 }
 0x312   : > { %v14999_v3 = vpop.eup %14998  ;;  %v1693_v53 = vsub.s32 4, %v17465_v15  ;;  %v4993_v14 = vadd.s32 1, %v17528_v49  ;;  %vm17545_vm1 = vcmp.le.f32.partialorder %v1607_v52, 0.7853982  ;;  %v4990_v21 = vmul.u32 %v17496_v22, %v4974_v34 }
 0x313   : > { %v15001_v1 = vpop.eup %15000  ;;  %v4931_v47 = vxor.u32 2147483648, %v14999_v3  ;;  %v1682_v57 = vor.u32 %v1681_v54, %v1680_v58  ;;  %v1685_v30 = vshll.u32 %v1684_v11, 23  ;;  %v1726_v13 = vsub.s32 32, %v1725_v55 }
 0x314   : > { %v4928_v61 = vxor.u32 2147483648, %v15001_v1  ;;  %v4994_v7 = vsel %vm4992_vm15, %v4993_v14, %v17528_v49  ;;  %v1718_v63 = vand.u32 8388607, %v1711_v33  ;;  %v1694_v45 = vsel %vm1609_vm9, %v1693_v53, %v17465_v15 }
 0x315   : > { %v4932_v28 = vsel %vm4930_vm0, %v4931_v47, %v15001_v1  ;;  %v11610_v50 = vsel %vm11608_vm2, %v4931_v47, %v15001_v1  ;;  %v1686_v44 = vor.u32 4788187, %v1685_v30  ;;  %v4995_v19 = vadd.s32 %v4994_v7, %v4990_v21 }
 0x316   : > { %v4929_v59 = vsel %vm4927_vm14, %v14999_v3, %v4928_v61  ;;  %v11607_v52 = vsel %vm11605_vm7, %v14999_v3, %v4928_v61  ;;  %v1689_v39 = vcvt.s32.f32 %v1682_v57  ;;  %v17572_v2 = vshrl.u32 %v1723_v32, 5 }
 0x317   : > { %v4933_v40 = vsel %vm4926_vm13, %v4929_v59, %v4932_v28  ;;  %v11611_v22 = vsel %vm11604_vm8, %v11607_v52, %v11610_v50  ;;  %v1687_v16 = vand.u32 2147483647, %v1686_v44  ;;  %v4996_v41 = vadd.s32 536870912, %v4995_v19  ;;  %v17614_v59 = vpop.f32.mrf.mxu1 }
 0x318   : > { %v4934_v46 = vsel %vm4923_vm11, nan, %v4933_v40  ;;  %v11612_v23 = vsel %vm4923_vm11, nan, %v11611_v22  ;;  %v1729_v51 = vshrl.u32 %v15258_v4, %v1726_v13  ;;  %v1732_v24 = vshrl.u32 %v15259_v6, %v1726_v13 }
 0x319   : > { %7264 = vst [vmem:[%s15815_s20 + $0x148] sm:$0xff] %v4934_v46  ;;  %13920 = vst [vmem:[%s15815_s20 + $0x348] sm:$0xff] %v11612_v23  ;;  %v1690_v27 = vmul.f32 %v1689_v39, %v1687_v16  ;;  %v1735_v15 = vshrl.u32 %v15260_v8, %v1726_v13  ;;  %v1737_v29 = vshll.u32 %v15260_v8, %v1725_v55  ;;  %v4997_v25 = vshrl.u32 %v4996_v41, 30 }
 0x31a   : > { %v1738_v56 = vshrl.u32 %v15261_v10, %v1726_v13  ;;  %v1728_v9 = vshll.u32 %v15257_v0, %v1725_v55  ;;  %v1731_v62 = vshll.u32 %v15258_v4, %v1725_v55  ;;  %v1741_v36 = vshrl.u32 %v15262_v17, %v1726_v13 }
 0x31b   : > { %v1691_v38 = vxor.u32 2147483648, %v1690_v27  ;;  %v1734_v48 = vshll.u32 %v15259_v6, %v1725_v55  ;;  %v1740_v49 = vshll.u32 %v15261_v10, %v1725_v55  ;;  %v1696_v26 = vsel %vm17545_vm1, 0, %v1694_v45 }
 0x31c   : > { %v1739_v37 = vor.u32 %v1738_v56, %v1737_v29  ;;  %v4998_v12 = vshll.u32 %v4997_v25, 30  ;;  %v1730_v42 = vor.u32 %v1729_v51, %v1728_v9  ;;  %v1733_v32 = vor.u32 %v1732_v24, %v1731_v62 }
 0x31d   : > { %v1692_v34 = vsel %vm1609_vm9, %v1691_v38, %v1690_v27  ;;  %v1736_v3 = vor.u32 %v1735_v15, %v1734_v48  ;;  %v1742_v58 = vor.u32 %v1741_v36, %v1740_v49  ;;  %v1719_v1 = vor.u32 8388608, %v1718_v63 }
 0x31e   : > { %v1695_v54 = vsel %vm17545_vm1, %v17278_v43, %v1692_v34  ;;  %v17591_v11 = vsub.s32 %v4995_v19, %v4998_v12  ;;  %vm1746_vm3 = vcmp.lt.s32.totalorder %v17572_v2, 4  ;;  %v1700_v55 = vadd.s32 3, %v1696_v26 }
 0x31f   : > { %15002 = vcosq.f32 %v1695_v54  ;;  %vm1743_vm4 = vcmp.lt.s32.totalorder %v17572_v2, 1  ;;  %v1752_v47 = vsel %vm1746_vm3, %v1739_v37, 920167782  ;;  %vm1745_vm5 = vcmp.lt.s32.totalorder %v17572_v2, 3 }
 0x320   : > { %15004 = vsinq.f32 %v1695_v54  ;;  %v5001_v53 = vsub.s32 0, %v17591_v11  ;;  %v1751_v14 = vsel %vm1743_vm4, %v1730_v42, %v1733_v32  ;;  %v17599_v61 = vand.u32 3, %v1696_v26 }
 0x321   : > { %vm17603_vm2 = vcmp.le.f32.partialorder %v4935_v18, 0.7853982  ;;  %v1748_v57 = vsel %vm1746_vm3, %v1736_v3, 2102212464  ;;  %v1753_v30 = vsel %vm1745_vm5, %v1736_v3, %v1752_v47  ;;  %v1756_v21 = vsel %vm1746_vm3, %v1742_v58, 1326507024  ;;  %v17653_v58 = vpop.f32.mrf.mxu0 }
 0x322   : > { %v14249_v28 = vmin.u32 %v5001_v53, %v17591_v11  ;;  %v1727_v50 = vshrl.u32 %v15257_v0, %v1726_v13  ;;  %vm1744_vm6 = vcmp.lt.s32.totalorder %v17572_v2, 2  ;;  %v1755_v7 = vsel %vm1743_vm4, %v1733_v32, %v1736_v3 }
 0x323   : > { %v5021_v18 = vsub.s32 4, %v4997_v25  ;;  %v1754_v52 = vsel %vm1744_vm6, %v1751_v14, %v1753_v30  ;;  %v1757_v44 = vsel %vm1745_vm5, %v1739_v37, %v1756_v21  ;;  %v1759_v63 = vshll.u32 %v1719_v1, 8 }
 0x324   : > { %v1701_v40 = vand.u32 3, %v1700_v55  ;;  %v5003_v22 = vclz %v14249_v28  ;;  %v1747_v13 = vsel %vm1743_vm4, %v1727_v50, %v1730_v42  ;;  %v1749_v45 = vsel %vm1745_vm5, %v1733_v32, %v1748_v57 }
 0x325   : > { %v1758_v19 = vsel %vm1744_vm6, %v1755_v7, %v1757_v44  ;;  %v17626_v46 = vmul.u32.u64.low %v1759_v63, %v1754_v52  ;;  %v17627_v23 = vmul.u32.u64.high %v1759_v63, %v1754_v52, %v17626_v46  ;;  %v5042_v16 = vand.u32 2139095040, %v17614_v59 }
 0x326   : > { %vm4937_vm7 = vcmp.lt.s32.totalorder %v17383_v20, 0  ;;  %v14250_v39 = vadd.s32 4294967294, %v5003_v22  ;;  %v17632_v41 = vmul.u32.u64.low %v1759_v63, %v1758_v19  ;;  %v17633_v51 = vmul.u32.u64.high %v1759_v63, %v1758_v19, %v17632_v41 }
 0x327   : > { %vm8412_vm8 = vcmp.eq.s32.totalorder %v17599_v61, 0  ;;  %v5022_v24 = vsel %vm4937_vm7, %v5021_v18, %v4997_v25  ;;  %v5039_v27 = vand.u32 2147483647, %v17614_v59  ;;  %v5043_v15 = vshrl.u32 %v5042_v16, 23 }
 0x328   : > { %vm1702_vm9 = vcmp.lt.s32.totalorder %v1701_v40, 2  ;;  %vm8411_vm10 = vcmp.lt.s32.totalorder %v17599_v61, 2  ;;  %vm8415_vm11 = vcmp.eq.s32.totalorder %v17599_v61, 2  ;;  %vm14251_vm12 = vcmp.lt.s32.totalorder %v14250_v39, 0 }
 0x329   : > { %v1750_v29 = vsel %vm1744_vm6, %v1747_v13, %v1749_v45  ;;  %vm1699_vm13 = vweird.f32 %v17278_v43  ;;  %vm1703_vm14 = vcmp.eq.s32.totalorder %v1701_v40, 0  ;;  %v5006_v56 = vsel %vm14251_vm12, 0, %v14250_v39 }
 0x32a   : > { %v1769_v9 = vadd.s32 1, %v17627_v23  ;;  %v14252_v62 = vadd.s32 4294967169, %v5043_v15  ;;  %v4991_v25 = vadd.s32 %v17527_v5, %v17523_v60  ;;  %v5007_v36 = vsub.s32 32, %v5006_v56 }
 0x32b   : > { %v5011_v38 = vsub.s32 4294967266, %v5006_v56  ;;  %v5024_v48 = vsel %vm17603_vm2, 0, %v5022_v24  ;;  %vm1706_vm15 = vcmp.eq.s32.totalorder %v1701_v40, 2  ;;  %v1766_v37 = vmul.u32 %v1759_v63, %v1750_v29 }
 0x32c   : > { %vm1768_vm0 = vc.u32 %v17633_v51, %v17626_v46  ;;  %v5049_v2 = vadd.s32 1, %v14252_v62  ;;  %v15003_v49 = vpop.eup %15002  ;;  %v5008_v26 = vshll.u32 %v17591_v11, %v5006_v56  ;;  %v5009_v12 = vshrl.u32 %v4991_v25, %v5007_v36 }
 0x32d   : > { %v5012_v42 = vadd.s32 127, %v5011_v38  ;;  %v1770_v32 = vsel %vm1768_vm0, %v1769_v9, %v17627_v23  ;;  %v15005_v34 = vpop.eup %15004  ;;  %v1707_v60 = vxor.u32 2147483648, %v15003_v49  ;;  %v5028_v5 = vadd.s32 3, %v5024_v48 }
 0x32e   : > { %v1771_v3 = vadd.s32 %v1770_v32, %v1766_v37  ;;  %vm5050_vm1 = vcmp.gt.s32.totalorder %v5049_v2, 0  ;;  %v1704_v54 = vxor.u32 2147483648, %v15005_v34  ;;  %v5010_v1 = vor.u32 %v5009_v12, %v5008_v26 }
 0x32f   : > { %v5013_v55 = vshll.u32 %v5012_v42, 23  ;;  %v5051_v47 = vsel %vm5050_vm1, %v5049_v2, 0  ;;  %v1708_v53 = vsel %vm1706_vm15, %v1707_v60, %v15005_v34  ;;  %v8417_v11 = vsel %vm8415_vm11, %v1707_v60, %v15005_v34 }
 0x330   : > { %v1772_v14 = vadd.s32 536870912, %v1771_v3  ;;  %v5046_v57 = vand.u32 8388607, %v5039_v27  ;;  %v1705_v30 = vsel %vm1703_vm14, %v15003_v49, %v1704_v54  ;;  %v8414_v21 = vsel %vm8412_vm8, %v15003_v49, %v1704_v54 }
 0x331   : > { %v5014_v28 = vor.u32 4788187, %v5013_v55  ;;  %v1818_v50 = vand.u32 2139095040, %v17653_v58  ;;  %v1709_v7 = vsel %vm1702_vm9, %v1705_v30, %v1708_v53  ;;  %v8418_v18 = vsel %vm8411_vm10, %v8414_v21, %v8417_v11 }
 0x332   : > { %v17667_v52 = vshrl.u32 %v1772_v14, 30  ;;  %v5053_v44 = vand.u32 31, %v5051_v47  ;;  %v1710_v63 = vsel %vm1699_vm13, nan, %v1709_v7  ;;  %v8419_v22 = vsel %vm1699_vm13, nan, %v8418_v18 }
 0x333   : > { %v5015_v13 = vand.u32 2147483647, %v5014_v28  ;;  %v5017_v45 = vcvt.s32.f32 %v5010_v1  ;;  %7233 = vst [vmem:[%s15815_s20 + $0x50] sm:$0xff] %v1710_v63  ;;  %13889 = vst [vmem:[%s15815_s20 + $0x250] sm:$0xff] %v8419_v22  ;;  %v17676_v16 = vand.u32 3, %v5024_v48  ;;  %v17678_v61 = vand.u32 3, %v5028_v5 }
 0x334   : > { %v1774_v19 = vshll.u32 %v17667_v52, 30  ;;  %v5054_v40 = vsub.s32 32, %v5053_v44  ;;  %v5047_v41 = vor.u32 8388608, %v5046_v57  ;;  %v1819_v56 = vshrl.u32 %v1818_v50, 23 }
 0x335   : > { %v5018_v23 = vmul.f32 %v5017_v45, %v5015_v13  ;;  %v5052_v62 = vshrl.u32 %v5051_v47, 5  ;;  %v5056_v25 = vshll.u32 %v15257_v0, %v5053_v44  ;;  %v5059_v36 = vshll.u32 %v15258_v4, %v5053_v44 }
 0x336   : > { %v17680_v39 = vsub.s32 %v1771_v3, %v1774_v19  ;;  %v5057_v24 = vshrl.u32 %v15258_v4, %v5054_v40  ;;  %v5060_v43 = vshrl.u32 %v15259_v6, %v5054_v40  ;;  %v5063_v29 = vshrl.u32 %v15260_v8, %v5054_v40 }
 0x337   : > { %v5019_v15 = vxor.u32 2147483648, %v5018_v23  ;;  %v5062_v48 = vshll.u32 %v15259_v6, %v5053_v44  ;;  %v5065_v37 = vshll.u32 %v15260_v8, %v5053_v44  ;;  %v5066_v2 = vshrl.u32 %v15261_v10, %v5054_v40 }
 0x338   : > { %v1777_v9 = vsub.s32 0, %v17680_v39  ;;  %v1767_v26 = vadd.s32 %v17626_v46, %v17633_v51  ;;  %v5058_v42 = vor.u32 %v5057_v24, %v5056_v25  ;;  %v5061_v32 = vor.u32 %v5060_v43, %v5059_v36 }
 0x339   : > { %v5020_v38 = vsel %vm4937_vm7, %v5019_v15, %v5018_v23  ;;  %v5064_v34 = vor.u32 %v5063_v29, %v5062_v48  ;;  %v5067_v60 = vor.u32 %v5066_v2, %v5065_v37  ;;  %vm1713_vm3 = vcmp.lt.s32.totalorder %v17443_v31, 0 }
 0x33a   : > { %v5023_v49 = vsel %vm17603_vm2, %v17383_v20, %v5020_v38  ;;  %v14125_v12 = vmin.u32 %v1777_v9, %v17680_v39  ;;  %v17700_v3 = vshll.u32 %v5047_v41, 8  ;;  %v14128_v54 = vadd.s32 4294967169, %v1819_v56 }
 0x33b   : > { %15006 = vcosq.f32 %v5023_v49  ;;  %v1797_v35 = vsub.s32 4, %v17667_v52  ;;  %v5068_v1 = vshll.u32 %v15261_v10, %v5053_v44  ;;  %v5069_v46 = vshrl.u32 %v15262_v17, %v5054_v40 }
 0x33c   : > { %15008 = vsinq.f32 %v5023_v49  ;;  %v1779_v5 = vclz %v14125_v12  ;;  %vm5071_vm4 = vcmp.lt.s32.totalorder %v5052_v62, 1  ;;  %v5055_v55 = vshrl.u32 %v15257_v0, %v5054_v40 }
 0x33d   : > { %vm5073_vm5 = vcmp.lt.s32.totalorder %v5052_v62, 3  ;;  %vm5074_vm2 = vcmp.lt.s32.totalorder %v5052_v62, 4  ;;  %vm17708_vm6 = vcmp.le.f32.partialorder %v1711_v33, 0.7853982  ;;  %v5070_v53 = vor.u32 %v5069_v46, %v5068_v1 }
 0x33e   : > { %v14126_v51 = vadd.s32 4294967294, %v1779_v5  ;;  %v5076_v11 = vsel %vm5074_vm2, %v5064_v34, 2102212464  ;;  %v5079_v14 = vsel %vm5071_vm4, %v5058_v42, %v5061_v32  ;;  %v5080_v57 = vsel %vm5074_vm2, %v5067_v60, 920167782  ;;  %v17748_v5 = vpop.f32.mrf.mxu1 }
 0x33f   : > { %vm5072_vm8 = vcmp.lt.s32.totalorder %v5052_v62, 2  ;;  %v5081_v30 = vsel %vm5073_vm5, %v5064_v34, %v5080_v57  ;;  %v5083_v21 = vsel %vm5071_vm4, %v5061_v32, %v5064_v34  ;;  %v5075_v50 = vsel %vm5071_vm4, %v5055_v55, %v5058_v42 }
 0x340   : > { %vm14127_vm7 = vcmp.lt.s32.totalorder %v14126_v51, 0  ;;  %v5082_v7 = vsel %vm5072_vm8, %v5079_v14, %v5081_v30  ;;  %v5084_v18 = vsel %vm5074_vm2, %v5070_v53, 1326507024  ;;  %v5077_v33 = vsel %vm5073_vm5, %v5061_v32, %v5076_v11 }
 0x341   : > { %v1782_v28 = vsel %vm14127_vm7, 0, %v14126_v51  ;;  %v5085_v22 = vsel %vm5073_vm5, %v5067_v60, %v5084_v18  ;;  %vm11708_vm9 = vcmp.eq.s32.totalorder %v17676_v16, 0  ;;  %vm11707_vm10 = vcmp.lt.s32.totalorder %v17676_v16, 2 }
 0x342   : > { %v1783_v44 = vsub.s32 32, %v1782_v28  ;;  %v1787_v63 = vsub.s32 4294967266, %v1782_v28  ;;  %v1784_v13 = vshll.u32 %v17680_v39, %v1782_v28  ;;  %v5086_v45 = vsel %vm5072_vm8, %v5083_v21, %v5085_v22 }
 0x343   : > { %v17720_v19 = vmul.u32.u64.low %v17700_v3, %v5082_v7  ;;  %v17721_v40 = vmul.u32.u64.high %v17700_v3, %v5082_v7, %v17720_v19  ;;  %v17726_v24 = vmul.u32.u64.low %v17700_v3, %v5086_v45  ;;  %v17727_v15 = vmul.u32.u64.high %v17700_v3, %v5086_v45, %v17726_v24 }
 0x344   : > { %v1785_v23 = vshrl.u32 %v1767_v26, %v1783_v44  ;;  %v1788_v41 = vadd.s32 127, %v1787_v63  ;;  %vm5027_vm11 = vweird.f32 %v17383_v20  ;;  %v1798_v39 = vsel %vm1713_vm3, %v1797_v35, %v17667_v52 }
 0x345   : > { %v5078_v43 = vsel %vm5072_vm8, %v5075_v50, %v5077_v33  ;;  %v1815_v29 = vand.u32 2147483647, %v17653_v58  ;;  %v1825_v56 = vadd.s32 1, %v14128_v54  ;;  %vm5030_vm12 = vcmp.lt.s32.totalorder %v17678_v61, 2 }
 0x346   : > { %vm11711_vm13 = vcmp.eq.s32.totalorder %v17676_v16, 2  ;;  %v1786_v9 = vor.u32 %v1785_v23, %v1784_v13  ;;  %v1789_v25 = vshll.u32 %v1788_v41, 23  ;;  %vm5031_vm14 = vcmp.eq.s32.totalorder %v17678_v61, 0 }
 0x347   : > { %vm5034_vm15 = vcmp.eq.s32.totalorder %v17678_v61, 2  ;;  %v5097_v36 = vadd.s32 1, %v17721_v40  ;;  %vm1826_vm0 = vcmp.gt.s32.totalorder %v1825_v56, 0  ;;  %v1800_v62 = vsel %vm17708_vm6, 0, %v1798_v39 }
 0x348   : > { %v15007_v38 = vpop.eup %15006  ;;  %v1790_v52 = vor.u32 4788187, %v1789_v25  ;;  %v5094_v48 = vmul.u32 %v17700_v3, %v5078_v43  ;;  %vm5096_vm1 = vc.u32 %v17727_v15, %v17720_v19  ;;  %v1822_v26 = vand.u32 8388607, %v1815_v29 }
 0x349   : > { %v15009_v37 = vpop.eup %15008  ;;  %v5035_v2 = vxor.u32 2147483648, %v15007_v38  ;;  %v5098_v49 = vsel %vm5096_vm1, %v5097_v36, %v17721_v40  ;;  %v1827_v12 = vsel %vm1826_vm0, %v1825_v56, 0  ;;  %v1793_v34 = vcvt.s32.f32 %v1786_v9 }
 0x34a   : > { %v5032_v42 = vxor.u32 2147483648, %v15009_v37  ;;  %v1791_v32 = vand.u32 2147483647, %v1790_v52  ;;  %v5099_v60 = vadd.s32 %v5098_v49, %v5094_v48  ;;  %v1804_v35 = vadd.s32 3, %v1800_v62 }
 0x34b   : > { %v5036_v3 = vsel %vm5034_vm15, %v5035_v2, %v15009_v37  ;;  %v11713_v54 = vsel %vm11711_vm13, %v5035_v2, %v15009_v37  ;;  %v1829_v1 = vand.u32 31, %v1827_v12  ;;  %v5146_v30 = vand.u32 2139095040, %v17748_v5 }
 0x34c   : > { %v5033_v46 = vsel %vm5031_vm14, %v15007_v38, %v5032_v42  ;;  %v11710_v51 = vsel %vm11708_vm9, %v15007_v38, %v5032_v42  ;;  %v1794_v55 = vmul.f32 %v1793_v34, %v1791_v32  ;;  %v5100_v53 = vadd.s32 536870912, %v5099_v60 }
 0x34d   : > { %v5037_v11 = vsel %vm5030_vm12, %v5033_v46, %v5036_v3  ;;  %v11714_v14 = vsel %vm11707_vm10, %v11710_v51, %v11713_v54  ;;  %v1830_v57 = vsub.s32 32, %v1829_v1  ;;  %v17769_v18 = vand.u32 3, %v1800_v62 }
 0x34e   : > { %v5038_v21 = vsel %vm5027_vm11, nan, %v5037_v11  ;;  %v11715_v28 = vsel %vm5027_vm11, nan, %v11714_v14  ;;  %v1795_v50 = vxor.u32 2147483648, %v1794_v55  ;;  %v5101_v7 = vshrl.u32 %v5100_v53, 30 }
 0x34f   : > { %7265 = vst [vmem:[%s15815_s20 + $0x150] sm:$0xff] %v5038_v21  ;;  %13921 = vst [vmem:[%s15815_s20 + $0x350] sm:$0xff] %v11715_v28  ;;  %v17773_v16 = vand.u32 3, %v1804_v35  ;;  %v1833_v63 = vshrl.u32 %v15258_v4, %v1830_v57  ;;  %v1823_v20 = vor.u32 8388608, %v1822_v26  ;;  %v1836_v22 = vshrl.u32 %v15259_v6, %v1830_v57 }
 0x350   : > { %v1796_v61 = vsel %vm1713_vm3, %v1795_v50, %v1794_v55  ;;  %v5102_v44 = vshll.u32 %v5101_v7, 30  ;;  %v5147_v13 = vshrl.u32 %v5146_v30, 23  ;;  %v1832_v40 = vshll.u32 %v15257_v0, %v1829_v1 }
 0x351   : > { %v1799_v33 = vsel %vm17708_vm6, %v17443_v31, %v1796_v61  ;;  %v1839_v23 = vshrl.u32 %v15260_v8, %v1830_v57  ;;  %v1835_v41 = vshll.u32 %v15258_v4, %v1829_v1  ;;  %v1841_v24 = vshll.u32 %v15260_v8, %v1829_v1 }
 0x352   : > { %15010 = vcosq.f32 %v1799_v33  ;;  %v17780_v45 = vsub.s32 %v5099_v60, %v5102_v44  ;;  %v1842_v39 = vshrl.u32 %v15261_v10, %v1830_v57  ;;  %v1828_v43 = vshrl.u32 %v1827_v12, 5 }
 0x353   : > { %15012 = vsinq.f32 %v1799_v33  ;;  %v1834_v56 = vor.u32 %v1833_v63, %v1832_v40  ;;  %v1838_v9 = vshll.u32 %v15259_v6, %v1829_v1  ;;  %v1837_v25 = vor.u32 %v1836_v22, %v1835_v41 }
 0x354   : > { %v5105_v47 = vsub.s32 0, %v17780_v45  ;;  %v1843_v36 = vor.u32 %v1842_v39, %v1841_v24  ;;  %v1844_v38 = vshll.u32 %v15261_v10, %v1829_v1  ;;  %v1845_v52 = vshrl.u32 %v15262_v17, %v1830_v57 }
 0x355   : > { %vm17793_vm3 = vcmp.le.f32.partialorder %v5039_v27, 0.7853982  ;;  %v1840_v37 = vor.u32 %v1839_v23, %v1838_v9  ;;  %vm5041_vm4 = vcmp.lt.s32.totalorder %v17614_v59, 0  ;;  %v5125_v2 = vsub.s32 4, %v5101_v7 }
 0x356   : > { %v14253_v48 = vmin.u32 %v5105_v47, %v17780_v45  ;;  %v1846_v49 = vor.u32 %v1845_v52, %v1844_v38  ;;  %v17799_v26 = vshll.u32 %v1823_v20, 8  ;;  %vm1847_vm5 = vcmp.lt.s32.totalorder %v1828_v43, 1 }
 0x357   : > { %vm1850_vm2 = vcmp.lt.s32.totalorder %v1828_v43, 4  ;;  %v14256_v42 = vadd.s32 4294967169, %v5147_v13  ;;  %vm1810_vm6 = vcmp.eq.s32.totalorder %v17773_v16, 2  ;;  %vm8518_vm7 = vcmp.eq.s32.totalorder %v17769_v18, 2 }
 0x358   : > { %v5107_v12 = vclz %v14253_v48  ;;  %v1831_v27 = vshrl.u32 %v15257_v0, %v1830_v57  ;;  %vm1849_vm8 = vcmp.lt.s32.totalorder %v1828_v43, 3  ;;  %v1855_v32 = vsel %vm1847_vm5, %v1834_v56, %v1837_v25 }
 0x359   : > { %v1856_v34 = vsel %vm1850_vm2, %v1843_v36, 920167782  ;;  %vm1807_vm9 = vcmp.eq.s32.totalorder %v17773_v16, 0  ;;  %vm8515_vm10 = vcmp.eq.s32.totalorder %v17769_v18, 0  ;;  %vm1848_vm11 = vcmp.lt.s32.totalorder %v1828_v43, 2 }
 0x35a   : > { %v14254_v60 = vadd.s32 4294967294, %v5107_v12  ;;  %v1857_v3 = vsel %vm1849_vm8, %v1840_v37, %v1856_v34  ;;  %v1859_v54 = vsel %vm1847_vm5, %v1837_v25, %v1840_v37  ;;  %vm1806_vm12 = vcmp.lt.s32.totalorder %v17773_v16, 2 }
 0x35b   : > { %vm8514_vm13 = vcmp.lt.s32.totalorder %v17769_v18, 2  ;;  %v5126_v35 = vsel %vm5041_vm4, %v5125_v2, %v5101_v7  ;;  %v1852_v1 = vsel %vm1850_vm2, %v1840_v37, 2102212464  ;;  %v1858_v46 = vsel %vm1848_vm11, %v1855_v32, %v1857_v3 }
 0x35c   : > { %v1860_v51 = vsel %vm1850_vm2, %v1846_v49, 1326507024  ;;  %vm1803_vm14 = vweird.f32 %v17443_v31  ;;  %vm14255_vm15 = vcmp.lt.s32.totalorder %v14254_v60, 0  ;;  %v5095_v14 = vadd.s32 %v17720_v19, %v17727_v15 }
 0x35d   : > { %v1861_v55 = vsel %vm1849_vm8, %v1843_v36, %v1860_v51  ;;  %v17820_v53 = vmul.u32.u64.low %v17799_v26, %v1858_v46  ;;  %v17821_v11 = vmul.u32.u64.high %v17799_v26, %v1858_v46, %v17820_v53  ;;  %v5110_v57 = vsel %vm14255_vm15, 0, %v14254_v60 }
 0x35e   : > { %v1851_v30 = vsel %vm1847_vm5, %v1831_v27, %v1834_v56  ;;  %v1862_v21 = vsel %vm1848_vm11, %v1859_v54, %v1861_v55  ;;  %v5111_v28 = vsub.s32 32, %v5110_v57  ;;  %v5115_v50 = vsub.s32 4294967266, %v5110_v57 }
 0x35f   : > { %v1853_v7 = vsel %vm1849_vm8, %v1837_v25, %v1852_v1  ;;  %v5153_v61 = vadd.s32 1, %v14256_v42  ;;  %v15011_v44 = vpop.eup %15010  ;;  %v17831_v63 = vsel %vm17793_vm3, 0, %v5126_v35  ;;  %v5143_v19 = vand.u32 2147483647, %v17748_v5 }
 0x360   : > { %v17834_v33 = vmul.u32.u64.low %v17799_v26, %v1862_v21  ;;  %v17835_v20 = vmul.u32.u64.high %v17799_v26, %v1862_v21, %v17834_v33  ;;  %v15013_v15 = vpop.eup %15012  ;;  %v1811_v22 = vxor.u32 2147483648, %v15011_v44  ;;  %v5112_v13 = vshll.u32 %v17780_v45, %v5110_v57 }
 0x361   : > { %v5113_v40 = vshrl.u32 %v5095_v14, %v5111_v28  ;;  %v5116_v23 = vadd.s32 127, %v5115_v50  ;;  %v1808_v41 = vxor.u32 2147483648, %v15013_v15  ;;  %v1854_v24 = vsel %vm1848_vm11, %v1851_v30, %v1853_v7 }
 0x362   : > { %v1873_v39 = vadd.s32 1, %v17821_v11  ;;  %vm5154_vm0 = vcmp.gt.s32.totalorder %v5153_v61, 0  ;;  %v1812_v47 = vsel %vm1810_vm6, %v1811_v22, %v15013_v15  ;;  %v8520_v56 = vsel %vm8518_vm7, %v1811_v22, %v15013_v15 }
 0x363   : > { %v5114_v9 = vor.u32 %v5113_v40, %v5112_v13  ;;  %v5117_v25 = vshll.u32 %v5116_v23, 23  ;;  %v1809_v45 = vsel %vm1807_vm9, %v15011_v44, %v1808_v41  ;;  %v8517_v43 = vsel %vm8515_vm10, %v15011_v44, %v1808_v41 }
 0x364   : > { %vm1872_vm1 = vc.u32 %v17835_v20, %v17820_v53  ;;  %v5150_v36 = vand.u32 8388607, %v5143_v19  ;;  %v1813_v38 = vsel %vm1806_vm12, %v1809_v45, %v1812_v47  ;;  %v8521_v52 = vsel %vm8514_vm13, %v8517_v43, %v8520_v56 }
 0x365   : > { %v5118_v48 = vor.u32 4788187, %v5117_v25  ;;  %v1870_v37 = vmul.u32 %v17799_v26, %v1854_v24  ;;  %v1814_v2 = vsel %vm1803_vm14, nan, %v1813_v38  ;;  %v8522_v49 = vsel %vm1803_vm14, nan, %v8521_v52  ;;  %v17866_v26 = vpop.f32.mrf.mxu0 }
 0x366   : > { %v1874_v12 = vsel %vm1872_vm1, %v1873_v39, %v17821_v11  ;;  %v5155_v42 = vsel %vm5154_vm0, %v5153_v61, 0  ;;  %7234 = vst [vmem:[%s15815_s20 + $0x58] sm:$0xff] %v1814_v2  ;;  %13890 = vst [vmem:[%s15815_s20 + $0x258] sm:$0xff] %v8522_v49  ;;  %v5121_v27 = vcvt.s32.f32 %v5114_v9  ;;  %v5132_v54 = vadd.s32 3, %v17831_v63 }
 0x367   : > { %v5119_v16 = vand.u32 2147483647, %v5118_v48  ;;  %v1875_v32 = vadd.s32 %v1874_v12, %v1870_v37  ;;  %v5157_v18 = vand.u32 31, %v5155_v42  ;;  %v5151_v1 = vor.u32 8388608, %v5150_v36 }
 0x368   : > { %v17871_v46 = vshrl.u32 %v5155_v42, 5  ;;  %v1922_v14 = vand.u32 2139095040, %v17866_v26  ;;  %v17893_v24 = vand.u32 3, %v5132_v54  ;;  %v17896_v39 = vand.u32 3, %v17831_v63 }
 0x369   : > { %v5122_v34 = vmul.f32 %v5121_v27, %v5119_v16  ;;  %v1876_v60 = vadd.s32 536870912, %v1875_v32  ;;  %v5158_v3 = vsub.s32 32, %v5157_v18  ;;  %v5160_v21 = vshll.u32 %v15257_v0, %v5157_v18 }
 0x36a   : > { %v5163_v7 = vshll.u32 %v15258_v4, %v5157_v18  ;;  %v5169_v61 = vshll.u32 %v15260_v8, %v5157_v18  ;;  %v5166_v15 = vshll.u32 %v15259_v6, %v5157_v18  ;;  %v5172_v22 = vshll.u32 %v15261_v10, %v5157_v18 }
 0x36b   : > { %v5123_v35 = vxor.u32 2147483648, %v5122_v34  ;;  %v17869_v31 = vshrl.u32 %v1876_v60, 30  ;;  %v5161_v51 = vshrl.u32 %v15258_v4, %v5158_v3  ;;  %v5164_v55 = vshrl.u32 %v15259_v6, %v5158_v3 }
 0x36c   : > { %v5170_v11 = vshrl.u32 %v15261_v10, %v5158_v3  ;;  %v5167_v28 = vshrl.u32 %v15260_v8, %v5158_v3  ;;  %v5173_v44 = vshrl.u32 %v15262_v17, %v5158_v3  ;;  %v17901_v9 = vshll.u32 %v5151_v1, 8 }
 0x36d   : > { %v5124_v57 = vsel %vm5041_vm4, %v5123_v35, %v5122_v34  ;;  %v1878_v30 = vshll.u32 %v17869_v31, 30  ;;  %v5162_v13 = vor.u32 %v5161_v51, %v5160_v21  ;;  %v5165_v40 = vor.u32 %v5164_v55, %v5163_v7 }
 0x36e   : > { %v5127_v50 = vsel %vm17793_vm3, %v17614_v59, %v5124_v57  ;;  %v5171_v23 = vor.u32 %v5170_v11, %v5169_v61  ;;  %v5168_v41 = vor.u32 %v5167_v28, %v5166_v15  ;;  %v5174_v47 = vor.u32 %v5173_v44, %v5172_v22 }
 0x36f   : > { %15014 = vcosq.f32 %v5127_v50  ;;  %v17888_v33 = vsub.s32 %v1875_v32, %v1878_v30  ;;  %vm5175_vm3 = vcmp.lt.s32.totalorder %v17871_v46, 1  ;;  %vm5178_vm4 = vcmp.lt.s32.totalorder %v17871_v46, 4 }
 0x370   : > { %15016 = vsinq.f32 %v5127_v50  ;;  %v5159_v25 = vshrl.u32 %v15257_v0, %v5158_v3  ;;  %v5183_v45 = vsel %vm5175_vm3, %v5162_v13, %v5165_v40  ;;  %v5184_v43 = vsel %vm5178_vm4, %v5171_v23, 920167782 }
 0x371   : > { %v1881_v62 = vsub.s32 0, %v17888_v33  ;;  %v1923_v36 = vshrl.u32 %v1922_v14, 23  ;;  %vm1817_vm5 = vcmp.lt.s32.totalorder %v17653_v58, 0  ;;  %vm5176_vm2 = vcmp.lt.s32.totalorder %v17871_v46, 2 }
 0x372   : > { %vm5177_vm6 = vcmp.lt.s32.totalorder %v17871_v46, 3  ;;  %v5187_v38 = vsel %vm5175_vm3, %v5165_v40, %v5168_v41  ;;  %v5180_v52 = vsel %vm5178_vm4, %v5168_v41, 2102212464  ;;  %v5188_v37 = vsel %vm5178_vm4, %v5174_v47, 1326507024 }
 0x373   : > { %v14129_v56 = vmin.u32 %v1881_v62, %v17888_v33  ;;  %v5185_v48 = vsel %vm5177_vm6, %v5168_v41, %v5184_v43  ;;  %v14132_v2 = vadd.s32 4294967169, %v1923_v36  ;;  %vm11811_vm7 = vcmp.eq.s32.totalorder %v17896_v39, 0 }
 0x374   : > { %vm11814_vm8 = vcmp.eq.s32.totalorder %v17896_v39, 2  ;;  %v5186_v12 = vsel %vm5176_vm2, %v5183_v45, %v5185_v48  ;;  %v5189_v42 = vsel %vm5177_vm6, %v5171_v23, %v5188_v37  ;;  %vm5134_vm9 = vcmp.lt.s32.totalorder %v17893_v24, 2  ;;  %v17974_v45 = vpop.f32.mrf.mxu1 }
 0x375   : > { %v1883_v63 = vclz %v14129_v56  ;;  %vm11810_vm10 = vcmp.lt.s32.totalorder %v17896_v39, 2  ;;  %vm17923_vm11 = vcmp.le.f32.partialorder %v1815_v29, 0.7853982  ;;  %v5179_v27 = vsel %vm5175_vm3, %v5159_v25, %v5162_v13 }
 0x376   : > { %v5190_v32 = vsel %vm5176_vm2, %v5187_v38, %v5189_v42  ;;  %v17932_v18 = vmul.u32.u64.low %v17901_v9, %v5186_v12  ;;  %v17933_v34 = vmul.u32.u64.high %v17901_v9, %v5186_v12, %v17932_v18  ;;  %vm5131_vm12 = vweird.f32 %v17614_v59 }
 0x377   : > { %v14130_v49 = vadd.s32 4294967294, %v1883_v63  ;;  %v5181_v29 = vsel %vm5177_vm6, %v5165_v40, %v5180_v52  ;;  %v17940_v60 = vmul.u32.u64.low %v17901_v9, %v5190_v32  ;;  %v17941_v3 = vmul.u32.u64.high %v17901_v9, %v5190_v32, %v17940_v60 }
 0x378   : > { %vm5135_vm14 = vcmp.eq.s32.totalorder %v17893_v24, 0  ;;  %v1901_v35 = vsub.s32 4, %v17869_v31  ;;  %v1929_v1 = vadd.s32 1, %v14132_v2  ;;  %vm5138_vm15 = vcmp.eq.s32.totalorder %v17893_v24, 2 }
 0x379   : > { %vm14131_vm13 = vcmp.lt.s32.totalorder %v14130_v49, 0  ;;  %v1871_v51 = vadd.s32 %v17820_v53, %v17835_v20  ;;  %v5182_v57 = vsel %vm5176_vm2, %v5179_v27, %v5181_v29  ;;  %v5201_v30 = vadd.s32 1, %v17933_v34 }
 0x37a   : > { %v1886_v54 = vsel %vm14131_vm13, 0, %v14130_v49  ;;  %v1919_v21 = vand.u32 2147483647, %v17866_v26  ;;  %vm1930_vm0 = vcmp.gt.s32.totalorder %v1929_v1, 0  ;;  %v1902_v53 = vsel %vm1817_vm5, %v1901_v35, %v17869_v31 }
 0x37b   : > { %v1887_v55 = vsub.s32 32, %v1886_v54  ;;  %v1891_v11 = vsub.s32 4294967266, %v1886_v54  ;;  %v1888_v7 = vshll.u32 %v17888_v33, %v1886_v54  ;;  %vm5200_vm1 = vc.u32 %v17941_v3, %v17932_v18 }
 0x37c   : > { %v15015_v14 = vpop.eup %15014  ;;  %v1931_v20 = vsel %vm1930_vm0, %v1929_v1, 0  ;;  %v5198_v23 = vmul.u32 %v17901_v9, %v5182_v57  ;;  %v5202_v62 = vsel %vm5200_vm1, %v5201_v30, %v17933_v34  ;;  %v1904_v25 = vsel %vm17923_vm11, 0, %v1902_v53 }
 0x37d   : > { %v15017_v28 = vpop.eup %15016  ;;  %v5139_v50 = vxor.u32 2147483648, %v15015_v14  ;;  %v1889_v61 = vshrl.u32 %v1871_v51, %v1887_v55  ;;  %v1892_v44 = vadd.s32 127, %v1891_v11  ;;  %v1933_v63 = vand.u32 31, %v1931_v20 }
 0x37e   : > { %v5136_v15 = vxor.u32 2147483648, %v15017_v28  ;;  %v5203_v36 = vadd.s32 %v5202_v62, %v5198_v23  ;;  %v1926_v52 = vand.u32 8388607, %v1919_v21  ;;  %v5247_v37 = vand.u32 2147483647, %v17974_v45 }
 0x37f   : > { %v5140_v46 = vsel %vm5138_vm15, %v5139_v50, %v15017_v28  ;;  %v11816_v22 = vsel %vm11814_vm8, %v5139_v50, %v15017_v28  ;;  %v1890_v13 = vor.u32 %v1889_v61, %v1888_v7  ;;  %v1893_v33 = vshll.u32 %v1892_v44, 23 }
 0x380   : > { %v5137_v40 = vsel %vm5135_vm14, %v15015_v14, %v5136_v15  ;;  %v11813_v31 = vsel %vm11811_vm7, %v15015_v14, %v5136_v15  ;;  %v5204_v39 = vadd.s32 536870912, %v5203_v36  ;;  %v1934_v48 = vsub.s32 32, %v1933_v63 }
 0x381   : > { %v5141_v41 = vsel %vm5134_vm9, %v5137_v40, %v5140_v46  ;;  %v11817_v47 = vsel %vm11810_vm10, %v11813_v31, %v11816_v22  ;;  %v1894_v56 = vor.u32 4788187, %v1893_v33  ;;  %v1897_v38 = vcvt.s32.f32 %v1890_v13 }
 0x382   : > { %v5142_v43 = vsel %vm5131_vm12, nan, %v5141_v41  ;;  %v11818_v9 = vsel %vm5131_vm12, nan, %v11817_v47  ;;  %v1908_v49 = vadd.s32 3, %v1904_v25  ;;  %v1936_v12 = vshll.u32 %v15257_v0, %v1933_v63 }
 0x383   : > { %7266 = vst [vmem:[%s15815_s20 + $0x158] sm:$0xff] %v5142_v43  ;;  %13922 = vst [vmem:[%s15815_s20 + $0x358] sm:$0xff] %v11818_v9  ;;  %v1895_v24 = vand.u32 2147483647, %v1894_v56  ;;  %v5250_v59 = vand.u32 2139095040, %v17974_v45  ;;  %v5205_v42 = vshrl.u32 %v5204_v39, 30  ;;  %v1937_v27 = vshrl.u32 %v15258_v4, %v1934_v48 }
 0x384   : > { %v1940_v32 = vshrl.u32 %v15259_v6, %v1934_v48  ;;  %v1945_v34 = vshll.u32 %v15260_v8, %v1933_v63  ;;  %v1943_v60 = vshrl.u32 %v15260_v8, %v1934_v48  ;;  %v1946_v54 = vshrl.u32 %v15261_v10, %v1934_v48 }
 0x385   : > { %v1898_v2 = vmul.f32 %v1897_v38, %v1895_v24  ;;  %v1949_v35 = vshrl.u32 %v15262_v17, %v1934_v48  ;;  %v5206_v1 = vshll.u32 %v5205_v42, 30  ;;  %v1932_v51 = vshrl.u32 %v1931_v20, 5 }
 0x386   : > { %v1939_v55 = vshll.u32 %v15258_v4, %v1933_v63  ;;  %v1942_v11 = vshll.u32 %v15259_v6, %v1933_v63  ;;  %v1938_v57 = vor.u32 %v1937_v27, %v1936_v12  ;;  %v1947_v30 = vor.u32 %v1946_v54, %v1945_v34 }
 0x387   : > { %v1899_v29 = vxor.u32 2147483648, %v1898_v2  ;;  %v1948_v28 = vshll.u32 %v15261_v10, %v1933_v63  ;;  %v18001_v7 = vsub.s32 %v5203_v36, %v5206_v1  ;;  %v18003_v15 = vand.u32 3, %v1904_v25 }
 0x388   : > { %v1941_v61 = vor.u32 %v1940_v32, %v1939_v55  ;;  %v1944_v44 = vor.u32 %v1943_v60, %v1942_v11  ;;  %vm5145_vm3 = vcmp.lt.s32.totalorder %v17748_v5, 0  ;;  %v1927_v53 = vor.u32 8388608, %v1926_v52 }
 0x389   : > { %v1900_v14 = vsel %vm1817_vm5, %v1899_v29, %v1898_v2  ;;  %v1950_v20 = vor.u32 %v1949_v35, %v1948_v28  ;;  %v18006_v46 = vand.u32 3, %v1908_v49  ;;  %v5209_v22 = vsub.s32 0, %v18001_v7 }
 0x38a   : > { %v1903_v50 = vsel %vm17923_vm11, %v17653_v58, %v1900_v14  ;;  %vm1954_vm4 = vcmp.lt.s32.totalorder %v1932_v51, 4  ;;  %vm1951_vm5 = vcmp.lt.s32.totalorder %v1932_v51, 1  ;;  %vm1953_vm2 = vcmp.lt.s32.totalorder %v1932_v51, 3 }
 0x38b   : > { %15018 = vcosq.f32 %v1903_v50  ;;  %v1960_v16 = vsel %vm1954_vm4, %v1947_v30, 920167782  ;;  %v5251_v13 = vshrl.u32 %v5250_v59, 23  ;;  %vm18011_vm6 = vcmp.le.f32.partialorder %v5143_v19, 0.7853982 }
 0x38c   : > { %15020 = vsinq.f32 %v1903_v50  ;;  %v14257_v40 = vmin.u32 %v5209_v22, %v18001_v7  ;;  %v1935_v31 = vshrl.u32 %v15257_v0, %v1934_v48  ;;  %v1956_v23 = vsel %vm1954_vm4, %v1944_v44, 2102212464 }
 0x38d   : > { %v1959_v62 = vsel %vm1951_vm5, %v1938_v57, %v1941_v61  ;;  %v1961_v41 = vsel %vm1953_vm2, %v1944_v44, %v1960_v16  ;;  %v1963_v47 = vsel %vm1951_vm5, %v1941_v61, %v1944_v44  ;;  %v1964_v56 = vsel %vm1954_vm4, %v1950_v20, 1326507024 }
 0x38e   : > { %v1967_v25 = vshll.u32 %v1927_v53, 8  ;;  %v5211_v43 = vclz %v14257_v40  ;;  %v5229_v9 = vsub.s32 4, %v5205_v42  ;;  %vm1952_vm7 = vcmp.lt.s32.totalorder %v1932_v51, 2 }
 0x38f   : > { %v1955_v19 = vsel %vm1951_vm5, %v1935_v31, %v1938_v57  ;;  %v1957_v36 = vsel %vm1953_vm2, %v1941_v61, %v1956_v23  ;;  %v1962_v63 = vsel %vm1952_vm7, %v1959_v62, %v1961_v41  ;;  %v1965_v24 = vsel %vm1953_vm2, %v1947_v30, %v1964_v56 }
 0x390   : > { %v14260_v38 = vadd.s32 4294967169, %v5251_v13  ;;  %v14258_v39 = vadd.s32 4294967294, %v5211_v43  ;;  %v1966_v52 = vsel %vm1952_vm7, %v1963_v47, %v1965_v24  ;;  %vm8618_vm8 = vcmp.eq.s32.totalorder %v18003_v15, 0 }
 0x391   : > { %v18025_v48 = vmul.u32.u64.low %v1967_v25, %v1962_v63  ;;  %v18026_v2 = vmul.u32.u64.high %v1967_v25, %v1962_v63, %v18025_v48  ;;  %v18030_v49 = vmul.u32.u64.low %v1967_v25, %v1966_v52  ;;  %v18031_v12 = vmul.u32.u64.high %v1967_v25, %v1966_v52, %v18030_v49 }
 0x392   : > { %v5257_v59 = vadd.s32 1, %v14260_v38  ;;  %vm8617_vm9 = vcmp.lt.s32.totalorder %v18003_v15, 2  ;;  %vm8621_vm10 = vcmp.eq.s32.totalorder %v18003_v15, 2  ;;  %vm14259_vm11 = vcmp.lt.s32.totalorder %v14258_v39, 0 }
 0x393   : > { %v5230_v27 = vsel %vm5145_vm3, %v5229_v9, %v5205_v42  ;;  %v1958_v32 = vsel %vm1952_vm7, %v1955_v19, %v1957_v36  ;;  %vm1907_vm12 = vweird.f32 %v17653_v58  ;;  %vm1910_vm13 = vcmp.lt.s32.totalorder %v18006_v46, 2 }
 0x394   : > { %v5214_v34 = vsel %vm14259_vm11, 0, %v14258_v39  ;;  %v5254_v29 = vand.u32 8388607, %v5247_v37  ;;  %vm5258_vm14 = vcmp.gt.s32.totalorder %v5257_v59, 0  ;;  %v5199_v60 = vadd.s32 %v17932_v18, %v17941_v3 }
 0x395   : > { %v5215_v54 = vsub.s32 32, %v5214_v34  ;;  %v5219_v35 = vsub.s32 4294967266, %v5214_v34  ;;  %v1977_v1 = vadd.s32 1, %v18026_v2  ;;  %v5232_v42 = vsel %vm18011_vm6, 0, %v5230_v27 }
 0x396   : > { %v1974_v51 = vmul.u32 %v1967_v25, %v1958_v32  ;;  %vm1976_vm15 = vc.u32 %v18031_v12, %v18025_v48  ;;  %v5259_v55 = vsel %vm5258_vm14, %v5257_v59, 0  ;;  %v5216_v14 = vshll.u32 %v18001_v7, %v5214_v34 }
 0x397   : > { %v5217_v57 = vshrl.u32 %v5199_v60, %v5215_v54  ;;  %v5220_v30 = vadd.s32 127, %v5219_v35  ;;  %v1978_v28 = vsel %vm1976_vm15, %v1977_v1, %v18026_v2  ;;  %vm1911_vm0 = vcmp.eq.s32.totalorder %v18006_v46, 0 }
 0x398   : > { %v15019_v11 = vpop.eup %15018  ;;  %v1979_v50 = vadd.s32 %v1978_v28, %v1974_v51  ;;  %v5261_v61 = vand.u32 31, %v5259_v55  ;;  %vm1914_vm1 = vcmp.eq.s32.totalorder %v18006_v46, 2  ;;  %v5236_v16 = vadd.s32 3, %v5232_v42  ;;  %v18070_v46 = vpop.f32.mrf.mxu0 }
 0x399   : > { %v15021_v18 = vpop.eup %15020  ;;  %v1915_v3 = vxor.u32 2147483648, %v15019_v11  ;;  %v5218_v53 = vor.u32 %v5217_v57, %v5216_v14  ;;  %v5221_v20 = vshll.u32 %v5220_v30, 23  ;;  %v5255_v62 = vor.u32 8388608, %v5254_v29 }
 0x39a   : > { %v1912_v44 = vxor.u32 2147483648, %v15021_v18  ;;  %v1980_v13 = vadd.s32 536870912, %v1979_v50  ;;  %v5262_v25 = vsub.s32 32, %v5261_v61  ;;  %v18072_v15 = vand.u32 3, %v5236_v16 }
 0x39b   : > { %v1916_v22 = vsel %vm1914_vm1, %v1915_v3, %v15021_v18  ;;  %v8623_v7 = vsel %vm8621_vm10, %v1915_v3, %v15021_v18  ;;  %v5222_v23 = vor.u32 4788187, %v5221_v20  ;;  %v5225_v36 = vcvt.s32.f32 %v5218_v53 }
 0x39c   : > { %v1913_v40 = vsel %vm1911_vm0, %v15019_v11, %v1912_v44  ;;  %v8620_v31 = vsel %vm8618_vm8, %v15019_v11, %v1912_v44  ;;  %v18061_v56 = vshrl.u32 %v1980_v13, 30  ;;  %v18074_v38 = vand.u32 3, %v5232_v42 }
 0x39d   : > { %v1917_v41 = vsel %vm1910_vm13, %v1913_v40, %v1916_v22  ;;  %v8624_v47 = vsel %vm8617_vm9, %v8620_v31, %v8623_v7  ;;  %v5223_v19 = vand.u32 2147483647, %v5222_v23  ;;  %v5265_v52 = vshrl.u32 %v15258_v4, %v5262_v25 }
 0x39e   : > { %v1918_v43 = vsel %vm1907_vm12, nan, %v1917_v41  ;;  %v8625_v9 = vsel %vm1907_vm12, nan, %v8624_v47  ;;  %v1982_v63 = vshll.u32 %v18061_v56, 30  ;;  %v5268_v58 = vshrl.u32 %v15259_v6, %v5262_v25 }
 0x39f   : > { %7235 = vst [vmem:[%s15815_s20 + $0x60] sm:$0xff] %v1918_v43  ;;  %13891 = vst [vmem:[%s15815_s20 + $0x260] sm:$0xff] %v8625_v9  ;;  %v5226_v24 = vmul.f32 %v5225_v36, %v5223_v19  ;;  %v18080_v2 = vshll.u32 %v5255_v62, 8  ;;  %v5260_v59 = vshrl.u32 %v5259_v55, 5  ;;  %v5271_v27 = vshrl.u32 %v15260_v8, %v5262_v25 }
 0x3a0   : > { %v18076_v39 = vsub.s32 %v1979_v50, %v1982_v63  ;;  %v2026_v32 = vand.u32 2139095040, %v18070_v46  ;;  %v5264_v29 = vshll.u32 %v15257_v0, %v5261_v61  ;;  %v5267_v60 = vshll.u32 %v15258_v4, %v5261_v61 }
 0x3a1   : > { %v5227_v49 = vxor.u32 2147483648, %v5226_v24  ;;  %v5274_v54 = vshrl.u32 %v15261_v10, %v5262_v25  ;;  %v5270_v1 = vshll.u32 %v15259_v6, %v5261_v61  ;;  %v5273_v42 = vshll.u32 %v15260_v8, %v5261_v61 }
 0x3a2   : > { %v1985_v34 = vsub.s32 0, %v18076_v39  ;;  %v5277_v51 = vshrl.u32 %v15262_v17, %v5262_v25  ;;  %v5266_v14 = vor.u32 %v5265_v52, %v5264_v29  ;;  %v5269_v57 = vor.u32 %v5268_v58, %v5267_v60 }
 0x3a3   : > { %v5228_v35 = vsel %vm5145_vm3, %v5227_v49, %v5226_v24  ;;  %v5272_v30 = vor.u32 %v5271_v27, %v5270_v1  ;;  %v5275_v28 = vor.u32 %v5274_v54, %v5273_v42  ;;  %v5276_v18 = vshll.u32 %v15261_v10, %v5261_v61 }
 0x3a4   : > { %v5231_v55 = vsel %vm18011_vm6, %v17748_v5, %v5228_v35  ;;  %v14133_v11 = vmin.u32 %v1985_v34, %v18076_v39  ;;  %v1975_v3 = vadd.s32 %v18025_v48, %v18031_v12  ;;  %v2027_v44 = vshrl.u32 %v2026_v32, 23 }
 0x3a5   : > { %15022 = vcosq.f32 %v5231_v55  ;;  %vm1921_vm3 = vcmp.lt.s32.totalorder %v17866_v26, 0  ;;  %v2005_v33 = vsub.s32 4, %v18061_v56  ;;  %v5263_v53 = vshrl.u32 %v15257_v0, %v5262_v25 }
 0x3a6   : > { %15024 = vsinq.f32 %v5231_v55  ;;  %v1987_v50 = vclz %v14133_v11  ;;  %v5278_v20 = vor.u32 %v5277_v51, %v5276_v18  ;;  %vm5279_vm4 = vcmp.lt.s32.totalorder %v5260_v59, 1 }
 0x3a7   : > { %vm5281_vm5 = vcmp.lt.s32.totalorder %v5260_v59, 3  ;;  %vm5282_vm2 = vcmp.lt.s32.totalorder %v5260_v59, 4  ;;  %v5287_v7 = vsel %vm5279_vm4, %v5266_v14, %v5269_v57  ;;  %v5291_v13 = vsel %vm5279_vm4, %v5269_v57, %v5272_v30 }
 0x3a8   : > { %v14134_v22 = vadd.s32 4294967294, %v1987_v50  ;;  %v5284_v16 = vsel %vm5282_vm2, %v5272_v30, 2102212464  ;;  %v5288_v61 = vsel %vm5282_vm2, %v5275_v28, 920167782  ;;  %vm5280_vm8 = vcmp.lt.s32.totalorder %v5260_v59, 2 }
 0x3a9   : > { %v5292_v40 = vsel %vm5282_vm2, %v5278_v20, 1326507024  ;;  %vm18105_vm6 = vcmp.le.f32.partialorder %v1919_v21, 0.7853982  ;;  %v5289_v12 = vsel %vm5281_vm5, %v5272_v30, %v5288_v61  ;;  %v5283_v62 = vsel %vm5279_vm4, %v5263_v53, %v5266_v14 }
 0x3aa   : > { %vm14135_vm7 = vcmp.lt.s32.totalorder %v14134_v22, 0  ;;  %v5293_v31 = vsel %vm5281_vm5, %v5275_v28, %v5292_v40  ;;  %v5290_v41 = vsel %vm5280_vm8, %v5287_v7, %v5289_v12  ;;  %v5285_v9 = vsel %vm5281_vm5, %v5269_v57, %v5284_v16 }
 0x3ab   : > { %v1990_v23 = vsel %vm14135_vm7, 0, %v14134_v22  ;;  %v5294_v47 = vsel %vm5280_vm8, %v5291_v13, %v5293_v31  ;;  %v14136_v21 = vadd.s32 4294967169, %v2027_v44  ;;  %vm11913_vm9 = vcmp.lt.s32.totalorder %v18074_v38, 2 }
 0x3ac   : > { %v1991_v25 = vsub.s32 32, %v1990_v23  ;;  %v1995_v43 = vsub.s32 4294967266, %v1990_v23  ;;  %v18115_v19 = vmul.u32.u64.low %v18080_v2, %v5294_v47  ;;  %v18116_v36 = vmul.u32.u64.high %v18080_v2, %v5294_v47, %v18115_v19 }
 0x3ad   : > { %v18119_v63 = vmul.u32.u64.low %v18080_v2, %v5290_v41  ;;  %v18120_v24 = vmul.u32.u64.high %v18080_v2, %v5290_v41, %v18119_v63  ;;  %v1992_v52 = vshll.u32 %v18076_v39, %v1990_v23  ;;  %v2033_v27 = vadd.s32 1, %v14136_v21 }
 0x3ae   : > { %v1993_v58 = vshrl.u32 %v1975_v3, %v1991_v25  ;;  %v1996_v49 = vadd.s32 127, %v1995_v43  ;;  %vm5238_vm10 = vcmp.lt.s32.totalorder %v18072_v15, 2  ;;  %vm11914_vm11 = vcmp.eq.s32.totalorder %v18074_v38, 0 }
 0x3af   : > { %vm11917_vm12 = vcmp.eq.s32.totalorder %v18074_v38, 2  ;;  %v5286_v32 = vsel %vm5280_vm8, %v5283_v62, %v5285_v9  ;;  %v2006_v60 = vsel %vm1921_vm3, %v2005_v33, %v18061_v56  ;;  %vm2034_vm13 = vcmp.gt.s32.totalorder %v2033_v27, 0 }
 0x3b0   : > { %v1994_v34 = vor.u32 %v1993_v58, %v1992_v52  ;;  %v1997_v29 = vshll.u32 %v1996_v49, 23  ;;  %vm5304_vm14 = vc.u32 %v18116_v36, %v18119_v63  ;;  %v5305_v39 = vadd.s32 1, %v18120_v24 }
 0x3b1   : > { %v2023_v54 = vand.u32 2147483647, %v18070_v46  ;;  %v2035_v35 = vsel %vm2034_vm13, %v2033_v27, 0  ;;  %vm5239_vm15 = vcmp.eq.s32.totalorder %v18072_v15, 0  ;;  %v5302_v42 = vmul.u32 %v18080_v2, %v5286_v32 }
 0x3b2   : > { %v15023_v1 = vpop.eup %15022  ;;  %v1998_v59 = vor.u32 4788187, %v1997_v29  ;;  %v2037_v51 = vand.u32 31, %v2035_v35  ;;  %vm5242_vm0 = vcmp.eq.s32.totalorder %v18072_v15, 2  ;;  %v2008_v11 = vsel %vm18105_vm6, 0, %v2006_v60  ;;  %v18178_v29 = vpop.f32.mrf.mxu1 }
 0x3b3   : > { %v15025_v55 = vpop.eup %15024  ;;  %v5243_v56 = vxor.u32 2147483648, %v15023_v1  ;;  %v5306_v14 = vsel %vm5304_vm14, %v5305_v39, %v18120_v24  ;;  %v2001_v28 = vcvt.s32.f32 %v1994_v34  ;;  %v2030_v50 = vand.u32 8388607, %v2023_v54 }
 0x3b4   : > { %v5240_v57 = vxor.u32 2147483648, %v15025_v55  ;;  %v1999_v30 = vand.u32 2147483647, %v1998_v59  ;;  %v5307_v18 = vadd.s32 %v5306_v14, %v5302_v42  ;;  %v2038_v44 = vsub.s32 32, %v2037_v51 }
 0x3b5   : > { %v5244_v3 = vsel %vm5242_vm0, %v5243_v56, %v15025_v55  ;;  %v11919_v2 = vsel %vm11917_vm12, %v5243_v56, %v15025_v55  ;;  %vm5235_vm1 = vweird.f32 %v17748_v5  ;;  %v2012_v31 = vadd.s32 3, %v2008_v11 }
 0x3b6   : > { %v5241_v33 = vsel %vm5239_vm15, %v15023_v1, %v5240_v57  ;;  %v11916_v53 = vsel %vm11914_vm11, %v15023_v1, %v5240_v57  ;;  %v2002_v20 = vmul.f32 %v2001_v28, %v1999_v30  ;;  %v5308_v22 = vadd.s32 536870912, %v5307_v18 }
 0x3b7   : > { %v5245_v7 = vsel %vm5238_vm10, %v5241_v33, %v5244_v3  ;;  %v11920_v16 = vsel %vm11913_vm9, %v11916_v53, %v11919_v2  ;;  %v2031_v23 = vor.u32 8388608, %v2030_v50  ;;  %v2036_v62 = vshrl.u32 %v2035_v35, 5 }
 0x3b8   : > { %v5246_v61 = vsel %vm5235_vm1, nan, %v5245_v7  ;;  %v11921_v13 = vsel %vm5235_vm1, nan, %v11920_v16  ;;  %v2003_v40 = vxor.u32 2147483648, %v2002_v20  ;;  %v18155_v12 = vshrl.u32 %v5308_v22, 30 }
 0x3b9   : > { %7267 = vst [vmem:[%s15815_s20 + $0x160] sm:$0xff] %v5246_v61  ;;  %13923 = vst [vmem:[%s15815_s20 + $0x360] sm:$0xff] %v11921_v13  ;;  %v2047_v41 = vshrl.u32 %v15260_v8, %v2038_v44  ;;  %v2041_v38 = vshrl.u32 %v15258_v4, %v2038_v44  ;;  %v2044_v47 = vshrl.u32 %v15259_v6, %v2038_v44  ;;  %v18180_v60 = vand.u32 3, %v2008_v11 }
 0x3ba   : > { %v2004_v5 = vsel %vm1921_vm3, %v2003_v40, %v2002_v20  ;;  %v5310_v15 = vshll.u32 %v18155_v12, 30  ;;  %v2040_v43 = vshll.u32 %v15257_v0, %v2037_v51  ;;  %v2046_v9 = vshll.u32 %v15259_v6, %v2037_v51 }
 0x3bb   : > { %v2007_v25 = vsel %vm18105_vm6, %v17866_v26, %v2004_v5  ;;  %v2050_v21 = vshrl.u32 %v15261_v10, %v2038_v44  ;;  %v2043_v24 = vshll.u32 %v15258_v4, %v2037_v51  ;;  %v2049_v52 = vshll.u32 %v15260_v8, %v2037_v51 }
 0x3bc   : > { %15026 = vcosq.f32 %v2007_v25  ;;  %v18171_v19 = vsub.s32 %v5307_v18, %v5310_v15  ;;  %v2048_v58 = vor.u32 %v2047_v41, %v2046_v9  ;;  %v2052_v49 = vshll.u32 %v15261_v10, %v2037_v51 }
 0x3bd   : > { %15028 = vsinq.f32 %v2007_v25  ;;  %v2053_v48 = vshrl.u32 %v15262_v17, %v2038_v44  ;;  %v2042_v32 = vor.u32 %v2041_v38, %v2040_v43  ;;  %v2045_v34 = vor.u32 %v2044_v47, %v2043_v24 }
 0x3be   : > { %v5313_v27 = vsub.s32 0, %v18171_v19  ;;  %v2051_v39 = vor.u32 %v2050_v21, %v2049_v52  ;;  %v18182_v1 = vand.u32 3, %v2012_v31  ;;  %vm5249_vm3 = vcmp.lt.s32.totalorder %v17974_v45, 0 }
 0x3bf   : > { %v2054_v35 = vor.u32 %v2053_v48, %v2052_v49  ;;  %v2039_v42 = vshrl.u32 %v15257_v0, %v2038_v44  ;;  %vm2058_vm4 = vcmp.lt.s32.totalorder %v2036_v62, 4  ;;  %vm2055_vm5 = vcmp.lt.s32.totalorder %v2036_v62, 1 }
 0x3c0   : > { %v14261_v59 = vmin.u32 %v5313_v27, %v18171_v19  ;;  %v2060_v51 = vsel %vm2058_vm4, %v2048_v58, 2102212464  ;;  %v18187_v55 = vshll.u32 %v2031_v23, 8  ;;  %v5354_v56 = vand.u32 2139095040, %v18178_v29 }
 0x3c1   : > { %vm2057_vm2 = vcmp.lt.s32.totalorder %v2036_v62, 3  ;;  %v2059_v11 = vsel %vm2055_vm5, %v2039_v42, %v2042_v32  ;;  %v2063_v57 = vsel %vm2055_vm5, %v2042_v32, %v2045_v34  ;;  %vm8724_vm6 = vcmp.eq.s32.totalorder %v18180_v60, 2 }
 0x3c2   : > { %v5315_v14 = vclz %v14261_v59  ;;  %v2061_v30 = vsel %vm2057_vm2, %v2045_v34, %v2060_v51  ;;  %v2064_v28 = vsel %vm2058_vm4, %v2051_v39, 920167782  ;;  %v2067_v18 = vsel %vm2055_vm5, %v2045_v34, %v2048_v58 }
 0x3c3   : > { %v2068_v3 = vsel %vm2058_vm4, %v2054_v35, 1326507024  ;;  %vm2015_vm7 = vcmp.eq.s32.totalorder %v18182_v1, 0  ;;  %vm8721_vm8 = vcmp.eq.s32.totalorder %v18180_v60, 0  ;;  %vm2056_vm9 = vcmp.lt.s32.totalorder %v2036_v62, 2 }
 0x3c4   : > { %v14262_v2 = vadd.s32 4294967294, %v5315_v14  ;;  %v2065_v50 = vsel %vm2057_vm2, %v2048_v58, %v2064_v28  ;;  %v2069_v44 = vsel %vm2057_vm2, %v2051_v39, %v2068_v3  ;;  %vm2014_vm10 = vcmp.lt.s32.totalorder %v18182_v1, 2 }
 0x3c5   : > { %vm8720_vm11 = vcmp.lt.s32.totalorder %v18180_v60, 2  ;;  %v5333_v33 = vsub.s32 4, %v18155_v12  ;;  %v2066_v53 = vsel %vm2056_vm9, %v2063_v57, %v2065_v50  ;;  %v2070_v20 = vsel %vm2056_vm9, %v2067_v18, %v2069_v44 }
 0x3c6   : > { %v5355_v22 = vshrl.u32 %v5354_v56, 23  ;;  %vm2011_vm12 = vweird.f32 %v17866_v26  ;;  %vm14263_vm13 = vcmp.lt.s32.totalorder %v14262_v2, 0  ;;  %v2062_v7 = vsel %vm2056_vm9, %v2059_v11, %v2061_v30 }
 0x3c7   : > { %v18198_v16 = vmul.u32.u64.low %v18187_v55, %v2070_v20  ;;  %v18199_v61 = vmul.u32.u64.high %v18187_v55, %v2070_v20, %v18198_v16  ;;  %v5318_v13 = vsel %vm14263_vm13, 0, %v14262_v2  ;;  %vm2018_vm14 = vcmp.eq.s32.totalorder %v18182_v1, 2 }
 0x3c8   : > { %v18202_v40 = vmul.u32.u64.low %v18187_v55, %v2066_v53  ;;  %v18203_v31 = vmul.u32.u64.high %v18187_v55, %v2066_v53, %v18202_v40  ;;  %v14264_v23 = vadd.s32 4294967169, %v5355_v22  ;;  %v5303_v62 = vadd.s32 %v18119_v63, %v18116_v36 }
 0x3c9   : > { %v5319_v41 = vsub.s32 32, %v5318_v13  ;;  %v5323_v5 = vsub.s32 4294967266, %v5318_v13  ;;  %v15027_v15 = vpop.eup %15026  ;;  %v5334_v38 = vsel %vm5249_vm3, %v5333_v33, %v18155_v12  ;;  %v2078_v47 = vmul.u32 %v18187_v55, %v2062_v7 }
 0x3ca   : > { %v5351_v25 = vand.u32 2147483647, %v18178_v29  ;;  %v5361_v43 = vadd.s32 1, %v14264_v23  ;;  %v15029_v9 = vpop.eup %15028  ;;  %v2019_v21 = vxor.u32 2147483648, %v15027_v15  ;;  %v5320_v24 = vshll.u32 %v18171_v19, %v5318_v13 }
 0x3cb   : > { %v5321_v52 = vshrl.u32 %v5303_v62, %v5319_v41  ;;  %v5324_v58 = vadd.s32 127, %v5323_v5  ;;  %v2016_v49 = vxor.u32 2147483648, %v15029_v9  ;;  %vm2080_vm15 = vc.u32 %v18199_v61, %v18202_v40 }
 0x3cc   : > { %v2081_v36 = vadd.s32 1, %v18203_v31  ;;  %vm5362_vm0 = vcmp.gt.s32.totalorder %v5361_v43, 0  ;;  %v2020_v63 = vsel %vm2018_vm14, %v2019_v21, %v15029_v9  ;;  %v8726_v12 = vsel %vm8724_vm6, %v2019_v21, %v15029_v9 }
 0x3cd   : > { %v5322_v48 = vor.u32 %v5321_v52, %v5320_v24  ;;  %v5325_v27 = vshll.u32 %v5324_v58, 23  ;;  %v2017_v19 = vsel %vm2015_vm7, %v15027_v15, %v2016_v49  ;;  %v8723_v32 = vsel %vm8721_vm8, %v15027_v15, %v2016_v49  ;;  %v18270_v58 = vpop.f32.mrf.mxu0 }
 0x3ce   : > { %v2082_v34 = vsel %vm2080_vm15, %v2081_v36, %v18203_v31  ;;  %v5363_v39 = vsel %vm5362_vm0, %v5361_v43, 0  ;;  %v2021_v35 = vsel %vm2014_vm10, %v2017_v19, %v2020_v63  ;;  %v8727_v59 = vsel %vm8720_vm11, %v8723_v32, %v8726_v12 }
 0x3cf   : > { %vm18233_vm1 = vcmp.le.f32.partialorder %v5247_v37, 0.7853982  ;;  %v5326_v51 = vor.u32 4788187, %v5325_v27  ;;  %v2022_v55 = vsel %vm2011_vm12, nan, %v2021_v35  ;;  %v8728_v56 = vsel %vm2011_vm12, nan, %v8727_v59 }
 0x3d0   : > { %v2083_v14 = vadd.s32 %v2082_v34, %v2078_v47  ;;  %v5358_v1 = vand.u32 8388607, %v5351_v25  ;;  %7236 = vst [vmem:[%s15815_s20 + $0x68] sm:$0xff] %v2022_v55  ;;  %13892 = vst [vmem:[%s15815_s20 + $0x268] sm:$0xff] %v8728_v56  ;;  %v5329_v11 = vcvt.s32.f32 %v5322_v48  ;;  %v5336_v37 = vsel %vm18233_vm1, 0, %v5334_v38 }
 0x3d1   : > { %v5327_v60 = vand.u32 2147483647, %v5326_v51  ;;  %v5365_v57 = vand.u32 31, %v5363_v39  ;;  %v5340_v3 = vadd.s32 3, %v5336_v37  ;;  %v5364_v50 = vshrl.u32 %v5363_v39, 5 }
 0x3d2   : > { %v2084_v30 = vadd.s32 536870912, %v2083_v14  ;;  %v5359_v26 = vor.u32 8388608, %v5358_v1  ;;  %v18267_v24 = vand.u32 3, %v5336_v37  ;;  %v2130_v34 = vand.u32 2139095040, %v18270_v58 }
 0x3d3   : > { %v5330_v28 = vmul.f32 %v5329_v11, %v5327_v60  ;;  %v5366_v18 = vsub.s32 32, %v5365_v57  ;;  %v5368_v33 = vshll.u32 %v15257_v0, %v5365_v57  ;;  %v5371_v7 = vshll.u32 %v15258_v4, %v5365_v57 }
 0x3d4   : > { %v18247_v2 = vshrl.u32 %v2084_v30, 30  ;;  %v5374_v23 = vshll.u32 %v15259_v6, %v5365_v57  ;;  %v5377_v62 = vshll.u32 %v15260_v8, %v5365_v57  ;;  %v5380_v47 = vshll.u32 %v15261_v10, %v5365_v57 }
 0x3d5   : > { %v5331_v44 = vxor.u32 2147483648, %v5330_v28  ;;  %v5369_v53 = vshrl.u32 %v15258_v4, %v5366_v18  ;;  %v5372_v20 = vshrl.u32 %v15259_v6, %v5366_v18  ;;  %v5375_v16 = vshrl.u32 %v15260_v8, %v5366_v18 }
 0x3d6   : > { %v2086_v22 = vshll.u32 %v18247_v2, 30  ;;  %v5378_v13 = vshrl.u32 %v15261_v10, %v5366_v18  ;;  %v5381_v41 = vshrl.u32 %v15262_v17, %v5366_v18  ;;  %v18272_v49 = vand.u32 3, %v5340_v3 }
 0x3d7   : > { %v5332_v31 = vsel %vm5249_vm3, %v5331_v44, %v5330_v28  ;;  %v5370_v38 = vor.u32 %v5369_v53, %v5368_v33  ;;  %v5373_v43 = vor.u32 %v5372_v20, %v5371_v7  ;;  %v5376_v9 = vor.u32 %v5375_v16, %v5374_v23 }
 0x3d8   : > { %v5335_v5 = vsel %vm18233_vm1, %v17974_v45, %v5332_v31  ;;  %v18264_v15 = vsub.s32 %v2083_v14, %v2086_v22  ;;  %v5379_v21 = vor.u32 %v5378_v13, %v5377_v62  ;;  %v5382_v36 = vor.u32 %v5381_v41, %v5380_v47 }
 0x3d9   : > { %15030 = vcosq.f32 %v5335_v5  ;;  %vm5383_vm3 = vcmp.lt.s32.totalorder %v5364_v50, 1  ;;  %v5399_v63 = vshll.u32 %v5359_v26, 8  ;;  %v5367_v48 = vshrl.u32 %v15257_v0, %v5366_v18 }
 0x3da   : > { %15032 = vsinq.f32 %v5335_v5  ;;  %v2089_v52 = vsub.s32 0, %v18264_v15  ;;  %vm5384_vm4 = vcmp.lt.s32.totalorder %v5364_v50, 2  ;;  %vm5386_vm5 = vcmp.lt.s32.totalorder %v5364_v50, 4 }
 0x3db   : > { %v5388_v27 = vsel %vm5386_vm5, %v5376_v9, 2102212464  ;;  %v5391_v19 = vsel %vm5383_vm3, %v5370_v38, %v5373_v43  ;;  %v5392_v32 = vsel %vm5386_vm5, %v5379_v21, 920167782  ;;  %vm5385_vm2 = vcmp.lt.s32.totalorder %v5364_v50, 3 }
 0x3dc   : > { %v14137_v12 = vmin.u32 %v2089_v52, %v18264_v15  ;;  %v5387_v35 = vsel %vm5383_vm3, %v5367_v48, %v5370_v38  ;;  %v5395_v59 = vsel %vm5383_vm3, %v5373_v43, %v5376_v9  ;;  %v5389_v42 = vsel %vm5385_vm2, %v5373_v43, %v5388_v27 }
 0x3dd   : > { %v5393_v51 = vsel %vm5385_vm2, %v5376_v9, %v5392_v32  ;;  %v5396_v55 = vsel %vm5386_vm5, %v5382_v36, 1326507024  ;;  %v2131_v56 = vshrl.u32 %v2130_v34, 23  ;;  %vm2025_vm6 = vcmp.lt.s32.totalorder %v18070_v46, 0 }
 0x3de   : > { %v2091_v39 = vclz %v14137_v12  ;;  %v5394_v1 = vsel %vm5384_vm4, %v5391_v19, %v5393_v51  ;;  %v5397_v60 = vsel %vm5385_vm2, %v5379_v21, %v5396_v55  ;;  %vm12017_vm7 = vcmp.eq.s32.totalorder %v18267_v24, 0 }
 0x3df   : > { %vm18282_vm8 = vcmp.le.f32.partialorder %v2023_v54, 0.7853982  ;;  %v5390_v37 = vsel %vm5384_vm4, %v5387_v35, %v5389_v42  ;;  %v5398_v57 = vsel %vm5384_vm4, %v5395_v59, %v5397_v60  ;;  %vm12016_vm9 = vcmp.lt.s32.totalorder %v18267_v24, 2 }
 0x3e0   : > { %v14138_v14 = vadd.s32 4294967294, %v2091_v39  ;;  %v18288_v30 = vmul.u32.u64.low %v5399_v63, %v5394_v1  ;;  %v18289_v28 = vmul.u32.u64.high %v5399_v63, %v5394_v1, %v18288_v30  ;;  %v14140_v26 = vadd.s32 4294967169, %v2131_v56 }
 0x3e1   : > { %v18293_v18 = vmul.u32.u64.low %v5399_v63, %v5398_v57  ;;  %v18294_v3 = vmul.u32.u64.high %v5399_v63, %v5398_v57, %v18293_v18  ;;  %vm5339_vm11 = vweird.f32 %v17974_v45  ;;  %vm5342_vm12 = vcmp.lt.s32.totalorder %v18272_v49, 2 }
 0x3e2   : > { %vm14139_vm10 = vcmp.lt.s32.totalorder %v14138_v14, 0  ;;  %vm12020_vm13 = vcmp.eq.s32.totalorder %v18267_v24, 2  ;;  %v2109_v50 = vsub.s32 4, %v18247_v2  ;;  %v2079_v44 = vadd.s32 %v18202_v40, %v18199_v61 }
 0x3e3   : > { %v2094_v54 = vsel %vm14139_vm10, 0, %v14138_v14  ;;  %v2137_v20 = vadd.s32 1, %v14140_v26  ;;  %vm5343_vm14 = vcmp.eq.s32.totalorder %v18272_v49, 0  ;;  %vm5346_vm15 = vcmp.eq.s32.totalorder %v18272_v49, 2 }
 0x3e4   : > { %v2095_v33 = vsub.s32 32, %v2094_v54  ;;  %v2099_v53 = vsub.s32 4294967266, %v2094_v54  ;;  %v5406_v22 = vmul.u32 %v5399_v63, %v5390_v37  ;;  %v5409_v7 = vadd.s32 1, %v18289_v28 }
 0x3e5   : > { %v2096_v13 = vshll.u32 %v18264_v15, %v2094_v54  ;;  %vm5408_vm0 = vc.u32 %v18294_v3, %v18288_v30  ;;  %v2110_v40 = vsel %vm2025_vm6, %v2109_v50, %v18247_v2  ;;  %vm2138_vm1 = vcmp.gt.s32.totalorder %v2137_v20, 0 }
 0x3e6   : > { %v15031_v16 = vpop.eup %15030  ;;  %v2097_v31 = vshrl.u32 %v2079_v44, %v2095_v33  ;;  %v2100_v23 = vadd.s32 127, %v2099_v53  ;;  %v5410_v41 = vsel %vm5408_vm0, %v5409_v7, %v18289_v28  ;;  %v2127_v21 = vand.u32 2147483647, %v18270_v58  ;;  %v18356_v7 = vpop.f32.mrf.mxu1 }
 0x3e7   : > { %v15033_v62 = vpop.eup %15032  ;;  %v5347_v61 = vxor.u32 2147483648, %v15031_v16  ;;  %v5411_v43 = vadd.s32 %v5410_v41, %v5406_v22  ;;  %v2139_v52 = vsel %vm2138_vm1, %v2137_v20, 0  ;;  %v2112_v12 = vsel %vm18282_vm8, 0, %v2110_v40 }
 0x3e8   : > { %v5344_v5 = vxor.u32 2147483648, %v15033_v62  ;;  %v2098_v38 = vor.u32 %v2097_v31, %v2096_v13  ;;  %v2101_v47 = vshll.u32 %v2100_v23, 23  ;;  %v2141_v59 = vand.u32 31, %v2139_v52 }
 0x3e9   : > { %v5348_v15 = vsel %vm5346_vm15, %v5347_v61, %v15033_v62  ;;  %v12022_v9 = vsel %vm12020_vm13, %v5347_v61, %v15033_v62  ;;  %v5412_v32 = vadd.s32 536870912, %v5411_v43  ;;  %v2134_v49 = vand.u32 8388607, %v2127_v21 }
 0x3ea   : > { %v5345_v2 = vsel %vm5343_vm14, %v15031_v16, %v5344_v5  ;;  %v12019_v36 = vsel %vm12017_vm7, %v15031_v16, %v5344_v5  ;;  %v2102_v63 = vor.u32 4788187, %v2101_v47  ;;  %v2105_v19 = vcvt.s32.f32 %v2098_v38 }
 0x3eb   : > { %v5349_v48 = vsel %vm5342_vm12, %v5345_v2, %v5348_v15  ;;  %v12023_v27 = vsel %vm12016_vm9, %v12019_v36, %v12022_v9  ;;  %v18333_v42 = vshrl.u32 %v5412_v32, 30  ;;  %v2142_v24 = vsub.s32 32, %v2141_v59 }
 0x3ec   : > { %v5350_v34 = vsel %vm5339_vm11, nan, %v5349_v48  ;;  %v12024_v39 = vsel %vm5339_vm11, nan, %v12023_v27  ;;  %v2103_v35 = vand.u32 2147483647, %v2102_v63  ;;  %v2116_v55 = vadd.s32 3, %v2112_v12 }
 0x3ed   : > { %7268 = vst [vmem:[%s15815_s20 + $0x168] sm:$0xff] %v5350_v34  ;;  %13924 = vst [vmem:[%s15815_s20 + $0x368] sm:$0xff] %v12024_v39  ;;  %v5414_v56 = vshll.u32 %v18333_v42, 30  ;;  %v18338_v1 = vand.u32 3, %v2112_v12  ;;  %v2145_v45 = vshrl.u32 %v15258_v4, %v2142_v24  ;;  %v2148_v60 = vshrl.u32 %v15259_v6, %v2142_v24 }
 0x3ee   : > { %v2106_v51 = vmul.f32 %v2105_v19, %v2103_v35  ;;  %v2135_v57 = vor.u32 8388608, %v2134_v49  ;;  %v2151_v28 = vshrl.u32 %v15260_v8, %v2142_v24  ;;  %v2154_v18 = vshrl.u32 %v15261_v10, %v2142_v24 }
 0x3ef   : > { %v18342_v37 = vsub.s32 %v5411_v43, %v5414_v56  ;;  %v2144_v54 = vshll.u32 %v15257_v0, %v2141_v59  ;;  %v2147_v50 = vshll.u32 %v15258_v4, %v2141_v59  ;;  %v2150_v44 = vshll.u32 %v15259_v6, %v2141_v59 }
 0x3f0   : > { %v2107_v14 = vxor.u32 2147483648, %v2106_v51  ;;  %v2140_v20 = vshrl.u32 %v2139_v52, 5  ;;  %v2153_v22 = vshll.u32 %v15260_v8, %v2141_v59  ;;  %v18358_v23 = vand.u32 3, %v2116_v55 }
 0x3f1   : > { %v5417_v53 = vsub.s32 0, %v18342_v37  ;;  %v2146_v16 = vor.u32 %v2145_v45, %v2144_v54  ;;  %v2149_v13 = vor.u32 %v2148_v60, %v2147_v50  ;;  %v2152_v31 = vor.u32 %v2151_v28, %v2150_v44 }
 0x3f2   : > { %v2108_v26 = vsel %vm2025_vm6, %v2107_v14, %v2106_v51  ;;  %v2155_v61 = vor.u32 %v2154_v18, %v2153_v22  ;;  %v2156_v11 = vshll.u32 %v15261_v10, %v2141_v59  ;;  %v2157_v40 = vshrl.u32 %v15262_v17, %v2142_v24 }
 0x3f3   : > { %v2111_v33 = vsel %vm18282_vm8, %v18070_v46, %v2108_v26  ;;  %v14265_v62 = vmin.u32 %v5417_v53, %v18342_v37  ;;  %v18363_v41 = vshll.u32 %v2135_v57, 8  ;;  %v5458_v5 = vand.u32 2139095040, %v18356_v7 }
 0x3f4   : > { %15034 = vcosq.f32 %v2111_v33  ;;  %vm2159_vm3 = vcmp.lt.s32.totalorder %v2140_v20, 1  ;;  %vm2160_vm4 = vcmp.lt.s32.totalorder %v2140_v20, 2  ;;  %vm2162_vm5 = vcmp.lt.s32.totalorder %v2140_v20, 4 }
 0x3f5   : > { %15036 = vsinq.f32 %v2111_v33  ;;  %v5419_v38 = vclz %v14265_v62  ;;  %v2143_v47 = vshrl.u32 %v15257_v0, %v2142_v24  ;;  %v2158_v43 = vor.u32 %v2157_v40, %v2156_v11 }
 0x3f6   : > { %v2164_v15 = vsel %vm2162_vm5, %v2152_v31, 2102212464  ;;  %v2167_v9 = vsel %vm2159_vm3, %v2146_v16, %v2149_v13  ;;  %vm2161_vm2 = vcmp.lt.s32.totalorder %v2140_v20, 3  ;;  %v2168_v2 = vsel %vm2162_vm5, %v2155_v61, 920167782 }
 0x3f7   : > { %v14266_v52 = vadd.s32 4294967294, %v5419_v38  ;;  %v2171_v36 = vsel %vm2159_vm3, %v2149_v13, %v2152_v31  ;;  %vm5353_vm6 = vcmp.lt.s32.totalorder %v18178_v29, 0  ;;  %v2163_v63 = vsel %vm2159_vm3, %v2143_v47, %v2146_v16 }
 0x3f8   : > { %v2169_v12 = vsel %vm2161_vm2, %v2152_v31, %v2168_v2  ;;  %v2172_v48 = vsel %vm2162_vm5, %v2158_v43, 1326507024  ;;  %v5459_v27 = vshrl.u32 %v5458_v5, 23  ;;  %vm8827_vm7 = vcmp.eq.s32.totalorder %v18338_v1, 2 }
 0x3f9   : > { %vm14267_vm8 = vcmp.lt.s32.totalorder %v14266_v52, 0  ;;  %v2165_v19 = vsel %vm2161_vm2, %v2149_v13, %v2164_v15  ;;  %v2170_v32 = vsel %vm2160_vm4, %v2167_v9, %v2169_v12  ;;  %v2173_v34 = vsel %vm2161_vm2, %v2155_v61, %v2172_v48 }
 0x3fa   : > { %vm8824_vm9 = vcmp.eq.s32.totalorder %v18338_v1, 0  ;;  %v5422_v39 = vsel %vm14267_vm8, 0, %v14266_v52  ;;  %v2174_v35 = vsel %vm2160_vm4, %v2171_v36, %v2173_v34  ;;  %vm8823_vm10 = vcmp.lt.s32.totalorder %v18338_v1, 2 }
 0x3fb   : > { %v18373_v59 = vmul.u32.u64.low %v18363_v41, %v2170_v32  ;;  %v18374_v49 = vmul.u32.u64.high %v18363_v41, %v2170_v32, %v18373_v59  ;;  %vm18380_vm11 = vcmp.le.f32.partialorder %v5351_v25, 0.7853982  ;;  %v5407_v24 = vadd.s32 %v18288_v30, %v18294_v3 }
 0x3fc   : > { %v5423_v55 = vsub.s32 32, %v5422_v39  ;;  %v5427_v56 = vsub.s32 4294967266, %v5422_v39  ;;  %v14268_v14 = vadd.s32 4294967169, %v5459_v27  ;;  %vm2115_vm12 = vweird.f32 %v18070_v46 }
 0x3fd   : > { %v5437_v45 = vsub.s32 4, %v18333_v42  ;;  %v2166_v60 = vsel %vm2160_vm4, %v2163_v63, %v2165_v19  ;;  %v18390_v57 = vmul.u32.u64.low %v18363_v41, %v2174_v35  ;;  %v18391_v28 = vmul.u32.u64.high %v18363_v41, %v2174_v35, %v18390_v57 }
 0x3fe   : > { %v5424_v25 = vshll.u32 %v18342_v37, %v5422_v39  ;;  %v5425_v18 = vshrl.u32 %v5407_v24, %v5423_v55  ;;  %v5428_v26 = vadd.s32 127, %v5427_v56  ;;  %v5465_v54 = vadd.s32 1, %v14268_v14 }
 0x3ff   : > { %vm2118_vm13 = vcmp.lt.s32.totalorder %v18358_v23, 2  ;;  %vm2119_vm14 = vcmp.eq.s32.totalorder %v18358_v23, 0  ;;  %vm2122_vm15 = vcmp.eq.s32.totalorder %v18358_v23, 2  ;;  %v2185_v30 = vadd.s32 1, %v18374_v49 }
 0x400   : > { %v5426_v50 = vor.u32 %v5425_v18, %v5424_v25  ;;  %v5429_v44 = vshll.u32 %v5428_v26, 23  ;;  %v5455_v33 = vand.u32 2147483647, %v18356_v7  ;;  %vm5466_vm0 = vcmp.gt.s32.totalorder %v5465_v54, 0  ;;  %v18447_v26 = vpop.f32.mrf.mxu0 }
 0x401   : > { %v15035_v3 = vpop.eup %15034  ;;  %v2182_v37 = vmul.u32 %v18363_v41, %v2166_v60  ;;  %vm2184_vm1 = vc.u32 %v18391_v28, %v18373_v59  ;;  %v5467_v22 = vsel %vm5466_vm0, %v5465_v54, 0  ;;  %v5438_v31 = vsel %vm5353_vm6, %v5437_v45, %v18333_v42 }
 0x402   : > { %v15037_v53 = vpop.eup %15036  ;;  %v2123_v20 = vxor.u32 2147483648, %v15035_v3  ;;  %v5430_v13 = vor.u32 4788187, %v5429_v44  ;;  %v2186_v62 = vsel %vm2184_vm1, %v2185_v30, %v18374_v49  ;;  %v5433_v40 = vcvt.s32.f32 %v5426_v50 }
 0x403   : > { %v2120_v16 = vxor.u32 2147483648, %v15037_v53  ;;  %v2187_v41 = vadd.s32 %v2186_v62, %v2182_v37  ;;  %v5469_v42 = vand.u32 31, %v5467_v22  ;;  %v5440_v9 = vsel %vm18380_vm11, 0, %v5438_v31 }
 0x404   : > { %v2124_v61 = vsel %vm2122_vm15, %v2123_v20, %v15037_v53  ;;  %v8829_v11 = vsel %vm8827_vm7, %v2123_v20, %v15037_v53  ;;  %v5431_v47 = vand.u32 2147483647, %v5430_v13  ;;  %v5444_v27 = vadd.s32 3, %v5440_v9 }
 0x405   : > { %v2121_v5 = vsel %vm2119_vm14, %v15035_v3, %v2120_v16  ;;  %v8826_v38 = vsel %vm8824_vm9, %v15035_v3, %v2120_v16  ;;  %v2188_v52 = vadd.s32 536870912, %v2187_v41  ;;  %v5470_v12 = vsub.s32 32, %v5469_v42 }
 0x406   : > { %v2125_v43 = vsel %vm2118_vm13, %v2121_v5, %v2124_v61  ;;  %v8830_v15 = vsel %vm8823_vm10, %v8826_v38, %v8829_v11  ;;  %v5434_v63 = vmul.f32 %v5433_v40, %v5431_v47  ;;  %v5462_v46 = vand.u32 8388607, %v5455_v33 }
 0x407   : > { %v2126_v2 = vsel %vm2115_vm12, nan, %v2125_v43  ;;  %v8831_v36 = vsel %vm2115_vm12, nan, %v8830_v15  ;;  %v18426_v48 = vshrl.u32 %v2188_v52, 30  ;;  %v5473_v19 = vshrl.u32 %v15258_v4, %v5470_v12 }
 0x408   : > { %7237 = vst [vmem:[%s15815_s20 + $0x70] sm:$0xff] %v2126_v2  ;;  %13893 = vst [vmem:[%s15815_s20 + $0x270] sm:$0xff] %v8831_v36  ;;  %v5435_v23 = vxor.u32 2147483648, %v5434_v63  ;;  %v5476_v32 = vshrl.u32 %v15259_v6, %v5470_v12  ;;  %v5479_v39 = vshrl.u32 %v15260_v8, %v5470_v12  ;;  %v5482_v35 = vshrl.u32 %v15261_v10, %v5470_v12 }
 0x409   : > { %v2190_v1 = vshll.u32 %v18426_v48, 30  ;;  %v5472_v55 = vshll.u32 %v15257_v0, %v5469_v42  ;;  %v5475_v56 = vshll.u32 %v15258_v4, %v5469_v42  ;;  %v5468_v14 = vshrl.u32 %v5467_v22, 5 }
 0x40a   : > { %v5436_v34 = vsel %vm5353_vm6, %v5435_v23, %v5434_v63  ;;  %v5478_v45 = vshll.u32 %v15259_v6, %v5469_v42  ;;  %v5481_v60 = vshll.u32 %v15260_v8, %v5469_v42  ;;  %vm2129_vm3 = vcmp.lt.s32.totalorder %v18270_v58, 0 }
 0x40b   : > { %v5439_v49 = vsel %vm18380_vm11, %v18178_v29, %v5436_v34  ;;  %v18440_v24 = vsub.s32 %v2187_v41, %v2190_v1  ;;  %v5474_v25 = vor.u32 %v5473_v19, %v5472_v55  ;;  %v5477_v18 = vor.u32 %v5476_v32, %v5475_v56 }
 0x40c   : > { %15038 = vcosq.f32 %v5439_v49  ;;  %v5480_v51 = vor.u32 %v5479_v39, %v5478_v45  ;;  %v5483_v54 = vor.u32 %v5482_v35, %v5481_v60  ;;  %v5484_v30 = vshll.u32 %v15261_v10, %v5469_v42 }
 0x40d   : > { %15040 = vsinq.f32 %v5439_v49  ;;  %v2193_v57 = vsub.s32 0, %v18440_v24  ;;  %v5485_v3 = vshrl.u32 %v15262_v17, %v5470_v12  ;;  %v18452_v50 = vand.u32 3, %v5444_v27 }
 0x40e   : > { %v18454_v44 = vand.u32 3, %v5440_v9  ;;  %v5463_v20 = vor.u32 8388608, %v5462_v46  ;;  %v5471_v37 = vshrl.u32 %v15257_v0, %v5470_v12  ;;  %vm5487_vm4 = vcmp.lt.s32.totalorder %v5468_v14, 1 }
 0x40f   : > { %v14141_v53 = vmin.u32 %v2193_v57, %v18440_v24  ;;  %v5486_v22 = vor.u32 %v5485_v3, %v5484_v30  ;;  %v2234_v16 = vand.u32 2139095040, %v18447_v26  ;;  %vm18461_vm5 = vcmp.le.f32.partialorder %v2127_v21, 0.7853982 }
 0x410   : > { %v2213_v62 = vsub.s32 4, %v18426_v48  ;;  %vm5489_vm2 = vcmp.lt.s32.totalorder %v5468_v14, 3  ;;  %vm5490_vm6 = vcmp.lt.s32.totalorder %v5468_v14, 4  ;;  %v5495_v11 = vsel %vm5487_vm4, %v5474_v25, %v5477_v18 }
 0x411   : > { %v2195_v31 = vclz %v14141_v53  ;;  %v5492_v61 = vsel %vm5490_vm6, %v5480_v51, 2102212464  ;;  %v5496_v40 = vsel %vm5490_vm6, %v5483_v54, 920167782  ;;  %v5499_v41 = vsel %vm5487_vm4, %v5477_v18, %v5480_v51 }
 0x412   : > { %vm12123_vm7 = vcmp.eq.s32.totalorder %v18454_v44, 2  ;;  %vm5488_vm8 = vcmp.lt.s32.totalorder %v5468_v14, 2  ;;  %v5497_v21 = vsel %vm5489_vm2, %v5480_v51, %v5496_v40  ;;  %v5500_v38 = vsel %vm5490_vm6, %v5486_v22, 1326507024 }
 0x413   : > { %v14142_v5 = vadd.s32 4294967294, %v2195_v31  ;;  %vm5447_vm9 = vcmp.eq.s32.totalorder %v18452_v50, 0  ;;  %vm12120_vm10 = vcmp.eq.s32.totalorder %v18454_v44, 0  ;;  %v5491_v47 = vsel %vm5487_vm4, %v5471_v37, %v5474_v25 }
 0x414   : > { %v5501_v42 = vsel %vm5489_vm2, %v5483_v54, %v5500_v38  ;;  %v5503_v43 = vshll.u32 %v5463_v20, 8  ;;  %v2235_v15 = vshrl.u32 %v2234_v16, 23  ;;  %vm5446_vm11 = vcmp.lt.s32.totalorder %v18452_v50, 2 }
 0x415   : > { %vm12119_vm12 = vcmp.lt.s32.totalorder %v18454_v44, 2  ;;  %vm14143_vm13 = vcmp.lt.s32.totalorder %v14142_v5, 0  ;;  %v5493_v9 = vsel %vm5489_vm2, %v5477_v18, %v5492_v61  ;;  %v5498_v52 = vsel %vm5488_vm8, %v5495_v11, %v5497_v21 }
 0x416   : > { %v5502_v2 = vsel %vm5488_vm8, %v5499_v41, %v5501_v42  ;;  %vm5443_vm14 = vweird.f32 %v18178_v29  ;;  %v2183_v36 = vadd.s32 %v18373_v59, %v18391_v28  ;;  %v2198_v63 = vsel %vm14143_vm13, 0, %v14142_v5 }
 0x417   : > { %v18482_v12 = vmul.u32.u64.low %v5503_v43, %v5502_v2  ;;  %v18483_v23 = vmul.u32.u64.high %v5503_v43, %v5502_v2, %v18482_v12  ;;  %v2199_v27 = vsub.s32 32, %v2198_v63  ;;  %v2203_v1 = vsub.s32 4294967266, %v2198_v63 }
 0x418   : > { %v2214_v19 = vsel %vm2129_vm3, %v2213_v62, %v18426_v48  ;;  %v14144_v32 = vadd.s32 4294967169, %v2235_v15  ;;  %vm5450_vm15 = vcmp.eq.s32.totalorder %v18452_v50, 2  ;;  %v5494_v34 = vsel %vm5488_vm8, %v5491_v47, %v5493_v9 }
 0x419   : > { %v18490_v46 = vmul.u32.u64.low %v5503_v43, %v5498_v52  ;;  %v18491_v39 = vmul.u32.u64.high %v5503_v43, %v5498_v52, %v18490_v46  ;;  %v15039_v59 = vpop.eup %15038  ;;  %v2200_v28 = vshll.u32 %v18440_v24, %v2198_v63  ;;  %v2201_v35 = vshrl.u32 %v2183_v36, %v2199_v27 }
 0x41a   : > { %v2204_v49 = vadd.s32 127, %v2203_v1  ;;  %v2241_v55 = vadd.s32 1, %v14144_v32  ;;  %v15041_v56 = vpop.eup %15040  ;;  %v5451_v45 = vxor.u32 2147483648, %v15039_v59  ;;  %v2216_v48 = vsel %vm18461_vm5, 0, %v2214_v19 }
 0x41b   : > { %vm5512_vm0 = vc.u32 %v18483_v23, %v18490_v46  ;;  %v2231_v14 = vand.u32 2147483647, %v18447_v26  ;;  %v5448_v60 = vxor.u32 2147483648, %v15041_v56  ;;  %v2202_v57 = vor.u32 %v2201_v35, %v2200_v28 }
 0x41c   : > { %v2205_v25 = vshll.u32 %v2204_v49, 23  ;;  %vm2242_vm1 = vcmp.gt.s32.totalorder %v2241_v55, 0  ;;  %v5452_v24 = vsel %vm5450_vm15, %v5451_v45, %v15041_v56  ;;  %v12125_v18 = vsel %vm12123_vm7, %v5451_v45, %v15041_v56 }
 0x41d   : > { %v5510_v51 = vmul.u32 %v5503_v43, %v5494_v34  ;;  %v5513_v54 = vadd.s32 1, %v18491_v39  ;;  %v5449_v30 = vsel %vm5447_vm9, %v15039_v59, %v5448_v60  ;;  %v12122_v3 = vsel %vm12120_vm10, %v15039_v59, %v5448_v60 }
 0x41e   : > { %v2206_v53 = vor.u32 4788187, %v2205_v25  ;;  %v2243_v20 = vsel %vm2242_vm1, %v2241_v55, 0  ;;  %v5453_v37 = vsel %vm5446_vm11, %v5449_v30, %v5452_v24  ;;  %v12126_v22 = vsel %vm12119_vm12, %v12122_v3, %v12125_v18  ;;  %v18559_v24 = vpop.f32.mrf.mxu1 }
 0x41f   : > { %v2209_v16 = vcvt.s32.f32 %v2202_v57  ;;  %v5514_v31 = vsel %vm5512_vm0, %v5513_v54, %v18491_v39  ;;  %v5454_v62 = vsel %vm5443_vm14, nan, %v5453_v37  ;;  %v12127_v61 = vsel %vm5443_vm14, nan, %v12126_v22 }
 0x420   : > { %v2207_v11 = vand.u32 2147483647, %v2206_v53  ;;  %v5515_v40 = vadd.s32 %v5514_v31, %v5510_v51  ;;  %7269 = vst [vmem:[%s15815_s20 + $0x170] sm:$0xff] %v5454_v62  ;;  %13925 = vst [vmem:[%s15815_s20 + $0x370] sm:$0xff] %v12127_v61  ;;  %v2245_v50 = vand.u32 31, %v2243_v20  ;;  %v2220_v5 = vadd.s32 3, %v2216_v48 }
 0x421   : > { %v2238_v21 = vand.u32 8388607, %v2231_v14  ;;  %v18527_v43 = vshrl.u32 %v2243_v20, 5  ;;  %v18549_v13 = vand.u32 3, %v2216_v48  ;;  %vm2219_vm10 = vweird.f32 %v18270_v58 }
 0x422   : > { %v2210_v41 = vmul.f32 %v2209_v16, %v2207_v11  ;;  %v5516_v44 = vadd.s32 536870912, %v5515_v40  ;;  %v2246_v38 = vsub.s32 32, %v2245_v50  ;;  %v2248_v29 = vshll.u32 %v15257_v0, %v2245_v50 }
 0x423   : > { %v2251_v9 = vshll.u32 %v15258_v4, %v2245_v50  ;;  %v2257_v12 = vshll.u32 %v15260_v8, %v2245_v50  ;;  %v2239_v19 = vor.u32 8388608, %v2238_v21  ;;  %v2254_v34 = vshll.u32 %v15259_v6, %v2245_v50 }
 0x424   : > { %v2211_v47 = vxor.u32 2147483648, %v2210_v41  ;;  %v18525_v42 = vshrl.u32 %v5516_v44, 30  ;;  %v2249_v15 = vshrl.u32 %v15258_v4, %v2246_v38  ;;  %v2252_v52 = vshrl.u32 %v15259_v6, %v2246_v38 }
 0x425   : > { %v2255_v2 = vshrl.u32 %v15260_v8, %v2246_v38  ;;  %v2258_v27 = vshrl.u32 %v15261_v10, %v2246_v38  ;;  %v2260_v49 = vshll.u32 %v15261_v10, %v2245_v50  ;;  %v2261_v55 = vshrl.u32 %v15262_v17, %v2246_v38 }
 0x426   : > { %v2212_v36 = vsel %vm2129_vm3, %v2211_v47, %v2210_v41  ;;  %v5518_v63 = vshll.u32 %v18525_v42, 30  ;;  %v2250_v32 = vor.u32 %v2249_v15, %v2248_v29  ;;  %v2253_v59 = vor.u32 %v2252_v52, %v2251_v9 }
 0x427   : > { %v2215_v1 = vsel %vm18461_vm5, %v18270_v58, %v2212_v36  ;;  %v2259_v28 = vor.u32 %v2258_v27, %v2257_v12  ;;  %v2256_v35 = vor.u32 %v2255_v2, %v2254_v34  ;;  %vm2266_vm3 = vcmp.lt.s32.totalorder %v18527_v43, 4 }
 0x428   : > { %15042 = vcosq.f32 %v2215_v1  ;;  %v18543_v39 = vsub.s32 %v5515_v40, %v5518_v63  ;;  %v2262_v45 = vor.u32 %v2261_v55, %v2260_v49  ;;  %vm2263_vm4 = vcmp.lt.s32.totalorder %v18527_v43, 1  ;;  %v18614_v49 = vpop.f32.mrf.mxu0 }
 0x429   : > { %15044 = vsinq.f32 %v2215_v1  ;;  %v2272_v60 = vsel %vm2266_vm3, %v2259_v28, 920167782  ;;  %vm5457_vm5 = vcmp.lt.s32.totalorder %v18356_v7, 0  ;;  %vm2265_vm2 = vcmp.lt.s32.totalorder %v18527_v43, 3 }
 0x42a   : > { %v5521_v56 = vsub.s32 0, %v18543_v39  ;;  %v2271_v25 = vsel %vm2263_vm4, %v2250_v32, %v2253_v59  ;;  %v2221_v18 = vand.u32 3, %v2220_v5  ;;  %vm2264_vm6 = vcmp.lt.s32.totalorder %v18527_v43, 2 }
 0x42b   : > { %v2273_v48 = vsel %vm2265_vm2, %v2256_v35, %v2272_v60  ;;  %v18564_v51 = vshll.u32 %v2239_v19, 8  ;;  %v2247_v30 = vshrl.u32 %v15257_v0, %v2246_v38  ;;  %v2268_v3 = vsel %vm2266_vm3, %v2256_v35, 2102212464 }
 0x42c   : > { %v14269_v57 = vmin.u32 %v5521_v56, %v18543_v39  ;;  %v2275_v53 = vsel %vm2263_vm4, %v2253_v59, %v2256_v35  ;;  %vm8930_vm7 = vcmp.eq.s32.totalorder %v18549_v13, 2  ;;  %v5541_v20 = vsub.s32 4, %v18525_v42 }
 0x42d   : > { %v2274_v37 = vsel %vm2264_vm6, %v2271_v25, %v2273_v48  ;;  %v2276_v22 = vsel %vm2266_vm3, %v2262_v45, 1326507024  ;;  %v5562_v16 = vand.u32 2139095040, %v18559_v24  ;;  %vm8927_vm8 = vcmp.eq.s32.totalorder %v18549_v13, 0 }
 0x42e   : > { %v5523_v54 = vclz %v14269_v57  ;;  %v2277_v62 = vsel %vm2265_vm2, %v2259_v28, %v2276_v22  ;;  %v18582_v61 = vmul.u32.u64.low %v18564_v51, %v2274_v37  ;;  %v18583_v11 = vmul.u32.u64.high %v18564_v51, %v2274_v37, %v18582_v61 }
 0x42f   : > { %vm8926_vm9 = vcmp.lt.s32.totalorder %v18549_v13, 2  ;;  %v2267_v40 = vsel %vm2263_vm4, %v2247_v30, %v2250_v32  ;;  %v2269_v50 = vsel %vm2265_vm2, %v2253_v59, %v2268_v3  ;;  %v2278_v41 = vsel %vm2264_vm6, %v2275_v53, %v2277_v62 }
 0x430   : > { %v14270_v31 = vadd.s32 4294967294, %v5523_v54  ;;  %v5563_v44 = vshrl.u32 %v5562_v16, 23  ;;  %vm2222_vm11 = vcmp.lt.s32.totalorder %v2221_v18, 2  ;;  %vm2223_vm13 = vcmp.eq.s32.totalorder %v2221_v18, 0 }
 0x431   : > { %v18595_v5 = vmul.u32.u64.low %v18564_v51, %v2278_v41  ;;  %v18596_v21 = vmul.u32.u64.high %v18564_v51, %v2278_v41, %v18595_v5  ;;  %vm2226_vm14 = vcmp.eq.s32.totalorder %v2221_v18, 2  ;;  %v5511_v29 = vadd.s32 %v18490_v46, %v18483_v23 }
 0x432   : > { %vm14271_vm12 = vcmp.lt.s32.totalorder %v14270_v31, 0  ;;  %v14272_v47 = vadd.s32 4294967169, %v5563_v44  ;;  %v2270_v52 = vsel %vm2264_vm6, %v2267_v40, %v2269_v50  ;;  %v5542_v36 = vsel %vm5457_vm5, %v5541_v20, %v18525_v42 }
 0x433   : > { %v5526_v38 = vsel %vm14271_vm12, 0, %v14270_v31  ;;  %v2289_v63 = vadd.s32 1, %v18583_v11  ;;  %v5559_v12 = vand.u32 2147483647, %v18559_v24  ;;  %v2286_v43 = vmul.u32 %v18564_v51, %v2270_v52 }
 0x434   : > { %v5527_v15 = vsub.s32 32, %v5526_v38  ;;  %v5531_v9 = vsub.s32 4294967266, %v5526_v38  ;;  %v5569_v27 = vadd.s32 1, %v14272_v47  ;;  %v5528_v32 = vshll.u32 %v18543_v39, %v5526_v38 }
 0x435   : > { %v15043_v2 = vpop.eup %15042  ;;  %vm2288_vm15 = vc.u32 %v18596_v21, %v18582_v61  ;;  %v5566_v48 = vand.u32 8388607, %v5559_v12  ;;  %v2338_v3 = vand.u32 2139095040, %v18614_v49  ;;  %vm18634_vm1 = vcmp.le.f32.partialorder %v5455_v33, 0.7853982 }
 0x436   : > { %v15045_v1 = vpop.eup %15044  ;;  %v2227_v19 = vxor.u32 2147483648, %v15043_v2  ;;  %v5529_v23 = vshrl.u32 %v5511_v29, %v5527_v15  ;;  %v5532_v46 = vadd.s32 127, %v5531_v9  ;;  %vm5570_vm0 = vcmp.gt.s32.totalorder %v5569_v27, 0 }
 0x437   : > { %v2224_v34 = vxor.u32 2147483648, %v15045_v1  ;;  %v2290_v56 = vsel %vm2288_vm15, %v2289_v63, %v18583_v11  ;;  %v5571_v45 = vsel %vm5570_vm0, %v5569_v27, 0  ;;  %v5544_v58 = vsel %vm18634_vm1, 0, %v5542_v36 }
 0x438   : > { %v2228_v42 = vsel %vm2226_vm14, %v2227_v19, %v15045_v1  ;;  %v8932_v59 = vsel %vm8930_vm7, %v2227_v19, %v15045_v1  ;;  %v5530_v28 = vor.u32 %v5529_v23, %v5528_v32  ;;  %v5533_v35 = vshll.u32 %v5532_v46, 23 }
 0x439   : > { %v2225_v39 = vsel %vm2223_vm13, %v15043_v2, %v2224_v34  ;;  %v8929_v55 = vsel %vm8927_vm8, %v15043_v2, %v2224_v34  ;;  %v2291_v30 = vadd.s32 %v2290_v56, %v2286_v43  ;;  %v5573_v20 = vand.u32 31, %v5571_v45 }
 0x43a   : > { %v2229_v60 = vsel %vm2222_vm11, %v2225_v39, %v2228_v42  ;;  %v8933_v57 = vsel %vm8926_vm9, %v8929_v55, %v8932_v59  ;;  %v5534_v25 = vor.u32 4788187, %v5533_v35  ;;  %v5537_v53 = vcvt.s32.f32 %v5530_v28 }
 0x43b   : > { %v2230_v51 = vsel %vm2219_vm10, nan, %v2229_v60  ;;  %v8934_v54 = vsel %vm2219_vm10, nan, %v8933_v57  ;;  %v2292_v37 = vadd.s32 536870912, %v2291_v30  ;;  %v5574_v16 = vsub.s32 32, %v5573_v20 }
 0x43c   : > { %7238 = vst [vmem:[%s15815_s20 + $0x78] sm:$0xff] %v2230_v51  ;;  %13894 = vst [vmem:[%s15815_s20 + $0x278] sm:$0xff] %v8934_v54  ;;  %v5535_v18 = vand.u32 2147483647, %v5534_v25  ;;  %v5567_v62 = vor.u32 8388608, %v5566_v48  ;;  %v5572_v11 = vshrl.u32 %v5571_v45, 5  ;;  %v5576_v41 = vshll.u32 %v15257_v0, %v5573_v20 }
 0x43d   : > { %v18640_v31 = vshrl.u32 %v2292_v37, 30  ;;  %v2339_v40 = vshrl.u32 %v2338_v3, 23  ;;  %v5577_v44 = vshrl.u32 %v15258_v4, %v5574_v16  ;;  %v5580_v33 = vshrl.u32 %v15259_v6, %v5574_v16 }
 0x43e   : > { %v5538_v22 = vmul.f32 %v5537_v53, %v5535_v18  ;;  %v5579_v38 = vshll.u32 %v15258_v4, %v5573_v20  ;;  %v5583_v47 = vshrl.u32 %v15260_v8, %v5574_v16  ;;  %v5586_v29 = vshrl.u32 %v15261_v10, %v5574_v16 }
 0x43f   : > { %v2294_v5 = vshll.u32 %v18640_v31, 30  ;;  %v5582_v9 = vshll.u32 %v15259_v6, %v5573_v20  ;;  %v5585_v52 = vshll.u32 %v15260_v8, %v5573_v20  ;;  %v5589_v2 = vshrl.u32 %v15262_v17, %v5574_v16 }
 0x440   : > { %v5539_v50 = vxor.u32 2147483648, %v5538_v22  ;;  %v5578_v27 = vor.u32 %v5577_v44, %v5576_v41  ;;  %v5588_v1 = vshll.u32 %v15261_v10, %v5573_v20  ;;  %v5581_v19 = vor.u32 %v5580_v33, %v5579_v38 }
 0x441   : > { %v18657_v63 = vsub.s32 %v2291_v30, %v2294_v5  ;;  %v5584_v32 = vor.u32 %v5583_v47, %v5582_v9  ;;  %v5587_v23 = vor.u32 %v5586_v29, %v5585_v52  ;;  %v5548_v46 = vadd.s32 3, %v5544_v58 }
 0x442   : > { %v5540_v15 = vsel %vm5457_vm5, %v5539_v50, %v5538_v22  ;;  %v18661_v43 = vand.u32 3, %v5544_v58  ;;  %v5590_v42 = vor.u32 %v5589_v2, %v5588_v1  ;;  %v5607_v59 = vshll.u32 %v5567_v62, 8 }
 0x443   : > { %v5543_v36 = vsel %vm18634_vm1, %v18356_v7, %v5540_v15  ;;  %v2297_v34 = vsub.s32 0, %v18657_v63  ;;  %v14148_v28 = vadd.s32 4294967169, %v2339_v40  ;;  %v5575_v39 = vshrl.u32 %v15257_v0, %v5574_v16 }
 0x444   : > { %15046 = vcosq.f32 %v5543_v36  ;;  %vm5591_vm3 = vcmp.lt.s32.totalorder %v5572_v11, 1  ;;  %vm5594_vm4 = vcmp.lt.s32.totalorder %v5572_v11, 4  ;;  %vm5592_vm5 = vcmp.lt.s32.totalorder %v5572_v11, 2 }
 0x445   : > { %15048 = vsinq.f32 %v5543_v36  ;;  %v14145_v35 = vmin.u32 %v2297_v34, %v18657_v63  ;;  %v5596_v55 = vsel %vm5594_vm4, %v5584_v32, 2102212464  ;;  %v5599_v56 = vsel %vm5591_vm3, %v5578_v27, %v5581_v19 }
 0x446   : > { %v5600_v45 = vsel %vm5594_vm4, %v5587_v23, 920167782  ;;  %vm5593_vm2 = vcmp.lt.s32.totalorder %v5572_v11, 3  ;;  %v5595_v57 = vsel %vm5591_vm3, %v5575_v39, %v5578_v27  ;;  %v5603_v25 = vsel %vm5591_vm3, %v5581_v19, %v5584_v32 }
 0x447   : > { %v2299_v60 = vclz %v14145_v35  ;;  %v5597_v48 = vsel %vm5593_vm2, %v5581_v19, %v5596_v55  ;;  %v5601_v51 = vsel %vm5593_vm2, %v5584_v32, %v5600_v45  ;;  %v5604_v54 = vsel %vm5594_vm4, %v5590_v42, 1326507024 }
 0x448   : > { %v2345_v30 = vadd.s32 1, %v14148_v28  ;;  %v5549_v3 = vand.u32 3, %v5548_v46  ;;  %v5602_v53 = vsel %vm5592_vm5, %v5599_v56, %v5601_v51  ;;  %v5605_v20 = vsel %vm5593_vm2, %v5587_v23, %v5604_v54 }
 0x449   : > { %v14146_v18 = vadd.s32 4294967294, %v2299_v60  ;;  %v5598_v13 = vsel %vm5592_vm5, %v5595_v57, %v5597_v48  ;;  %v5606_v37 = vsel %vm5592_vm5, %v5603_v25, %v5605_v20  ;;  %vm5547_vm8 = vweird.f32 %v18356_v7 }
 0x44a   : > { %v18668_v22 = vmul.u32.u64.low %v5607_v59, %v5602_v53  ;;  %v18669_v58 = vmul.u32.u64.high %v5607_v59, %v5602_v53, %v18668_v22  ;;  %v18672_v16 = vmul.u32.u64.low %v5607_v59, %v5606_v37  ;;  %v18673_v62 = vmul.u32.u64.high %v5607_v59, %v5606_v37, %v18672_v16 }
 0x44b   : > { %vm14147_vm6 = vcmp.lt.s32.totalorder %v14146_v18, 0  ;;  %vm2346_vm7 = vcmp.gt.s32.totalorder %v2345_v30, 0  ;;  %vm12222_vm9 = vcmp.lt.s32.totalorder %v18661_v43, 2  ;;  %vm12223_vm10 = vcmp.eq.s32.totalorder %v18661_v43, 0 }
 0x44c   : > { %v2302_v40 = vsel %vm14147_vm6, 0, %v14146_v18  ;;  %v2347_v50 = vsel %vm2346_vm7, %v2345_v30, 0  ;;  %vm12226_vm11 = vcmp.eq.s32.totalorder %v18661_v43, 2  ;;  %vm2233_vm12 = vcmp.lt.s32.totalorder %v18447_v26, 0 }
 0x44d   : > { %v2287_v11 = vadd.s32 %v18582_v61, %v18596_v21  ;;  %v2303_v41 = vsub.s32 32, %v2302_v40  ;;  %v2307_v44 = vsub.s32 4294967266, %v2302_v40  ;;  %vm5551_vm13 = vcmp.eq.s32.totalorder %v5549_v3, 0 }
 0x44e   : > { %v5614_v33 = vmul.u32 %v5607_v59, %v5598_v13  ;;  %v5617_v5 = vadd.s32 1, %v18669_v58  ;;  %v2349_v38 = vand.u32 31, %v2347_v50  ;;  %v2304_v29 = vshll.u32 %v18657_v63, %v2302_v40 }
 0x44f   : > { %v2305_v15 = vshrl.u32 %v2287_v11, %v2303_v41  ;;  %v2308_v9 = vadd.s32 127, %v2307_v44  ;;  %vm5616_vm14 = vc.u32 %v18673_v62, %v18668_v22  ;;  %vm5554_vm15 = vcmp.eq.s32.totalorder %v5549_v3, 2 }
 0x450   : > { %v5618_v61 = vsel %vm5616_vm14, %v5617_v5, %v18669_v58  ;;  %v2335_v21 = vand.u32 2147483647, %v18614_v49  ;;  %vm18690_vm0 = vcmp.le.f32.partialorder %v2231_v14, 0.7853982  ;;  %v2317_v46 = vsub.s32 4, %v18640_v31 }
 0x451   : > { %v15047_v47 = vpop.eup %15046  ;;  %v2306_v63 = vor.u32 %v2305_v15, %v2304_v29  ;;  %v2309_v1 = vshll.u32 %v2308_v9, 23  ;;  %v5619_v19 = vadd.s32 %v5618_v61, %v5614_v33  ;;  %v2350_v34 = vsub.s32 32, %v2349_v38 }
 0x452   : > { %v15049_v52 = vpop.eup %15048  ;;  %v5555_v2 = vxor.u32 2147483648, %v15047_v47  ;;  %vm5550_vm1 = vcmp.lt.s32.totalorder %v5549_v3, 2  ;;  %v2342_v55 = vand.u32 8388607, %v2335_v21  ;;  %v2318_v25 = vsel %vm2233_vm12, %v2317_v46, %v18640_v31 }
 0x453   : > { %v5552_v36 = vxor.u32 2147483648, %v15049_v52  ;;  %v2310_v59 = vor.u32 4788187, %v2309_v1  ;;  %v5620_v39 = vadd.s32 536870912, %v5619_v19  ;;  %v2313_v57 = vcvt.s32.f32 %v2306_v63 }
 0x454   : > { %v5556_v32 = vsel %vm5554_vm15, %v5555_v2, %v15049_v52  ;;  %v12228_v23 = vsel %vm12226_vm11, %v5555_v2, %v15049_v52  ;;  %v2353_v48 = vshrl.u32 %v15258_v4, %v2350_v34  ;;  %v2359_v51 = vshrl.u32 %v15260_v8, %v2350_v34 }
 0x455   : > { %v5553_v42 = vsel %vm5551_vm13, %v15047_v47, %v5552_v36  ;;  %v12225_v14 = vsel %vm12223_vm10, %v15047_v47, %v5552_v36  ;;  %v2311_v60 = vand.u32 2147483647, %v2310_v59  ;;  %v18713_v43 = vshrl.u32 %v5620_v39, 30  ;;  %v18746_v59 = vpop.f32.mrf.mxu1 }
 0x456   : > { %v5557_v28 = vsel %vm5550_vm1, %v5553_v42, %v5556_v32  ;;  %v12229_v35 = vsel %vm12222_vm9, %v12225_v14, %v12228_v23  ;;  %v2356_v30 = vshrl.u32 %v15259_v6, %v2350_v34  ;;  %v2358_v7 = vshll.u32 %v15259_v6, %v2349_v38 }
 0x457   : > { %v5558_v56 = vsel %vm5547_vm8, nan, %v5557_v28  ;;  %v12230_v45 = vsel %vm5547_vm8, nan, %v12229_v35  ;;  %v2314_v54 = vmul.f32 %v2313_v57, %v2311_v60  ;;  %v2362_v3 = vshrl.u32 %v15261_v10, %v2350_v34 }
 0x458   : > { %7270 = vst [vmem:[%s15815_s20 + $0x178] sm:$0xff] %v5558_v56  ;;  %13926 = vst [vmem:[%s15815_s20 + $0x378] sm:$0xff] %v12230_v45  ;;  %v5622_v18 = vshll.u32 %v18713_v43, 30  ;;  %v2348_v53 = vshrl.u32 %v2347_v50, 5  ;;  %v2352_v20 = vshll.u32 %v15257_v0, %v2349_v38  ;;  %v2355_v31 = vshll.u32 %v15258_v4, %v2349_v38 }
 0x459   : > { %v2315_v13 = vxor.u32 2147483648, %v2314_v54  ;;  %v2360_v37 = vor.u32 %v2359_v51, %v2358_v7  ;;  %v2361_v58 = vshll.u32 %v15260_v8, %v2349_v38  ;;  %v2365_v16 = vshrl.u32 %v15262_v17, %v2350_v34 }
 0x45a   : > { %v2320_v40 = vsel %vm18690_vm0, 0, %v2318_v25  ;;  %v18727_v11 = vsub.s32 %v5619_v19, %v5622_v18  ;;  %v2354_v41 = vor.u32 %v2353_v48, %v2352_v20  ;;  %v2357_v50 = vor.u32 %v2356_v30, %v2355_v31 }
 0x45b   : > { %v2316_v44 = vsel %vm2233_vm12, %v2315_v13, %v2314_v54  ;;  %v2363_v33 = vor.u32 %v2362_v3, %v2361_v58  ;;  %v2364_v5 = vshll.u32 %v15261_v10, %v2349_v38  ;;  %v2343_v15 = vor.u32 8388608, %v2342_v55 }
 0x45c   : > { %v2319_v47 = vsel %vm18690_vm0, %v18447_v26, %v2316_v44  ;;  %v5625_v29 = vsub.s32 0, %v18727_v11  ;;  %vm2370_vm3 = vcmp.lt.s32.totalorder %v2348_v53, 4  ;;  %v2324_v9 = vadd.s32 3, %v2320_v40 }
 0x45d   : > { %15050 = vcosq.f32 %v2319_v47  ;;  %v2366_v52 = vor.u32 %v2365_v16, %v2364_v5  ;;  %v2372_v2 = vsel %vm2370_vm3, %v2360_v37, 2102212464  ;;  %vm5561_vm4 = vcmp.lt.s32.totalorder %v18559_v24, 0 }
 0x45e   : > { %15052 = vsinq.f32 %v2319_v47  ;;  %v14273_v61 = vmin.u32 %v5625_v29, %v18727_v11  ;;  %v2351_v38 = vshrl.u32 %v15257_v0, %v2350_v34  ;;  %vm2367_vm5 = vcmp.lt.s32.totalorder %v2348_v53, 1 }
 0x45f   : > { %v18740_v36 = vand.u32 3, %v2320_v40  ;;  %vm2369_vm2 = vcmp.lt.s32.totalorder %v2348_v53, 3  ;;  %v2375_v27 = vsel %vm2367_vm5, %v2354_v41, %v2357_v50  ;;  %v2376_v63 = vsel %vm2370_vm3, %v2363_v33, 920167782 }
 0x460   : > { %v5627_v1 = vclz %v14273_v61  ;;  %v2371_v19 = vsel %vm2367_vm5, %v2351_v38, %v2354_v41  ;;  %v2373_v32 = vsel %vm2369_vm2, %v2357_v50, %v2372_v2  ;;  %v2383_v23 = vshll.u32 %v2343_v15, 8 }
 0x461   : > { %vm2368_vm6 = vcmp.lt.s32.totalorder %v2348_v53, 2  ;;  %v2377_v46 = vsel %vm2369_vm2, %v2360_v37, %v2376_v63  ;;  %v2379_v42 = vsel %vm2367_vm5, %v2357_v50, %v2360_v37  ;;  %v2380_v14 = vsel %vm2370_vm3, %v2366_v52, 1326507024 }
 0x462   : > { %vm18750_vm7 = vcmp.le.f32.partialorder %v5559_v12, 0.7853982  ;;  %v14274_v28 = vadd.s32 4294967294, %v5627_v1  ;;  %v5645_v35 = vsub.s32 4, %v18713_v43  ;;  %v2378_v39 = vsel %vm2368_vm6, %v2375_v27, %v2377_v46 }
 0x463   : > { %v2381_v55 = vsel %vm2369_vm2, %v2363_v33, %v2380_v14  ;;  %v2374_v56 = vsel %vm2368_vm6, %v2371_v19, %v2373_v32  ;;  %v18756_v60 = vmul.u32.u64.low %v2383_v23, %v2378_v39  ;;  %v18757_v57 = vmul.u32.u64.high %v2383_v23, %v2378_v39, %v18756_v60 }
 0x464   : > { %v2382_v45 = vsel %vm2368_vm6, %v2379_v42, %v2381_v55  ;;  %vm14275_vm8 = vcmp.lt.s32.totalorder %v14274_v28, 0  ;;  %v5666_v12 = vand.u32 2139095040, %v18746_v59  ;;  %v2325_v51 = vand.u32 3, %v2324_v9 }
 0x465   : > { %v18760_v25 = vmul.u32.u64.low %v2383_v23, %v2382_v45  ;;  %v18761_v48 = vmul.u32.u64.high %v2383_v23, %v2382_v45, %v18760_v25  ;;  %vm9030_vm9 = vcmp.eq.s32.totalorder %v18740_v36, 0  ;;  %vm9033_vm10 = vcmp.eq.s32.totalorder %v18740_v36, 2 }
 0x466   : > { %v5630_v54 = vsel %vm14275_vm8, 0, %v14274_v28  ;;  %vm9029_vm11 = vcmp.lt.s32.totalorder %v18740_v36, 2  ;;  %v5615_v30 = vadd.s32 %v18668_v22, %v18673_v62  ;;  %v5667_v18 = vshrl.u32 %v5666_v12, 23  ;;  %v18778_v22 = vpop.f32.mrf.mxu0 }
 0x467   : > { %v5631_v7 = vsub.s32 32, %v5630_v54  ;;  %v5635_v3 = vsub.s32 4294967266, %v5630_v54  ;;  %vm2323_vm12 = vweird.f32 %v18447_v26  ;;  %v5646_v53 = vsel %vm5561_vm4, %v5645_v35, %v18713_v43 }
 0x468   : > { %v2390_v20 = vmul.u32 %v2383_v23, %v2374_v56  ;;  %v2393_v31 = vadd.s32 1, %v18757_v57  ;;  %v5663_v13 = vand.u32 2147483647, %v18746_v59  ;;  %v5632_v37 = vshll.u32 %v18727_v11, %v5630_v54 }
 0x469   : > { %v5633_v58 = vshrl.u32 %v5615_v30, %v5631_v7  ;;  %v5636_v16 = vadd.s32 127, %v5635_v3  ;;  %vm2392_vm13 = vc.u32 %v18761_v48, %v18756_v60  ;;  %vm2326_vm14 = vcmp.lt.s32.totalorder %v2325_v51, 2 }
 0x46a   : > { %vm2327_vm15 = vcmp.eq.s32.totalorder %v2325_v51, 0  ;;  %v2394_v62 = vsel %vm2392_vm13, %v2393_v31, %v18757_v57  ;;  %v14276_v40 = vadd.s32 4294967169, %v5667_v18  ;;  %v15051_v43 = vpop.eup %15050  ;;  %vm2330_vm0 = vcmp.eq.s32.totalorder %v2325_v51, 2 }
 0x46b   : > { %v5634_v41 = vor.u32 %v5633_v58, %v5632_v37  ;;  %v5637_v44 = vshll.u32 %v5636_v16, 23  ;;  %v2395_v50 = vadd.s32 %v2394_v62, %v2390_v20  ;;  %v15053_v33 = vpop.eup %15052  ;;  %v2331_v5 = vxor.u32 2147483648, %v15051_v43 }
 0x46c   : > { %v5648_v11 = vsel %vm18750_vm7, 0, %v5646_v53  ;;  %v5673_v47 = vadd.s32 1, %v14276_v40  ;;  %v2442_v29 = vand.u32 2139095040, %v18778_v22  ;;  %v2328_v15 = vxor.u32 2147483648, %v15053_v33 }
 0x46d   : > { %v5638_v9 = vor.u32 4788187, %v5637_v44  ;;  %v2396_v52 = vadd.s32 536870912, %v2395_v50  ;;  %v5670_v2 = vand.u32 8388607, %v5663_v13  ;;  %v2332_v61 = vsel %vm2330_vm0, %v2331_v5, %v15053_v33 }
 0x46e   : > { %v9035_v38 = vsel %vm9033_vm10, %v2331_v5, %v15053_v33  ;;  %v5641_v27 = vcvt.s32.f32 %v5634_v41  ;;  %vm5674_vm1 = vcmp.gt.s32.totalorder %v5673_v47, 0  ;;  %v2329_v63 = vsel %vm2327_vm15, %v15051_v43, %v2328_v15 }
 0x46f   : > { %v9032_v1 = vsel %vm9030_vm9, %v15051_v43, %v2328_v15  ;;  %v5639_v19 = vand.u32 2147483647, %v5638_v9  ;;  %v2397_v32 = vshrl.u32 %v2396_v52, 30  ;;  %v2333_v23 = vsel %vm2326_vm14, %v2329_v63, %v2332_v61 }
 0x470   : > { %v9036_v46 = vsel %vm9029_vm11, %v9032_v1, %v9035_v38  ;;  %v5675_v42 = vsel %vm5674_vm1, %v5673_v47, 0  ;;  %v2443_v14 = vshrl.u32 %v2442_v29, 23  ;;  %v2334_v28 = vsel %vm2323_vm12, nan, %v2333_v23 }
 0x471   : > { %v9037_v35 = vsel %vm2323_vm12, nan, %v9036_v46  ;;  %v5642_v39 = vmul.f32 %v5641_v27, %v5639_v19  ;;  %v2398_v55 = vshll.u32 %v2397_v32, 30  ;;  %7239 = vst [vmem:[%s15815_s20 + $0x80] sm:$0xff] %v2334_v28  ;;  %v5652_v56 = vadd.s32 3, %v5648_v11 }
 0x472   : > { %13895 = vst [vmem:[%s15815_s20 + $0x280] sm:$0xff] %v9037_v35  ;;  %v5677_v45 = vand.u32 31, %v5675_v42  ;;  %v5671_v12 = vor.u32 8388608, %v5670_v2  ;;  %vm2337_vm3 = vcmp.lt.s32.totalorder %v18614_v49, 0  ;;  %v2439_v51 = vand.u32 2147483647, %v18778_v22 }
 0x473   : > { %v5643_v57 = vxor.u32 2147483648, %v5642_v39  ;;  %v18800_v25 = vsub.s32 %v2395_v50, %v2398_v55  ;;  %v2421_v30 = vsub.s32 4, %v2397_v32  ;;  %v14152_v7 = vadd.s32 4294967169, %v2443_v14 }
 0x474   : > { %v5678_v36 = vsub.s32 32, %v5677_v45  ;;  %v18810_v18 = vand.u32 3, %v5652_v56  ;;  %v18812_v53 = vand.u32 3, %v5648_v11  ;;  %v2391_v20 = vadd.s32 %v18756_v60, %v18761_v48 }
 0x475   : > { %v5644_v54 = vsel %vm5561_vm4, %v5643_v57, %v5642_v39  ;;  %v2401_v26 = vsub.s32 0, %v18800_v25  ;;  %v18818_v58 = vshll.u32 %v5671_v12, 8  ;;  %v18820_v16 = vshrl.u32 %v5675_v42, 5 }
 0x476   : > { %v5647_v3 = vsel %vm18750_vm7, %v18559_v24, %v5644_v54  ;;  %v5681_v37 = vshrl.u32 %v15258_v4, %v5678_v36  ;;  %v5684_v34 = vshrl.u32 %v15259_v6, %v5678_v36  ;;  %v18825_v62 = vand.u32 8388607, %v2439_v51 }
 0x477   : > { %15054 = vcosq.f32 %v5647_v3  ;;  %v14149_v31 = vmin.u32 %v2401_v26, %v18800_v25  ;;  %v2422_v60 = vsel %vm2337_vm3, %v2421_v30, %v2397_v32  ;;  %v5680_v48 = vshll.u32 %v15257_v0, %v5677_v45 }
 0x478   : > { %15056 = vsinq.f32 %v5647_v3  ;;  %v2449_v43 = vadd.s32 1, %v14152_v7  ;;  %v5679_v41 = vshrl.u32 %v15257_v0, %v5678_v36  ;;  %v5683_v44 = vshll.u32 %v15258_v4, %v5677_v45 }
 0x479   : > { %v2403_v40 = vclz %v14149_v31  ;;  %v5686_v50 = vshll.u32 %v15259_v6, %v5677_v45  ;;  %v5687_v33 = vshrl.u32 %v15260_v8, %v5678_v36  ;;  %v5682_v11 = vor.u32 %v5681_v37, %v5680_v48 }
 0x47a   : > { %v5689_v47 = vshll.u32 %v15260_v8, %v5677_v45  ;;  %v5690_v29 = vshrl.u32 %v15261_v10, %v5678_v36  ;;  %v5685_v15 = vor.u32 %v5684_v34, %v5683_v44  ;;  %v5692_v52 = vshll.u32 %v15261_v10, %v5677_v45 }
 0x47b   : > { %v14150_v5 = vadd.s32 4294967294, %v2403_v40  ;;  %v5688_v9 = vor.u32 %v5687_v33, %v5686_v50  ;;  %v5693_v2 = vshrl.u32 %v15262_v17, %v5678_v36  ;;  %vm18840_vm4 = vcmp.le.f32.partialorder %v2335_v21, 0.7853982 }
 0x47c   : > { %v5691_v38 = vor.u32 %v5690_v29, %v5689_v47  ;;  %vm5695_vm2 = vcmp.lt.s32.totalorder %v18820_v16, 1  ;;  %vm5696_vm6 = vcmp.lt.s32.totalorder %v18820_v16, 2  ;;  %vm12329_vm7 = vcmp.eq.s32.totalorder %v18812_v53, 2 }
 0x47d   : > { %vm14151_vm5 = vcmp.lt.s32.totalorder %v14150_v5, 0  ;;  %v5694_v63 = vor.u32 %v5693_v2, %v5692_v52  ;;  %vm5697_vm8 = vcmp.lt.s32.totalorder %v18820_v16, 3  ;;  %vm5698_vm9 = vcmp.lt.s32.totalorder %v18820_v16, 4 }
 0x47e   : > { %v2406_v27 = vsel %vm14151_vm5, 0, %v14150_v5  ;;  %vm5655_vm10 = vcmp.eq.s32.totalorder %v18810_v18, 0  ;;  %vm12326_vm11 = vcmp.eq.s32.totalorder %v18812_v53, 0  ;;  %v5699_v19 = vsel %vm5695_vm2, %v5679_v41, %v5682_v11 }
 0x47f   : > { %v2407_v21 = vsub.s32 32, %v2406_v27  ;;  %v2411_v1 = vsub.s32 4294967266, %v2406_v27  ;;  %v5700_v32 = vsel %vm5698_vm9, %v5688_v9, 2102212464  ;;  %vm5654_vm12 = vcmp.lt.s32.totalorder %v18810_v18, 2 }
 0x480   : > { %vm12325_vm13 = vcmp.lt.s32.totalorder %v18812_v53, 2  ;;  %v2408_v23 = vshll.u32 %v18800_v25, %v2406_v27  ;;  %v5703_v46 = vsel %vm5695_vm2, %v5682_v11, %v5685_v15  ;;  %v5704_v42 = vsel %vm5698_vm9, %v5691_v38, 920167782 }
 0x481   : > { %v5707_v14 = vsel %vm5695_vm2, %v5685_v15, %v5688_v9  ;;  %vm5651_vm14 = vweird.f32 %v18559_v24  ;;  %v2409_v28 = vshrl.u32 %v2391_v20, %v2407_v21  ;;  %v2412_v35 = vadd.s32 127, %v2411_v1 }
 0x482   : > { %v5705_v39 = vsel %vm5697_vm8, %v5688_v9, %v5704_v42  ;;  %v5708_v55 = vsel %vm5698_vm9, %v5694_v63, 1326507024  ;;  %v5701_v56 = vsel %vm5697_vm8, %v5685_v15, %v5700_v32  ;;  %vm2450_vm15 = vcmp.gt.s32.totalorder %v2449_v43, 0 }
 0x483   : > { %v5706_v45 = vsel %vm5696_vm6, %v5703_v46, %v5705_v39  ;;  %v5709_v57 = vsel %vm5697_vm8, %v5691_v38, %v5708_v55  ;;  %v2410_v25 = vor.u32 %v2409_v28, %v2408_v23  ;;  %v2413_v12 = vshll.u32 %v2412_v35, 23 }
 0x484   : > { %v5710_v36 = vsel %vm5696_vm6, %v5707_v14, %v5709_v57  ;;  %v2451_v54 = vsel %vm2450_vm15, %v2449_v43, 0  ;;  %v15055_v26 = vpop.eup %15054  ;;  %v18882_v3 = vmul.u32.u64.low %v18818_v58, %v5706_v45  ;;  %v18883_v20 = vmul.u32.u64.high %v18818_v58, %v5706_v45, %v18882_v3 }
 0x485   : > { %v18878_v30 = vmul.u32.u64.low %v18818_v58, %v5710_v36  ;;  %v18879_v7 = vmul.u32.u64.high %v18818_v58, %v5710_v36, %v18878_v30  ;;  %v15057_v31 = vpop.eup %15056  ;;  %vm5658_vm0 = vcmp.eq.s32.totalorder %v18810_v18, 2  ;;  %v5659_v37 = vxor.u32 2147483648, %v15055_v26 }
 0x486   : > { %v2414_v34 = vor.u32 4788187, %v2413_v12  ;;  %v5702_v40 = vsel %vm5696_vm6, %v5699_v19, %v5701_v56  ;;  %v5656_v48 = vxor.u32 2147483648, %v15057_v31  ;;  %v18891_v43 = vsel %vm18840_vm4, 0, %v2422_v60  ;;  %v18932_v12 = vpop.f32.mrf.mxu1 }
 0x487   : > { %v2447_v41 = vor.u32 8388608, %v18825_v62  ;;  %v2453_v44 = vand.u32 31, %v2451_v54  ;;  %v5660_v50 = vsel %vm5658_vm0, %v5659_v37, %v15057_v31  ;;  %v12331_v33 = vsel %vm12329_vm7, %v5659_v37, %v15057_v31 }
 0x488   : > { %v2415_v5 = vand.u32 2147483647, %v2414_v34  ;;  %v2417_v11 = vcvt.s32.f32 %v2410_v25  ;;  %v5657_v16 = vsel %vm5655_vm10, %v15055_v26, %v5656_v48  ;;  %v12328_v47 = vsel %vm12326_vm11, %v15055_v26, %v5656_v48 }
 0x489   : > { %v5718_v60 = vmul.u32 %v18818_v58, %v5702_v40  ;;  %vm5720_vm1 = vc.u32 %v18879_v7, %v18882_v3  ;;  %v5661_v62 = vsel %vm5654_vm12, %v5657_v16, %v5660_v50  ;;  %v12332_v29 = vsel %vm12325_vm13, %v12328_v47, %v12331_v33 }
 0x48a   : > { %v2418_v15 = vmul.f32 %v2417_v11, %v2415_v5  ;;  %v5721_v9 = vadd.s32 1, %v18883_v20  ;;  %v5662_v52 = vsel %vm5651_vm14, nan, %v5661_v62  ;;  %v12333_v2 = vsel %vm5651_vm14, nan, %v12332_v29 }
 0x48b   : > { %v18912_v38 = vshrl.u32 %v2451_v54, 5  ;;  %v2454_v58 = vsub.s32 32, %v2453_v44  ;;  %7271 = vst [vmem:[%s15815_s20 + $0x180] sm:$0xff] %v5662_v52  ;;  %13927 = vst [vmem:[%s15815_s20 + $0x380] sm:$0xff] %v12333_v2  ;;  %v2456_v53 = vshll.u32 %v15257_v0, %v2453_v44  ;;  %v2459_v63 = vshll.u32 %v15258_v4, %v2453_v44 }
 0x48c   : > { %v2419_v27 = vxor.u32 2147483648, %v2418_v15  ;;  %v5722_v18 = vsel %vm5720_vm1, %v5721_v9, %v18883_v20  ;;  %v2462_v24 = vshll.u32 %v15259_v6, %v2453_v44  ;;  %v2465_v46 = vshll.u32 %v15260_v8, %v2453_v44 }
 0x48d   : > { %v5723_v21 = vadd.s32 %v5722_v18, %v5718_v60  ;;  %v2457_v1 = vshrl.u32 %v15258_v4, %v2454_v58  ;;  %v2460_v19 = vshrl.u32 %v15259_v6, %v2454_v58  ;;  %v2463_v23 = vshrl.u32 %v15260_v8, %v2454_v58 }
 0x48e   : > { %v2420_v32 = vsel %vm2337_vm3, %v2419_v27, %v2418_v15  ;;  %v2466_v42 = vshrl.u32 %v15261_v10, %v2454_v58  ;;  %v2468_v57 = vshll.u32 %v15261_v10, %v2453_v44  ;;  %v2469_v25 = vshrl.u32 %v15262_v17, %v2454_v58 }
 0x48f   : > { %v2423_v14 = vsel %vm18840_vm4, %v18614_v49, %v2420_v32  ;;  %v5724_v28 = vadd.s32 536870912, %v5723_v21  ;;  %v2458_v35 = vor.u32 %v2457_v1, %v2456_v53  ;;  %v2461_v39 = vor.u32 %v2460_v19, %v2459_v63 }
 0x490   : > { %15058 = vcosq.f32 %v2423_v14  ;;  %v2464_v55 = vor.u32 %v2463_v23, %v2462_v24  ;;  %v2467_v56 = vor.u32 %v2466_v42, %v2465_v46  ;;  %v2428_v36 = vadd.s32 3, %v18891_v43 }
 0x491   : > { %15060 = vsinq.f32 %v2423_v14  ;;  %v5725_v45 = vshrl.u32 %v5724_v28, 30  ;;  %v2455_v54 = vshrl.u32 %v15257_v0, %v2454_v58  ;;  %vm2471_vm3 = vcmp.lt.s32.totalorder %v18912_v38, 1 }
 0x492   : > { %v2487_v61 = vshll.u32 %v2447_v41, 8  ;;  %v2470_v30 = vor.u32 %v2469_v25, %v2468_v57  ;;  %vm2474_vm4 = vcmp.lt.s32.totalorder %v18912_v38, 4  ;;  %v2479_v20 = vsel %vm2471_vm3, %v2458_v35, %v2461_v39 }
 0x493   : > { %v5726_v26 = vshll.u32 %v5725_v45, 30  ;;  %vm2473_vm5 = vcmp.lt.s32.totalorder %v18912_v38, 3  ;;  %v2476_v31 = vsel %vm2474_vm4, %v2464_v55, 2102212464  ;;  %v2480_v37 = vsel %vm2474_vm4, %v2467_v56, 920167782 }
 0x494   : > { %v5770_v34 = vand.u32 2139095040, %v18932_v12  ;;  %vm2472_vm2 = vcmp.lt.s32.totalorder %v18912_v38, 2  ;;  %v2481_v48 = vsel %vm2473_vm5, %v2464_v55, %v2480_v37  ;;  %v2483_v41 = vsel %vm2471_vm3, %v2461_v39, %v2464_v55 }
 0x495   : > { %v18942_v40 = vsub.s32 %v5723_v21, %v5726_v26  ;;  %v2429_v44 = vand.u32 3, %v2428_v36  ;;  %v9131_v50 = vand.u32 3, %v18891_v43  ;;  %v2482_v33 = vsel %vm2472_vm2, %v2479_v20, %v2481_v48 }
 0x496   : > { %v2484_v5 = vsel %vm2474_vm4, %v2470_v30, 1326507024  ;;  %v2475_v16 = vsel %vm2471_vm3, %v2455_v54, %v2458_v35  ;;  %v2477_v47 = vsel %vm2473_vm5, %v2461_v39, %v2476_v31  ;;  %v5771_v9 = vshrl.u32 %v5770_v34, 23 }
 0x497   : > { %v5729_v11 = vsub.s32 0, %v18942_v40  ;;  %v2485_v60 = vsel %vm2473_vm5, %v2467_v56, %v2484_v5  ;;  %v18955_v29 = vmul.u32.u64.low %v2487_v61, %v2482_v33  ;;  %v18956_v15 = vmul.u32.u64.high %v2487_v61, %v2482_v33, %v18955_v29 }
 0x498   : > { %v2486_v62 = vsel %vm2472_vm2, %v2483_v41, %v2485_v60  ;;  %vm5665_vm6 = vcmp.lt.s32.totalorder %v18746_v59, 0  ;;  %v5749_v52 = vsub.s32 4, %v5725_v45  ;;  %v5767_v2 = vand.u32 2147483647, %v18932_v12 }
 0x499   : > { %v14277_v43 = vmin.u32 %v5729_v11, %v18942_v40  ;;  %vm2427_vm7 = vweird.f32 %v18614_v49  ;;  %vm9132_vm8 = vcmp.lt.s32.totalorder %v9131_v50, 2  ;;  %v14280_v18 = vadd.s32 4294967169, %v5771_v9 }
 0x49a   : > { %v18963_v58 = vmul.u32.u64.low %v2487_v61, %v2486_v62  ;;  %v18964_v27 = vmul.u32.u64.high %v2487_v61, %v2486_v62, %v18963_v58  ;;  %vm9133_vm9 = vcmp.eq.s32.totalorder %v9131_v50, 0  ;;  %vm9136_vm10 = vcmp.eq.s32.totalorder %v9131_v50, 2 }
 0x49b   : > { %v5731_v53 = vclz %v14277_v43  ;;  %v2478_v63 = vsel %vm2472_vm2, %v2475_v16, %v2477_v47  ;;  %vm2430_vm11 = vcmp.lt.s32.totalorder %v2429_v44, 2  ;;  %vm2431_vm12 = vcmp.eq.s32.totalorder %v2429_v44, 0 }
 0x49c   : > { %v2497_v21 = vadd.s32 1, %v18956_v15  ;;  %v5777_v1 = vadd.s32 1, %v14280_v18  ;;  %vm2434_vm13 = vcmp.eq.s32.totalorder %v2429_v44, 2  ;;  %v5719_v24 = vadd.s32 %v18882_v3, %v18879_v7  ;;  %v18997_v44 = vpop.f32.mrf.mxu0 }
 0x49d   : > { %v15059_v19 = vpop.eup %15058  ;;  %v14278_v32 = vadd.s32 4294967294, %v5731_v53  ;;  %v5750_v23 = vsel %vm5665_vm6, %v5749_v52, %v5725_v45  ;;  %v2494_v14 = vmul.u32 %v2487_v61, %v2478_v63  ;;  %vm2496_vm14 = vc.u32 %v18964_v27, %v18955_v29 }
 0x49e   : > { %v15061_v46 = vpop.eup %15060  ;;  %v2435_v42 = vxor.u32 2147483648, %v15059_v19  ;;  %v5774_v38 = vand.u32 8388607, %v5767_v2  ;;  %v2498_v35 = vsel %vm2496_vm14, %v2497_v21, %v18956_v15  ;;  %vm5778_vm0 = vcmp.gt.s32.totalorder %v5777_v1, 0 }
 0x49f   : > { %v2432_v28 = vxor.u32 2147483648, %v15061_v46  ;;  %vm14279_vm15 = vcmp.lt.s32.totalorder %v14278_v32, 0  ;;  %v2499_v55 = vadd.s32 %v2498_v35, %v2494_v14  ;;  %v5779_v37 = vsel %vm5778_vm0, %v5777_v1, 0 }
 0x4a0   : > { %v2436_v39 = vsel %vm2434_vm13, %v2435_v42, %v15061_v46  ;;  %v9138_v7 = vsel %vm9136_vm10, %v2435_v42, %v15061_v46  ;;  %v5734_v3 = vsel %vm14279_vm15, 0, %v14278_v32  ;;  %vm18993_vm1 = vcmp.le.f32.partialorder %v5663_v13, 0.7853982 }
 0x4a1   : > { %v2433_v56 = vsel %vm2431_vm12, %v15059_v19, %v2432_v28  ;;  %v9135_v45 = vsel %vm9133_vm9, %v15059_v19, %v2432_v28  ;;  %v5735_v57 = vsub.s32 32, %v5734_v3  ;;  %v5736_v25 = vshll.u32 %v18942_v40, %v5734_v3 }
 0x4a2   : > { %v2437_v36 = vsel %vm2430_vm11, %v2433_v56, %v2436_v39  ;;  %v9139_v54 = vsel %vm9132_vm8, %v9135_v45, %v9138_v7  ;;  %v5739_v61 = vsub.s32 4294967266, %v5734_v3  ;;  %v2500_v26 = vadd.s32 536870912, %v2499_v55 }
 0x4a3   : > { %v2438_v30 = vsel %vm2427_vm7, nan, %v2437_v36  ;;  %v9140_v20 = vsel %vm2427_vm7, nan, %v9139_v54  ;;  %v5737_v31 = vshrl.u32 %v5719_v24, %v5735_v57  ;;  %v5781_v41 = vand.u32 31, %v5779_v37 }
 0x4a4   : > { %7240 = vst [vmem:[%s15815_s20 + $0x88] sm:$0xff] %v2438_v30  ;;  %13896 = vst [vmem:[%s15815_s20 + $0x288] sm:$0xff] %v9140_v20  ;;  %v5740_v40 = vadd.s32 127, %v5739_v61  ;;  %v2501_v48 = vshrl.u32 %v2500_v26, 30  ;;  %v5752_v49 = vsel %vm18993_vm1, 0, %v5750_v23  ;;  %vm2441_vm3 = vcmp.lt.s32.totalorder %v18778_v22, 0 }
 0x4a5   : > { %v5738_v50 = vor.u32 %v5737_v31, %v5736_v25  ;;  %v5782_v11 = vsub.s32 32, %v5781_v41  ;;  %v5775_v16 = vor.u32 8388608, %v5774_v38  ;;  %v2546_v13 = vand.u32 2139095040, %v18997_v44 }
 0x4a6   : > { %v5741_v33 = vshll.u32 %v5740_v40, 23  ;;  %v2502_v5 = vshll.u32 %v2501_v48, 30  ;;  %v19003_v60 = vadd.s32 3, %v5752_v49  ;;  %v19005_v62 = vand.u32 3, %v5752_v49 }
 0x4a7   : > { %v5745_v9 = vcvt.s32.f32 %v5738_v50  ;;  %v2495_v43 = vadd.s32 %v18955_v29, %v18964_v27  ;;  %v2525_v52 = vsub.s32 4, %v2501_v48  ;;  %v5785_v58 = vshrl.u32 %v15258_v4, %v5782_v11 }
 0x4a8   : > { %v5742_v47 = vor.u32 4788187, %v5741_v33  ;;  %v2503_v15 = vsub.s32 %v2499_v55, %v2502_v5  ;;  %v5788_v63 = vshrl.u32 %v15259_v6, %v5782_v11  ;;  %v5791_v21 = vshrl.u32 %v15260_v8, %v5782_v11 }
 0x4a9   : > { %v5780_v1 = vshrl.u32 %v5779_v37, 5  ;;  %v5784_v19 = vshll.u32 %v15257_v0, %v5781_v41  ;;  %v19013_v24 = vshll.u32 %v5775_v16, 8  ;;  %v2547_v32 = vshrl.u32 %v2546_v13, 23 }
 0x4aa   : > { %v5743_v18 = vand.u32 2147483647, %v5742_v47  ;;  %v2505_v53 = vsub.s32 0, %v2503_v15  ;;  %v5787_v42 = vshll.u32 %v15258_v4, %v5781_v41  ;;  %v5790_v29 = vshll.u32 %v15259_v6, %v5781_v41 }
 0x4ab   : > { %v2526_v27 = vsel %vm2441_vm3, %v2525_v52, %v2501_v48  ;;  %v5786_v14 = vor.u32 %v5785_v58, %v5784_v19  ;;  %v5793_v38 = vshll.u32 %v15260_v8, %v5781_v41  ;;  %v5794_v28 = vshrl.u32 %v15261_v10, %v5782_v11 }
 0x4ac   : > { %v5746_v23 = vmul.f32 %v5745_v9, %v5743_v18  ;;  %v14153_v46 = vmin.u32 %v2505_v53, %v2503_v15  ;;  %v5789_v7 = vor.u32 %v5788_v63, %v5787_v42  ;;  %v5792_v3 = vor.u32 %v5791_v21, %v5790_v29 }
 0x4ad   : > { %v5783_v55 = vshrl.u32 %v15257_v0, %v5782_v11  ;;  %v5795_v56 = vor.u32 %v5794_v28, %v5793_v38  ;;  %v5796_v45 = vshll.u32 %v15261_v10, %v5781_v41  ;;  %v5797_v57 = vshrl.u32 %v15262_v17, %v5782_v11 }
 0x4ae   : > { %v5747_v35 = vxor.u32 2147483648, %v5746_v23  ;;  %v2507_v39 = vclz %v14153_v46  ;;  %vm5799_vm4 = vcmp.lt.s32.totalorder %v5780_v1, 1  ;;  %vm5801_vm5 = vcmp.lt.s32.totalorder %v5780_v1, 3 }
 0x4af   : > { %v5798_v61 = vor.u32 %v5797_v57, %v5796_v45  ;;  %vm5802_vm2 = vcmp.lt.s32.totalorder %v5780_v1, 4  ;;  %v5803_v26 = vsel %vm5799_vm4, %v5783_v55, %v5786_v14  ;;  %v5807_v20 = vsel %vm5799_vm4, %v5786_v14, %v5789_v7 }
 0x4b0   : > { %v5748_v25 = vsel %vm5665_vm6, %v5747_v35, %v5746_v23  ;;  %v14154_v36 = vadd.s32 4294967294, %v2507_v39  ;;  %v5804_v30 = vsel %vm5802_vm2, %v5792_v3, 2102212464  ;;  %v5808_v40 = vsel %vm5802_vm2, %v5795_v56, 920167782 }
 0x4b1   : > { %v5751_v54 = vsel %vm18993_vm1, %v18746_v59, %v5748_v25  ;;  %v5805_v37 = vsel %vm5801_vm5, %v5789_v7, %v5804_v30  ;;  %vm5800_vm6 = vcmp.lt.s32.totalorder %v5780_v1, 2  ;;  %v5809_v49 = vsel %vm5801_vm5, %v5792_v3, %v5808_v40 }
 0x4b2   : > { %15062 = vcosq.f32 %v5751_v54  ;;  %vm14155_vm7 = vcmp.lt.s32.totalorder %v14154_v36, 0  ;;  %v5806_v50 = vsel %vm5800_vm6, %v5803_v26, %v5805_v37  ;;  %v5811_v33 = vsel %vm5799_vm4, %v5789_v7, %v5792_v3 }
 0x4b3   : > { %15064 = vsinq.f32 %v5751_v54  ;;  %v2510_v31 = vsel %vm14155_vm7, 0, %v14154_v36  ;;  %v5812_v5 = vsel %vm5802_vm2, %v5798_v61, 1326507024  ;;  %v5810_v13 = vsel %vm5800_vm6, %v5807_v20, %v5809_v49 }
 0x4b4   : > { %v2511_v48 = vsub.s32 32, %v2510_v31  ;;  %v2512_v41 = vshll.u32 %v2503_v15, %v2510_v31  ;;  %v2515_v34 = vsub.s32 4294967266, %v2510_v31  ;;  %v5813_v47 = vsel %vm5801_vm5, %v5795_v56, %v5812_v5 }
 0x4b5   : > { %v5814_v9 = vsel %vm5800_vm6, %v5811_v33, %v5813_v47  ;;  %v19039_v52 = vmul.u32.u64.low %v19013_v24, %v5810_v13  ;;  %v19040_v58 = vmul.u32.u64.high %v19013_v24, %v5810_v13, %v19039_v52  ;;  %v14156_v15 = vadd.s32 4294967169, %v2547_v32 }
 0x4b6   : > { %v2513_v11 = vshrl.u32 %v2495_v43, %v2511_v48  ;;  %v2516_v16 = vadd.s32 127, %v2515_v34  ;;  %v19044_v63 = vmul.u32.u64.low %v19013_v24, %v5814_v9  ;;  %v19045_v21 = vmul.u32.u64.high %v19013_v24, %v5814_v9, %v19044_v63 }
 0x4b7   : > { %v5757_v19 = vand.u32 3, %v19003_v60  ;;  %vm19050_vm8 = vcmp.le.f32.partialorder %v2439_v51, 0.7853982  ;;  %v2553_v1 = vadd.s32 1, %v14156_v15  ;;  %vm12429_vm9 = vcmp.eq.s32.totalorder %v19005_v62, 0 }
 0x4b8   : > { %v2514_v18 = vor.u32 %v2513_v11, %v2512_v41  ;;  %v2517_v53 = vshll.u32 %v2516_v16, 23  ;;  %v2543_v32 = vand.u32 2147483647, %v18997_v44  ;;  %vm12428_vm10 = vcmp.lt.s32.totalorder %v19005_v62, 2 }
 0x4b9   : > { %v2528_v46 = vsel %vm19050_vm8, 0, %v2526_v27  ;;  %v5822_v42 = vmul.u32 %v19013_v24, %v5806_v50  ;;  %v5825_v60 = vadd.s32 1, %v19040_v58  ;;  %vm2554_vm11 = vcmp.gt.s32.totalorder %v2553_v1, 0  ;;  %v19066_v27 = vpop.f32.mrf.mxu1 }
 0x4ba   : > { %v2518_v23 = vor.u32 4788187, %v2517_v53  ;;  %vm5755_vm12 = vweird.f32 %v18746_v59  ;;  %v2521_v29 = vcvt.s32.f32 %v2514_v18  ;;  %vm5824_vm13 = vc.u32 %v19045_v21, %v19039_v52 }
 0x4bb   : > { %v2555_v14 = vsel %vm2554_vm11, %v2553_v1, 0  ;;  %vm5758_vm14 = vcmp.lt.s32.totalorder %v5757_v19, 2  ;;  %vm12432_vm15 = vcmp.eq.s32.totalorder %v19005_v62, 2  ;;  %v5826_v38 = vsel %vm5824_vm13, %v5825_v60, %v19040_v58 }
 0x4bc   : > { %v2519_v51 = vand.u32 2147483647, %v2518_v23  ;;  %v2557_v28 = vand.u32 31, %v2555_v14  ;;  %vm5759_vm0 = vcmp.eq.s32.totalorder %v5757_v19, 0  ;;  %vm5762_vm1 = vcmp.eq.s32.totalorder %v5757_v19, 2 }
 0x4bd   : > { %v5827_v35 = vadd.s32 %v5826_v38, %v5822_v42  ;;  %v2532_v7 = vadd.s32 3, %v2528_v46  ;;  %v19068_v3 = vand.u32 3, %v2528_v46  ;;  %v19072_v55 = vand.u32 8388607, %v2543_v32 }
 0x4be   : > { %v2522_v24 = vmul.f32 %v2521_v29, %v2519_v51  ;;  %v2558_v56 = vsub.s32 32, %v2557_v28  ;;  %v5874_v54 = vand.u32 2139095040, %v19066_v27  ;;  %v2560_v26 = vshll.u32 %v15257_v0, %v2557_v28 }
 0x4bf   : > { %v15063_v39 = vpop.eup %15062  ;;  %v5828_v36 = vadd.s32 536870912, %v5827_v35  ;;  %v2563_v20 = vshll.u32 %v15258_v4, %v2557_v28  ;;  %v2566_v47 = vshll.u32 %v15259_v6, %v2557_v28  ;;  %v2569_v62 = vshll.u32 %v15260_v8, %v2557_v28 }
 0x4c0   : > { %v15065_v45 = vpop.eup %15064  ;;  %v5763_v57 = vxor.u32 2147483648, %v15063_v39  ;;  %v2523_v25 = vxor.u32 2147483648, %v2522_v24  ;;  %v2561_v30 = vshrl.u32 %v15258_v4, %v2558_v56  ;;  %v2564_v49 = vshrl.u32 %v15259_v6, %v2558_v56 }
 0x4c1   : > { %v5760_v61 = vxor.u32 2147483648, %v15065_v45  ;;  %v19083_v48 = vshrl.u32 %v5828_v36, 30  ;;  %v2567_v58 = vshrl.u32 %v15260_v8, %v2558_v56  ;;  %v2570_v15 = vshrl.u32 %v15261_v10, %v2558_v56 }
 0x4c2   : > { %v5764_v31 = vsel %vm5762_vm1, %v5763_v57, %v15065_v45  ;;  %v12434_v37 = vsel %vm12432_vm15, %v5763_v57, %v15065_v45  ;;  %v2524_v40 = vsel %vm2441_vm3, %v2523_v25, %v2522_v24  ;;  %v19108_v18 = vand.u32 3, %v2532_v7 }
 0x4c3   : > { %v5761_v41 = vsel %vm5759_vm0, %v15063_v39, %v5760_v61  ;;  %v12431_v34 = vsel %vm12429_vm9, %v15063_v39, %v5760_v61  ;;  %v2527_v50 = vsel %vm19050_vm8, %v18778_v22, %v2524_v40  ;;  %v5830_v11 = vshll.u32 %v19083_v48, 30 }
 0x4c4   : > { %v5765_v33 = vsel %vm5758_vm14, %v5761_v41, %v5764_v31  ;;  %v12435_v5 = vsel %vm12428_vm10, %v12431_v34, %v12434_v37  ;;  %15066 = vcosq.f32 %v2527_v50  ;;  %v2556_v53 = vshrl.u32 %v2555_v14, 5 }
 0x4c5   : > { %v5766_v16 = vsel %vm5755_vm12, nan, %v5765_v33  ;;  %v12436_v13 = vsel %vm5755_vm12, nan, %v12435_v5  ;;  %15068 = vsinq.f32 %v2527_v50  ;;  %v19103_v9 = vsub.s32 %v5827_v35, %v5830_v11 }
 0x4c6   : > { %7272 = vst [vmem:[%s15815_s20 + $0x188] sm:$0xff] %v5766_v16  ;;  %13928 = vst [vmem:[%s15815_s20 + $0x388] sm:$0xff] %v12436_v13  ;;  %v2562_v63 = vor.u32 %v2561_v30, %v2560_v26  ;;  %v2573_v59 = vshrl.u32 %v15262_v17, %v2558_v56  ;;  %v2565_v43 = vor.u32 %v2564_v49, %v2563_v20  ;;  %v2551_v46 = vor.u32 8388608, %v19072_v55 }
 0x4c7   : > { %v5833_v19 = vsub.s32 0, %v19103_v9  ;;  %v2568_v1 = vor.u32 %v2567_v58, %v2566_v47  ;;  %v2571_v23 = vor.u32 %v2570_v15, %v2569_v62  ;;  %v2572_v42 = vshll.u32 %v15261_v10, %v2557_v28 }
 0x4c8   : > { %v5823_v60 = vadd.s32 %v19039_v52, %v19045_v21  ;;  %v5875_v29 = vshrl.u32 %v5874_v54, 23  ;;  %vm2538_vm3 = vcmp.eq.s32.totalorder %v19108_v18, 2  ;;  %vm9239_vm4 = vcmp.eq.s32.totalorder %v19068_v3, 2 }
 0x4c9   : > { %v14281_v51 = vmin.u32 %v5833_v19, %v19103_v9  ;;  %v2559_v14 = vshrl.u32 %v15257_v0, %v2558_v56  ;;  %v2574_v38 = vor.u32 %v2573_v59, %v2572_v42  ;;  %vm2575_vm5 = vcmp.lt.s32.totalorder %v2556_v53, 1 }
 0x4ca   : > { %vm2578_vm2 = vcmp.lt.s32.totalorder %v2556_v53, 4  ;;  %vm2535_vm7 = vcmp.eq.s32.totalorder %v19108_v18, 0  ;;  %vm9236_vm6 = vcmp.eq.s32.totalorder %v19068_v3, 0  ;;  %v2583_v52 = vsel %vm2575_vm5, %v2562_v63, %v2565_v43 }
 0x4cb   : > { %v5835_v28 = vclz %v14281_v51  ;;  %v2580_v24 = vsel %vm2578_vm2, %v2568_v1, 2102212464  ;;  %v2584_v21 = vsel %vm2578_vm2, %v2571_v23, 920167782  ;;  %vm2534_vm8 = vcmp.lt.s32.totalorder %v19108_v18, 2 }
 0x4cc   : > { %vm9235_vm9 = vcmp.lt.s32.totalorder %v19068_v3, 2  ;;  %vm2576_vm10 = vcmp.lt.s32.totalorder %v2556_v53, 2  ;;  %vm2577_vm11 = vcmp.lt.s32.totalorder %v2556_v53, 3  ;;  %v2579_v35 = vsel %vm2575_vm5, %v2559_v14, %v2562_v63 }
 0x4cd   : > { %v2591_v39 = vshll.u32 %v2551_v46, 8  ;;  %vm2531_vm12 = vweird.f32 %v18778_v22  ;;  %v14282_v7 = vadd.s32 4294967294, %v5835_v28  ;;  %v2581_v55 = vsel %vm2577_vm11, %v2565_v43, %v2580_v24 }
 0x4ce   : > { %v2585_v56 = vsel %vm2577_vm11, %v2568_v1, %v2584_v21  ;;  %v2587_v45 = vsel %vm2575_vm5, %v2565_v43, %v2568_v1  ;;  %v5853_v57 = vsub.s32 4, %v19083_v48  ;;  %v2588_v36 = vsel %vm2578_vm2, %v2574_v38, 1326507024 }
 0x4cf   : > { %v2586_v25 = vsel %vm2576_vm10, %v2583_v52, %v2585_v56  ;;  %v14284_v54 = vadd.s32 4294967169, %v5875_v29  ;;  %vm14283_vm13 = vcmp.lt.s32.totalorder %v14282_v7, 0  ;;  %v2589_v61 = vsel %vm2577_vm11, %v2571_v23, %v2588_v36 }
 0x4d0   : > { %v19133_v26 = vmul.u32.u64.low %v2591_v39, %v2586_v25  ;;  %v19134_v30 = vmul.u32.u64.high %v2591_v39, %v2586_v25, %v19133_v26  ;;  %v5838_v31 = vsel %vm14283_vm13, 0, %v14282_v7  ;;  %v2582_v37 = vsel %vm2576_vm10, %v2579_v35, %v2581_v55 }
 0x4d1   : > { %v15067_v20 = vpop.eup %15066  ;;  %v2590_v40 = vsel %vm2576_vm10, %v2587_v45, %v2589_v61  ;;  %v5881_v41 = vadd.s32 1, %v14284_v54  ;;  %v5839_v49 = vsub.s32 32, %v5838_v31  ;;  %v5840_v33 = vshll.u32 %v19103_v9, %v5838_v31 }
 0x4d2   : > { %v15069_v34 = vpop.eup %15068  ;;  %v2539_v50 = vxor.u32 2147483648, %v15067_v20  ;;  %v5843_v5 = vsub.s32 4294967266, %v5838_v31  ;;  %v19140_v16 = vmul.u32.u64.low %v2591_v39, %v2590_v40  ;;  %v19141_v13 = vmul.u32.u64.high %v2591_v39, %v2590_v40, %v19140_v16 }
 0x4d3   : > { %v2536_v11 = vxor.u32 2147483648, %v15069_v34  ;;  %vm5882_vm14 = vcmp.gt.s32.totalorder %v5881_v41, 0  ;;  %v5841_v62 = vshrl.u32 %v5823_v60, %v5839_v49  ;;  %v2601_v63 = vadd.s32 1, %v19134_v30 }
 0x4d4   : > { %v2540_v47 = vsel %vm2538_vm3, %v2539_v50, %v15069_v34  ;;  %v9241_v58 = vsel %vm9239_vm4, %v2539_v50, %v15069_v34  ;;  %v5844_v15 = vadd.s32 127, %v5843_v5  ;;  %v5883_v59 = vsel %vm5882_vm14, %v5881_v41, 0 }
 0x4d5   : > { %v2537_v53 = vsel %vm2535_vm7, %v15067_v20, %v2536_v11  ;;  %v9238_v9 = vsel %vm9236_vm6, %v15067_v20, %v2536_v11  ;;  %v5842_v1 = vor.u32 %v5841_v62, %v5840_v33  ;;  %v2598_v60 = vmul.u32 %v2591_v39, %v2582_v37 }
 0x4d6   : > { %v2541_v19 = vsel %vm2534_vm8, %v2537_v53, %v2540_v47  ;;  %v9242_v43 = vsel %vm9235_vm9, %v9238_v9, %v9241_v58  ;;  %v5845_v23 = vshll.u32 %v5844_v15, 23  ;;  %vm2600_vm15 = vc.u32 %v19141_v13, %v19133_v26 }
 0x4d7   : > { %v2542_v46 = vsel %vm2531_vm12, nan, %v2541_v19  ;;  %v9243_v42 = vsel %vm2531_vm12, nan, %v9242_v43  ;;  %vm5769_vm0 = vcmp.lt.s32.totalorder %v18932_v12, 0  ;;  %v2602_v3 = vsel %vm2600_vm15, %v2601_v63, %v19134_v30 }
 0x4d8   : > { %7241 = vst [vmem:[%s15815_s20 + $0x90] sm:$0xff] %v2542_v46  ;;  %13897 = vst [vmem:[%s15815_s20 + $0x290] sm:$0xff] %v9243_v42  ;;  %v5846_v18 = vor.u32 4788187, %v5845_v23  ;;  %v5871_v51 = vand.u32 2147483647, %v19066_v27  ;;  %v5854_v29 = vsel %vm5769_vm0, %v5853_v57, %v19083_v48  ;;  %v2603_v14 = vadd.s32 %v2602_v3, %v2598_v60 }
 0x4d9   : > { %v5885_v22 = vand.u32 31, %v5883_v59  ;;  %v5849_v28 = vcvt.s32.f32 %v5842_v1  ;;  %vm19172_vm1 = vcmp.le.f32.partialorder %v5767_v2, 0.7853982  ;;  %v5884_v30 = vshrl.u32 %v5883_v59, 5 }
 0x4da   : > { %v5847_v38 = vand.u32 2147483647, %v5846_v18  ;;  %v2604_v52 = vadd.s32 536870912, %v2603_v14  ;;  %v5856_v39 = vsel %vm19172_vm1, 0, %v5854_v29  ;;  %v5878_v7 = vand.u32 8388607, %v5871_v51 }
 0x4db   : > { %v5886_v21 = vsub.s32 32, %v5885_v22  ;;  %v5888_v48 = vshll.u32 %v15257_v0, %v5885_v22  ;;  %v5897_v2 = vshll.u32 %v15260_v8, %v5885_v22  ;;  %v5891_v20 = vshll.u32 %v15258_v4, %v5885_v22 }
 0x4dc   : > { %v5850_v35 = vmul.f32 %v5849_v28, %v5847_v38  ;;  %v2605_v55 = vshrl.u32 %v2604_v52, 30  ;;  %v5894_v31 = vshll.u32 %v15259_v6, %v5885_v22  ;;  %v5900_v34 = vshll.u32 %v15261_v10, %v5885_v22  ;;  %v19213_v22 = vpop.f32.mrf.mxu0 }
 0x4dd   : > { %v5889_v56 = vshrl.u32 %v15258_v4, %v5886_v21  ;;  %v5892_v45 = vshrl.u32 %v15259_v6, %v5886_v21  ;;  %v5895_v25 = vshrl.u32 %v15260_v8, %v5886_v21  ;;  %v5898_v36 = vshrl.u32 %v15261_v10, %v5886_v21 }
 0x4de   : > { %v5851_v57 = vxor.u32 2147483648, %v5850_v35  ;;  %v5901_v54 = vshrl.u32 %v15262_v17, %v5886_v21  ;;  %v2606_v61 = vshll.u32 %v2605_v55, 30  ;;  %v5860_v11 = vadd.s32 3, %v5856_v39 }
 0x4df   : > { %v5890_v40 = vor.u32 %v5889_v56, %v5888_v48  ;;  %v5899_v41 = vor.u32 %v5898_v36, %v5897_v2  ;;  %v5893_v33 = vor.u32 %v5892_v45, %v5891_v20  ;;  %v5896_v5 = vor.u32 %v5895_v25, %v5894_v31 }
 0x4e0   : > { %v5852_v37 = vsel %vm5769_vm0, %v5851_v57, %v5850_v35  ;;  %v19195_v49 = vsub.s32 %v2603_v14, %v2606_v61  ;;  %vm2545_vm3 = vcmp.lt.s32.totalorder %v18997_v44, 0  ;;  %v5902_v16 = vor.u32 %v5901_v54, %v5900_v34 }
 0x4e1   : > { %v5855_v50 = vsel %vm19172_vm1, %v18932_v12, %v5852_v37  ;;  %v5879_v58 = vor.u32 8388608, %v5878_v7  ;;  %vm5906_vm4 = vcmp.lt.s32.totalorder %v5884_v30, 4  ;;  %v19199_v62 = vand.u32 3, %v5856_v39 }
 0x4e2   : > { %15070 = vcosq.f32 %v5855_v50  ;;  %v2609_v47 = vsub.s32 0, %v19195_v49  ;;  %vm19203_vm5 = vcmp.le.f32.partialorder %v2543_v32, 0.7853982  ;;  %vm5903_vm2 = vcmp.lt.s32.totalorder %v5884_v30, 1 }
 0x4e3   : > { %15072 = vsinq.f32 %v5855_v50  ;;  %vm5905_vm7 = vcmp.lt.s32.totalorder %v5884_v30, 3  ;;  %v5912_v53 = vsel %vm5906_vm4, %v5899_v41, 920167782  ;;  %v5887_v63 = vshrl.u32 %v15257_v0, %v5886_v21 }
 0x4e4   : > { %v14157_v9 = vmin.u32 %v2609_v47, %v19195_v49  ;;  %v5908_v59 = vsel %vm5906_vm4, %v5896_v5, 2102212464  ;;  %v5911_v19 = vsel %vm5903_vm2, %v5890_v40, %v5893_v33  ;;  %v2629_v43 = vsub.s32 4, %v2605_v55 }
 0x4e5   : > { %v5913_v1 = vsel %vm5905_vm7, %v5896_v5, %v5912_v53  ;;  %v5915_v23 = vsel %vm5903_vm2, %v5893_v33, %v5896_v5  ;;  %v5916_v46 = vsel %vm5906_vm4, %v5902_v16, 1326507024  ;;  %v5861_v42 = vand.u32 3, %v5860_v11 }
 0x4e6   : > { %v2611_v60 = vclz %v14157_v9  ;;  %vm5904_vm6 = vcmp.lt.s32.totalorder %v5884_v30, 2  ;;  %v5919_v32 = vshll.u32 %v5879_v58, 8  ;;  %v5907_v18 = vsel %vm5903_vm2, %v5887_v63, %v5890_v40 }
 0x4e7   : > { %v5909_v3 = vsel %vm5905_vm7, %v5893_v33, %v5908_v59  ;;  %v5914_v29 = vsel %vm5904_vm6, %v5911_v19, %v5913_v1  ;;  %v5917_v14 = vsel %vm5905_vm7, %v5899_v41, %v5916_v46  ;;  %vm12532_vm8 = vcmp.eq.s32.totalorder %v19199_v62, 0  ;;  %v19247_v19 = vpop.f32.mrf.mxu1 }
 0x4e8   : > { %v14158_v38 = vadd.s32 4294967294, %v2611_v60  ;;  %v5918_v28 = vsel %vm5904_vm6, %v5915_v23, %v5917_v14  ;;  %v19216_v24 = vmul.u32.u64.low %v5919_v32, %v5914_v29  ;;  %v19217_v52 = vmul.u32.u64.high %v5919_v32, %v5914_v29, %v19216_v24 }
 0x4e9   : > { %v2630_v21 = vsel %vm2545_vm3, %v2629_v43, %v2605_v55  ;;  %v19223_v35 = vmul.u32.u64.low %v5919_v32, %v5918_v28  ;;  %v19224_v39 = vmul.u32.u64.high %v5919_v32, %v5918_v28, %v19223_v35  ;;  %vm12531_vm9 = vcmp.lt.s32.totalorder %v19199_v62, 2 }
 0x4ea   : > { %vm12535_vm10 = vcmp.eq.s32.totalorder %v19199_v62, 2  ;;  %vm14159_vm11 = vcmp.lt.s32.totalorder %v14158_v38, 0  ;;  %v5910_v7 = vsel %vm5904_vm6, %v5907_v18, %v5909_v3  ;;  %v2650_v48 = vand.u32 2139095040, %v19213_v22 }
 0x4eb   : > { %vm5859_vm12 = vweird.f32 %v18932_v12  ;;  %vm5862_vm13 = vcmp.lt.s32.totalorder %v5861_v42, 2  ;;  %vm5863_vm14 = vcmp.eq.s32.totalorder %v5861_v42, 0  ;;  %v2599_v56 = vadd.s32 %v19133_v26, %v19141_v13 }
 0x4ec   : > { %v2614_v55 = vsel %vm14159_vm11, 0, %v14158_v38  ;;  %v2632_v57 = vsel %vm19203_vm5, 0, %v2630_v21  ;;  %v5929_v25 = vadd.s32 1, %v19217_v52  ;;  %vm5866_vm15 = vcmp.eq.s32.totalorder %v5861_v42, 2 }
 0x4ed   : > { %v2615_v45 = vsub.s32 32, %v2614_v55  ;;  %v2619_v2 = vsub.s32 4294967266, %v2614_v55  ;;  %v5926_v36 = vmul.u32 %v5919_v32, %v5910_v7  ;;  %vm5928_vm0 = vc.u32 %v19224_v39, %v19216_v24 }
 0x4ee   : > { %v2651_v54 = vshrl.u32 %v2650_v48, 23  ;;  %v2616_v30 = vshll.u32 %v19195_v49, %v2614_v55  ;;  %v5930_v26 = vsel %vm5928_vm0, %v5929_v25, %v19217_v52  ;;  %v2636_v40 = vadd.s32 3, %v2632_v57 }
 0x4ef   : > { %v15071_v61 = vpop.eup %15070  ;;  %v2617_v20 = vshrl.u32 %v2599_v56, %v2615_v45  ;;  %v2620_v31 = vadd.s32 127, %v2619_v2  ;;  %v5931_v41 = vadd.s32 %v5930_v26, %v5926_v36  ;;  %v2647_v11 = vand.u32 2147483647, %v19213_v22 }
 0x4f0   : > { %v15073_v13 = vpop.eup %15072  ;;  %v5867_v37 = vxor.u32 2147483648, %v15071_v61  ;;  %v14160_v34 = vadd.s32 4294967169, %v2651_v54  ;;  %v5978_v62 = vand.u32 2139095040, %v19247_v19  ;;  %v19263_v21 = vand.u32 3, %v2636_v40 }
 0x4f1   : > { %v5864_v50 = vxor.u32 2147483648, %v15073_v13  ;;  %v2618_v33 = vor.u32 %v2617_v20, %v2616_v30  ;;  %v2621_v5 = vshll.u32 %v2620_v31, 23  ;;  %v5932_v49 = vadd.s32 536870912, %v5931_v41 }
 0x4f2   : > { %v5868_v16 = vsel %vm5866_vm15, %v5867_v37, %v15073_v13  ;;  %v12537_v47 = vsel %vm12535_vm10, %v5867_v37, %v15073_v13  ;;  %v2657_v58 = vadd.s32 1, %v14160_v34  ;;  %v2654_v42 = vand.u32 8388607, %v2647_v11 }
 0x4f3   : > { %v5865_v53 = vsel %vm5863_vm14, %v15071_v61, %v5864_v50  ;;  %v12534_v9 = vsel %vm12532_vm8, %v15071_v61, %v5864_v50  ;;  %v2622_v63 = vor.u32 4788187, %v2621_v5  ;;  %v2625_v59 = vcvt.s32.f32 %v2618_v33 }
 0x4f4   : > { %v5869_v43 = vsel %vm5862_vm13, %v5865_v53, %v5868_v16  ;;  %v12538_v1 = vsel %vm12531_vm9, %v12534_v9, %v12537_v47  ;;  %v5933_v23 = vshrl.u32 %v5932_v49, 30  ;;  %vm2658_vm1 = vcmp.gt.s32.totalorder %v2657_v58, 0 }
 0x4f5   : > { %v5870_v46 = vsel %vm5859_vm12, nan, %v5869_v43  ;;  %v12539_v60 = vsel %vm5859_vm12, nan, %v12538_v1  ;;  %v2623_v32 = vand.u32 2147483647, %v2622_v63  ;;  %v2659_v18 = vsel %vm2658_vm1, %v2657_v58, 0 }
 0x4f6   : > { %7273 = vst [vmem:[%s15815_s20 + $0x190] sm:$0xff] %v5870_v46  ;;  %13929 = vst [vmem:[%s15815_s20 + $0x390] sm:$0xff] %v12539_v60  ;;  %v5934_v3 = vshll.u32 %v5933_v23, 30  ;;  %v2661_v29 = vand.u32 31, %v2659_v18  ;;  %v19265_v12 = vand.u32 3, %v2632_v57  ;;  %vm5873_vm4 = vcmp.lt.s32.totalorder %v19066_v27, 0 }
 0x4f7   : > { %v2626_v14 = vmul.f32 %v2625_v59, %v2623_v32  ;;  %v2655_v7 = vor.u32 8388608, %v2654_v42  ;;  %v5975_v48 = vand.u32 2147483647, %v19247_v19  ;;  %v5979_v56 = vshrl.u32 %v5978_v62, 23 }
 0x4f8   : > { %v19261_v38 = vsub.s32 %v5931_v41, %v5934_v3  ;;  %v2662_v28 = vsub.s32 32, %v2661_v29  ;;  %v5957_v54 = vsub.s32 4, %v5933_v23  ;;  %v19279_v61 = vshrl.u32 %v2659_v18, 5 }
 0x4f9   : > { %v2627_v52 = vxor.u32 2147483648, %v2626_v14  ;;  %v2664_v30 = vshll.u32 %v15257_v0, %v2661_v29  ;;  %v2667_v20 = vshll.u32 %v15258_v4, %v2661_v29  ;;  %v2670_v31 = vshll.u32 %v15259_v6, %v2661_v29 }
 0x4fa   : > { %v5937_v35 = vsub.s32 0, %v19261_v38  ;;  %v2665_v45 = vshrl.u32 %v15258_v4, %v2662_v28  ;;  %v2668_v2 = vshrl.u32 %v15259_v6, %v2662_v28  ;;  %v2671_v25 = vshrl.u32 %v15260_v8, %v2662_v28 }
 0x4fb   : > { %v2628_v55 = vsel %vm2545_vm3, %v2627_v52, %v2626_v14  ;;  %v5927_v26 = vadd.s32 %v19216_v24, %v19224_v39  ;;  %v19286_v37 = vshll.u32 %v2655_v7, 8  ;;  %v2673_v34 = vshll.u32 %v15260_v8, %v2661_v29 }
 0x4fc   : > { %v2631_v57 = vsel %vm19203_vm5, %v18997_v44, %v2628_v55  ;;  %v14285_v36 = vmin.u32 %v5937_v35, %v19261_v38  ;;  %v2666_v15 = vor.u32 %v2665_v45, %v2664_v30  ;;  %v2669_v40 = vor.u32 %v2668_v2, %v2667_v20 }
 0x4fd   : > { %15074 = vcosq.f32 %v2631_v57  ;;  %v2672_v41 = vor.u32 %v2671_v25, %v2670_v31  ;;  %v2674_v33 = vshrl.u32 %v15261_v10, %v2662_v28  ;;  %v2676_v5 = vshll.u32 %v15261_v10, %v2661_v29 }
 0x4fe   : > { %15076 = vsinq.f32 %v2631_v57  ;;  %v5939_v13 = vclz %v14285_v36  ;;  %v2677_v16 = vshrl.u32 %v15262_v17, %v2662_v28  ;;  %v5958_v47 = vsel %vm5873_vm4, %v5957_v54, %v5933_v23 }
 0x4ff   : > { %v2663_v24 = vshrl.u32 %v15257_v0, %v2662_v28  ;;  %vm2679_vm3 = vcmp.lt.s32.totalorder %v19279_v61, 1  ;;  %v14288_v39 = vadd.s32 4294967169, %v5979_v56  ;;  %vm19298_vm5 = vcmp.le.f32.partialorder %v5871_v51, 0.7853982 }
 0x500   : > { %v14286_v50 = vadd.s32 4294967294, %v5939_v13  ;;  %v2675_v58 = vor.u32 %v2674_v33, %v2673_v34  ;;  %v2678_v53 = vor.u32 %v2677_v16, %v2676_v5  ;;  %vm2682_vm7 = vcmp.lt.s32.totalorder %v19279_v61, 4 }
 0x501   : > { %vm2680_vm6 = vcmp.lt.s32.totalorder %v19279_v61, 2  ;;  %vm2681_vm8 = vcmp.lt.s32.totalorder %v19279_v61, 3  ;;  %v2684_v63 = vsel %vm2682_vm7, %v2672_v41, 2102212464  ;;  %vm9342_vm9 = vcmp.eq.s32.totalorder %v19265_v12, 2 }
 0x502   : > { %vm14287_vm2 = vcmp.lt.s32.totalorder %v14286_v50, 0  ;;  %v2687_v51 = vsel %vm2679_vm3, %v2666_v15, %v2669_v40  ;;  %v2691_v1 = vsel %vm2679_vm3, %v2669_v40, %v2672_v41  ;;  %vm9339_vm10 = vcmp.eq.s32.totalorder %v19265_v12, 0 }
 0x503   : > { %v5942_v9 = vsel %vm14287_vm2, 0, %v14286_v50  ;;  %v2683_v46 = vsel %vm2679_vm3, %v2663_v24, %v2666_v15  ;;  %v2688_v60 = vsel %vm2682_vm7, %v2675_v58, 920167782  ;;  %v2692_v32 = vsel %vm2682_vm7, %v2678_v53, 1326507024 }
 0x504   : > { %v5943_v59 = vsub.s32 32, %v5942_v9  ;;  %v5947_v43 = vsub.s32 4294967266, %v5942_v9  ;;  %v5944_v23 = vshll.u32 %v19261_v38, %v5942_v9  ;;  %vm2638_vm11 = vcmp.lt.s32.totalorder %v19263_v21, 2 }
 0x505   : > { %vm9338_vm12 = vcmp.lt.s32.totalorder %v19265_v12, 2  ;;  %v2689_v42 = vsel %vm2681_vm8, %v2672_v41, %v2688_v60  ;;  %v2693_v29 = vsel %vm2681_vm8, %v2675_v58, %v2692_v32  ;;  %vm2635_vm13 = vweird.f32 %v18997_v44 }
 0x506   : > { %v5945_v18 = vshrl.u32 %v5927_v26, %v5943_v59  ;;  %v5948_v3 = vadd.s32 127, %v5947_v43  ;;  %v2685_v62 = vsel %vm2681_vm8, %v2669_v40, %v2684_v63  ;;  %v2690_v14 = vsel %vm2680_vm6, %v2687_v51, %v2689_v42 }
 0x507   : > { %v2694_v38 = vsel %vm2680_vm6, %v2691_v1, %v2693_v29  ;;  %v5985_v28 = vadd.s32 1, %v14288_v39  ;;  %vm2639_vm14 = vcmp.eq.s32.totalorder %v19263_v21, 0  ;;  %vm2642_vm0 = vcmp.eq.s32.totalorder %v19263_v21, 2 }
 0x508   : > { %v5946_v52 = vor.u32 %v5945_v18, %v5944_v23  ;;  %v5949_v35 = vshll.u32 %v5948_v3, 23  ;;  %v19328_v7 = vmul.u32.u64.low %v19286_v37, %v2694_v38  ;;  %v19329_v56 = vmul.u32.u64.high %v19286_v37, %v2694_v38, %v19328_v7 }
 0x509   : > { %v19333_v55 = vmul.u32.u64.low %v19286_v37, %v2690_v14  ;;  %v19334_v45 = vmul.u32.u64.high %v19286_v37, %v2690_v14, %v19333_v55  ;;  %vm5986_vm15 = vcmp.gt.s32.totalorder %v5985_v28, 0  ;;  %v19340_v57 = vand.u32 8388607, %v5975_v48 }
 0x50a   : > { %v15075_v2 = vpop.eup %15074  ;;  %v5950_v25 = vor.u32 4788187, %v5949_v35  ;;  %v5987_v36 = vsel %vm5986_vm15, %v5985_v28, 0  ;;  %v5960_v20 = vsel %vm19298_vm5, 0, %v5958_v47  ;;  %v2686_v31 = vsel %vm2680_vm6, %v2683_v46, %v2685_v62 }
 0x50b   : > { %v15077_v54 = vpop.eup %15076  ;;  %v2643_v30 = vxor.u32 2147483648, %v15075_v2  ;;  %v5989_v26 = vand.u32 31, %v5987_v36  ;;  %v5953_v40 = vcvt.s32.f32 %v5946_v52  ;;  %vm2704_vm1 = vc.u32 %v19329_v56, %v19333_v55 }
 0x50c   : > { %v2640_v13 = vxor.u32 2147483648, %v15077_v54  ;;  %v5951_v15 = vand.u32 2147483647, %v5950_v25  ;;  %v2705_v50 = vadd.s32 1, %v19334_v45  ;;  %v2702_v47 = vmul.u32 %v19286_v37, %v2686_v31 }
 0x50d   : > { %v2644_v41 = vsel %vm2642_vm0, %v2643_v30, %v15077_v54  ;;  %v9344_v34 = vsel %vm9342_vm9, %v2643_v30, %v15077_v54  ;;  %v5990_v33 = vsub.s32 32, %v5989_v26  ;;  %v19361_v53 = vshrl.u32 %v5987_v36, 5 }
 0x50e   : > { %v2641_v61 = vsel %vm2639_vm14, %v15075_v2, %v2640_v13  ;;  %v9341_v5 = vsel %vm9339_vm10, %v15075_v2, %v2640_v13  ;;  %v5954_v16 = vmul.f32 %v5953_v40, %v5951_v15  ;;  %v2706_v58 = vsel %vm2704_vm1, %v2705_v50, %v19334_v45  ;;  %v19405_v50 = vpop.f32.mrf.mxu0 }
 0x50f   : > { %v2645_v24 = vsel %vm2638_vm11, %v2641_v61, %v2644_v41  ;;  %v9345_v39 = vsel %vm9338_vm12, %v9341_v5, %v9344_v34  ;;  %v2707_v43 = vadd.s32 %v2706_v58, %v2702_v47  ;;  %v5992_v21 = vshll.u32 %v15257_v0, %v5989_v26 }
 0x510   : > { %v2646_v9 = vsel %vm2635_vm13, nan, %v2645_v24  ;;  %v9346_v63 = vsel %vm2635_vm13, nan, %v9345_v39  ;;  %v5955_v59 = vxor.u32 2147483648, %v5954_v16  ;;  %v5993_v37 = vshrl.u32 %v15258_v4, %v5990_v33 }
 0x511   : > { %7242 = vst [vmem:[%s15815_s20 + $0x98] sm:$0xff] %v2646_v9  ;;  %13898 = vst [vmem:[%s15815_s20 + $0x298] sm:$0xff] %v9346_v63  ;;  %v5995_v12 = vshll.u32 %v15258_v4, %v5989_v26  ;;  %v5996_v51 = vshrl.u32 %v15259_v6, %v5990_v33  ;;  %v2708_v23 = vadd.s32 536870912, %v2707_v43  ;;  %v5998_v46 = vshll.u32 %v15259_v6, %v5989_v26 }
 0x512   : > { %v5956_v1 = vsel %vm5873_vm4, %v5955_v59, %v5954_v16  ;;  %v5999_v44 = vshrl.u32 %v15260_v8, %v5990_v33  ;;  %v5994_v32 = vor.u32 %v5993_v37, %v5992_v21  ;;  %v6001_v18 = vshll.u32 %v15260_v8, %v5989_v26 }
 0x513   : > { %v5959_v60 = vsel %vm19298_vm5, %v19066_v27, %v5956_v1  ;;  %v6002_v3 = vshrl.u32 %v15261_v10, %v5990_v33  ;;  %v2709_v42 = vshrl.u32 %v2708_v23, 30  ;;  %v5997_v29 = vor.u32 %v5996_v51, %v5995_v12 }
 0x514   : > { %15078 = vcosq.f32 %v5959_v60  ;;  %v6000_v62 = vor.u32 %v5999_v44, %v5998_v46  ;;  %v6004_v38 = vshll.u32 %v15261_v10, %v5989_v26  ;;  %v6005_v28 = vshrl.u32 %v15262_v17, %v5990_v33 }
 0x515   : > { %15080 = vsinq.f32 %v5959_v60  ;;  %v6003_v14 = vor.u32 %v6002_v3, %v6001_v18  ;;  %v5964_v52 = vadd.s32 3, %v5960_v20  ;;  %v2710_v35 = vshll.u32 %v2709_v42, 30 }
 0x516   : > { %v5983_v49 = vor.u32 8388608, %v19340_v57  ;;  %v6006_v7 = vor.u32 %v6005_v28, %v6004_v38  ;;  %vm6007_vm4 = vcmp.lt.s32.totalorder %v19361_v53, 1  ;;  %vm6010_vm3 = vcmp.lt.s32.totalorder %v19361_v53, 4 }
 0x517   : > { %v19387_v45 = vsub.s32 %v2707_v43, %v2710_v35  ;;  %vm6009_vm5 = vcmp.lt.s32.totalorder %v19361_v53, 3  ;;  %v6015_v2 = vsel %vm6007_vm4, %v5994_v32, %v5997_v29  ;;  %v6016_v25 = vsel %vm6010_vm3, %v6003_v14, 920167782 }
 0x518   : > { %v12633_v36 = vand.u32 3, %v5960_v20  ;;  %v6017_v54 = vsel %vm6009_vm5, %v6000_v62, %v6016_v25  ;;  %v5991_v57 = vshrl.u32 %v15257_v0, %v5990_v33  ;;  %vm6008_vm2 = vcmp.lt.s32.totalorder %v19361_v53, 2  ;;  %v19443_v25 = vpop.f32.mrf.mxu1 }
 0x519   : > { %v2713_v30 = vsub.s32 0, %v19387_v45  ;;  %v6012_v31 = vsel %vm6010_vm3, %v6000_v62, 2102212464  ;;  %v5965_v26 = vand.u32 3, %v5964_v52  ;;  %v6018_v13 = vsel %vm6008_vm2, %v6015_v2, %v6017_v54 }
 0x51a   : > { %v6020_v15 = vsel %vm6010_vm3, %v6006_v7, 1326507024  ;;  %v6023_v40 = vshll.u32 %v5983_v49, 8  ;;  %vm2649_vm7 = vcmp.lt.s32.totalorder %v19213_v22, 0  ;;  %v6011_v41 = vsel %vm6007_vm4, %v5991_v57, %v5994_v32 }
 0x51b   : > { %v14161_v20 = vmin.u32 %v2713_v30, %v19387_v45  ;;  %v6019_v34 = vsel %vm6007_vm4, %v5997_v29, %v6000_v62  ;;  %v6013_v33 = vsel %vm6009_vm5, %v5997_v29, %v6012_v31  ;;  %v6021_v61 = vsel %vm6009_vm5, %v6003_v14, %v6020_v15 }
 0x51c   : > { %v19411_v5 = vmul.u32.u64.low %v6023_v40, %v6018_v13  ;;  %v19412_v16 = vmul.u32.u64.high %v6023_v40, %v6018_v13, %v19411_v5  ;;  %vm5963_vm6 = vweird.f32 %v19066_v27  ;;  %vm12634_vm8 = vcmp.lt.s32.totalorder %v12633_v36, 2 }
 0x51d   : > { %vm12635_vm9 = vcmp.eq.s32.totalorder %v12633_v36, 0  ;;  %v2715_v47 = vclz %v14161_v20  ;;  %v2733_v24 = vsub.s32 4, %v2709_v42  ;;  %vm5966_vm10 = vcmp.lt.s32.totalorder %v5965_v26, 2 }
 0x51e   : > { %vm12638_vm11 = vcmp.eq.s32.totalorder %v12633_v36, 2  ;;  %v6022_v39 = vsel %vm6008_vm2, %v6019_v34, %v6021_v61  ;;  %v2754_v58 = vand.u32 2139095040, %v19405_v50  ;;  %v6014_v63 = vsel %vm6008_vm2, %v6011_v41, %v6013_v33 }
 0x51f   : > { %v14162_v9 = vadd.s32 4294967294, %v2715_v47  ;;  %v19421_v59 = vmul.u32.u64.low %v6023_v40, %v6022_v39  ;;  %v19422_v43 = vmul.u32.u64.high %v6023_v40, %v6022_v39, %v19421_v59  ;;  %vm5967_vm12 = vcmp.eq.s32.totalorder %v5965_v26, 0 }
 0x520   : > { %vm5970_vm13 = vcmp.eq.s32.totalorder %v5965_v26, 2  ;;  %v2751_v37 = vand.u32 2147483647, %v19405_v50  ;;  %v2755_v12 = vshrl.u32 %v2754_v58, 23  ;;  %v2703_v23 = vadd.s32 %v19333_v55, %v19329_v56 }
 0x521   : > { %v15079_v21 = vpop.eup %15078  ;;  %vm14163_vm14 = vcmp.lt.s32.totalorder %v14162_v9, 0  ;;  %v2734_v46 = vsel %vm2649_vm7, %v2733_v24, %v2709_v42  ;;  %v6030_v60 = vmul.u32 %v6023_v40, %v6014_v63  ;;  %v6033_v32 = vadd.s32 1, %v19412_v16 }
 0x522   : > { %v15081_v51 = vpop.eup %15080  ;;  %v5971_v1 = vxor.u32 2147483648, %v15079_v21  ;;  %v2718_v44 = vsel %vm14163_vm14, 0, %v14162_v9  ;;  %v14164_v62 = vadd.s32 4294967169, %v2755_v12  ;;  %vm6032_vm15 = vc.u32 %v19422_v43, %v19411_v5 }
 0x523   : > { %v5968_v53 = vxor.u32 2147483648, %v15081_v51  ;;  %v2719_v29 = vsub.s32 32, %v2718_v44  ;;  %v2720_v55 = vshll.u32 %v19387_v45, %v2718_v44  ;;  %v2723_v38 = vsub.s32 4294967266, %v2718_v44 }
 0x524   : > { %v5972_v18 = vsel %vm5970_vm13, %v5971_v1, %v15081_v51  ;;  %v12640_v3 = vsel %vm12638_vm11, %v5971_v1, %v15081_v51  ;;  %v6034_v2 = vsel %vm6032_vm15, %v6033_v32, %v19412_v16  ;;  %vm19449_vm0 = vcmp.le.f32.partialorder %v2647_v11, 0.7853982 }
 0x525   : > { %v5969_v14 = vsel %vm5967_vm12, %v15079_v21, %v5968_v53  ;;  %v12637_v56 = vsel %vm12635_vm9, %v15079_v21, %v5968_v53  ;;  %v2721_v52 = vshrl.u32 %v2703_v23, %v2719_v29  ;;  %v2724_v7 = vadd.s32 127, %v2723_v38 }
 0x526   : > { %v5973_v42 = vsel %vm5966_vm10, %v5969_v14, %v5972_v18  ;;  %v12641_v28 = vsel %vm12634_vm8, %v12637_v56, %v12640_v3  ;;  %v6035_v36 = vadd.s32 %v6034_v2, %v6030_v60  ;;  %v2758_v54 = vand.u32 8388607, %v2751_v37 }
 0x527   : > { %v5974_v35 = vsel %vm5963_vm6, nan, %v5973_v42  ;;  %v12642_v49 = vsel %vm5963_vm6, nan, %v12641_v28  ;;  %v2761_v30 = vadd.s32 1, %v14164_v62  ;;  %v2722_v27 = vor.u32 %v2721_v52, %v2720_v55 }
 0x528   : > { %7274 = vst [vmem:[%s15815_s20 + $0x198] sm:$0xff] %v5974_v35  ;;  %13930 = vst [vmem:[%s15815_s20 + $0x398] sm:$0xff] %v12642_v49  ;;  %v2725_v57 = vshll.u32 %v2724_v7, 23  ;;  %v2736_v31 = vsel %vm19449_vm0, 0, %v2734_v46  ;;  %v6036_v26 = vadd.s32 536870912, %v6035_v36  ;;  %v6082_v13 = vand.u32 2139095040, %v19443_v25 }
 0x529   : > { %vm2762_vm1 = vcmp.gt.s32.totalorder %v2761_v30, 0  ;;  %v2740_v11 = vadd.s32 3, %v2736_v31  ;;  %v2759_v41 = vor.u32 8388608, %v2758_v54  ;;  %v2729_v61 = vcvt.s32.f32 %v2722_v27 }
 0x52a   : > { %v2726_v15 = vor.u32 4788187, %v2725_v57  ;;  %v2763_v40 = vsel %vm2762_vm1, %v2761_v30, 0  ;;  %v19458_v20 = vshrl.u32 %v6036_v26, 30  ;;  %v6083_v24 = vshrl.u32 %v6082_v13, 23 }
 0x52b   : > { %v2765_v34 = vand.u32 31, %v2763_v40  ;;  %v19461_v58 = vand.u32 3, %v2736_v31  ;;  %v19463_v9 = vand.u32 3, %v2740_v11  ;;  %v19467_v59 = vshll.u32 %v2759_v41, 8 }
 0x52c   : > { %v2727_v33 = vand.u32 2147483647, %v2726_v15  ;;  %v6038_v16 = vshll.u32 %v19458_v20, 30  ;;  %v6079_v21 = vand.u32 2147483647, %v19443_v25  ;;  %v6031_v46 = vadd.s32 %v19411_v5, %v19422_v43 }
 0x52d   : > { %v2766_v47 = vsub.s32 32, %v2765_v34  ;;  %v2768_v44 = vshll.u32 %v15257_v0, %v2765_v34  ;;  %v14292_v60 = vadd.s32 4294967169, %v6083_v24  ;;  %v2771_v18 = vshll.u32 %v15258_v4, %v2765_v34 }
 0x52e   : > { %v2730_v39 = vmul.f32 %v2729_v61, %v2727_v33  ;;  %v19465_v63 = vsub.s32 %v6035_v36, %v6038_v16  ;;  %v2774_v3 = vshll.u32 %v15259_v6, %v2765_v34  ;;  %v2764_v43 = vshrl.u32 %v2763_v40, 5 }
 0x52f   : > { %v2769_v51 = vshrl.u32 %v15258_v4, %v2766_v47  ;;  %v2772_v1 = vshrl.u32 %v15259_v6, %v2766_v47  ;;  %v2775_v23 = vshrl.u32 %v15260_v8, %v2766_v47  ;;  %v2778_v29 = vshrl.u32 %v15261_v10, %v2766_v47 }
 0x530   : > { %v2731_v12 = vxor.u32 2147483648, %v2730_v39  ;;  %v6041_v53 = vsub.s32 0, %v19465_v63  ;;  %v2777_v14 = vshll.u32 %v15260_v8, %v2765_v34  ;;  %vm5977_vm4 = vcmp.lt.s32.totalorder %v19247_v19, 0 }
 0x531   : > { %v2770_v56 = vor.u32 %v2769_v51, %v2768_v44  ;;  %v2773_v55 = vor.u32 %v2772_v1, %v2771_v18  ;;  %v2776_v38 = vor.u32 %v2775_v23, %v2774_v3  ;;  %v19490_v52 = vand.u32 8388607, %v6079_v21 }
 0x532   : > { %v2732_v32 = vsel %vm2649_vm7, %v2731_v12, %v2730_v39  ;;  %v14289_v5 = vmin.u32 %v6041_v53, %v19465_v63  ;;  %v2779_v28 = vor.u32 %v2778_v29, %v2777_v14  ;;  %v6061_v35 = vsub.s32 4, %v19458_v20 }
 0x533   : > { %v2735_v62 = vsel %vm19449_vm0, %v19213_v22, %v2732_v32  ;;  %v2780_v49 = vshll.u32 %v15261_v10, %v2765_v34  ;;  %v2781_v7 = vshrl.u32 %v15262_v17, %v2766_v47  ;;  %v6089_v2 = vadd.s32 1, %v14292_v60 }
 0x534   : > { %15082 = vcosq.f32 %v2735_v62  ;;  %v6043_v42 = vclz %v14289_v5  ;;  %v2767_v36 = vshrl.u32 %v15257_v0, %v2766_v47  ;;  %vm2783_vm3 = vcmp.lt.s32.totalorder %v2764_v43, 1  ;;  %v19529_v5 = vpop.f32.mrf.mxu0 }
 0x535   : > { %15084 = vsinq.f32 %v2735_v62  ;;  %vm2786_vm5 = vcmp.lt.s32.totalorder %v2764_v43, 4  ;;  %vm19498_vm2 = vcmp.le.f32.partialorder %v5975_v48, 0.7853982  ;;  %v2782_v30 = vor.u32 %v2781_v7, %v2780_v49 }
 0x536   : > { %v14290_v45 = vadd.s32 4294967294, %v6043_v42  ;;  %vm2784_vm7 = vcmp.lt.s32.totalorder %v2764_v43, 2  ;;  %v2788_v27 = vsel %vm2786_vm5, %v2776_v38, 2102212464  ;;  %v2791_v57 = vsel %vm2783_vm3, %v2770_v56, %v2773_v55 }
 0x537   : > { %vm2785_vm8 = vcmp.lt.s32.totalorder %v2764_v43, 3  ;;  %v2787_v31 = vsel %vm2783_vm3, %v2767_v36, %v2770_v56  ;;  %v2792_v26 = vsel %vm2786_vm5, %v2779_v28, 920167782  ;;  %v2795_v40 = vsel %vm2783_vm3, %v2773_v55, %v2776_v38 }
 0x538   : > { %vm14291_vm6 = vcmp.lt.s32.totalorder %v14290_v45, 0  ;;  %v2793_v15 = vsel %vm2785_vm8, %v2776_v38, %v2792_v26  ;;  %v2796_v11 = vsel %vm2786_vm5, %v2782_v30, 1326507024  ;;  %v2789_v33 = vsel %vm2785_vm8, %v2773_v55, %v2788_v27 }
 0x539   : > { %v6046_v13 = vsel %vm14291_vm6, 0, %v14290_v45  ;;  %v2794_v48 = vsel %vm2784_vm7, %v2791_v57, %v2793_v15  ;;  %vm9442_vm9 = vcmp.eq.s32.totalorder %v19461_v58, 0  ;;  %v2797_v16 = vsel %vm2785_vm8, %v2779_v28, %v2796_v11 }
 0x53a   : > { %v6047_v41 = vsub.s32 32, %v6046_v13  ;;  %v6051_v34 = vsub.s32 4294967266, %v6046_v13  ;;  %v6048_v61 = vshll.u32 %v19465_v63, %v6046_v13  ;;  %vm9441_vm10 = vcmp.lt.s32.totalorder %v19461_v58, 2 }
 0x53b   : > { %v19506_v47 = vmul.u32.u64.low %v19467_v59, %v2794_v48  ;;  %v19507_v24 = vmul.u32.u64.high %v19467_v59, %v2794_v48, %v19506_v47  ;;  %v2798_v51 = vsel %vm2784_vm7, %v2795_v40, %v2797_v16  ;;  %vm6090_vm11 = vcmp.gt.s32.totalorder %v6089_v2, 0 }
 0x53c   : > { %v6049_v39 = vshrl.u32 %v6031_v46, %v6047_v41  ;;  %v6052_v12 = vadd.s32 127, %v6051_v34  ;;  %vm2739_vm12 = vweird.f32 %v19213_v22  ;;  %v6062_v1 = vsel %vm5977_vm4, %v6061_v35, %v19458_v20 }
 0x53d   : > { %v19517_v63 = vmul.u32.u64.low %v19467_v59, %v2798_v51  ;;  %v19518_v23 = vmul.u32.u64.high %v19467_v59, %v2798_v51, %v19517_v63  ;;  %v6091_v53 = vsel %vm6090_vm11, %v6089_v2, 0  ;;  %v2790_v32 = vsel %vm2784_vm7, %v2787_v31, %v2789_v33 }
 0x53e   : > { %v6050_v44 = vor.u32 %v6049_v39, %v6048_v61  ;;  %v6053_v60 = vshll.u32 %v6052_v12, 23  ;;  %v6093_v46 = vand.u32 31, %v6091_v53  ;;  %vm2742_vm13 = vcmp.lt.s32.totalorder %v19463_v9, 2 }
 0x53f   : > { %vm2743_vm14 = vcmp.eq.s32.totalorder %v19463_v9, 0  ;;  %vm9445_vm15 = vcmp.eq.s32.totalorder %v19461_v58, 2  ;;  %v2809_v18 = vadd.s32 1, %v19507_v24  ;;  %vm2746_vm0 = vcmp.eq.s32.totalorder %v19463_v9, 2 }
 0x540   : > { %v6054_v20 = vor.u32 4788187, %v6053_v60  ;;  %v6064_v29 = vsel %vm19498_vm2, 0, %v6062_v1  ;;  %v6087_v62 = vor.u32 8388608, %v19490_v52  ;;  %v6057_v56 = vcvt.s32.f32 %v6050_v44 }
 0x541   : > { %v15083_v3 = vpop.eup %15082  ;;  %v2806_v55 = vmul.u32 %v19467_v59, %v2790_v32  ;;  %vm2808_vm1 = vc.u32 %v19518_v23, %v19506_v47  ;;  %v6094_v35 = vsub.s32 32, %v6093_v46  ;;  %v2858_v2 = vand.u32 2139095040, %v19529_v5 }
 0x542   : > { %v15085_v43 = vpop.eup %15084  ;;  %v2747_v14 = vxor.u32 2147483648, %v15083_v3  ;;  %v6055_v42 = vand.u32 2147483647, %v6054_v20  ;;  %v2810_v28 = vsel %vm2808_vm1, %v2809_v18, %v19507_v24  ;;  %v6068_v30 = vadd.s32 3, %v6064_v29 }
 0x543   : > { %v2744_v38 = vxor.u32 2147483648, %v15085_v43  ;;  %v2811_v7 = vadd.s32 %v2810_v28, %v2806_v55  ;;  %v19546_v26 = vshrl.u32 %v6091_v53, 5  ;;  %v6097_v11 = vshrl.u32 %v15258_v4, %v6094_v35 }
 0x544   : > { %v2748_v49 = vsel %vm2746_vm0, %v2747_v14, %v15085_v43  ;;  %v9447_v52 = vsel %vm9445_vm15, %v2747_v14, %v15085_v43  ;;  %v6058_v36 = vmul.f32 %v6057_v56, %v6055_v42  ;;  %v6100_v9 = vshrl.u32 %v15259_v6, %v6094_v35 }
 0x545   : > { %v2745_v59 = vsel %vm2743_vm14, %v15083_v3, %v2744_v38  ;;  %v9444_v45 = vsel %vm9442_vm9, %v15083_v3, %v2744_v38  ;;  %v2812_v31 = vadd.s32 536870912, %v2811_v7  ;;  %v6102_v58 = vshll.u32 %v15259_v6, %v6093_v46 }
 0x546   : > { %v2749_v27 = vsel %vm2742_vm13, %v2745_v59, %v2748_v49  ;;  %v9448_v57 = vsel %vm9441_vm10, %v9444_v45, %v9447_v52  ;;  %v6059_v40 = vxor.u32 2147483648, %v6058_v36  ;;  %v6103_v34 = vshrl.u32 %v15260_v8, %v6094_v35 }
 0x547   : > { %v2750_v13 = vsel %vm2739_vm12, nan, %v2749_v27  ;;  %v9449_v15 = vsel %vm2739_vm12, nan, %v9448_v57  ;;  %v19555_v41 = vshrl.u32 %v2812_v31, 30  ;;  %v6105_v48 = vshll.u32 %v15260_v8, %v6093_v46 }
 0x548   : > { %7243 = vst [vmem:[%s15815_s20 + $0xa0] sm:$0xff] %v2750_v13  ;;  %13899 = vst [vmem:[%s15815_s20 + $0x2a0] sm:$0xff] %v9449_v15  ;;  %v6060_v33 = vsel %vm5977_vm4, %v6059_v40, %v6058_v36  ;;  %v6106_v22 = vshrl.u32 %v15261_v10, %v6094_v35  ;;  %v6109_v61 = vshrl.u32 %v15262_v17, %v6094_v35  ;;  %v2855_v54 = vand.u32 2147483647, %v19529_v5 }
 0x549   : > { %v6063_v16 = vsel %vm19498_vm2, %v19247_v19, %v6060_v33  ;;  %v2814_v24 = vshll.u32 %v19555_v41, 30  ;;  %v6096_v39 = vshll.u32 %v15257_v0, %v6093_v46  ;;  %v6099_v12 = vshll.u32 %v15258_v4, %v6093_v46 }
 0x54a   : > { %15086 = vcosq.f32 %v6063_v16  ;;  %v6104_v51 = vor.u32 %v6103_v34, %v6102_v58  ;;  %v6107_v1 = vor.u32 %v6106_v22, %v6105_v48  ;;  %v6108_v63 = vshll.u32 %v15261_v10, %v6093_v46 }
 0x54b   : > { %15088 = vsinq.f32 %v6063_v16  ;;  %v19572_v53 = vsub.s32 %v2811_v7, %v2814_v24  ;;  %v6098_v44 = vor.u32 %v6097_v11, %v6096_v39  ;;  %v6101_v60 = vor.u32 %v6100_v9, %v6099_v12 }
 0x54c   : > { %v6110_v32 = vor.u32 %v6109_v61, %v6108_v63  ;;  %v2859_v18 = vshrl.u32 %v2858_v2, 23  ;;  %v19575_v3 = vand.u32 3, %v6064_v29  ;;  %vm6114_vm4 = vcmp.lt.s32.totalorder %v19546_v26, 4 }
 0x54d   : > { %v2817_v20 = vsub.s32 0, %v19572_v53  ;;  %v6127_v43 = vshll.u32 %v6087_v62, 8  ;;  %v19579_v14 = vand.u32 3, %v6068_v30  ;;  %vm6111_vm3 = vcmp.lt.s32.totalorder %v19546_v26, 1 }
 0x54e   : > { %v6116_v46 = vsel %vm6114_vm4, %v6104_v51, 2102212464  ;;  %v6120_v56 = vsel %vm6114_vm4, %v6107_v1, 920167782  ;;  %v6095_v38 = vshrl.u32 %v15257_v0, %v6094_v35  ;;  %vm6113_vm5 = vcmp.lt.s32.totalorder %v19546_v26, 3 }
 0x54f   : > { %v14165_v55 = vmin.u32 %v2817_v20, %v19572_v53  ;;  %v6119_v42 = vsel %vm6111_vm3, %v6098_v44, %v6101_v60  ;;  %v6121_v29 = vsel %vm6113_vm5, %v6104_v51, %v6120_v56  ;;  %v6123_v28 = vsel %vm6111_vm3, %v6101_v60, %v6104_v51 }
 0x550   : > { %v6124_v49 = vsel %vm6114_vm4, %v6110_v32, 1326507024  ;;  %v14168_v52 = vadd.s32 4294967169, %v2859_v18  ;;  %vm2753_vm2 = vcmp.lt.s32.totalorder %v19405_v50, 0  ;;  %vm6112_vm7 = vcmp.lt.s32.totalorder %v19546_v26, 2 }
 0x551   : > { %v2819_v62 = vclz %v14165_v55  ;;  %v6115_v7 = vsel %vm6111_vm3, %v6095_v38, %v6098_v44  ;;  %v6117_v2 = vsel %vm6113_vm5, %v6101_v60, %v6116_v46  ;;  %vm12738_vm6 = vcmp.eq.s32.totalorder %v19575_v3, 0 }
 0x552   : > { %vm12741_vm8 = vcmp.eq.s32.totalorder %v19575_v3, 2  ;;  %v6122_v59 = vsel %vm6112_vm7, %v6119_v42, %v6121_v29  ;;  %v6125_v35 = vsel %vm6113_vm5, %v6107_v1, %v6124_v49  ;;  %vm12737_vm9 = vcmp.lt.s32.totalorder %v19575_v3, 2 }
 0x553   : > { %v14166_v45 = vadd.s32 4294967294, %v2819_v62  ;;  %v6126_v36 = vsel %vm6112_vm7, %v6123_v28, %v6125_v35  ;;  %v19590_v30 = vmul.u32.u64.low %v6127_v43, %v6122_v59  ;;  %v19591_v27 = vmul.u32.u64.high %v6127_v43, %v6122_v59, %v19590_v30 }
 0x554   : > { %vm6067_vm10 = vweird.f32 %v19247_v19  ;;  %vm19597_vm11 = vcmp.le.f32.partialorder %v2751_v37, 0.7853982  ;;  %v6118_v31 = vsel %vm6112_vm7, %v6115_v7, %v6117_v2  ;;  %v2865_v15 = vadd.s32 1, %v14168_v52 }
 0x555   : > { %v19601_v26 = vmul.u32.u64.low %v6127_v43, %v6126_v36  ;;  %v19602_v13 = vmul.u32.u64.high %v6127_v43, %v6126_v36, %v19601_v26  ;;  %vm6070_vm12 = vcmp.lt.s32.totalorder %v19579_v14, 2  ;;  %vm6071_vm13 = vcmp.eq.s32.totalorder %v19579_v14, 0 }
 0x556   : > { %vm6074_vm14 = vcmp.eq.s32.totalorder %v19579_v14, 2  ;;  %vm14167_vm15 = vcmp.lt.s32.totalorder %v14166_v45, 0  ;;  %v2807_v40 = vadd.s32 %v19506_v47, %v19518_v23  ;;  %v2837_v37 = vsub.s32 4, %v19555_v41 }
 0x557   : > { %v2822_v11 = vsel %vm14167_vm15, 0, %v14166_v45  ;;  %vm2866_vm0 = vcmp.gt.s32.totalorder %v2865_v15, 0  ;;  %v15087_v9 = vpop.eup %15086  ;;  %v6134_v33 = vmul.u32 %v6127_v43, %v6118_v31  ;;  %v6137_v48 = vadd.s32 1, %v19591_v27 }
 0x558   : > { %v2823_v58 = vsub.s32 32, %v2822_v11  ;;  %v2827_v34 = vsub.s32 4294967266, %v2822_v11  ;;  %v15089_v22 = vpop.eup %15088  ;;  %v6075_v61 = vxor.u32 2147483648, %v15087_v9  ;;  %v2824_v16 = vshll.u32 %v19572_v53, %v2822_v11 }
 0x559   : > { %vm6136_vm1 = vc.u32 %v19602_v13, %v19590_v30  ;;  %v2867_v24 = vsel %vm2866_vm0, %v2865_v15, 0  ;;  %v6072_v39 = vxor.u32 2147483648, %v15089_v22  ;;  %v2838_v63 = vsel %vm2753_vm2, %v2837_v37, %v19555_v41 }
 0x55a   : > { %v2825_v47 = vshrl.u32 %v2807_v40, %v2823_v58  ;;  %v2828_v23 = vadd.s32 127, %v2827_v34  ;;  %v6138_v12 = vsel %vm6136_vm1, %v6137_v48, %v19591_v27  ;;  %v6076_v51 = vsel %vm6074_vm14, %v6075_v61, %v15089_v22  ;;  %v19657_v34 = vpop.f32.mrf.mxu1 }
 0x55b   : > { %v12743_v1 = vsel %vm12741_vm8, %v6075_v61, %v15089_v22  ;;  %v6139_v53 = vadd.s32 %v6138_v12, %v6134_v33  ;;  %v6073_v44 = vsel %vm6071_vm13, %v15087_v9, %v6072_v39  ;;  %v12740_v60 = vsel %vm12738_vm6, %v15087_v9, %v6072_v39 }
 0x55c   : > { %v2826_v32 = vor.u32 %v2825_v47, %v2824_v16  ;;  %v2829_v18 = vshll.u32 %v2828_v23, 23  ;;  %v6077_v20 = vsel %vm6070_vm12, %v6073_v44, %v6076_v51  ;;  %v12744_v43 = vsel %vm12737_vm9, %v12740_v60, %v12743_v1 }
 0x55d   : > { %v6140_v46 = vadd.s32 536870912, %v6139_v53  ;;  %v2869_v56 = vand.u32 31, %v2867_v24  ;;  %v6078_v41 = vsel %vm6067_vm10, nan, %v6077_v20  ;;  %v12745_v55 = vsel %vm6067_vm10, nan, %v12744_v43 }
 0x55e   : > { %v2830_v38 = vor.u32 4788187, %v2829_v18  ;;  %v2840_v42 = vsel %vm19597_vm11, 0, %v2838_v63  ;;  %7275 = vst [vmem:[%s15815_s20 + $0x1a0] sm:$0xff] %v6078_v41  ;;  %13931 = vst [vmem:[%s15815_s20 + $0x3a0] sm:$0xff] %v12745_v55  ;;  %v2833_v49 = vcvt.s32.f32 %v2826_v32  ;;  %v2868_v37 = vshrl.u32 %v2867_v24, 5 }
 0x55f   : > { %v19638_v29 = vshrl.u32 %v6140_v46, 30  ;;  %v2862_v3 = vand.u32 8388607, %v2855_v54  ;;  %v2870_v14 = vsub.s32 32, %v2869_v56  ;;  %v2844_v52 = vadd.s32 3, %v2840_v42 }
 0x560   : > { %v2831_v28 = vand.u32 2147483647, %v2830_v38  ;;  %v19643_v19 = vand.u32 3, %v2840_v42  ;;  %v2872_v26 = vshll.u32 %v15257_v0, %v2869_v56  ;;  %v2875_v15 = vshll.u32 %v15258_v4, %v2869_v56 }
 0x561   : > { %v6142_v62 = vshll.u32 %v19638_v29, 30  ;;  %v2873_v2 = vshrl.u32 %v15258_v4, %v2870_v14  ;;  %v2876_v59 = vshrl.u32 %v15259_v6, %v2870_v14  ;;  %v2863_v45 = vor.u32 8388608, %v2862_v3 }
 0x562   : > { %v2834_v7 = vmul.f32 %v2833_v49, %v2831_v28  ;;  %v2879_v36 = vshrl.u32 %v15260_v8, %v2870_v14  ;;  %v2882_v27 = vshrl.u32 %v15261_v10, %v2870_v14  ;;  %v2885_v40 = vshrl.u32 %v15262_v17, %v2870_v14 }
 0x563   : > { %v19647_v35 = vsub.s32 %v6139_v53, %v6142_v62  ;;  %v2878_v9 = vshll.u32 %v15259_v6, %v2869_v56  ;;  %v2881_v58 = vshll.u32 %v15260_v8, %v2869_v56  ;;  %v2874_v48 = vor.u32 %v2873_v2, %v2872_v26 }
 0x564   : > { %v2835_v31 = vxor.u32 2147483648, %v2834_v7  ;;  %v2877_v22 = vor.u32 %v2876_v59, %v2875_v15  ;;  %v2884_v61 = vshll.u32 %v15261_v10, %v2869_v56  ;;  %v2903_v12 = vshll.u32 %v2863_v45, 8 }
 0x565   : > { %v6145_v11 = vsub.s32 0, %v19647_v35  ;;  %v2880_v24 = vor.u32 %v2879_v36, %v2878_v9  ;;  %v2883_v47 = vor.u32 %v2882_v27, %v2881_v58  ;;  %v6186_v51 = vand.u32 2139095040, %v19657_v34 }
 0x566   : > { %v2836_v33 = vsel %vm2753_vm2, %v2835_v31, %v2834_v7  ;;  %v2886_v23 = vor.u32 %v2885_v40, %v2884_v61  ;;  %vm6081_vm4 = vcmp.lt.s32.totalorder %v19443_v25, 0  ;;  %v6165_v63 = vsub.s32 4, %v19638_v29 }
 0x567   : > { %v2839_v16 = vsel %vm19597_vm11, %v19405_v50, %v2836_v33  ;;  %v14293_v39 = vmin.u32 %v6145_v11, %v19647_v35  ;;  %vm2887_vm3 = vcmp.lt.s32.totalorder %v2868_v37, 1  ;;  %v2871_v53 = vshrl.u32 %v15257_v0, %v2870_v14 }
 0x568   : > { %15090 = vcosq.f32 %v2839_v16  ;;  %vm2889_vm5 = vcmp.lt.s32.totalorder %v2868_v37, 3  ;;  %vm2890_vm2 = vcmp.lt.s32.totalorder %v2868_v37, 4  ;;  %v2895_v57 = vsel %vm2887_vm3, %v2874_v48, %v2877_v22 }
 0x569   : > { %15092 = vsinq.f32 %v2839_v16  ;;  %v6147_v1 = vclz %v14293_v39  ;;  %v2892_v60 = vsel %vm2890_vm2, %v2880_v24, 2102212464  ;;  %v2896_v32 = vsel %vm2890_vm2, %v2883_v47, 920167782 }
 0x56a   : > { %v2899_v18 = vsel %vm2887_vm3, %v2877_v22, %v2880_v24  ;;  %vm2888_vm7 = vcmp.lt.s32.totalorder %v2868_v37, 2  ;;  %v2891_v20 = vsel %vm2887_vm3, %v2871_v53, %v2874_v48  ;;  %v2897_v43 = vsel %vm2889_vm5, %v2880_v24, %v2896_v32 }
 0x56b   : > { %v14294_v44 = vadd.s32 4294967294, %v6147_v1  ;;  %v2900_v46 = vsel %vm2890_vm2, %v2886_v23, 1326507024  ;;  %v2893_v56 = vsel %vm2889_vm5, %v2877_v22, %v2892_v60  ;;  %v2898_v41 = vsel %vm2888_vm7, %v2895_v57, %v2897_v43  ;;  %v19703_v23 = vpop.f32.mrf.mxu0 }
 0x56c   : > { %v2901_v55 = vsel %vm2889_vm5, %v2883_v47, %v2900_v46  ;;  %v19672_v3 = vmul.u32.u64.low %v2903_v12, %v2898_v41  ;;  %v19673_v14 = vmul.u32.u64.high %v2903_v12, %v2898_v41, %v19672_v3  ;;  %v2845_v28 = vand.u32 3, %v2844_v52 }
 0x56d   : > { %vm14295_vm6 = vcmp.lt.s32.totalorder %v14294_v44, 0  ;;  %v2902_v42 = vsel %vm2888_vm7, %v2899_v18, %v2901_v55  ;;  %v6135_v49 = vadd.s32 %v19590_v30, %v19602_v13  ;;  %vm19680_vm8 = vcmp.le.f32.partialorder %v6079_v21, 0.7853982 }
 0x56e   : > { %v6150_v38 = vsel %vm14295_vm6, 0, %v14294_v44  ;;  %v19684_v59 = vmul.u32.u64.low %v2903_v12, %v2902_v42  ;;  %v19685_v45 = vmul.u32.u64.high %v2903_v12, %v2902_v42, %v19684_v59  ;;  %v6187_v36 = vshrl.u32 %v6186_v51, 23 }
 0x56f   : > { %v6151_v62 = vsub.s32 32, %v6150_v38  ;;  %v6155_v7 = vsub.s32 4294967266, %v6150_v38  ;;  %vm9544_vm9 = vcmp.lt.s32.totalorder %v19643_v19, 2  ;;  %v6152_v27 = vshll.u32 %v19647_v35, %v6150_v38 }
 0x570   : > { %v2894_v30 = vsel %vm2888_vm7, %v2891_v20, %v2893_v56  ;;  %vm2843_vm10 = vweird.f32 %v19405_v50  ;;  %vm9545_vm11 = vcmp.eq.s32.totalorder %v19643_v19, 0  ;;  %v6166_v21 = vsel %vm6081_vm4, %v6165_v63, %v19638_v29 }
 0x571   : > { %v6153_v52 = vshrl.u32 %v6135_v49, %v6151_v62  ;;  %v6156_v31 = vadd.s32 127, %v6155_v7  ;;  %v2913_v13 = vadd.s32 1, %v19673_v14  ;;  %v14296_v26 = vadd.s32 4294967169, %v6187_v36 }
 0x572   : > { %vm2846_vm12 = vcmp.lt.s32.totalorder %v2845_v28, 2  ;;  %vm9548_vm13 = vcmp.eq.s32.totalorder %v19643_v19, 2  ;;  %vm2847_vm14 = vcmp.eq.s32.totalorder %v2845_v28, 0  ;;  %v2910_v40 = vmul.u32 %v2903_v12, %v2894_v30 }
 0x573   : > { %v6154_v15 = vor.u32 %v6153_v52, %v6152_v27  ;;  %v6157_v35 = vshll.u32 %v6156_v31, 23  ;;  %vm2912_vm15 = vc.u32 %v19685_v45, %v19672_v3  ;;  %v6193_v11 = vadd.s32 1, %v14296_v26 }
 0x574   : > { %vm2850_vm0 = vcmp.eq.s32.totalorder %v2845_v28, 2  ;;  %v6168_v29 = vsel %vm19680_vm8, 0, %v6166_v21  ;;  %v2914_v58 = vsel %vm2912_vm15, %v2913_v13, %v19673_v14  ;;  %v6183_v61 = vand.u32 2147483647, %v19657_v34 }
 0x575   : > { %v15091_v37 = vpop.eup %15090  ;;  %v6158_v9 = vor.u32 4788187, %v6157_v35  ;;  %v2915_v22 = vadd.s32 %v2914_v58, %v2910_v40  ;;  %vm6194_vm1 = vcmp.gt.s32.totalorder %v6193_v11, 0  ;;  %v6161_v24 = vcvt.s32.f32 %v6154_v15 }
 0x576   : > { %v15093_v33 = vpop.eup %15092  ;;  %v2851_v48 = vxor.u32 2147483648, %v15091_v37  ;;  %v6195_v47 = vsel %vm6194_vm1, %v6193_v11, 0  ;;  %v6172_v1 = vadd.s32 3, %v6168_v29  ;;  %v2962_v43 = vand.u32 2139095040, %v19703_v23 }
 0x577   : > { %v2848_v16 = vxor.u32 2147483648, %v15093_v33  ;;  %v6159_v39 = vand.u32 2147483647, %v6158_v9  ;;  %v2916_v63 = vadd.s32 536870912, %v2915_v22  ;;  %v6197_v60 = vand.u32 31, %v6195_v47 }
 0x578   : > { %v2852_v12 = vsel %vm2850_vm0, %v2851_v48, %v15093_v33  ;;  %v9550_v51 = vsel %vm9548_vm13, %v2851_v48, %v15093_v33  ;;  %v19725_v42 = vand.u32 3, %v6168_v29  ;;  %v6190_v14 = vand.u32 8388607, %v6183_v61 }
 0x579   : > { %v2849_v53 = vsel %vm2847_vm14, %v15091_v37, %v2848_v16  ;;  %v9547_v57 = vsel %vm9545_vm11, %v15091_v37, %v2848_v16  ;;  %v6162_v44 = vmul.f32 %v6161_v24, %v6159_v39  ;;  %v19713_v20 = vshrl.u32 %v2916_v63, 30 }
 0x57a   : > { %v2853_v32 = vsel %vm2846_vm12, %v2849_v53, %v2852_v12  ;;  %v9551_v18 = vsel %vm9544_vm9, %v9547_v57, %v9550_v51  ;;  %v6198_v55 = vsub.s32 32, %v6197_v60  ;;  %v2959_v28 = vand.u32 2147483647, %v19703_v23 }
 0x57b   : > { %v2854_v46 = vsel %vm2843_vm10, nan, %v2853_v32  ;;  %v9552_v56 = vsel %vm2843_vm10, nan, %v9551_v18  ;;  %v6163_v41 = vxor.u32 2147483648, %v6162_v44  ;;  %v2918_v38 = vshll.u32 %v19713_v20, 30 }
 0x57c   : > { %7244 = vst [vmem:[%s15815_s20 + $0xa8] sm:$0xff] %v2854_v46  ;;  %13900 = vst [vmem:[%s15815_s20 + $0x2a8] sm:$0xff] %v9552_v56  ;;  %v6201_v62 = vshrl.u32 %v15258_v4, %v6198_v55  ;;  %v6204_v7 = vshrl.u32 %v15259_v6, %v6198_v55  ;;  %v19737_v59 = vand.u32 3, %v6172_v1  ;;  %v6196_v36 = vshrl.u32 %v6195_v47, 5 }
 0x57d   : > { %v6164_v19 = vsel %vm6081_vm4, %v6163_v41, %v6162_v44  ;;  %v19733_v49 = vsub.s32 %v2915_v22, %v2918_v38  ;;  %v2963_v27 = vshrl.u32 %v2962_v43, 23  ;;  %v6200_v31 = vshll.u32 %v15257_v0, %v6197_v60 }
 0x57e   : > { %v6167_v50 = vsel %vm19680_vm8, %v19443_v25, %v6164_v19  ;;  %v6203_v30 = vshll.u32 %v15258_v4, %v6197_v60  ;;  %v6206_v2 = vshll.u32 %v15259_v6, %v6197_v60  ;;  %v6207_v21 = vshrl.u32 %v15260_v8, %v6198_v55 }
 0x57f   : > { %15094 = vcosq.f32 %v6167_v50  ;;  %v2921_v52 = vsub.s32 0, %v19733_v49  ;;  %v6209_v13 = vshll.u32 %v15260_v8, %v6197_v60  ;;  %v6210_v26 = vshrl.u32 %v15261_v10, %v6198_v55 }
 0x580   : > { %15096 = vsinq.f32 %v6167_v50  ;;  %v6191_v35 = vor.u32 8388608, %v6190_v14  ;;  %v6202_v40 = vor.u32 %v6201_v62, %v6200_v31  ;;  %v6205_v11 = vor.u32 %v6204_v7, %v6203_v30 }
 0x581   : > { %v14169_v15 = vmin.u32 %v2921_v52, %v19733_v49  ;;  %v6208_v37 = vor.u32 %v6207_v21, %v6206_v2  ;;  %v6211_v9 = vor.u32 %v6210_v26, %v6209_v13  ;;  %v6212_v29 = vshll.u32 %v15261_v10, %v6197_v60 }
 0x582   : > { %v6213_v58 = vshrl.u32 %v15262_v17, %v6198_v55  ;;  %v2911_v33 = vadd.s32 %v19672_v3, %v19685_v45  ;;  %v6199_v22 = vshrl.u32 %v15257_v0, %v6198_v55  ;;  %v14172_v16 = vadd.s32 4294967169, %v2963_v27 }
 0x583   : > { %v2923_v48 = vclz %v14169_v15  ;;  %vm6215_vm4 = vcmp.lt.s32.totalorder %v6196_v36, 1  ;;  %vm6217_vm3 = vcmp.lt.s32.totalorder %v6196_v36, 3  ;;  %vm6218_vm5 = vcmp.lt.s32.totalorder %v6196_v36, 4 }
 0x584   : > { %v6214_v39 = vor.u32 %v6213_v58, %v6212_v29  ;;  %vm12844_vm2 = vcmp.eq.s32.totalorder %v19725_v42, 2  ;;  %v6219_v47 = vsel %vm6215_vm4, %v6199_v22, %v6202_v40  ;;  %v6220_v12 = vsel %vm6218_vm5, %v6208_v37, 2102212464 }
 0x585   : > { %v14170_v24 = vadd.s32 4294967294, %v2923_v48  ;;  %v6223_v51 = vsel %vm6215_vm4, %v6202_v40, %v6205_v11  ;;  %vm12841_vm7 = vcmp.eq.s32.totalorder %v19725_v42, 0  ;;  %v6221_v1 = vsel %vm6217_vm3, %v6205_v11, %v6220_v12 }
 0x586   : > { %v6224_v63 = vsel %vm6218_vm5, %v6211_v9, 920167782  ;;  %v6227_v3 = vsel %vm6215_vm4, %v6205_v11, %v6208_v37  ;;  %v6228_v45 = vsel %vm6218_vm5, %v6214_v39, 1326507024  ;;  %vm6174_vm6 = vcmp.lt.s32.totalorder %v19737_v59, 2 }
 0x587   : > { %vm12840_vm8 = vcmp.lt.s32.totalorder %v19725_v42, 2  ;;  %vm14171_vm9 = vcmp.lt.s32.totalorder %v14170_v24, 0  ;;  %vm6216_vm10 = vcmp.lt.s32.totalorder %v6196_v36, 2  ;;  %v6225_v53 = vsel %vm6217_vm3, %v6208_v37, %v6224_v63 }
 0x588   : > { %v6229_v57 = vsel %vm6217_vm3, %v6211_v9, %v6228_v45  ;;  %vm6171_vm11 = vweird.f32 %v19443_v25  ;;  %v2926_v44 = vsel %vm14171_vm9, 0, %v14170_v24  ;;  %v6226_v60 = vsel %vm6216_vm10, %v6223_v51, %v6225_v53 }
 0x589   : > { %v6230_v32 = vsel %vm6216_vm10, %v6227_v3, %v6229_v57  ;;  %v6231_v18 = vshll.u32 %v6191_v35, 8  ;;  %vm2857_vm12 = vcmp.lt.s32.totalorder %v19529_v5, 0  ;;  %v2927_v43 = vsub.s32 32, %v2926_v44 }
 0x58a   : > { %v2931_v46 = vsub.s32 4294967266, %v2926_v44  ;;  %v6222_v56 = vsel %vm6216_vm10, %v6219_v47, %v6221_v1  ;;  %v2969_v41 = vadd.s32 1, %v14172_v16  ;;  %v2928_v62 = vshll.u32 %v19733_v49, %v2926_v44 }
 0x58b   : > { %v19761_v55 = vmul.u32.u64.low %v6231_v18, %v6230_v32  ;;  %v19762_v38 = vmul.u32.u64.high %v6231_v18, %v6230_v32, %v19761_v55  ;;  %v19764_v19 = vmul.u32.u64.low %v6231_v18, %v6226_v60  ;;  %v19765_v14 = vmul.u32.u64.high %v6231_v18, %v6226_v60, %v19764_v19 }
 0x58c   : > { %v15095_v50 = vpop.eup %15094  ;;  %v2929_v7 = vshrl.u32 %v2911_v33, %v2927_v43  ;;  %v2932_v36 = vadd.s32 127, %v2931_v46  ;;  %vm2970_vm13 = vcmp.gt.s32.totalorder %v2969_v41, 0  ;;  %vm6175_vm14 = vcmp.eq.s32.totalorder %v19737_v59, 0 }
 0x58d   : > { %v15097_v27 = vpop.eup %15096  ;;  %vm6178_vm15 = vcmp.eq.s32.totalorder %v19737_v59, 2  ;;  %v6179_v52 = vxor.u32 2147483648, %v15095_v50  ;;  %v19773_v31 = vand.u32 8388607, %v2959_v28  ;;  %v2971_v13 = vsel %vm2970_vm13, %v2969_v41, 0 }
 0x58e   : > { %v6176_v30 = vxor.u32 2147483648, %v15097_v27  ;;  %v2930_v2 = vor.u32 %v2929_v7, %v2928_v62  ;;  %v2933_v21 = vshll.u32 %v2932_v36, 23  ;;  %v2941_v15 = vsub.s32 4, %v19713_v20 }
 0x58f   : > { %v6180_v26 = vsel %vm6178_vm15, %v6179_v52, %v15097_v27  ;;  %v12846_v49 = vsel %vm12844_vm2, %v6179_v52, %v15097_v27  ;;  %v6238_v35 = vmul.u32 %v6231_v18, %v6222_v56  ;;  %vm19782_vm0 = vcmp.le.f32.partialorder %v2855_v54, 0.7853982 }
 0x590   : > { %v6177_v40 = vsel %vm6175_vm14, %v15095_v50, %v6176_v30  ;;  %v12843_v11 = vsel %vm12841_vm7, %v15095_v50, %v6176_v30  ;;  %v2934_v9 = vor.u32 4788187, %v2933_v21  ;;  %vm6240_vm1 = vc.u32 %v19762_v38, %v19764_v19 }
 0x591   : > { %v6181_v29 = vsel %vm6174_vm6, %v6177_v40, %v6180_v26  ;;  %v12847_v58 = vsel %vm12840_vm8, %v12843_v11, %v12846_v49  ;;  %v6241_v33 = vadd.s32 1, %v19765_v14  ;;  %v2973_v48 = vand.u32 31, %v2971_v13  ;;  %v19842_v11 = vpop.f32.mrf.mxu1 }
 0x592   : > { %v6182_v22 = vsel %vm6171_vm11, nan, %v6181_v29  ;;  %v12848_v54 = vsel %vm6171_vm11, nan, %v12847_v58  ;;  %v2935_v16 = vand.u32 2147483647, %v2934_v9  ;;  %v2937_v39 = vcvt.s32.f32 %v2930_v2 }
 0x593   : > { %7276 = vst [vmem:[%s15815_s20 + $0x1a8] sm:$0xff] %v6182_v22  ;;  %13932 = vst [vmem:[%s15815_s20 + $0x3a8] sm:$0xff] %v12848_v54  ;;  %v2942_v59 = vsel %vm2857_vm12, %v2941_v15, %v19713_v20  ;;  %v6242_v42 = vsel %vm6240_vm1, %v6241_v33, %v19765_v14  ;;  %v19803_v24 = vshrl.u32 %v2971_v13, 5  ;;  %v2974_v47 = vsub.s32 32, %v2973_v48 }
 0x594   : > { %v2938_v12 = vmul.f32 %v2937_v39, %v2935_v16  ;;  %v6243_v51 = vadd.s32 %v6242_v42, %v6238_v35  ;;  %v2976_v1 = vshll.u32 %v15257_v0, %v2973_v48  ;;  %v2979_v25 = vshll.u32 %v15258_v4, %v2973_v48 }
 0x595   : > { %v2977_v63 = vshrl.u32 %v15258_v4, %v2974_v47  ;;  %v2980_v3 = vshrl.u32 %v15259_v6, %v2974_v47  ;;  %v2982_v45 = vshll.u32 %v15259_v6, %v2973_v48  ;;  %v2983_v53 = vshrl.u32 %v15260_v8, %v2974_v47 }
 0x596   : > { %v2939_v20 = vxor.u32 2147483648, %v2938_v12  ;;  %v6244_v57 = vadd.s32 536870912, %v6243_v51  ;;  %v2985_v44 = vshll.u32 %v15260_v8, %v2973_v48  ;;  %v2986_v60 = vshrl.u32 %v15261_v10, %v2974_v47 }
 0x597   : > { %v2978_v32 = vor.u32 %v2977_v63, %v2976_v1  ;;  %v2981_v18 = vor.u32 %v2980_v3, %v2979_v25  ;;  %v2988_v43 = vshll.u32 %v15261_v10, %v2973_v48  ;;  %v2989_v46 = vshrl.u32 %v15262_v17, %v2974_v47 }
 0x598   : > { %v2940_v56 = vsel %vm2857_vm12, %v2939_v20, %v2938_v12  ;;  %v6245_v41 = vshrl.u32 %v6244_v57, 30  ;;  %v2984_v55 = vor.u32 %v2983_v53, %v2982_v45  ;;  %v2987_v14 = vor.u32 %v2986_v60, %v2985_v44 }
 0x599   : > { %v2943_v50 = vsel %vm19782_vm0, %v19529_v5, %v2940_v56  ;;  %v2944_v62 = vsel %vm19782_vm0, 0, %v2942_v59  ;;  %v2967_v7 = vor.u32 8388608, %v19773_v31  ;;  %vm2991_vm4 = vcmp.lt.s32.totalorder %v19803_v24, 1 }
 0x59a   : > { %15098 = vcosq.f32 %v2943_v50  ;;  %v6246_v36 = vshll.u32 %v6245_v41, 30  ;;  %v2990_v27 = vor.u32 %v2989_v46, %v2988_v43  ;;  %vm2994_vm3 = vcmp.lt.s32.totalorder %v19803_v24, 4 }
 0x59b   : > { %15100 = vsinq.f32 %v2943_v50  ;;  %vm2993_vm5 = vcmp.lt.s32.totalorder %v19803_v24, 3  ;;  %v2999_v52 = vsel %vm2991_vm4, %v2978_v32, %v2981_v18  ;;  %v3000_v30 = vsel %vm2994_vm3, %v2987_v14, 920167782 }
 0x59c   : > { %v2948_v2 = vadd.s32 3, %v2944_v62  ;;  %v19830_v21 = vsub.s32 %v6243_v51, %v6246_v36  ;;  %vm2992_vm2 = vcmp.lt.s32.totalorder %v19803_v24, 2  ;;  %v3001_v31 = vsel %vm2993_vm5, %v2984_v55, %v3000_v30 }
 0x59d   : > { %v3002_v13 = vsel %vm2992_vm2, %v2999_v52, %v3001_v31  ;;  %v3007_v26 = vshll.u32 %v2967_v7, 8  ;;  %v9646_v49 = vand.u32 3, %v2944_v62  ;;  %v3003_v35 = vsel %vm2991_vm4, %v2981_v18, %v2984_v55 }
 0x59e   : > { %v6249_v15 = vsub.s32 0, %v19830_v21  ;;  %v3004_v40 = vsel %vm2994_vm3, %v2990_v27, 1326507024  ;;  %v2996_v37 = vsel %vm2994_vm3, %v2984_v55, 2102212464  ;;  %v2949_v33 = vand.u32 3, %v2948_v2 }
 0x59f   : > { %v3005_v9 = vsel %vm2993_vm5, %v2987_v14, %v3004_v40  ;;  %v19848_v29 = vmul.u32.u64.low %v3007_v26, %v3002_v13  ;;  %v19849_v58 = vmul.u32.u64.high %v3007_v26, %v3002_v13, %v19848_v29  ;;  %v2975_v22 = vshrl.u32 %v15257_v0, %v2974_v47 }
 0x5a0   : > { %v14297_v48 = vmin.u32 %v6249_v15, %v19830_v21  ;;  %v3006_v54 = vsel %vm2992_vm2, %v3003_v35, %v3005_v9  ;;  %v6290_v16 = vand.u32 2139095040, %v19842_v11  ;;  %vm6185_vm7 = vcmp.lt.s32.totalorder %v19657_v34, 0 }
 0x5a1   : > { %v2995_v59 = vsel %vm2991_vm4, %v2975_v22, %v2978_v32  ;;  %v2997_v42 = vsel %vm2993_vm5, %v2981_v18, %v2996_v37  ;;  %vm9647_vm6 = vcmp.lt.s32.totalorder %v9646_v49, 2  ;;  %v6269_v12 = vsub.s32 4, %v6245_v41 }
 0x5a2   : > { %v6251_v39 = vclz %v14297_v48  ;;  %v19862_v51 = vmul.u32.u64.low %v3007_v26, %v3006_v54  ;;  %v19863_v1 = vmul.u32.u64.high %v3007_v26, %v3006_v54, %v19862_v51  ;;  %v6291_v47 = vshrl.u32 %v6290_v16, 23 }
 0x5a3   : > { %vm2947_vm8 = vweird.f32 %v19529_v5  ;;  %vm2950_vm9 = vcmp.lt.s32.totalorder %v2949_v33, 2  ;;  %vm9648_vm10 = vcmp.eq.s32.totalorder %v9646_v49, 0  ;;  %vm9651_vm11 = vcmp.eq.s32.totalorder %v9646_v49, 2 }
 0x5a4   : > { %v14298_v25 = vadd.s32 4294967294, %v6251_v39  ;;  %vm2951_vm12 = vcmp.eq.s32.totalorder %v2949_v33, 0  ;;  %v2998_v63 = vsel %vm2992_vm2, %v2995_v59, %v2997_v42  ;;  %v3017_v3 = vadd.s32 1, %v19849_v58 }
 0x5a5   : > { %v14300_v45 = vadd.s32 4294967169, %v6291_v47  ;;  %vm2954_vm13 = vcmp.eq.s32.totalorder %v2949_v33, 2  ;;  %v6239_v53 = vadd.s32 %v19764_v19, %v19762_v38  ;;  %v6287_v20 = vand.u32 2147483647, %v19842_v11 }
 0x5a6   : > { %vm14299_vm14 = vcmp.lt.s32.totalorder %v14298_v25, 0  ;;  %v6270_v60 = vsel %vm6185_vm7, %v6269_v12, %v6245_v41  ;;  %vm3016_vm15 = vc.u32 %v19863_v1, %v19848_v29  ;;  %v3014_v56 = vmul.u32 %v3007_v26, %v2998_v63 }
 0x5a7   : > { %v15099_v57 = vpop.eup %15098  ;;  %v6254_v44 = vsel %vm14299_vm14, 0, %v14298_v25  ;;  %v6297_v24 = vadd.s32 1, %v14300_v45  ;;  %v3018_v19 = vsel %vm3016_vm15, %v3017_v3, %v19849_v58  ;;  %vm19890_vm1 = vcmp.le.f32.partialorder %v6183_v61, 0.7853982  ;;  %v19900_v58 = vpop.f32.mrf.mxu0 }
 0x5a8   : > { %v15101_v32 = vpop.eup %15100  ;;  %v2955_v18 = vxor.u32 2147483648, %v15099_v57  ;;  %v6255_v43 = vsub.s32 32, %v6254_v44  ;;  %v6259_v46 = vsub.s32 4294967266, %v6254_v44  ;;  %v6256_v38 = vshll.u32 %v19830_v21, %v6254_v44 }
 0x5a9   : > { %v2952_v55 = vxor.u32 2147483648, %v15101_v32  ;;  %vm6298_vm0 = vcmp.gt.s32.totalorder %v6297_v24, 0  ;;  %v3019_v27 = vadd.s32 %v3018_v19, %v3014_v56  ;;  %v6272_v49 = vsel %vm19890_vm1, 0, %v6270_v60 }
 0x5aa   : > { %v2956_v14 = vsel %vm2954_vm13, %v2955_v18, %v15101_v32  ;;  %v9653_v41 = vsel %vm9651_vm11, %v2955_v18, %v15101_v32  ;;  %v6257_v50 = vshrl.u32 %v6239_v53, %v6255_v43  ;;  %v6260_v62 = vadd.s32 127, %v6259_v46 }
 0x5ab   : > { %v2953_v7 = vsel %vm2951_vm12, %v15099_v57, %v2952_v55  ;;  %v9650_v36 = vsel %vm9648_vm10, %v15099_v57, %v2952_v55  ;;  %v6299_v52 = vsel %vm6298_vm0, %v6297_v24, 0  ;;  %v3020_v35 = vadd.s32 536870912, %v3019_v27 }
 0x5ac   : > { %v2957_v30 = vsel %vm2950_vm9, %v2953_v7, %v2956_v14  ;;  %v9654_v2 = vsel %vm9647_vm6, %v9650_v36, %v9653_v41  ;;  %v6258_v21 = vor.u32 %v6257_v50, %v6256_v38  ;;  %v6261_v31 = vshll.u32 %v6260_v62, 23 }
 0x5ad   : > { %v2958_v13 = vsel %vm2947_vm8, nan, %v2957_v30  ;;  %v9655_v26 = vsel %vm2947_vm8, nan, %v9654_v2  ;;  %v6301_v37 = vand.u32 31, %v6299_v52  ;;  %v19898_v9 = vshrl.u32 %v3020_v35, 30 }
 0x5ae   : > { %7245 = vst [vmem:[%s15815_s20 + $0xb0] sm:$0xff] %v2958_v13  ;;  %13901 = vst [vmem:[%s15815_s20 + $0x2b0] sm:$0xff] %v9655_v26  ;;  %v6262_v40 = vor.u32 4788187, %v6261_v31  ;;  %v6265_v33 = vcvt.s32.f32 %v6258_v21  ;;  %v6294_v61 = vand.u32 8388607, %v6287_v20  ;;  %vm6275_vm10 = vweird.f32 %v19657_v34 }
 0x5af   : > { %v6302_v48 = vsub.s32 32, %v6301_v37  ;;  %v6276_v22 = vadd.s32 3, %v6272_v49  ;;  %v19904_v54 = vand.u32 3, %v6272_v49  ;;  %v3022_v16 = vshll.u32 %v19898_v9, 30 }
 0x5b0   : > { %v6263_v5 = vand.u32 2147483647, %v6262_v40  ;;  %v3066_v12 = vand.u32 2139095040, %v19900_v58  ;;  %v6304_v47 = vshll.u32 %v15257_v0, %v6301_v37  ;;  %v6295_v45 = vor.u32 8388608, %v6294_v61 }
 0x5b1   : > { %v6305_v59 = vshrl.u32 %v15258_v4, %v6302_v48  ;;  %v6308_v42 = vshrl.u32 %v15259_v6, %v6302_v48  ;;  %v19910_v51 = vsub.s32 %v3019_v27, %v3022_v16  ;;  %v6311_v25 = vshrl.u32 %v15260_v8, %v6302_v48 }
 0x5b2   : > { %v6266_v39 = vmul.f32 %v6265_v33, %v6263_v5  ;;  %v6314_v63 = vshrl.u32 %v15261_v10, %v6302_v48  ;;  %v6300_v53 = vshrl.u32 %v6299_v52, 5  ;;  %v6307_v57 = vshll.u32 %v15258_v4, %v6301_v37 }
 0x5b3   : > { %v3025_v44 = vsub.s32 0, %v19910_v51  ;;  %v6306_v60 = vor.u32 %v6305_v59, %v6304_v47  ;;  %v6310_v24 = vshll.u32 %v15259_v6, %v6301_v37  ;;  %v6313_v32 = vshll.u32 %v15260_v8, %v6301_v37 }
 0x5b4   : > { %v6267_v3 = vxor.u32 2147483648, %v6266_v39  ;;  %v6309_v43 = vor.u32 %v6308_v42, %v6307_v57  ;;  %v6316_v46 = vshll.u32 %v15261_v10, %v6301_v37  ;;  %v6317_v56 = vshrl.u32 %v15262_v17, %v6302_v48 }
 0x5b5   : > { %v14173_v38 = vmin.u32 %v3025_v44, %v19910_v51  ;;  %v6312_v19 = vor.u32 %v6311_v25, %v6310_v24  ;;  %v6315_v14 = vor.u32 %v6314_v63, %v6313_v32  ;;  %v19927_v50 = vshll.u32 %v6295_v45, 8 }
 0x5b6   : > { %v6268_v18 = vsel %vm6185_vm7, %v6267_v3, %v6266_v39  ;;  %v6318_v41 = vor.u32 %v6317_v56, %v6316_v46  ;;  %v3067_v62 = vshrl.u32 %v3066_v12, 23  ;;  %vm6319_vm4 = vcmp.lt.s32.totalorder %v6300_v53, 1 }
 0x5b7   : > { %v6271_v55 = vsel %vm19890_vm1, %v19657_v34, %v6268_v18  ;;  %v3027_v7 = vclz %v14173_v38  ;;  %vm6320_vm3 = vcmp.lt.s32.totalorder %v6300_v53, 2  ;;  %vm2961_vm5 = vcmp.lt.s32.totalorder %v19703_v23, 0 }
 0x5b8   : > { %15102 = vcosq.f32 %v6271_v55  ;;  %v6303_v36 = vshrl.u32 %v15257_v0, %v6302_v48  ;;  %vm6321_vm2 = vcmp.lt.s32.totalorder %v6300_v53, 3  ;;  %vm6322_vm7 = vcmp.lt.s32.totalorder %v6300_v53, 4 }
 0x5b9   : > { %15104 = vsinq.f32 %v6271_v55  ;;  %v6327_v27 = vsel %vm6319_vm4, %v6306_v60, %v6309_v43  ;;  %v14174_v52 = vadd.s32 4294967294, %v3027_v7  ;;  %v6324_v30 = vsel %vm6322_vm7, %v6312_v19, 2102212464 }
 0x5ba   : > { %v6328_v2 = vsel %vm6322_vm7, %v6315_v14, 920167782  ;;  %v6331_v21 = vsel %vm6319_vm4, %v6309_v43, %v6312_v19  ;;  %v6323_v31 = vsel %vm6319_vm4, %v6303_v36, %v6306_v60  ;;  %v6332_v26 = vsel %vm6322_vm7, %v6318_v41, 1326507024 }
 0x5bb   : > { %v6329_v13 = vsel %vm6321_vm2, %v6312_v19, %v6328_v2  ;;  %v14176_v15 = vadd.s32 4294967169, %v3067_v62  ;;  %vm19933_vm6 = vcmp.le.f32.partialorder %v2959_v28, 0.7853982  ;;  %vm14175_vm8 = vcmp.lt.s32.totalorder %v14174_v52, 0 }
 0x5bc   : > { %v6325_v40 = vsel %vm6321_vm2, %v6309_v43, %v6324_v30  ;;  %v6330_v49 = vsel %vm6320_vm3, %v6327_v27, %v6329_v13  ;;  %v6333_v37 = vsel %vm6321_vm2, %v6315_v14, %v6332_v26  ;;  %v3030_v5 = vsel %vm14175_vm8, 0, %v14174_v52  ;;  %v19972_v27 = vpop.f32.mrf.mxu1 }
 0x5bd   : > { %v6334_v33 = vsel %vm6320_vm3, %v6331_v21, %v6333_v37  ;;  %v19940_v61 = vmul.u32.u64.low %v19927_v50, %v6330_v49  ;;  %v19941_v48 = vmul.u32.u64.high %v19927_v50, %v6330_v49, %v19940_v61  ;;  %v3015_v16 = vadd.s32 %v19848_v29, %v19863_v1 }
 0x5be   : > { %v3031_v28 = vsub.s32 32, %v3030_v5  ;;  %v3035_v39 = vsub.s32 4294967266, %v3030_v5  ;;  %v3045_v59 = vsub.s32 4, %v19898_v9  ;;  %v6277_v42 = vand.u32 3, %v6276_v22 }
 0x5bf   : > { %v19948_v12 = vmul.u32.u64.low %v19927_v50, %v6334_v33  ;;  %v19949_v47 = vmul.u32.u64.high %v19927_v50, %v6334_v33, %v19948_v12  ;;  %v3073_v25 = vadd.s32 1, %v14176_v15  ;;  %vm12943_vm9 = vcmp.lt.s32.totalorder %v19904_v54, 2 }
 0x5c0   : > { %v3032_v63 = vshll.u32 %v19910_v51, %v3030_v5  ;;  %v3033_v3 = vshrl.u32 %v3015_v16, %v3031_v28  ;;  %v3036_v45 = vadd.s32 127, %v3035_v39  ;;  %v6326_v57 = vsel %vm6320_vm3, %v6323_v31, %v6325_v40 }
 0x5c1   : > { %vm12944_vm11 = vcmp.eq.s32.totalorder %v19904_v54, 0  ;;  %v6345_v29 = vadd.s32 1, %v19941_v48  ;;  %v3063_v1 = vand.u32 2147483647, %v19900_v58  ;;  %vm3074_vm12 = vcmp.gt.s32.totalorder %v3073_v25, 0 }
 0x5c2   : > { %v3034_v22 = vor.u32 %v3033_v3, %v3032_v63  ;;  %v3037_v44 = vshll.u32 %v3036_v45, 23  ;;  %v3046_v60 = vsel %vm2961_vm5, %v3045_v59, %v19898_v9  ;;  %v3075_v51 = vsel %vm3074_vm12, %v3073_v25, 0 }
 0x5c3   : > { %vm12947_vm13 = vcmp.eq.s32.totalorder %v19904_v54, 2  ;;  %v6342_v53 = vmul.u32 %v19927_v50, %v6326_v57  ;;  %vm6344_vm14 = vc.u32 %v19949_v47, %v19940_v61  ;;  %v3077_v24 = vand.u32 31, %v3075_v51 }
 0x5c4   : > { %vm6278_vm15 = vcmp.lt.s32.totalorder %v6277_v42, 2  ;;  %vm6279_vm0 = vcmp.eq.s32.totalorder %v6277_v42, 0  ;;  %v3038_v18 = vor.u32 4788187, %v3037_v44  ;;  %v6346_v43 = vsel %vm6344_vm14, %v6345_v29, %v19941_v48 }
 0x5c5   : > { %v15103_v32 = vpop.eup %15102  ;;  %v3048_v9 = vsel %vm19933_vm6, 0, %v3046_v60  ;;  %v6347_v55 = vadd.s32 %v6346_v43, %v6342_v53  ;;  %v3070_v38 = vand.u32 8388607, %v3063_v1  ;;  %vm6282_vm1 = vcmp.eq.s32.totalorder %v6277_v42, 2 }
 0x5c6   : > { %v15105_v46 = vpop.eup %15104  ;;  %v6283_v56 = vxor.u32 2147483648, %v15103_v32  ;;  %v3039_v14 = vand.u32 2147483647, %v3038_v18  ;;  %v3041_v41 = vcvt.s32.f32 %v3034_v22  ;;  %v3078_v36 = vsub.s32 32, %v3077_v24 }
 0x5c7   : > { %v6280_v19 = vxor.u32 2147483648, %v15105_v46  ;;  %v6348_v7 = vadd.s32 536870912, %v6347_v55  ;;  %v3052_v21 = vadd.s32 3, %v3048_v9  ;;  %v3071_v15 = vor.u32 8388608, %v3070_v38 }
 0x5c8   : > { %v6284_v50 = vsel %vm6282_vm1, %v6283_v56, %v15105_v46  ;;  %v12949_v62 = vsel %vm12947_vm13, %v6283_v56, %v15105_v46  ;;  %v3042_v2 = vmul.f32 %v3041_v41, %v3039_v14  ;;  %v6394_v5 = vand.u32 2139095040, %v19972_v27 }
 0x5c9   : > { %v6281_v52 = vsel %vm6279_vm0, %v15103_v32, %v6280_v19  ;;  %v12946_v30 = vsel %vm12944_vm11, %v15103_v32, %v6280_v19  ;;  %v19980_v26 = vshrl.u32 %v6348_v7, 30  ;;  %v19990_v48 = vshrl.u32 %v3075_v51, 5 }
 0x5ca   : > { %v6285_v31 = vsel %vm6278_vm15, %v6281_v52, %v6284_v50  ;;  %v12950_v13 = vsel %vm12943_vm9, %v12946_v30, %v12949_v62  ;;  %v3043_v37 = vxor.u32 2147483648, %v3042_v2  ;;  %v3081_v54 = vshrl.u32 %v15258_v4, %v3078_v36 }
 0x5cb   : > { %v6286_v40 = vsel %vm6275_vm10, nan, %v6285_v31  ;;  %v12951_v49 = vsel %vm6275_vm10, nan, %v12950_v13  ;;  %v6350_v33 = vshll.u32 %v19980_v26, 30  ;;  %v3084_v16 = vshrl.u32 %v15259_v6, %v3078_v36 }
 0x5cc   : > { %7277 = vst [vmem:[%s15815_s20 + $0x1b0] sm:$0xff] %v6286_v40  ;;  %13933 = vst [vmem:[%s15815_s20 + $0x3b0] sm:$0xff] %v12951_v49  ;;  %v3044_v28 = vsel %vm2961_vm5, %v3043_v37, %v3042_v2  ;;  %v3080_v39 = vshll.u32 %v15257_v0, %v3077_v24  ;;  %v3087_v34 = vshrl.u32 %v15260_v8, %v3078_v36  ;;  %v20010_v53 = vand.u32 3, %v3052_v21 }
 0x5cd   : > { %v3090_v59 = vshrl.u32 %v15261_v10, %v3078_v36  ;;  %v3047_v42 = vsel %vm19933_vm6, %v19703_v23, %v3044_v28  ;;  %v20002_v12 = vsub.s32 %v6347_v55, %v6350_v33  ;;  %v3083_v25 = vshll.u32 %v15258_v4, %v3077_v24 }
 0x5ce   : > { %v3086_v63 = vshll.u32 %v15259_v6, %v3077_v24  ;;  %15106 = vcosq.f32 %v3047_v42  ;;  %v3089_v3 = vshll.u32 %v15260_v8, %v3077_v24  ;;  %v3092_v45 = vshll.u32 %v15261_v10, %v3077_v24 }
 0x5cf   : > { %v3093_v57 = vshrl.u32 %v15262_v17, %v3078_v36  ;;  %15108 = vsinq.f32 %v3047_v42  ;;  %v6353_v29 = vsub.s32 0, %v20002_v12  ;;  %v3082_v22 = vor.u32 %v3081_v54, %v3080_v39 }
 0x5d0   : > { %v3085_v44 = vor.u32 %v3084_v16, %v3083_v25  ;;  %v3088_v35 = vor.u32 %v3087_v34, %v3086_v63  ;;  %v3091_v60 = vor.u32 %v3090_v59, %v3089_v3  ;;  %v20012_v32 = vand.u32 3, %v3048_v9 }
 0x5d1   : > { %v3094_v51 = vor.u32 %v3093_v57, %v3092_v45  ;;  %v14301_v18 = vmin.u32 %v6353_v29, %v20002_v12  ;;  %v3079_v43 = vshrl.u32 %v15257_v0, %v3078_v36  ;;  %vm3095_vm4 = vcmp.lt.s32.totalorder %v19990_v48, 1 }
 0x5d2   : > { %v20017_v24 = vshll.u32 %v3071_v15, 8  ;;  %v6395_v46 = vshrl.u32 %v6394_v5, 23  ;;  %vm3097_vm3 = vcmp.lt.s32.totalorder %v19990_v48, 3  ;;  %vm3098_vm5 = vcmp.lt.s32.totalorder %v19990_v48, 4 }
 0x5d3   : > { %v6355_v56 = vclz %v14301_v18  ;;  %v3103_v55 = vsel %vm3095_vm4, %v3082_v22, %v3085_v44  ;;  %v3100_v38 = vsel %vm3098_vm5, %v3088_v35, 2102212464  ;;  %v3104_v9 = vsel %vm3098_vm5, %v3091_v60, 920167782 }
 0x5d4   : > { %v3107_v19 = vsel %vm3095_vm4, %v3085_v44, %v3088_v35  ;;  %v3108_v14 = vsel %vm3098_vm5, %v3094_v51, 1326507024  ;;  %vm9754_vm2 = vcmp.eq.s32.totalorder %v20012_v32, 2  ;;  %vm3096_vm7 = vcmp.lt.s32.totalorder %v19990_v48, 2 }
 0x5d5   : > { %v14302_v41 = vadd.s32 4294967294, %v6355_v56  ;;  %v3105_v50 = vsel %vm3097_vm3, %v3088_v35, %v3104_v9  ;;  %v3109_v62 = vsel %vm3097_vm3, %v3091_v60, %v3108_v14  ;;  %vm9751_vm6 = vcmp.eq.s32.totalorder %v20012_v32, 0 }
 0x5d6   : > { %vm6289_vm8 = vcmp.lt.s32.totalorder %v19842_v11, 0  ;;  %v3099_v7 = vsel %vm3095_vm4, %v3079_v43, %v3082_v22  ;;  %v3106_v36 = vsel %vm3096_vm7, %v3103_v55, %v3105_v50  ;;  %v3110_v52 = vsel %vm3096_vm7, %v3107_v19, %v3109_v62 }
 0x5d7   : > { %v14304_v30 = vadd.s32 4294967169, %v6395_v46  ;;  %vm9750_vm9 = vcmp.lt.s32.totalorder %v20012_v32, 2  ;;  %vm14303_vm10 = vcmp.lt.s32.totalorder %v14302_v41, 0  ;;  %v3101_v2 = vsel %vm3097_vm3, %v3085_v44, %v3100_v38 }
 0x5d8   : > { %v20043_v21 = vmul.u32.u64.low %v20017_v24, %v3110_v52  ;;  %v20044_v31 = vmul.u32.u64.high %v20017_v24, %v3110_v52, %v20043_v21  ;;  %vm3051_vm11 = vweird.f32 %v19703_v23  ;;  %vm3054_vm12 = vcmp.lt.s32.totalorder %v20010_v53, 2 }
 0x5d9   : > { %v6358_v13 = vsel %vm14303_vm10, 0, %v14302_v41  ;;  %v20049_v15 = vmul.u32.u64.low %v20017_v24, %v3106_v36  ;;  %v20050_v40 = vmul.u32.u64.high %v20017_v24, %v3106_v36, %v20049_v15  ;;  %v6343_v49 = vadd.s32 %v19940_v61, %v19949_v47 }
 0x5da   : > { %v6359_v37 = vsub.s32 32, %v6358_v13  ;;  %v6363_v5 = vsub.s32 4294967266, %v6358_v13  ;;  %v6401_v33 = vadd.s32 1, %v14304_v30  ;;  %vm3055_vm13 = vcmp.eq.s32.totalorder %v20010_v53, 0 }
 0x5db   : > { %vm3058_vm14 = vcmp.eq.s32.totalorder %v20010_v53, 2  ;;  %v6373_v54 = vsub.s32 4, %v19980_v26  ;;  %v3102_v16 = vsel %vm3096_vm7, %v3099_v7, %v3101_v2  ;;  %v15107_v28 = vpop.eup %15106  ;;  %v6360_v39 = vshll.u32 %v20002_v12, %v6358_v13 }
 0x5dc   : > { %v6361_v34 = vshrl.u32 %v6343_v49, %v6359_v37  ;;  %v6364_v59 = vadd.s32 127, %v6363_v5  ;;  %vm3120_vm15 = vc.u32 %v20044_v31, %v20049_v15  ;;  %v15109_v61 = vpop.eup %15108  ;;  %v3059_v47 = vxor.u32 2147483648, %v15107_v28 }
 0x5dd   : > { %v3121_v42 = vadd.s32 1, %v20050_v40  ;;  %v6391_v25 = vand.u32 2147483647, %v19972_v27  ;;  %vm6402_vm0 = vcmp.gt.s32.totalorder %v6401_v33, 0  ;;  %v3056_v63 = vxor.u32 2147483648, %v15109_v61 }
 0x5de   : > { %v6362_v3 = vor.u32 %v6361_v34, %v6360_v39  ;;  %v6365_v45 = vshll.u32 %v6364_v59, 23  ;;  %v6403_v48 = vsel %vm6402_vm0, %v6401_v33, 0  ;;  %v3060_v57 = vsel %vm3058_vm14, %v3059_v47, %v15109_v61 }
 0x5df   : > { %v9756_v12 = vsel %vm9754_vm2, %v3059_v47, %v15109_v61  ;;  %v3118_v29 = vmul.u32 %v20017_v24, %v3102_v16  ;;  %v3122_v22 = vsel %vm3120_vm15, %v3121_v42, %v20050_v40  ;;  %v3057_v44 = vsel %vm3055_vm13, %v15107_v28, %v3056_v63 }
 0x5e0   : > { %v9753_v35 = vsel %vm9751_vm6, %v15107_v28, %v3056_v63  ;;  %v6366_v60 = vor.u32 4788187, %v6365_v45  ;;  %v6374_v51 = vsel %vm6289_vm8, %v6373_v54, %v19980_v26  ;;  %v3061_v18 = vsel %vm3054_vm12, %v3057_v44, %v3060_v57 }
 0x5e1   : > { %v9757_v43 = vsel %vm9750_vm9, %v9753_v35, %v9756_v12  ;;  %v3123_v24 = vadd.s32 %v3122_v22, %v3118_v29  ;;  %v6405_v46 = vand.u32 31, %v6403_v48  ;;  %v3062_v56 = vsel %vm3051_vm11, nan, %v3061_v18 }
 0x5e2   : > { %v9758_v55 = vsel %vm3051_vm11, nan, %v9757_v43  ;;  %v6367_v38 = vand.u32 2147483647, %v6366_v60  ;;  %v6369_v9 = vcvt.s32.f32 %v6362_v3  ;;  %7246 = vst [vmem:[%s15815_s20 + $0xb8] sm:$0xff] %v3062_v56  ;;  %vm20090_vm1 = vcmp.le.f32.partialorder %v6287_v20, 0.7853982 }
 0x5e3   : > { %13902 = vst [vmem:[%s15815_s20 + $0x2b8] sm:$0xff] %v9758_v55  ;;  %v3124_v53 = vadd.s32 536870912, %v3123_v24  ;;  %v6406_v32 = vsub.s32 32, %v6405_v46  ;;  %v6376_v14 = vsel %vm20090_vm1, 0, %v6374_v51  ;;  %v6398_v23 = vand.u32 8388607, %v6391_v25  ;;  %v20128_v51 = vpop.f32.mrf.mxu0 }
 0x5e4   : > { %v6370_v19 = vmul.f32 %v6369_v9, %v6367_v38  ;;  %v6408_v50 = vshll.u32 %v15257_v0, %v6405_v46  ;;  %v6417_v52 = vshll.u32 %v15260_v8, %v6405_v46  ;;  %v6404_v21 = vshrl.u32 %v6403_v48, 5 }
 0x5e5   : > { %v20098_v41 = vshrl.u32 %v3124_v53, 30  ;;  %v6409_v62 = vshrl.u32 %v15258_v4, %v6406_v32  ;;  %v6412_v20 = vshrl.u32 %v15259_v6, %v6406_v32  ;;  %v6415_v36 = vshrl.u32 %v15260_v8, %v6406_v32 }
 0x5e6   : > { %v6371_v7 = vxor.u32 2147483648, %v6370_v19  ;;  %v6418_v30 = vshrl.u32 %v15261_v10, %v6406_v32  ;;  %v6411_v13 = vshll.u32 %v15258_v4, %v6405_v46  ;;  %v6414_v40 = vshll.u32 %v15259_v6, %v6405_v46 }
 0x5e7   : > { %v3126_v2 = vshll.u32 %v20098_v41, 30  ;;  %v6410_v37 = vor.u32 %v6409_v62, %v6408_v50  ;;  %v6421_v33 = vshrl.u32 %v15262_v17, %v6406_v32  ;;  %v6380_v34 = vadd.s32 3, %v6376_v14 }
 0x5e8   : > { %v6372_v49 = vsel %vm6289_vm8, %v6371_v7, %v6370_v19  ;;  %v6419_v5 = vor.u32 %v6418_v30, %v6417_v52  ;;  %v6413_v28 = vor.u32 %v6412_v20, %v6411_v13  ;;  %v6416_v39 = vor.u32 %v6415_v36, %v6414_v40 }
 0x5e9   : > { %v6375_v54 = vsel %vm20090_vm1, %v19842_v11, %v6372_v49  ;;  %v20115_v16 = vsub.s32 %v3123_v24, %v3126_v2  ;;  %v6420_v59 = vshll.u32 %v15261_v10, %v6405_v46  ;;  %v6399_v47 = vor.u32 8388608, %v6398_v23 }
 0x5ea   : > { %15110 = vcosq.f32 %v6375_v54  ;;  %vm6426_vm4 = vcmp.lt.s32.totalorder %v6404_v21, 4  ;;  %vm6423_vm3 = vcmp.lt.s32.totalorder %v6404_v21, 1  ;;  %vm6425_vm5 = vcmp.lt.s32.totalorder %v6404_v21, 3 }
 0x5eb   : > { %15112 = vsinq.f32 %v6375_v54  ;;  %v3129_v61 = vsub.s32 0, %v20115_v16  ;;  %v6422_v42 = vor.u32 %v6421_v33, %v6420_v59  ;;  %v6432_v63 = vsel %vm6426_vm4, %v6419_v5, 920167782 }
 0x5ec   : > { %v6428_v45 = vsel %vm6426_vm4, %v6416_v39, 2102212464  ;;  %v6431_v48 = vsel %vm6423_vm3, %v6410_v37, %v6413_v28  ;;  %v20122_v57 = vand.u32 3, %v6380_v34  ;;  %v20124_v12 = vand.u32 3, %v6376_v14 }
 0x5ed   : > { %v14177_v3 = vmin.u32 %v3129_v61, %v20115_v16  ;;  %v6407_v29 = vshrl.u32 %v15257_v0, %v6406_v32  ;;  %v6433_v22 = vsel %vm6425_vm5, %v6416_v39, %v6432_v63  ;;  %vm6424_vm2 = vcmp.lt.s32.totalorder %v6404_v21, 2 }
 0x5ee   : > { %v6435_v35 = vsel %vm6423_vm3, %v6413_v28, %v6416_v39  ;;  %v6439_v60 = vshll.u32 %v6399_v47, 8  ;;  %v6429_v43 = vsel %vm6425_vm5, %v6413_v28, %v6428_v45  ;;  %v6434_v24 = vsel %vm6424_vm2, %v6431_v48, %v6433_v22  ;;  %v20178_v45 = vpop.f32.mrf.mxu1 }
 0x5ef   : > { %v3131_v44 = vclz %v14177_v3  ;;  %v6427_v18 = vsel %vm6423_vm3, %v6407_v29, %v6410_v37  ;;  %v6436_v46 = vsel %vm6426_vm4, %v6422_v42, 1326507024  ;;  %vm3065_vm7 = vcmp.lt.s32.totalorder %v19900_v58, 0 }
 0x5f0   : > { %v6437_v55 = vsel %vm6425_vm5, %v6419_v5, %v6436_v46  ;;  %v20135_v38 = vmul.u32.u64.low %v6439_v60, %v6434_v24  ;;  %v20136_v9 = vmul.u32.u64.high %v6439_v60, %v6434_v24, %v20135_v38  ;;  %vm13047_vm6 = vcmp.eq.s32.totalorder %v20124_v12, 0 }
 0x5f1   : > { %v14178_v56 = vadd.s32 4294967294, %v3131_v44  ;;  %vm13050_vm8 = vcmp.eq.s32.totalorder %v20124_v12, 2  ;;  %v6438_v26 = vsel %vm6424_vm2, %v6435_v35, %v6437_v55  ;;  %v3170_v53 = vand.u32 2139095040, %v20128_v51 }
 0x5f2   : > { %vm13046_vm9 = vcmp.lt.s32.totalorder %v20124_v12, 2  ;;  %v6430_v32 = vsel %vm6424_vm2, %v6427_v18, %v6429_v43  ;;  %v20145_v19 = vmul.u32.u64.low %v6439_v60, %v6438_v26  ;;  %v20146_v14 = vmul.u32.u64.high %v6439_v60, %v6438_v26, %v20145_v19 }
 0x5f3   : > { %vm14179_vm10 = vcmp.lt.s32.totalorder %v14178_v56, 0  ;;  %vm6379_vm11 = vweird.f32 %v19842_v11  ;;  %vm6382_vm12 = vcmp.lt.s32.totalorder %v20122_v57, 2  ;;  %vm6383_vm13 = vcmp.eq.s32.totalorder %v20122_v57, 0 }
 0x5f4   : > { %v3134_v23 = vsel %vm14179_vm10, 0, %v14178_v56  ;;  %v3171_v50 = vshrl.u32 %v3170_v53, 23  ;;  %vm20153_vm14 = vcmp.le.f32.partialorder %v3063_v1, 0.7853982  ;;  %v3119_v20 = vadd.s32 %v20049_v15, %v20044_v31 }
 0x5f5   : > { %v3135_v7 = vsub.s32 32, %v3134_v23  ;;  %v3139_v36 = vsub.s32 4294967266, %v3134_v23  ;;  %v6449_v52 = vadd.s32 1, %v20136_v9  ;;  %v3149_v30 = vsub.s32 4, %v20098_v41 }
 0x5f6   : > { %v6446_v2 = vmul.u32 %v6439_v60, %v6430_v32  ;;  %v3167_v21 = vand.u32 2147483647, %v20128_v51  ;;  %v14180_v13 = vadd.s32 4294967169, %v3171_v50  ;;  %v3136_v49 = vshll.u32 %v20115_v16, %v3134_v23 }
 0x5f7   : > { %v15111_v40 = vpop.eup %15110  ;;  %v3137_v1 = vshrl.u32 %v3119_v20, %v3135_v7  ;;  %v3140_v37 = vadd.s32 127, %v3139_v36  ;;  %vm6448_vm15 = vc.u32 %v20146_v14, %v20135_v38  ;;  %vm6386_vm0 = vcmp.eq.s32.totalorder %v20122_v57, 2 }
 0x5f8   : > { %v15113_v5 = vpop.eup %15112  ;;  %v6387_v31 = vxor.u32 2147483648, %v15111_v40  ;;  %v6450_v15 = vsel %vm6448_vm15, %v6449_v52, %v20136_v9  ;;  %v3177_v33 = vadd.s32 1, %v14180_v13  ;;  %v3150_v61 = vsel %vm3065_vm7, %v3149_v30, %v20098_v41 }
 0x5f9   : > { %v6384_v54 = vxor.u32 2147483648, %v15113_v5  ;;  %v3138_v28 = vor.u32 %v3137_v1, %v3136_v49  ;;  %v3141_v39 = vshll.u32 %v3140_v37, 23  ;;  %v6451_v34 = vadd.s32 %v6450_v15, %v6446_v2 }
 0x5fa   : > { %v6388_v59 = vsel %vm6386_vm0, %v6387_v31, %v15113_v5  ;;  %v13052_v16 = vsel %vm13050_vm8, %v6387_v31, %v15113_v5  ;;  %vm3178_vm1 = vcmp.gt.s32.totalorder %v3177_v33, 0  ;;  %v3174_v3 = vand.u32 8388607, %v3167_v21 }
 0x5fb   : > { %v6385_v47 = vsel %vm6383_vm13, %v15111_v40, %v6384_v54  ;;  %v13049_v42 = vsel %vm13047_vm6, %v15111_v40, %v6384_v54  ;;  %v3142_v63 = vor.u32 4788187, %v3141_v39  ;;  %v6452_v29 = vadd.s32 536870912, %v6451_v34 }
 0x5fc   : > { %v6389_v48 = vsel %vm6382_vm12, %v6385_v47, %v6388_v59  ;;  %v13053_v41 = vsel %vm13046_vm9, %v13049_v42, %v13052_v16  ;;  %v3179_v22 = vsel %vm3178_vm1, %v3177_v33, 0  ;;  %v3145_v18 = vcvt.s32.f32 %v3138_v28 }
 0x5fd   : > { %v6390_v44 = vsel %vm6379_vm11, nan, %v6389_v48  ;;  %v13054_v35 = vsel %vm6379_vm11, nan, %v13053_v41  ;;  %v3143_v60 = vand.u32 2147483647, %v3142_v63  ;;  %v3152_v43 = vsel %vm20153_vm14, 0, %v3150_v61 }
 0x5fe   : > { %7278 = vst [vmem:[%s15815_s20 + $0x1b8] sm:$0xff] %v6390_v44  ;;  %13934 = vst [vmem:[%s15815_s20 + $0x3b8] sm:$0xff] %v13054_v35  ;;  %v20192_v57 = vshrl.u32 %v6452_v29, 30  ;;  %v3181_v24 = vand.u32 31, %v3179_v22  ;;  %v6498_v12 = vand.u32 2139095040, %v20178_v45  ;;  %v3156_v26 = vadd.s32 3, %v3152_v43 }
 0x5ff   : > { %v3146_v46 = vmul.f32 %v3145_v18, %v3143_v60  ;;  %v20196_v11 = vand.u32 3, %v3152_v43  ;;  %v3175_v53 = vor.u32 8388608, %v3174_v3  ;;  %v20200_v19 = vshrl.u32 %v3179_v22, 5 }
 0x600   : > { %v6454_v56 = vshll.u32 %v20192_v57, 30  ;;  %v3182_v55 = vsub.s32 32, %v3181_v24  ;;  %v6499_v50 = vshrl.u32 %v6498_v12, 23  ;;  %v3184_v7 = vshll.u32 %v15257_v0, %v3181_v24 }
 0x601   : > { %v3147_v9 = vxor.u32 2147483648, %v3146_v46  ;;  %v3187_v13 = vshll.u32 %v15258_v4, %v3181_v24  ;;  %v3190_v40 = vshll.u32 %v15259_v6, %v3181_v24  ;;  %v20214_v49 = vand.u32 3, %v3156_v26 }
 0x602   : > { %v20198_v32 = vsub.s32 %v6451_v34, %v6454_v56  ;;  %v3185_v23 = vshrl.u32 %v15258_v4, %v3182_v55  ;;  %v3188_v36 = vshrl.u32 %v15259_v6, %v3182_v55  ;;  %v3191_v52 = vshrl.u32 %v15260_v8, %v3182_v55 }
 0x603   : > { %v3148_v20 = vsel %vm3065_vm7, %v3147_v9, %v3146_v46  ;;  %v20216_v37 = vshll.u32 %v3175_v53, 8  ;;  %v6447_v62 = vadd.s32 %v20135_v38, %v20146_v14  ;;  %v3193_v33 = vshll.u32 %v15260_v8, %v3181_v24 }
 0x604   : > { %v3151_v30 = vsel %vm20153_vm14, %v19900_v58, %v3148_v20  ;;  %v6457_v2 = vsub.s32 0, %v20198_v32  ;;  %v3186_v1 = vor.u32 %v3185_v23, %v3184_v7  ;;  %v3189_v31 = vor.u32 %v3188_v36, %v3187_v13 }
 0x605   : > { %15114 = vcosq.f32 %v3151_v30  ;;  %v3192_v15 = vor.u32 %v3191_v52, %v3190_v40  ;;  %v3194_v54 = vshrl.u32 %v15261_v10, %v3182_v55  ;;  %v14308_v28 = vadd.s32 4294967169, %v6499_v50 }
 0x606   : > { %15116 = vsinq.f32 %v3151_v30  ;;  %v14305_v5 = vmin.u32 %v6457_v2, %v20198_v32  ;;  %v3183_v34 = vshrl.u32 %v15257_v0, %v3182_v55  ;;  %vm3199_vm4 = vcmp.lt.s32.totalorder %v20200_v19, 1 }
 0x607   : > { %vm3200_vm3 = vcmp.lt.s32.totalorder %v20200_v19, 2  ;;  %v3195_v59 = vor.u32 %v3194_v54, %v3193_v33  ;;  %v3196_v16 = vshll.u32 %v15261_v10, %v3181_v24  ;;  %v3197_v61 = vshrl.u32 %v15262_v17, %v3182_v55 }
 0x608   : > { %v6459_v39 = vclz %v14305_v5  ;;  %vm3202_vm5 = vcmp.lt.s32.totalorder %v20200_v19, 4  ;;  %vm6393_vm2 = vcmp.lt.s32.totalorder %v19972_v27, 0  ;;  %vm3201_vm7 = vcmp.lt.s32.totalorder %v20200_v19, 3 }
 0x609   : > { %v3204_v14 = vsel %vm3202_vm5, %v3192_v15, 2102212464  ;;  %v3207_v47 = vsel %vm3199_vm4, %v3186_v1, %v3189_v31  ;;  %v6477_v42 = vsub.s32 4, %v20192_v57  ;;  %v3198_v63 = vor.u32 %v3197_v61, %v3196_v16 }
 0x60a   : > { %v14306_v38 = vadd.s32 4294967294, %v6459_v39  ;;  %v3203_v3 = vsel %vm3199_vm4, %v3183_v34, %v3186_v1  ;;  %v3208_v48 = vsel %vm3202_vm5, %v3195_v59, 920167782  ;;  %vm9857_vm6 = vcmp.eq.s32.totalorder %v20196_v11, 2 }
 0x60b   : > { %v3209_v41 = vsel %vm3201_vm7, %v3192_v15, %v3208_v48  ;;  %v3211_v29 = vsel %vm3199_vm4, %v3189_v31, %v3192_v15  ;;  %v6505_v22 = vadd.s32 1, %v14308_v28  ;;  %vm9854_vm9 = vcmp.eq.s32.totalorder %v20196_v11, 0 }
 0x60c   : > { %vm14307_vm8 = vcmp.lt.s32.totalorder %v14306_v38, 0  ;;  %v3205_v35 = vsel %vm3201_vm7, %v3189_v31, %v3204_v14  ;;  %v3210_v60 = vsel %vm3200_vm3, %v3207_v47, %v3209_v41  ;;  %v3212_v18 = vsel %vm3202_vm5, %v3198_v63, 1326507024 }
 0x60d   : > { %v6462_v44 = vsel %vm14307_vm8, 0, %v14306_v38  ;;  %vm9853_vm10 = vcmp.lt.s32.totalorder %v20196_v11, 2  ;;  %v3213_v46 = vsel %vm3201_vm7, %v3195_v59, %v3212_v18  ;;  %vm6506_vm11 = vcmp.gt.s32.totalorder %v6505_v22, 0 }
 0x60e   : > { %v6463_v43 = vsub.s32 32, %v6462_v44  ;;  %v6464_v24 = vshll.u32 %v20198_v32, %v6462_v44  ;;  %v6467_v12 = vsub.s32 4294967266, %v6462_v44  ;;  %v3214_v56 = vsel %vm3200_vm3, %v3211_v29, %v3213_v46 }
 0x60f   : > { %v20259_v55 = vmul.u32.u64.low %v20216_v37, %v3210_v60  ;;  %v20260_v9 = vmul.u32.u64.high %v20216_v37, %v3210_v60, %v20259_v55  ;;  %v20264_v23 = vmul.u32.u64.low %v20216_v37, %v3214_v56  ;;  %v20265_v50 = vmul.u32.u64.high %v20216_v37, %v3214_v56, %v20264_v23 }
 0x610   : > { %v6465_v26 = vshrl.u32 %v6447_v62, %v6463_v43  ;;  %v6468_v53 = vadd.s32 127, %v6467_v12  ;;  %vm3158_vm12 = vcmp.lt.s32.totalorder %v20214_v49, 2  ;;  %vm3159_vm13 = vcmp.eq.s32.totalorder %v20214_v49, 0 }
 0x611   : > { %v3206_v32 = vsel %vm3200_vm3, %v3203_v3, %v3205_v35  ;;  %v6507_v20 = vsel %vm6506_vm11, %v6505_v22, 0  ;;  %vm3162_vm14 = vcmp.eq.s32.totalorder %v20214_v49, 2  ;;  %v6478_v40 = vsel %vm6393_vm2, %v6477_v42, %v20192_v57 }
 0x612   : > { %v15115_v7 = vpop.eup %15114  ;;  %v6466_v36 = vor.u32 %v6465_v26, %v6464_v24  ;;  %v6469_v52 = vshll.u32 %v6468_v53, 23  ;;  %v6509_v30 = vand.u32 31, %v6507_v20  ;;  %v3225_v1 = vadd.s32 1, %v20260_v9 }
 0x613   : > { %v15117_v2 = vpop.eup %15116  ;;  %v3163_v13 = vxor.u32 2147483648, %v15115_v7  ;;  %v6495_v5 = vand.u32 2147483647, %v20178_v45  ;;  %v3222_v62 = vmul.u32 %v20216_v37, %v3206_v32  ;;  %vm3224_vm15 = vc.u32 %v20265_v50, %v20259_v55 }
 0x614   : > { %v3160_v31 = vxor.u32 2147483648, %v15117_v2  ;;  %v6470_v19 = vor.u32 4788187, %v6469_v52  ;;  %v6473_v15 = vcvt.s32.f32 %v6466_v36  ;;  %v6510_v28 = vsub.s32 32, %v6509_v30 }
 0x615   : > { %v3164_v33 = vsel %vm3162_vm14, %v3163_v13, %v15117_v2  ;;  %v9859_v54 = vsel %vm9857_vm6, %v3163_v13, %v15117_v2  ;;  %v3226_v59 = vsel %vm3224_vm15, %v3225_v1, %v20260_v9  ;;  %vm3155_vm0 = vweird.f32 %v19900_v58 }
 0x616   : > { %v3161_v57 = vsel %vm3159_vm13, %v15115_v7, %v3160_v31  ;;  %v9856_v39 = vsel %vm9854_vm9, %v15115_v7, %v3160_v31  ;;  %v6471_v34 = vand.u32 2147483647, %v6470_v19  ;;  %v3227_v61 = vadd.s32 %v3226_v59, %v3222_v62  ;;  %v20332_v62 = vpop.f32.mrf.mxu0 }
 0x617   : > { %v3165_v37 = vsel %vm3158_vm12, %v3161_v57, %v3164_v33  ;;  %v9860_v16 = vsel %vm9853_vm10, %v9856_v39, %v9859_v54  ;;  %vm20294_vm1 = vcmp.le.f32.partialorder %v6391_v25, 0.7853982  ;;  %v6502_v11 = vand.u32 8388607, %v6495_v5 }
 0x618   : > { %v3166_v38 = vsel %vm3155_vm0, nan, %v3165_v37  ;;  %v9861_v14 = vsel %vm3155_vm0, nan, %v9860_v16  ;;  %v6474_v42 = vmul.f32 %v6473_v15, %v6471_v34  ;;  %v6480_v58 = vsel %vm20294_vm1, 0, %v6478_v40 }
 0x619   : > { %7247 = vst [vmem:[%s15815_s20 + $0xc0] sm:$0xff] %v3166_v38  ;;  %13903 = vst [vmem:[%s15815_s20 + $0x2c0] sm:$0xff] %v9861_v14  ;;  %v3228_v49 = vadd.s32 536870912, %v3227_v61  ;;  %v6508_v3 = vshrl.u32 %v6507_v20, 5  ;;  %v6513_v48 = vshrl.u32 %v15258_v4, %v6510_v28  ;;  %v6519_v41 = vshrl.u32 %v15260_v8, %v6510_v28 }
 0x61a   : > { %v6475_v63 = vxor.u32 2147483648, %v6474_v42  ;;  %v6516_v29 = vshrl.u32 %v15259_v6, %v6510_v28  ;;  %v6518_v22 = vshll.u32 %v15259_v6, %v6509_v30  ;;  %v6522_v44 = vshrl.u32 %v15261_v10, %v6510_v28 }
 0x61b   : > { %v20306_v25 = vshrl.u32 %v3228_v49, 30  ;;  %v6521_v60 = vshll.u32 %v15260_v8, %v6509_v30  ;;  %v6524_v18 = vshll.u32 %v15261_v10, %v6509_v30  ;;  %v6525_v43 = vshrl.u32 %v15262_v17, %v6510_v28 }
 0x61c   : > { %v6476_v35 = vsel %vm6393_vm2, %v6475_v63, %v6474_v42  ;;  %v6512_v46 = vshll.u32 %v15257_v0, %v6509_v30  ;;  %v6515_v56 = vshll.u32 %v15258_v4, %v6509_v30  ;;  %v6520_v9 = vor.u32 %v6519_v41, %v6518_v22 }
 0x61d   : > { %v6479_v24 = vsel %vm20294_vm1, %v19972_v27, %v6476_v35  ;;  %v3230_v12 = vshll.u32 %v20306_v25, 30  ;;  %v6523_v26 = vor.u32 %v6522_v44, %v6521_v60  ;;  %v6526_v53 = vor.u32 %v6525_v43, %v6524_v18 }
 0x61e   : > { %15118 = vcosq.f32 %v6479_v24  ;;  %v6514_v32 = vor.u32 %v6513_v48, %v6512_v46  ;;  %v6517_v20 = vor.u32 %v6516_v29, %v6515_v56  ;;  %v6484_v7 = vadd.s32 3, %v6480_v58 }
 0x61f   : > { %15120 = vsinq.f32 %v6479_v24  ;;  %v20322_v23 = vsub.s32 %v3227_v61, %v3230_v12  ;;  %v6503_v36 = vor.u32 8388608, %v6502_v11  ;;  %v20324_v52 = vand.u32 3, %v6480_v58 }
 0x620   : > { %vm6527_vm4 = vcmp.lt.s32.totalorder %v6508_v3, 1  ;;  %vm6530_vm3 = vcmp.lt.s32.totalorder %v6508_v3, 4  ;;  %vm3169_vm5 = vcmp.lt.s32.totalorder %v20128_v51, 0  ;;  %v6511_v30 = vshrl.u32 %v15257_v0, %v6510_v28 }
 0x621   : > { %v3233_v2 = vsub.s32 0, %v20322_v23  ;;  %v6532_v13 = vsel %vm6530_vm3, %v6520_v9, 2102212464  ;;  %v6536_v40 = vsel %vm6530_vm3, %v6523_v26, 920167782  ;;  %vm6529_vm2 = vcmp.lt.s32.totalorder %v6508_v3, 3 }
 0x622   : > { %v6540_v1 = vsel %vm6530_vm3, %v6526_v53, 1326507024  ;;  %v6535_v19 = vsel %vm6527_vm4, %v6514_v32, %v6517_v20  ;;  %v6539_v15 = vsel %vm6527_vm4, %v6517_v20, %v6520_v9  ;;  %v6485_v33 = vand.u32 3, %v6484_v7 }
 0x623   : > { %v14181_v31 = vmin.u32 %v3233_v2, %v20322_v23  ;;  %v6537_v54 = vsel %vm6529_vm2, %v6520_v9, %v6536_v40  ;;  %v6541_v57 = vsel %vm6529_vm2, %v6523_v26, %v6540_v1  ;;  %v6543_v39 = vshll.u32 %v6503_v36, 8 }
 0x624   : > { %vm6528_vm7 = vcmp.lt.s32.totalorder %v6508_v3, 2  ;;  %v6531_v28 = vsel %vm6527_vm4, %v6511_v30, %v6514_v32  ;;  %v6533_v59 = vsel %vm6529_vm2, %v6517_v20, %v6532_v13  ;;  %vm13150_vm6 = vcmp.eq.s32.totalorder %v20324_v52, 0 }
 0x625   : > { %v3235_v34 = vclz %v14181_v31  ;;  %vm13153_vm8 = vcmp.eq.s32.totalorder %v20324_v52, 2  ;;  %v6538_v37 = vsel %vm6528_vm7, %v6535_v19, %v6537_v54  ;;  %v6542_v16 = vsel %vm6528_vm7, %v6539_v15, %v6541_v57 }
 0x626   : > { %v3274_v61 = vand.u32 2139095040, %v20332_v62  ;;  %vm13149_vm9 = vcmp.lt.s32.totalorder %v20324_v52, 2  ;;  %v3253_v14 = vsub.s32 4, %v20306_v25  ;;  %vm6483_vm10 = vweird.f32 %v19972_v27 }
 0x627   : > { %v14182_v38 = vadd.s32 4294967294, %v3235_v34  ;;  %v20340_v47 = vmul.u32.u64.low %v6543_v39, %v6542_v16  ;;  %v20341_v42 = vmul.u32.u64.high %v6543_v39, %v6542_v16, %v20340_v47  ;;  %v6534_v58 = vsel %vm6528_vm7, %v6531_v28, %v6533_v59  ;;  %v20386_v28 = vpop.f32.mrf.mxu1 }
 0x628   : > { %v20344_v49 = vmul.u32.u64.low %v6543_v39, %v6538_v37  ;;  %v20345_v11 = vmul.u32.u64.high %v6543_v39, %v6538_v37, %v20344_v49  ;;  %v3275_v63 = vshrl.u32 %v3274_v61, 23  ;;  %vm6486_vm11 = vcmp.lt.s32.totalorder %v6485_v33, 2 }
 0x629   : > { %vm6487_vm12 = vcmp.eq.s32.totalorder %v6485_v33, 0  ;;  %vm6490_vm13 = vcmp.eq.s32.totalorder %v6485_v33, 2  ;;  %vm14183_vm14 = vcmp.lt.s32.totalorder %v14182_v38, 0  ;;  %v3223_v3 = vadd.s32 %v20259_v55, %v20265_v50 }
 0x62a   : > { %v3238_v48 = vsel %vm14183_vm14, 0, %v14182_v38  ;;  %v3271_v41 = vand.u32 2147483647, %v20332_v62  ;;  %v14184_v29 = vadd.s32 4294967169, %v3275_v63  ;;  %v3254_v60 = vsel %vm3169_vm5, %v3253_v14, %v20306_v25 }
 0x62b   : > { %v15119_v22 = vpop.eup %15118  ;;  %v3239_v44 = vsub.s32 32, %v3238_v48  ;;  %v3243_v35 = vsub.s32 4294967266, %v3238_v48  ;;  %v6550_v18 = vmul.u32 %v6543_v39, %v6534_v58  ;;  %vm6552_vm15 = vc.u32 %v20341_v42, %v20344_v49 }
 0x62c   : > { %v15121_v43 = vpop.eup %15120  ;;  %v6491_v24 = vxor.u32 2147483648, %v15119_v22  ;;  %v6553_v12 = vadd.s32 1, %v20345_v11  ;;  %v3281_v55 = vadd.s32 1, %v14184_v29  ;;  %v3240_v46 = vshll.u32 %v20322_v23, %v3238_v48 }
 0x62d   : > { %v6488_v50 = vxor.u32 2147483648, %v15121_v43  ;;  %v3241_v56 = vshrl.u32 %v3223_v3, %v3239_v44  ;;  %v3244_v9 = vadd.s32 127, %v3243_v35  ;;  %vm20376_vm1 = vcmp.le.f32.partialorder %v3167_v21, 0.7853982 }
 0x62e   : > { %v6492_v26 = vsel %vm6490_vm13, %v6491_v24, %v15121_v43  ;;  %v13155_v25 = vsel %vm13153_vm8, %v6491_v24, %v15121_v43  ;;  %v6554_v53 = vsel %vm6552_vm15, %v6553_v12, %v20345_v11  ;;  %vm3282_vm0 = vcmp.gt.s32.totalorder %v3281_v55, 0 }
 0x62f   : > { %v6489_v32 = vsel %vm6487_vm12, %v15119_v22, %v6488_v50  ;;  %v13152_v20 = vsel %vm13150_vm6, %v15119_v22, %v6488_v50  ;;  %v3242_v7 = vor.u32 %v3241_v56, %v3240_v46  ;;  %v3245_v36 = vshll.u32 %v3244_v9, 23 }
 0x630   : > { %v6493_v23 = vsel %vm6486_vm11, %v6489_v32, %v6492_v26  ;;  %v13156_v2 = vsel %vm13149_vm9, %v13152_v20, %v13155_v25  ;;  %v6555_v30 = vadd.s32 %v6554_v53, %v6550_v18  ;;  %v3283_v13 = vsel %vm3282_vm0, %v3281_v55, 0 }
 0x631   : > { %v6494_v40 = vsel %vm6483_vm10, nan, %v6493_v23  ;;  %v13157_v1 = vsel %vm6483_vm10, nan, %v13156_v2  ;;  %v3246_v31 = vor.u32 4788187, %v3245_v36  ;;  %v3278_v52 = vand.u32 8388607, %v3271_v41 }
 0x632   : > { %7279 = vst [vmem:[%s15815_s20 + $0x1c0] sm:$0xff] %v6494_v40  ;;  %13935 = vst [vmem:[%s15815_s20 + $0x3c0] sm:$0xff] %v13157_v1  ;;  %v6556_v15 = vadd.s32 536870912, %v6555_v30  ;;  %v3285_v33 = vand.u32 31, %v3283_v13  ;;  %v3249_v57 = vcvt.s32.f32 %v3242_v7  ;;  %v3256_v27 = vsel %vm20376_vm1, 0, %v3254_v60  ;;  %v20513_v1 = vpop.f32.mrf.mxu0 }
 0x633   : > { %v3247_v54 = vand.u32 2147483647, %v3246_v31  ;;  %v3260_v21 = vadd.s32 3, %v3256_v27  ;;  %v20388_v37 = vand.u32 3, %v3256_v27  ;;  %v3279_v61 = vor.u32 8388608, %v3278_v52 }
 0x634   : > { %v20384_v39 = vshrl.u32 %v6556_v15, 30  ;;  %v3286_v34 = vsub.s32 32, %v3285_v33  ;;  %v6602_v58 = vand.u32 2139095040, %v20386_v28  ;;  %v20396_v63 = vshrl.u32 %v3283_v13, 5 }
 0x635   : > { %v3250_v59 = vmul.f32 %v3249_v57, %v3247_v54  ;;  %v3288_v22 = vshll.u32 %v15257_v0, %v3285_v33  ;;  %v3291_v44 = vshll.u32 %v15258_v4, %v3285_v33  ;;  %v3294_v43 = vshll.u32 %v15259_v6, %v3285_v33 }
 0x636   : > { %v6558_v16 = vshll.u32 %v20384_v39, 30  ;;  %v3289_v14 = vshrl.u32 %v15258_v4, %v3286_v34  ;;  %v3292_v47 = vshrl.u32 %v15259_v6, %v3286_v34  ;;  %v3295_v3 = vshrl.u32 %v15260_v8, %v3286_v34 }
 0x637   : > { %v3251_v38 = vxor.u32 2147483648, %v3250_v59  ;;  %v3298_v48 = vshrl.u32 %v15261_v10, %v3286_v34  ;;  %v3301_v35 = vshrl.u32 %v15262_v17, %v3286_v34  ;;  %v3297_v24 = vshll.u32 %v15260_v8, %v3285_v33 }
 0x638   : > { %v20394_v11 = vsub.s32 %v6555_v30, %v6558_v16  ;;  %v3290_v12 = vor.u32 %v3289_v14, %v3288_v22  ;;  %v3293_v55 = vor.u32 %v3292_v47, %v3291_v44  ;;  %v3300_v50 = vshll.u32 %v15261_v10, %v3285_v33 }
 0x639   : > { %v3252_v29 = vsel %vm3169_vm5, %v3251_v38, %v3250_v59  ;;  %v3296_v56 = vor.u32 %v3295_v3, %v3294_v43  ;;  %v3299_v9 = vor.u32 %v3298_v48, %v3297_v24  ;;  %v20413_v26 = vand.u32 3, %v3260_v21 }
 0x63a   : > { %v3255_v60 = vsel %vm20376_vm1, %v20128_v51, %v3252_v29  ;;  %v6561_v18 = vsub.s32 0, %v20394_v11  ;;  %v3302_v25 = vor.u32 %v3301_v35, %v3300_v50  ;;  %v20415_v53 = vshll.u32 %v3279_v61, 8 }
 0x63b   : > { %15122 = vcosq.f32 %v3255_v60  ;;  %v6603_v32 = vshrl.u32 %v6602_v58, 23  ;;  %vm6497_vm4 = vcmp.lt.s32.totalorder %v20178_v45, 0  ;;  %v6581_v7 = vsub.s32 4, %v20384_v39 }
 0x63c   : > { %15124 = vsinq.f32 %v3255_v60  ;;  %v14309_v46 = vmin.u32 %v6561_v18, %v20394_v11  ;;  %v3287_v36 = vshrl.u32 %v15257_v0, %v3286_v34  ;;  %vm3303_vm3 = vcmp.lt.s32.totalorder %v20396_v63, 1 }
 0x63d   : > { %vm3304_vm5 = vcmp.lt.s32.totalorder %v20396_v63, 2  ;;  %vm3305_vm2 = vcmp.lt.s32.totalorder %v20396_v63, 3  ;;  %vm3306_vm7 = vcmp.lt.s32.totalorder %v20396_v63, 4  ;;  %v3311_v23 = vsel %vm3303_vm3, %v3290_v12, %v3293_v55 }
 0x63e   : > { %v6563_v20 = vclz %v14309_v46  ;;  %v3308_v30 = vsel %vm3306_vm7, %v3296_v56, 2102212464  ;;  %v3312_v13 = vsel %vm3306_vm7, %v3299_v9, 920167782  ;;  %v3315_v40 = vsel %vm3303_vm3, %v3293_v55, %v3296_v56 }
 0x63f   : > { %vm20426_vm6 = vcmp.le.f32.partialorder %v6495_v5, 0.7853982  ;;  %v3307_v31 = vsel %vm3303_vm3, %v3287_v36, %v3290_v12  ;;  %v3313_v19 = vsel %vm3305_vm2, %v3296_v56, %v3312_v13  ;;  %v3316_v15 = vsel %vm3306_vm7, %v3302_v25, 1326507024 }
 0x640   : > { %v14310_v2 = vadd.s32 4294967294, %v6563_v20  ;;  %v14312_v52 = vadd.s32 4294967169, %v6603_v32  ;;  %vm9960_vm8 = vcmp.eq.s32.totalorder %v20388_v37, 2  ;;  %v3309_v33 = vsel %vm3305_vm2, %v3293_v55, %v3308_v30 }
 0x641   : > { %v3314_v54 = vsel %vm3304_vm5, %v3311_v23, %v3313_v19  ;;  %v3317_v5 = vsel %vm3305_vm2, %v3299_v9, %v3316_v15  ;;  %vm9957_vm10 = vcmp.eq.s32.totalorder %v20388_v37, 0  ;;  %vm3262_vm11 = vcmp.lt.s32.totalorder %v20413_v26, 2 }
 0x642   : > { %vm14311_vm9 = vcmp.lt.s32.totalorder %v14310_v2, 0  ;;  %v3318_v27 = vsel %vm3304_vm5, %v3315_v40, %v3317_v5  ;;  %v20443_v34 = vmul.u32.u64.low %v20415_v53, %v3314_v54  ;;  %v20444_v59 = vmul.u32.u64.high %v20415_v53, %v3314_v54, %v20443_v34 }
 0x643   : > { %v6566_v57 = vsel %vm14311_vm9, 0, %v14310_v2  ;;  %vm9956_vm12 = vcmp.lt.s32.totalorder %v20388_v37, 2  ;;  %v6551_v21 = vadd.s32 %v20344_v49, %v20341_v42  ;;  %vm3259_vm13 = vweird.f32 %v20128_v51 }
 0x644   : > { %v6567_v16 = vsub.s32 32, %v6566_v57  ;;  %v6571_v61 = vsub.s32 4294967266, %v6566_v57  ;;  %v20453_v38 = vmul.u32.u64.low %v20415_v53, %v3318_v27  ;;  %v20454_v14 = vmul.u32.u64.high %v20415_v53, %v3318_v27, %v20453_v38 }
 0x645   : > { %v6599_v47 = vand.u32 2147483647, %v20386_v28  ;;  %v6609_v58 = vadd.s32 1, %v14312_v52  ;;  %v6568_v3 = vshll.u32 %v20394_v11, %v6566_v57  ;;  %v3310_v22 = vsel %vm3304_vm5, %v3307_v31, %v3309_v33 }
 0x646   : > { %v6569_v48 = vshrl.u32 %v6551_v21, %v6567_v16  ;;  %v6572_v29 = vadd.s32 127, %v6571_v61  ;;  %vm3263_vm14 = vcmp.eq.s32.totalorder %v20413_v26, 0  ;;  %v6582_v42 = vsel %vm6497_vm4, %v6581_v7, %v20384_v39 }
 0x647   : > { %v3329_v49 = vadd.s32 1, %v20444_v59  ;;  %vm6610_vm15 = vcmp.gt.s32.totalorder %v6609_v58, 0  ;;  %vm3266_vm0 = vcmp.eq.s32.totalorder %v20413_v26, 2  ;;  %v3326_v63 = vmul.u32 %v20415_v53, %v3310_v22 }
 0x648   : > { %v15123_v44 = vpop.eup %15122  ;;  %v6570_v35 = vor.u32 %v6569_v48, %v6568_v3  ;;  %v6573_v60 = vshll.u32 %v6572_v29, 23  ;;  %v6611_v11 = vsel %vm6610_vm15, %v6609_v58, 0  ;;  %vm3328_vm1 = vc.u32 %v20454_v14, %v20443_v34 }
 0x649   : > { %v15125_v18 = vpop.eup %15124  ;;  %v3267_v43 = vxor.u32 2147483648, %v15123_v44  ;;  %v6606_v24 = vand.u32 8388607, %v6599_v47  ;;  %v6584_v55 = vsel %vm20426_vm6, 0, %v6582_v42  ;;  %v3330_v50 = vsel %vm3328_vm1, %v3329_v49, %v20444_v59 }
 0x64a   : > { %v3264_v39 = vxor.u32 2147483648, %v15125_v18  ;;  %v6574_v12 = vor.u32 4788187, %v6573_v60  ;;  %v3331_v9 = vadd.s32 %v3330_v50, %v3326_v63  ;;  %v6613_v25 = vand.u32 31, %v6611_v11 }
 0x64b   : > { %v3268_v46 = vsel %vm3266_vm0, %v3267_v43, %v15125_v18  ;;  %v9962_v56 = vsel %vm9960_vm8, %v3267_v43, %v15125_v18  ;;  %v6577_v7 = vcvt.s32.f32 %v6570_v35  ;;  %v6588_v52 = vadd.s32 3, %v6584_v55 }
 0x64c   : > { %v3265_v53 = vsel %vm3263_vm14, %v15123_v44, %v3264_v39  ;;  %v9959_v32 = vsel %vm9957_vm10, %v15123_v44, %v3264_v39  ;;  %v6575_v20 = vand.u32 2147483647, %v6574_v12  ;;  %v3332_v2 = vadd.s32 536870912, %v3331_v9 }
 0x64d   : > { %v3269_v36 = vsel %vm3262_vm11, %v3265_v53, %v3268_v46  ;;  %v9963_v23 = vsel %vm9956_vm12, %v9959_v32, %v9962_v56  ;;  %v6614_v30 = vsub.s32 32, %v6613_v25  ;;  %v6607_v26 = vor.u32 8388608, %v6606_v24 }
 0x64e   : > { %v3270_v13 = vsel %vm3259_vm13, nan, %v3269_v36  ;;  %v9964_v40 = vsel %vm3259_vm13, nan, %v9963_v23  ;;  %v6578_v31 = vmul.f32 %v6577_v7, %v6575_v20  ;;  %v20490_v19 = vshrl.u32 %v3332_v2, 30 }
 0x64f   : > { %7248 = vst [vmem:[%s15815_s20 + $0xc8] sm:$0xff] %v3270_v13  ;;  %13904 = vst [vmem:[%s15815_s20 + $0x2c8] sm:$0xff] %v9964_v40  ;;  %v20493_v37 = vshrl.u32 %v6611_v11, 5  ;;  %v6617_v54 = vshrl.u32 %v15258_v4, %v6614_v30  ;;  %v6620_v5 = vshrl.u32 %v15259_v6, %v6614_v30  ;;  %v6616_v57 = vshll.u32 %v15257_v0, %v6613_v25 }
 0x650   : > { %v6579_v15 = vxor.u32 2147483648, %v6578_v31  ;;  %v3334_v33 = vshll.u32 %v20490_v19, 30  ;;  %v6623_v27 = vshrl.u32 %v15260_v8, %v6614_v30  ;;  %v6626_v59 = vshrl.u32 %v15261_v10, %v6614_v30 }
 0x651   : > { %v6619_v61 = vshll.u32 %v15258_v4, %v6613_v25  ;;  %v6622_v38 = vshll.u32 %v15259_v6, %v6613_v25  ;;  %v6625_v58 = vshll.u32 %v15260_v8, %v6613_v25  ;;  %v6628_v3 = vshll.u32 %v15261_v10, %v6613_v25 }
 0x652   : > { %v6580_v51 = vsel %vm6497_vm4, %v6579_v15, %v6578_v31  ;;  %v20505_v16 = vsub.s32 %v3331_v9, %v3334_v33  ;;  %v6629_v48 = vshrl.u32 %v15262_v17, %v6614_v30  ;;  %v6618_v22 = vor.u32 %v6617_v54, %v6616_v57 }
 0x653   : > { %v6583_v21 = vsel %vm20426_vm6, %v20178_v45, %v6580_v51  ;;  %v6621_v42 = vor.u32 %v6620_v5, %v6619_v61  ;;  %v6624_v49 = vor.u32 %v6623_v27, %v6622_v38  ;;  %v6627_v44 = vor.u32 %v6626_v59, %v6625_v58 }
 0x654   : > { %15126 = vcosq.f32 %v6583_v21  ;;  %v3337_v29 = vsub.s32 0, %v20505_v16  ;;  %v6630_v35 = vor.u32 %v6629_v48, %v6628_v3  ;;  %v20515_v60 = vand.u32 3, %v6588_v52 }
 0x655   : > { %15128 = vsinq.f32 %v6583_v21  ;;  %v20517_v11 = vand.u32 3, %v6584_v55  ;;  %v20520_v43 = vshll.u32 %v6607_v26, 8  ;;  %v3357_v63 = vsub.s32 4, %v20490_v19 }
 0x656   : > { %v14185_v18 = vmin.u32 %v3337_v29, %v20505_v16  ;;  %v6615_v24 = vshrl.u32 %v15257_v0, %v6614_v30  ;;  %vm6631_vm4 = vcmp.lt.s32.totalorder %v20493_v37, 1  ;;  %v3378_v39 = vand.u32 2139095040, %v20513_v1 }
 0x657   : > { %vm3273_vm3 = vcmp.lt.s32.totalorder %v20332_v62, 0  ;;  %vm6633_vm5 = vcmp.lt.s32.totalorder %v20493_v37, 3  ;;  %vm6634_vm2 = vcmp.lt.s32.totalorder %v20493_v37, 4  ;;  %v6639_v55 = vsel %vm6631_vm4, %v6618_v22, %v6621_v42 }
 0x658   : > { %v3339_v12 = vclz %v14185_v18  ;;  %v6636_v50 = vsel %vm6634_vm2, %v6624_v49, 2102212464  ;;  %v6640_v46 = vsel %vm6634_vm2, %v6627_v44, 920167782  ;;  %v6643_v56 = vsel %vm6631_vm4, %v6621_v42, %v6624_v49 }
 0x659   : > { %v6644_v9 = vsel %vm6634_vm2, %v6630_v35, 1326507024  ;;  %vm13256_vm7 = vcmp.eq.s32.totalorder %v20517_v11, 2  ;;  %vm6632_vm6 = vcmp.lt.s32.totalorder %v20493_v37, 2  ;;  %v6641_v53 = vsel %vm6633_vm5, %v6624_v49, %v6640_v46 }
 0x65a   : > { %v14186_v25 = vadd.s32 4294967294, %v3339_v12  ;;  %v6645_v32 = vsel %vm6633_vm5, %v6627_v44, %v6644_v9  ;;  %vm13253_vm8 = vcmp.eq.s32.totalorder %v20517_v11, 0  ;;  %vm20542_vm9 = vcmp.le.f32.partialorder %v3271_v41, 0.7853982  ;;  %v20596_v12 = vpop.f32.mrf.mxu1 }
 0x65b   : > { %v6635_v7 = vsel %vm6631_vm4, %v6615_v24, %v6618_v22  ;;  %v6642_v36 = vsel %vm6632_vm6, %v6639_v55, %v6641_v53  ;;  %v6646_v23 = vsel %vm6632_vm6, %v6643_v56, %v6645_v32  ;;  %v3379_v2 = vshrl.u32 %v3378_v39, 23 }
 0x65c   : > { %vm6590_vm10 = vcmp.lt.s32.totalorder %v20515_v60, 2  ;;  %vm13252_vm11 = vcmp.lt.s32.totalorder %v20517_v11, 2  ;;  %vm14187_vm12 = vcmp.lt.s32.totalorder %v14186_v25, 0  ;;  %v6637_v41 = vsel %vm6633_vm5, %v6621_v42, %v6636_v50 }
 0x65d   : > { %v20557_v30 = vmul.u32.u64.low %v20520_v43, %v6646_v23  ;;  %v20558_v13 = vmul.u32.u64.high %v20520_v43, %v6646_v23, %v20557_v30  ;;  %vm6587_vm13 = vweird.f32 %v20178_v45  ;;  %v3342_v40 = vsel %vm14187_vm12, 0, %v14186_v25 }
 0x65e   : > { %v20562_v31 = vmul.u32.u64.low %v20520_v43, %v6642_v36  ;;  %v20563_v15 = vmul.u32.u64.high %v20520_v43, %v6642_v36, %v20562_v31  ;;  %v14188_v52 = vadd.s32 4294967169, %v3379_v2  ;;  %vm6591_vm14 = vcmp.eq.s32.totalorder %v20515_v60, 0 }
 0x65f   : > { %v3327_v26 = vadd.s32 %v20443_v34, %v20454_v14  ;;  %v3343_v33 = vsub.s32 32, %v3342_v40  ;;  %v3347_v54 = vsub.s32 4294967266, %v3342_v40  ;;  %vm6594_vm15 = vcmp.eq.s32.totalorder %v20515_v60, 2 }
 0x660   : > { %v6638_v5 = vsel %vm6632_vm6, %v6635_v7, %v6637_v41  ;;  %v3375_v51 = vand.u32 2147483647, %v20513_v1  ;;  %v3385_v57 = vadd.s32 1, %v14188_v52  ;;  %v3344_v59 = vshll.u32 %v20505_v16, %v3342_v40 }
 0x661   : > { %v15127_v27 = vpop.eup %15126  ;;  %v3345_v21 = vshrl.u32 %v3327_v26, %v3343_v33  ;;  %v3348_v61 = vadd.s32 127, %v3347_v54  ;;  %vm6656_vm0 = vc.u32 %v20558_v13, %v20562_v31  ;;  %v3358_v14 = vsel %vm3273_vm3, %v3357_v63, %v20490_v19 }
 0x662   : > { %v15129_v38 = vpop.eup %15128  ;;  %v6595_v34 = vxor.u32 2147483648, %v15127_v27  ;;  %v6657_v37 = vadd.s32 1, %v20563_v15  ;;  %vm3386_vm1 = vcmp.gt.s32.totalorder %v3385_v57, 0  ;;  %v6654_v42 = vmul.u32 %v20520_v43, %v6638_v5 }
 0x663   : > { %v6592_v58 = vxor.u32 2147483648, %v15129_v38  ;;  %v3346_v3 = vor.u32 %v3345_v21, %v3344_v59  ;;  %v3349_v48 = vshll.u32 %v3348_v61, 23  ;;  %v3387_v29 = vsel %vm3386_vm1, %v3385_v57, 0 }
 0x664   : > { %v6596_v16 = vsel %vm6594_vm15, %v6595_v34, %v15129_v38  ;;  %v13258_v22 = vsel %vm13256_vm7, %v6595_v34, %v15129_v38  ;;  %v6658_v49 = vsel %vm6656_vm0, %v6657_v37, %v20563_v15  ;;  %v3360_v18 = vsel %vm20542_vm9, 0, %v3358_v14 }
 0x665   : > { %v6593_v19 = vsel %vm6591_vm14, %v15127_v27, %v6592_v58  ;;  %v13255_v44 = vsel %vm13253_vm8, %v15127_v27, %v6592_v58  ;;  %v3350_v35 = vor.u32 4788187, %v3349_v48  ;;  %v6659_v43 = vadd.s32 %v6658_v49, %v6654_v42 }
 0x666   : > { %v6597_v63 = vsel %vm6590_vm10, %v6593_v19, %v6596_v16  ;;  %v13259_v24 = vsel %vm13252_vm11, %v13255_v44, %v13258_v22  ;;  %v3389_v39 = vand.u32 31, %v3387_v29  ;;  %v3353_v56 = vcvt.s32.f32 %v3346_v3 }
 0x667   : > { %v6598_v55 = vsel %vm6587_vm13, nan, %v6597_v63  ;;  %v13260_v50 = vsel %vm6587_vm13, nan, %v13259_v24  ;;  %v3351_v46 = vand.u32 2147483647, %v3350_v35  ;;  %v6660_v9 = vadd.s32 536870912, %v6659_v43 }
 0x668   : > { %7280 = vst [vmem:[%s15815_s20 + $0x1c8] sm:$0xff] %v6598_v55  ;;  %13936 = vst [vmem:[%s15815_s20 + $0x3c8] sm:$0xff] %v13260_v50  ;;  %v3390_v60 = vsub.s32 32, %v3389_v39  ;;  %v3364_v53 = vadd.s32 3, %v3360_v18  ;;  %v3382_v11 = vand.u32 8388607, %v3375_v51  ;;  %v3392_v36 = vshll.u32 %v15257_v0, %v3389_v39 }
 0x669   : > { %v3354_v25 = vmul.f32 %v3353_v56, %v3351_v46  ;;  %v6703_v32 = vand.u32 2147483647, %v20596_v12  ;;  %v6661_v7 = vshrl.u32 %v6660_v9, 30  ;;  %v3401_v30 = vshll.u32 %v15260_v8, %v3389_v39 }
 0x66a   : > { %v3393_v23 = vshrl.u32 %v15258_v4, %v3390_v60  ;;  %v3396_v45 = vshrl.u32 %v15259_v6, %v3390_v60  ;;  %v3399_v41 = vshrl.u32 %v15260_v8, %v3390_v60  ;;  %v3402_v40 = vshrl.u32 %v15261_v10, %v3390_v60 }
 0x66b   : > { %v3355_v2 = vxor.u32 2147483648, %v3354_v25  ;;  %v6662_v15 = vshll.u32 %v6661_v7, 30  ;;  %v3388_v52 = vshrl.u32 %v3387_v29, 5  ;;  %v3395_v26 = vshll.u32 %v15258_v4, %v3389_v39 }
 0x66c   : > { %v3398_v33 = vshll.u32 %v15259_v6, %v3389_v39  ;;  %v3394_v5 = vor.u32 %v3393_v23, %v3392_v36  ;;  %v3403_v57 = vor.u32 %v3402_v40, %v3401_v30  ;;  %v3405_v27 = vshrl.u32 %v15262_v17, %v3390_v60 }
 0x66d   : > { %v3356_v54 = vsel %vm3273_vm3, %v3355_v2, %v3354_v25  ;;  %vm6601_vm4 = vcmp.lt.s32.totalorder %v20386_v28, 0  ;;  %v20622_v21 = vsub.s32 %v6659_v43, %v6662_v15  ;;  %v3397_v61 = vor.u32 %v3396_v45, %v3395_v26 }
 0x66e   : > { %v3359_v59 = vsel %vm20542_vm9, %v20332_v62, %v3356_v54  ;;  %v3400_v38 = vor.u32 %v3399_v41, %v3398_v33  ;;  %v20624_v34 = vand.u32 3, %v3360_v18  ;;  %v3383_v14 = vor.u32 8388608, %v3382_v11 }
 0x66f   : > { %15130 = vcosq.f32 %v3359_v59  ;;  %v3404_v37 = vshll.u32 %v15261_v10, %v3389_v39  ;;  %v6665_v58 = vsub.s32 0, %v20622_v21  ;;  %vm3410_vm3 = vcmp.lt.s32.totalorder %v3388_v52, 4 }
 0x670   : > { %15132 = vsinq.f32 %v3359_v59  ;;  %v6706_v3 = vand.u32 2139095040, %v20596_v12  ;;  %v3391_v20 = vshrl.u32 %v15257_v0, %v3390_v60  ;;  %vm3407_vm5 = vcmp.lt.s32.totalorder %v3388_v52, 1 }
 0x671   : > { %v3406_v48 = vor.u32 %v3405_v27, %v3404_v37  ;;  %v3416_v29 = vsel %vm3410_vm3, %v3403_v57, 920167782  ;;  %vm20633_vm2 = vcmp.le.f32.partialorder %v6599_v47, 0.7853982  ;;  %v14313_v22 = vmin.u32 %v6665_v58, %v20622_v21 }
 0x672   : > { %vm3409_vm7 = vcmp.lt.s32.totalorder %v3388_v52, 3  ;;  %v3412_v42 = vsel %vm3410_vm3, %v3400_v38, 2102212464  ;;  %v3415_v49 = vsel %vm3407_vm5, %v3394_v5, %v3397_v61  ;;  %v3365_v19 = vand.u32 3, %v3364_v53 }
 0x673   : > { %v6685_v44 = vsub.s32 4, %v6661_v7  ;;  %v3417_v35 = vsel %vm3409_vm7, %v3400_v38, %v3416_v29  ;;  %v3423_v18 = vshll.u32 %v3383_v14, 8  ;;  %v6667_v63 = vclz %v14313_v22 }
 0x674   : > { %vm3408_vm6 = vcmp.lt.s32.totalorder %v3388_v52, 2  ;;  %v3411_v24 = vsel %vm3407_vm5, %v3391_v20, %v3394_v5  ;;  %v3419_v43 = vsel %vm3407_vm5, %v3397_v61, %v3400_v38  ;;  %v3413_v47 = vsel %vm3409_vm7, %v3397_v61, %v3412_v42 }
 0x675   : > { %v3418_v39 = vsel %vm3408_vm6, %v3415_v49, %v3417_v35  ;;  %v3420_v55 = vsel %vm3410_vm3, %v3406_v48, 1326507024  ;;  %v6707_v50 = vshrl.u32 %v6706_v3, 23  ;;  %v14314_v46 = vadd.s32 4294967294, %v6667_v63 }
 0x676   : > { %v3421_v56 = vsel %vm3409_vm7, %v3403_v57, %v3420_v55  ;;  %v20644_v9 = vmul.u32.u64.low %v3423_v18, %v3418_v39  ;;  %v20645_v60 = vmul.u32.u64.high %v3423_v18, %v3418_v39, %v20644_v9  ;;  %vm10060_vm8 = vcmp.eq.s32.totalorder %v20624_v34, 0 }
 0x677   : > { %v6686_v25 = vsel %vm6601_vm4, %v6685_v44, %v6661_v7  ;;  %v3422_v53 = vsel %vm3408_vm6, %v3419_v43, %v3421_v56  ;;  %v14316_v11 = vadd.s32 4294967169, %v6707_v50  ;;  %vm10059_vm9 = vcmp.lt.s32.totalorder %v20624_v34, 2 }
 0x678   : > { %vm14315_vm10 = vcmp.lt.s32.totalorder %v14314_v46, 0  ;;  %v3414_v36 = vsel %vm3408_vm6, %v3411_v24, %v3413_v47  ;;  %v20654_v23 = vmul.u32.u64.low %v3423_v18, %v3422_v53  ;;  %v20655_v45 = vmul.u32.u64.high %v3423_v18, %v3422_v53, %v20654_v23 }
 0x679   : > { %vm3363_vm11 = vweird.f32 %v20332_v62  ;;  %vm3366_vm12 = vcmp.lt.s32.totalorder %v3365_v19, 2  ;;  %vm10063_vm13 = vcmp.eq.s32.totalorder %v20624_v34, 2  ;;  %v6670_v2 = vsel %vm14315_vm10, 0, %v14314_v46 }
 0x67a   : > { %v6713_v41 = vadd.s32 1, %v14316_v11  ;;  %v6655_v7 = vadd.s32 %v20562_v31, %v20558_v13  ;;  %v6671_v30 = vsub.s32 32, %v6670_v2  ;;  %v6675_v40 = vsub.s32 4294967266, %v6670_v2 }
 0x67b   : > { %v3433_v15 = vadd.s32 1, %v20645_v60  ;;  %vm3367_vm14 = vcmp.eq.s32.totalorder %v3365_v19, 0  ;;  %v6688_v52 = vsel %vm20633_vm2, 0, %v6686_v25  ;;  %v3430_v26 = vmul.u32 %v3423_v18, %v3414_v36 }
 0x67c   : > { %vm6714_vm15 = vcmp.gt.s32.totalorder %v6713_v41, 0  ;;  %v15131_v33 = vpop.eup %15130  ;;  %v6672_v54 = vshll.u32 %v20622_v21, %v6670_v2  ;;  %v6673_v5 = vshrl.u32 %v6655_v7, %v6671_v30  ;;  %v6676_v57 = vadd.s32 127, %v6675_v40 }
 0x67d   : > { %vm3432_vm0 = vc.u32 %v20655_v45, %v20644_v9  ;;  %v15133_v27 = vpop.eup %15132  ;;  %vm3370_vm1 = vcmp.eq.s32.totalorder %v3365_v19, 2  ;;  %v3371_v13 = vxor.u32 2147483648, %v15131_v33  ;;  %v6715_v59 = vsel %vm6714_vm15, %v6713_v41, 0 }
 0x67e   : > { %v3434_v31 = vsel %vm3432_vm0, %v3433_v15, %v20645_v60  ;;  %v3368_v61 = vxor.u32 2147483648, %v15133_v27  ;;  %v6674_v38 = vor.u32 %v6673_v5, %v6672_v54  ;;  %v6677_v14 = vshll.u32 %v6676_v57, 23  ;;  %v20709_v54 = vpop.f32.mrf.mxu0 }
 0x67f   : > { %v3435_v37 = vadd.s32 %v3434_v31, %v3430_v26  ;;  %v3372_v58 = vsel %vm3370_vm1, %v3371_v13, %v15133_v27  ;;  %v10065_v21 = vsel %vm10063_vm13, %v3371_v13, %v15133_v27  ;;  %v6692_v3 = vadd.s32 3, %v6688_v52 }
 0x680   : > { %v6717_v20 = vand.u32 31, %v6715_v59  ;;  %v3369_v48 = vsel %vm3367_vm14, %v15131_v33, %v3368_v61  ;;  %v10062_v29 = vsel %vm10060_vm8, %v15131_v33, %v3368_v61  ;;  %v6678_v22 = vor.u32 4788187, %v6677_v14 }
 0x681   : > { %v6710_v42 = vand.u32 8388607, %v6703_v32  ;;  %v3373_v49 = vsel %vm3366_vm12, %v3369_v48, %v3372_v58  ;;  %v10066_v44 = vsel %vm10059_vm9, %v10062_v29, %v10065_v21  ;;  %v3436_v35 = vadd.s32 536870912, %v3435_v37 }
 0x682   : > { %v6718_v18 = vsub.s32 32, %v6717_v20  ;;  %v3374_v63 = vsel %vm3363_vm11, nan, %v3373_v49  ;;  %v10067_v24 = vsel %vm3363_vm11, nan, %v10066_v44  ;;  %v6679_v43 = vand.u32 2147483647, %v6678_v22 }
 0x683   : > { %v6681_v47 = vcvt.s32.f32 %v6674_v38  ;;  %7249 = vst [vmem:[%s15815_s20 + $0xd0] sm:$0xff] %v3374_v63  ;;  %13905 = vst [vmem:[%s15815_s20 + $0x2d0] sm:$0xff] %v10067_v24  ;;  %v20684_v39 = vshrl.u32 %v3436_v35, 30  ;;  %v20686_v19 = vand.u32 3, %v6688_v52  ;;  %v20688_v50 = vand.u32 3, %v6692_v3 }
 0x684   : > { %v6711_v46 = vor.u32 8388608, %v6710_v42  ;;  %v6721_v56 = vshrl.u32 %v15258_v4, %v6718_v18  ;;  %v6724_v62 = vshrl.u32 %v15259_v6, %v6718_v18  ;;  %v6727_v25 = vshrl.u32 %v15260_v8, %v6718_v18 }
 0x685   : > { %v6682_v55 = vmul.f32 %v6681_v47, %v6679_v43  ;;  %v3438_v34 = vshll.u32 %v20684_v39, 30  ;;  %v6730_v53 = vshrl.u32 %v15261_v10, %v6718_v18  ;;  %v6716_v36 = vshrl.u32 %v6715_v59, 5 }
 0x686   : > { %v6720_v23 = vshll.u32 %v15257_v0, %v6717_v20  ;;  %v6733_v2 = vshrl.u32 %v15262_v17, %v6718_v18  ;;  %v6723_v7 = vshll.u32 %v15258_v4, %v6717_v20  ;;  %v6726_v30 = vshll.u32 %v15259_v6, %v6717_v20 }
 0x687   : > { %v6683_v60 = vxor.u32 2147483648, %v6682_v55  ;;  %v20695_v11 = vsub.s32 %v3435_v37, %v3438_v34  ;;  %v6729_v40 = vshll.u32 %v15260_v8, %v6717_v20  ;;  %v6732_v33 = vshll.u32 %v15261_v10, %v6717_v20 }
 0x688   : > { %v6722_v26 = vor.u32 %v6721_v56, %v6720_v23  ;;  %v6725_v5 = vor.u32 %v6724_v62, %v6723_v7  ;;  %v6728_v57 = vor.u32 %v6727_v25, %v6726_v30  ;;  %v6751_v59 = vshll.u32 %v6711_v46, 8 }
 0x689   : > { %v6684_v41 = vsel %vm6601_vm4, %v6683_v60, %v6682_v55  ;;  %v3441_v52 = vsub.s32 0, %v20695_v11  ;;  %v6731_v27 = vor.u32 %v6730_v53, %v6729_v40  ;;  %v6734_v31 = vor.u32 %v6733_v2, %v6732_v33 }
 0x68a   : > { %v6687_v15 = vsel %vm20633_vm2, %v20386_v28, %v6684_v41  ;;  %v3431_v16 = vadd.s32 %v20644_v9, %v20655_v45  ;;  %v6719_v61 = vshrl.u32 %v15257_v0, %v6718_v18  ;;  %vm6735_vm4 = vcmp.lt.s32.totalorder %v6716_v36, 1 }
 0x68b   : > { %15134 = vcosq.f32 %v6687_v15  ;;  %v14189_v13 = vmin.u32 %v3441_v52, %v20695_v11  ;;  %v3482_v38 = vand.u32 2139095040, %v20709_v54  ;;  %vm3377_vm3 = vcmp.lt.s32.totalorder %v20513_v1, 0 }
 0x68c   : > { %15136 = vsinq.f32 %v6687_v15  ;;  %vm6736_vm5 = vcmp.lt.s32.totalorder %v6716_v36, 2  ;;  %vm6737_vm2 = vcmp.lt.s32.totalorder %v6716_v36, 3  ;;  %vm6738_vm7 = vcmp.lt.s32.totalorder %v6716_v36, 4 }
 0x68d   : > { %v3443_v14 = vclz %v14189_v13  ;;  %v6740_v37 = vsel %vm6738_vm7, %v6728_v57, 2102212464  ;;  %v6743_v58 = vsel %vm6735_vm4, %v6722_v26, %v6725_v5  ;;  %v6744_v21 = vsel %vm6738_vm7, %v6731_v27, 920167782 }
 0x68e   : > { %v6747_v3 = vsel %vm6735_vm4, %v6725_v5, %v6728_v57  ;;  %v6739_v48 = vsel %vm6735_vm4, %v6719_v61, %v6722_v26  ;;  %v6745_v29 = vsel %vm6737_vm2, %v6728_v57, %v6744_v21  ;;  %v6748_v22 = vsel %vm6738_vm7, %v6734_v31, 1326507024 }
 0x68f   : > { %v14190_v20 = vadd.s32 4294967294, %v3443_v14  ;;  %vm20719_vm6 = vcmp.le.f32.partialorder %v3375_v51, 0.7853982  ;;  %v6741_v45 = vsel %vm6737_vm2, %v6725_v5, %v6740_v37  ;;  %v6746_v42 = vsel %vm6736_vm5, %v6743_v58, %v6745_v29 }
 0x690   : > { %v6749_v49 = vsel %vm6737_vm2, %v6731_v27, %v6748_v22  ;;  %v3483_v44 = vshrl.u32 %v3482_v38, 23  ;;  %v20725_v18 = vmul.u32.u64.low %v6751_v59, %v6746_v42  ;;  %v20726_v63 = vmul.u32.u64.high %v6751_v59, %v6746_v42, %v20725_v18 }
 0x691   : > { %vm14191_vm8 = vcmp.lt.s32.totalorder %v14190_v20, 0  ;;  %v6750_v35 = vsel %vm6736_vm5, %v6747_v3, %v6749_v49  ;;  %vm13356_vm9 = vcmp.eq.s32.totalorder %v20686_v19, 0  ;;  %v3461_v51 = vsub.s32 4, %v20684_v39 }
 0x692   : > { %v3446_v24 = vsel %vm14191_vm8, 0, %v14190_v20  ;;  %v20731_v43 = vmul.u32.u64.low %v6751_v59, %v6750_v35  ;;  %v20732_v47 = vmul.u32.u64.high %v6751_v59, %v6750_v35, %v20731_v43  ;;  %vm13355_vm10 = vcmp.lt.s32.totalorder %v20686_v19, 2 }
 0x693   : > { %v3447_v55 = vsub.s32 32, %v3446_v24  ;;  %v3451_v34 = vsub.s32 4294967266, %v3446_v24  ;;  %v6742_v46 = vsel %vm6736_vm5, %v6739_v48, %v6741_v45  ;;  %v14192_v56 = vadd.s32 4294967169, %v3483_v44 }
 0x694   : > { %vm6691_vm11 = vweird.f32 %v20386_v28  ;;  %vm6694_vm12 = vcmp.lt.s32.totalorder %v20688_v50, 2  ;;  %vm13359_vm13 = vcmp.eq.s32.totalorder %v20686_v19, 2  ;;  %v3448_v60 = vshll.u32 %v20695_v11, %v3446_v24 }
 0x695   : > { %v3479_v62 = vand.u32 2147483647, %v20709_v54  ;;  %v3449_v25 = vshrl.u32 %v3431_v16, %v3447_v55  ;;  %v3452_v53 = vadd.s32 127, %v3451_v34  ;;  %v6761_v23 = vadd.s32 1, %v20726_v63 }
 0x696   : > { %v3489_v2 = vadd.s32 1, %v14192_v56  ;;  %vm6695_vm14 = vcmp.eq.s32.totalorder %v20688_v50, 0  ;;  %v3462_v36 = vsel %vm3377_vm3, %v3461_v51, %v20684_v39  ;;  %v6758_v41 = vmul.u32 %v6751_v59, %v6742_v46 }
 0x697   : > { %vm6760_vm15 = vc.u32 %v20732_v47, %v20725_v18  ;;  %v3450_v30 = vor.u32 %v3449_v25, %v3448_v60  ;;  %v3453_v11 = vshll.u32 %v3452_v53, 23  ;;  %vm6698_vm1 = vcmp.eq.s32.totalorder %v20688_v50, 2 }
 0x698   : > { %v15135_v7 = vpop.eup %15134  ;;  %v6762_v40 = vsel %vm6760_vm15, %v6761_v23, %v20726_v63  ;;  %vm3490_vm0 = vcmp.gt.s32.totalorder %v3489_v2, 0  ;;  %v3464_v39 = vsel %vm20719_vm6, 0, %v3462_v36  ;;  %v3486_v27 = vand.u32 8388607, %v3479_v62 }
 0x699   : > { %v15137_v15 = vpop.eup %15136  ;;  %v6699_v52 = vxor.u32 2147483648, %v15135_v7  ;;  %v6763_v26 = vadd.s32 %v6762_v40, %v6758_v41  ;;  %v3491_v33 = vsel %vm3490_vm0, %v3489_v2, 0  ;;  %v3454_v57 = vor.u32 4788187, %v3453_v11 }
 0x69a   : > { %v6696_v5 = vxor.u32 2147483648, %v15137_v15  ;;  %v3493_v16 = vand.u32 31, %v3491_v33  ;;  %v3457_v37 = vcvt.s32.f32 %v3450_v30  ;;  %v3468_v49 = vadd.s32 3, %v3464_v39 }
 0x69b   : > { %v6700_v13 = vsel %vm6698_vm1, %v6699_v52, %v15137_v15  ;;  %v13361_v31 = vsel %vm13359_vm13, %v6699_v52, %v15137_v15  ;;  %v6764_v59 = vadd.s32 536870912, %v6763_v26  ;;  %v3455_v14 = vand.u32 2147483647, %v3454_v57 }
 0x69c   : > { %v6697_v61 = vsel %vm6695_vm14, %v15135_v7, %v6696_v5  ;;  %v13358_v38 = vsel %vm13356_vm9, %v15135_v7, %v6696_v5  ;;  %v3494_v20 = vsub.s32 32, %v3493_v16  ;;  %v20770_v44 = vand.u32 3, %v3464_v39 }
 0x69d   : > { %v6701_v58 = vsel %vm6694_vm12, %v6697_v61, %v6700_v13  ;;  %v13362_v21 = vsel %vm13355_vm10, %v13358_v38, %v13361_v31  ;;  %v6765_v3 = vshrl.u32 %v6764_v59, 30  ;;  %v3458_v22 = vmul.f32 %v3457_v37, %v3455_v14  ;;  %v20816_v59 = vpop.f32.mrf.mxu1 }
 0x69e   : > { %v6702_v48 = vsel %vm6691_vm11, nan, %v6701_v58  ;;  %v13363_v29 = vsel %vm6691_vm11, nan, %v13362_v21  ;;  %vm6705_vm4 = vcmp.lt.s32.totalorder %v20596_v12, 0  ;;  %v3487_v50 = vor.u32 8388608, %v3486_v27 }
 0x69f   : > { %7281 = vst [vmem:[%s15815_s20 + $0x1d0] sm:$0xff] %v6702_v48  ;;  %13937 = vst [vmem:[%s15815_s20 + $0x3d0] sm:$0xff] %v13363_v29  ;;  %v6766_v45 = vshll.u32 %v6765_v3, 30  ;;  %v3459_v42 = vxor.u32 2147483648, %v3458_v22  ;;  %v3497_v35 = vshrl.u32 %v15258_v4, %v3494_v20  ;;  %v3500_v63 = vshrl.u32 %v15259_v6, %v3494_v20 }
 0x6a0   : > { %v20779_v24 = vshrl.u32 %v3491_v33, 5  ;;  %v3496_v51 = vshll.u32 %v15257_v0, %v3493_v16  ;;  %v3503_v43 = vshrl.u32 %v15260_v8, %v3494_v20  ;;  %v6789_v46 = vsub.s32 4, %v6765_v3 }
 0x6a1   : > { %v20773_v19 = vsub.s32 %v6763_v26, %v6766_v45  ;;  %v3460_v28 = vsel %vm3377_vm3, %v3459_v42, %v3458_v22  ;;  %v3499_v56 = vshll.u32 %v15258_v4, %v3493_v16  ;;  %v3502_v60 = vshll.u32 %v15259_v6, %v3493_v16 }
 0x6a2   : > { %v3463_v55 = vsel %vm20719_vm6, %v20513_v1, %v3460_v28  ;;  %v3505_v25 = vshll.u32 %v15260_v8, %v3493_v16  ;;  %v3506_v53 = vshrl.u32 %v15261_v10, %v3494_v20  ;;  %v3498_v2 = vor.u32 %v3497_v35, %v3496_v51 }
 0x6a3   : > { %v6769_v34 = vsub.s32 0, %v20773_v19  ;;  %15138 = vcosq.f32 %v3463_v55  ;;  %v3501_v36 = vor.u32 %v3500_v63, %v3499_v56  ;;  %v3504_v41 = vor.u32 %v3503_v43, %v3502_v60 }
 0x6a4   : > { %15140 = vsinq.f32 %v3463_v55  ;;  %v3507_v9 = vor.u32 %v3506_v53, %v3505_v25  ;;  %v3508_v7 = vshll.u32 %v15261_v10, %v3493_v16  ;;  %v3509_v30 = vshrl.u32 %v15262_v17, %v3494_v20 }
 0x6a5   : > { %v14317_v23 = vmin.u32 %v6769_v34, %v20773_v19  ;;  %v20794_v11 = vand.u32 3, %v3468_v49  ;;  %v6759_v40 = vadd.s32 %v20725_v18, %v20732_v47  ;;  %v20798_v52 = vshll.u32 %v3487_v50, 8 }
 0x6a6   : > { %v6790_v26 = vsel %vm6705_vm4, %v6789_v46, %v6765_v3  ;;  %v3495_v33 = vshrl.u32 %v15257_v0, %v3494_v20  ;;  %v3510_v5 = vor.u32 %v3509_v30, %v3508_v7  ;;  %vm3511_vm3 = vcmp.lt.s32.totalorder %v20779_v24, 1 }
 0x6a7   : > { %v6771_v15 = vclz %v14317_v23  ;;  %vm20806_vm5 = vcmp.le.f32.partialorder %v6703_v32, 0.7853982  ;;  %vm3513_vm2 = vcmp.lt.s32.totalorder %v20779_v24, 3  ;;  %vm3514_vm7 = vcmp.lt.s32.totalorder %v20779_v24, 4 }
 0x6a8   : > { %v3519_v18 = vsel %vm3511_vm3, %v3498_v2, %v3501_v36  ;;  %v3516_v47 = vsel %vm3514_vm7, %v3504_v41, 2102212464  ;;  %v3520_v27 = vsel %vm3514_vm7, %v3507_v9, 920167782  ;;  %v3523_v13 = vsel %vm3511_vm3, %v3501_v36, %v3504_v41 }
 0x6a9   : > { %v14318_v39 = vadd.s32 4294967294, %v6771_v15  ;;  %v3524_v31 = vsel %vm3514_vm7, %v3510_v5, 1326507024  ;;  %vm10166_vm6 = vcmp.eq.s32.totalorder %v20770_v44, 2  ;;  %vm3512_vm9 = vcmp.lt.s32.totalorder %v20779_v24, 2 }
 0x6aa   : > { %v3521_v32 = vsel %vm3513_vm2, %v3504_v41, %v3520_v27  ;;  %v3525_v16 = vsel %vm3513_vm2, %v3507_v9, %v3524_v31  ;;  %vm10163_vm10 = vcmp.eq.s32.totalorder %v20770_v44, 0  ;;  %v3515_v38 = vsel %vm3511_vm3, %v3495_v33, %v3498_v2 }
 0x6ab   : > { %vm14319_vm8 = vcmp.lt.s32.totalorder %v14318_v39, 0  ;;  %v3522_v14 = vsel %vm3512_vm9, %v3519_v18, %v3521_v32  ;;  %v3526_v37 = vsel %vm3512_vm9, %v3523_v13, %v3525_v16  ;;  %vm10162_vm11 = vcmp.lt.s32.totalorder %v20770_v44, 2 }
 0x6ac   : > { %v6774_v61 = vsel %vm14319_vm8, 0, %v14318_v39  ;;  %v3517_v3 = vsel %vm3513_vm2, %v3501_v36, %v3516_v47  ;;  %v6810_v20 = vand.u32 2139095040, %v20816_v59  ;;  %vm3470_vm12 = vcmp.lt.s32.totalorder %v20794_v11, 2  ;;  %v20871_v47 = vpop.f32.mrf.mxu0 }
 0x6ad   : > { %v6775_v58 = vsub.s32 32, %v6774_v61  ;;  %v6779_v21 = vsub.s32 4294967266, %v6774_v61  ;;  %v20836_v48 = vmul.u32.u64.low %v20798_v52, %v3526_v37  ;;  %v20837_v29 = vmul.u32.u64.high %v20798_v52, %v3526_v37, %v20836_v48 }
 0x6ae   : > { %v20840_v22 = vmul.u32.u64.low %v20798_v52, %v3522_v14  ;;  %v20841_v45 = vmul.u32.u64.high %v20798_v52, %v3522_v14, %v20840_v22  ;;  %v6776_v42 = vshll.u32 %v20773_v19, %v6774_v61  ;;  %v6811_v35 = vshrl.u32 %v6810_v20, 23 }
 0x6af   : > { %v6777_v49 = vshrl.u32 %v6759_v40, %v6775_v58  ;;  %v6780_v50 = vadd.s32 127, %v6779_v21  ;;  %vm3471_vm13 = vcmp.eq.s32.totalorder %v20794_v11, 0  ;;  %vm3474_vm14 = vcmp.eq.s32.totalorder %v20794_v11, 2 }
 0x6b0   : > { %v3518_v63 = vsel %vm3512_vm9, %v3515_v38, %v3517_v3  ;;  %v15139_v28 = vpop.eup %15138  ;;  %v6807_v55 = vand.u32 2147483647, %v20816_v59  ;;  %v14320_v34 = vadd.s32 4294967169, %v6811_v35  ;;  %v6792_v56 = vsel %vm20806_vm5, 0, %v6790_v26 }
 0x6b1   : > { %v6778_v51 = vor.u32 %v6777_v49, %v6776_v42  ;;  %v6781_v43 = vshll.u32 %v6780_v50, 23  ;;  %v15141_v46 = vpop.eup %15140  ;;  %v3475_v19 = vxor.u32 2147483648, %v15139_v28  ;;  %vm3536_vm15 = vc.u32 %v20837_v29, %v20840_v22 }
 0x6b2   : > { %v3537_v60 = vadd.s32 1, %v20841_v45  ;;  %v3472_v25 = vxor.u32 2147483648, %v15141_v46  ;;  %v3534_v24 = vmul.u32 %v20798_v52, %v3518_v63  ;;  %v6817_v23 = vadd.s32 1, %v14320_v34 }
 0x6b3   : > { %v6782_v53 = vor.u32 4788187, %v6781_v43  ;;  %v3476_v2 = vsel %vm3474_vm14, %v3475_v19, %v15141_v46  ;;  %v10168_v36 = vsel %vm10166_vm6, %v3475_v19, %v15141_v46  ;;  %v6785_v41 = vcvt.s32.f32 %v6778_v51 }
 0x6b4   : > { %v3538_v9 = vsel %vm3536_vm15, %v3537_v60, %v20841_v45  ;;  %v3473_v7 = vsel %vm3471_vm13, %v15139_v28, %v3472_v25  ;;  %v10165_v30 = vsel %vm10163_vm10, %v15139_v28, %v3472_v25  ;;  %vm3467_vm0 = vweird.f32 %v20513_v1 }
 0x6b5   : > { %v6783_v40 = vand.u32 2147483647, %v6782_v53  ;;  %v3539_v15 = vadd.s32 %v3538_v9, %v3534_v24  ;;  %v3477_v52 = vsel %vm3470_vm12, %v3473_v7, %v3476_v2  ;;  %v10169_v26 = vsel %vm10162_vm11, %v10165_v30, %v10168_v36 }
 0x6b6   : > { %vm6818_vm1 = vcmp.gt.s32.totalorder %v6817_v23, 0  ;;  %v3478_v33 = vsel %vm3467_vm0, nan, %v3477_v52  ;;  %v10170_v5 = vsel %vm3467_vm0, nan, %v10169_v26  ;;  %v6796_v27 = vadd.s32 3, %v6792_v56 }
 0x6b7   : > { %v6786_v39 = vmul.f32 %v6785_v41, %v6783_v40  ;;  %v3540_v18 = vadd.s32 536870912, %v3539_v15  ;;  %7250 = vst [vmem:[%s15815_s20 + $0xd8] sm:$0xff] %v3478_v33  ;;  %13906 = vst [vmem:[%s15815_s20 + $0x2d8] sm:$0xff] %v10170_v5  ;;  %v6819_v13 = vsel %vm6818_vm1, %v6817_v23, 0  ;;  %v6814_v1 = vand.u32 8388607, %v6807_v55 }
 0x6b8   : > { %v6821_v11 = vand.u32 31, %v6819_v13  ;;  %v3586_v44 = vand.u32 2139095040, %v20871_v47  ;;  %v20886_v37 = vand.u32 3, %v6792_v56  ;;  %v20888_v58 = vand.u32 3, %v6796_v27 }
 0x6b9   : > { %v6787_v31 = vxor.u32 2147483648, %v6786_v39  ;;  %v20875_v32 = vshrl.u32 %v3540_v18, 30  ;;  %v6815_v3 = vor.u32 8388608, %v6814_v1  ;;  %v6820_v35 = vshrl.u32 %v6819_v13, 5 }
 0x6ba   : > { %v6822_v38 = vsub.s32 32, %v6821_v11  ;;  %v3587_v45 = vshrl.u32 %v3586_v44, 23  ;;  %v6824_v49 = vshll.u32 %v15257_v0, %v6821_v11  ;;  %v6827_v57 = vshll.u32 %v15258_v4, %v6821_v11 }
 0x6bb   : > { %v6788_v16 = vsel %vm6705_vm4, %v6787_v31, %v6786_v39  ;;  %v3542_v61 = vshll.u32 %v20875_v32, 30  ;;  %v6830_v63 = vshll.u32 %v15259_v6, %v6821_v11  ;;  %v6833_v28 = vshll.u32 %v15260_v8, %v6821_v11 }
 0x6bc   : > { %v6791_v14 = vsel %vm20806_vm5, %v20596_v12, %v6788_v16  ;;  %v6825_v20 = vshrl.u32 %v15258_v4, %v6822_v38  ;;  %v6828_v48 = vshrl.u32 %v15259_v6, %v6822_v38  ;;  %v6831_v50 = vshrl.u32 %v15260_v8, %v6822_v38 }
 0x6bd   : > { %15142 = vcosq.f32 %v6791_v14  ;;  %v20890_v21 = vsub.s32 %v3539_v15, %v3542_v61  ;;  %v6834_v51 = vshrl.u32 %v15261_v10, %v6822_v38  ;;  %v3535_v19 = vadd.s32 %v20840_v22, %v20837_v29 }
 0x6be   : > { %15144 = vsinq.f32 %v6791_v14  ;;  %v6826_v34 = vor.u32 %v6825_v20, %v6824_v49  ;;  %v6829_v46 = vor.u32 %v6828_v48, %v6827_v57  ;;  %v6832_v56 = vor.u32 %v6831_v50, %v6830_v63 }
 0x6bf   : > { %v3545_v42 = vsub.s32 0, %v20890_v21  ;;  %v6835_v60 = vor.u32 %v6834_v51, %v6833_v28  ;;  %v3583_v25 = vand.u32 2147483647, %v20871_v47  ;;  %v3565_v24 = vsub.s32 4, %v20875_v32 }
 0x6c0   : > { %v20906_v23 = vshll.u32 %v6815_v3, 8  ;;  %v14196_v2 = vadd.s32 4294967169, %v3587_v45  ;;  %vm6802_vm4 = vcmp.eq.s32.totalorder %v20888_v58, 2  ;;  %vm13462_vm3 = vcmp.eq.s32.totalorder %v20886_v37, 2 }
 0x6c1   : > { %v14193_v43 = vmin.u32 %v3545_v42, %v20890_v21  ;;  %v6823_v36 = vshrl.u32 %v15257_v0, %v6822_v38  ;;  %v6836_v41 = vshll.u32 %v15261_v10, %v6821_v11  ;;  %v6837_v29 = vshrl.u32 %v15262_v17, %v6822_v38 }
 0x6c2   : > { %vm6839_vm5 = vcmp.lt.s32.totalorder %v6820_v35, 1  ;;  %vm6799_vm2 = vcmp.eq.s32.totalorder %v20888_v58, 0  ;;  %vm13459_vm7 = vcmp.eq.s32.totalorder %v20886_v37, 0  ;;  %vm6840_vm6 = vcmp.lt.s32.totalorder %v6820_v35, 2 }
 0x6c3   : > { %v3547_v53 = vclz %v14193_v43  ;;  %vm6842_vm8 = vcmp.lt.s32.totalorder %v6820_v35, 4  ;;  %v6847_v9 = vsel %vm6839_vm5, %v6826_v34, %v6829_v46  ;;  %vm6798_vm9 = vcmp.lt.s32.totalorder %v20888_v58, 2 }
 0x6c4   : > { %vm13458_vm10 = vcmp.lt.s32.totalorder %v20886_v37, 2  ;;  %vm3481_vm11 = vcmp.lt.s32.totalorder %v20709_v54, 0  ;;  %v6838_v7 = vor.u32 %v6837_v29, %v6836_v41  ;;  %vm6841_vm12 = vcmp.lt.s32.totalorder %v6820_v35, 3 }
 0x6c5   : > { %v14194_v22 = vadd.s32 4294967294, %v3547_v53  ;;  %v6844_v30 = vsel %vm6842_vm8, %v6832_v56, 2102212464  ;;  %v6848_v40 = vsel %vm6842_vm8, %v6835_v60, 920167782  ;;  %vm6795_vm13 = vweird.f32 %v20596_v12 }
 0x6c6   : > { %v6849_v15 = vsel %vm6841_vm12, %v6832_v56, %v6848_v40  ;;  %v6851_v52 = vsel %vm6839_vm5, %v6829_v46, %v6832_v56  ;;  %v3593_v26 = vadd.s32 1, %v14196_v2  ;;  %v6843_v5 = vsel %vm6839_vm5, %v6823_v36, %v6826_v34 }
 0x6c7   : > { %vm14195_vm14 = vcmp.lt.s32.totalorder %v14194_v22, 0  ;;  %v6850_v39 = vsel %vm6840_vm6, %v6847_v9, %v6849_v15  ;;  %v6852_v18 = vsel %vm6842_vm8, %v6838_v7, 1326507024  ;;  %v6845_v31 = vsel %vm6841_vm12, %v6829_v46, %v6844_v30 }
 0x6c8   : > { %v3550_v33 = vsel %vm14195_vm14, 0, %v14194_v22  ;;  %v6853_v1 = vsel %vm6841_vm12, %v6835_v60, %v6852_v18  ;;  %v20929_v61 = vmul.u32.u64.low %v20906_v23, %v6850_v39  ;;  %v20930_v38 = vmul.u32.u64.high %v20906_v23, %v6850_v39, %v20929_v61 }
 0x6c9   : > { %v3551_v27 = vsub.s32 32, %v3550_v33  ;;  %v3555_v13 = vsub.s32 4294967266, %v3550_v33  ;;  %v3552_v44 = vshll.u32 %v20890_v21, %v3550_v33  ;;  %v6854_v16 = vsel %vm6840_vm6, %v6851_v52, %v6853_v1 }
 0x6ca   : > { %v15143_v11 = vpop.eup %15142  ;;  %vm3594_vm15 = vcmp.gt.s32.totalorder %v3593_v26, 0  ;;  %v6846_v42 = vsel %vm6840_vm6, %v6843_v5, %v6845_v31  ;;  %v20935_v49 = vmul.u32.u64.low %v20906_v23, %v6854_v16  ;;  %v20936_v57 = vmul.u32.u64.high %v20906_v23, %v6854_v16, %v20935_v49 }
 0x6cb   : > { %v15145_v14 = vpop.eup %15144  ;;  %v6803_v3 = vxor.u32 2147483648, %v15143_v11  ;;  %v3553_v20 = vshrl.u32 %v3535_v19, %v3551_v27  ;;  %v3556_v48 = vadd.s32 127, %v3555_v13  ;;  %v6865_v43 = vadd.s32 1, %v20930_v38 }
 0x6cc   : > { %v6800_v45 = vxor.u32 2147483648, %v15145_v14  ;;  %v3595_v34 = vsel %vm3594_vm15, %v3593_v26, 0  ;;  %v3566_v60 = vsel %vm3481_vm11, %v3565_v24, %v20875_v32  ;;  %v6862_v36 = vmul.u32 %v20906_v23, %v6846_v42 }
 0x6cd   : > { %v6804_v21 = vsel %vm6802_vm4, %v6803_v3, %v15145_v14  ;;  %v13464_v50 = vsel %vm13462_vm3, %v6803_v3, %v15145_v14  ;;  %v3554_v63 = vor.u32 %v3553_v20, %v3552_v44  ;;  %v3557_v28 = vshll.u32 %v3556_v48, 23  ;;  %v20991_v14 = vpop.f32.mrf.mxu1 }
 0x6ce   : > { %v6801_v51 = vsel %vm6799_vm2, %v15143_v11, %v6800_v45  ;;  %v13461_v35 = vsel %vm13459_vm7, %v15143_v11, %v6800_v45  ;;  %vm6864_vm0 = vc.u32 %v20936_v57, %v20929_v61  ;;  %v3597_v29 = vand.u32 31, %v3595_v34 }
 0x6cf   : > { %v6805_v46 = vsel %vm6798_vm9, %v6801_v51, %v6804_v21  ;;  %v13465_v19 = vsel %vm13458_vm10, %v13461_v35, %v13464_v50  ;;  %v3558_v56 = vor.u32 4788187, %v3557_v28  ;;  %v3561_v58 = vcvt.s32.f32 %v3554_v63 }
 0x6d0   : > { %v6806_v53 = vsel %vm6795_vm13, nan, %v6805_v46  ;;  %v13466_v2 = vsel %vm6795_vm13, nan, %v13465_v19  ;;  %v6866_v41 = vsel %vm6864_vm0, %v6865_v43, %v20930_v38  ;;  %vm20966_vm1 = vcmp.le.f32.partialorder %v3479_v62, 0.7853982 }
 0x6d1   : > { %7282 = vst [vmem:[%s15815_s20 + $0x1d8] sm:$0xff] %v6806_v53  ;;  %13938 = vst [vmem:[%s15815_s20 + $0x3d8] sm:$0xff] %v13466_v2  ;;  %v3559_v37 = vand.u32 2147483647, %v3558_v56  ;;  %v6867_v22 = vadd.s32 %v6866_v41, %v6862_v36  ;;  %v3590_v24 = vand.u32 8388607, %v3583_v25  ;;  %v3600_v40 = vshll.u32 %v15257_v0, %v3597_v29 }
 0x6d2   : > { %v3598_v23 = vsub.s32 32, %v3597_v29  ;;  %v3568_v9 = vsel %vm20966_vm1, 0, %v3566_v60  ;;  %v20974_v30 = vshrl.u32 %v3595_v34, 5  ;;  %v3603_v62 = vshll.u32 %v15258_v4, %v3597_v29 }
 0x6d3   : > { %v3562_v12 = vmul.f32 %v3561_v58, %v3559_v37  ;;  %v6868_v7 = vadd.s32 536870912, %v6867_v22  ;;  %v3606_v13 = vshll.u32 %v15259_v6, %v3597_v29  ;;  %v3609_v31 = vshll.u32 %v15260_v8, %v3597_v29 }
 0x6d4   : > { %v3601_v52 = vshrl.u32 %v15258_v4, %v3598_v23  ;;  %v3604_v26 = vshrl.u32 %v15259_v6, %v3598_v23  ;;  %v3607_v5 = vshrl.u32 %v15260_v8, %v3598_v23  ;;  %v3610_v39 = vshrl.u32 %v15261_v10, %v3598_v23 }
 0x6d5   : > { %v3563_v15 = vxor.u32 2147483648, %v3562_v12  ;;  %v6869_v33 = vshrl.u32 %v6868_v7, 30  ;;  %v3613_v18 = vshrl.u32 %v15262_v17, %v3598_v23  ;;  %v3612_v1 = vshll.u32 %v15261_v10, %v3597_v29 }
 0x6d6   : > { %v3602_v16 = vor.u32 %v3601_v52, %v3600_v40  ;;  %v3605_v38 = vor.u32 %v3604_v26, %v3603_v62  ;;  %v3608_v3 = vor.u32 %v3607_v5, %v3606_v13  ;;  %v3611_v20 = vor.u32 %v3610_v39, %v3609_v31 }
 0x6d7   : > { %v3564_v27 = vsel %vm3481_vm11, %v3563_v15, %v3562_v12  ;;  %v6870_v44 = vshll.u32 %v6869_v33, 30  ;;  %v3614_v48 = vor.u32 %v3613_v18, %v3612_v1  ;;  %vm6809_vm4 = vcmp.lt.s32.totalorder %v20816_v59, 0 }
 0x6d8   : > { %v3567_v11 = vsel %vm20966_vm1, %v20709_v54, %v3564_v27  ;;  %vm3618_vm3 = vcmp.lt.s32.totalorder %v20974_v30, 4  ;;  %v3591_v42 = vor.u32 8388608, %v3590_v24  ;;  %vm3615_vm5 = vcmp.lt.s32.totalorder %v20974_v30, 1 }
 0x6d9   : > { %15146 = vcosq.f32 %v3567_v11  ;;  %v20994_v45 = vsub.s32 %v6867_v22, %v6870_v44  ;;  %v3624_v49 = vsel %vm3618_vm3, %v3611_v20, 920167782  ;;  %v6911_v21 = vand.u32 2147483647, %v20991_v14 }
 0x6da   : > { %15148 = vsinq.f32 %v3567_v11  ;;  %v3572_v50 = vadd.s32 3, %v3568_v9  ;;  %vm3617_vm2 = vcmp.lt.s32.totalorder %v20974_v30, 3  ;;  %v3623_v28 = vsel %vm3615_vm5, %v3602_v16, %v3605_v38 }
 0x6db   : > { %v6873_v63 = vsub.s32 0, %v20994_v45  ;;  %v21003_v51 = vand.u32 3, %v3568_v9  ;;  %vm21007_vm7 = vcmp.le.f32.partialorder %v6807_v55, 0.7853982  ;;  %v3620_v43 = vsel %vm3618_vm3, %v3608_v3, 2102212464 }
 0x6dc   : > { %v3625_v34 = vsel %vm3617_vm2, %v3608_v3, %v3624_v49  ;;  %v3628_v46 = vsel %vm3618_vm3, %v3614_v48, 1326507024  ;;  %v3599_v56 = vshrl.u32 %v15257_v0, %v3598_v23  ;;  %vm3616_vm6 = vcmp.lt.s32.totalorder %v20974_v30, 2 }
 0x6dd   : > { %v14321_v19 = vmin.u32 %v6873_v63, %v20994_v45  ;;  %v3627_v60 = vsel %vm3615_vm5, %v3605_v38, %v3608_v3  ;;  %v6893_v53 = vsub.s32 4, %v6869_v33  ;;  %v3626_v55 = vsel %vm3616_vm6, %v3623_v28, %v3625_v34 }
 0x6de   : > { %v3629_v2 = vsel %vm3617_vm2, %v3611_v20, %v3628_v46  ;;  %v3631_v36 = vshll.u32 %v3591_v42, 8  ;;  %v3573_v37 = vand.u32 3, %v3572_v50  ;;  %v3619_v41 = vsel %vm3615_vm5, %v3599_v56, %v3602_v16 }
 0x6df   : > { %v6875_v58 = vclz %v14321_v19  ;;  %v3621_v29 = vsel %vm3617_vm2, %v3605_v38, %v3620_v43  ;;  %v3630_v22 = vsel %vm3616_vm6, %v3627_v60, %v3629_v2  ;;  %v6914_v24 = vand.u32 2139095040, %v20991_v14 }
 0x6e0   : > { %v21028_v32 = vmul.u32.u64.low %v3631_v36, %v3626_v55  ;;  %v21029_v12 = vmul.u32.u64.high %v3631_v36, %v3626_v55, %v21028_v32  ;;  %vm10265_vm8 = vcmp.lt.s32.totalorder %v21003_v51, 2  ;;  %vm10266_vm9 = vcmp.eq.s32.totalorder %v21003_v51, 0 }
 0x6e1   : > { %v14322_v23 = vadd.s32 4294967294, %v6875_v58  ;;  %v21035_v9 = vmul.u32.u64.low %v3631_v36, %v3630_v22  ;;  %v21036_v7 = vmul.u32.u64.high %v3631_v36, %v3630_v22, %v21035_v9  ;;  %vm3571_vm10 = vweird.f32 %v20709_v54 }
 0x6e2   : > { %vm10269_vm11 = vcmp.eq.s32.totalorder %v21003_v51, 2  ;;  %v6894_v40 = vsel %vm6809_vm4, %v6893_v53, %v6869_v33  ;;  %v3622_v15 = vsel %vm3616_vm6, %v3619_v41, %v3621_v29  ;;  %v6915_v52 = vshrl.u32 %v6914_v24, 23 }
 0x6e3   : > { %vm3574_vm12 = vcmp.lt.s32.totalorder %v3573_v37, 2  ;;  %vm3575_vm13 = vcmp.eq.s32.totalorder %v3573_v37, 0  ;;  %vm3578_vm14 = vcmp.eq.s32.totalorder %v3573_v37, 2  ;;  %vm14323_vm15 = vcmp.lt.s32.totalorder %v14322_v23, 0  ;;  %v21072_v37 = vpop.f32.mrf.mxu0 }
 0x6e4   : > { %v6863_v62 = vadd.s32 %v20929_v61, %v20936_v57  ;;  %v6878_v26 = vsel %vm14323_vm15, 0, %v14322_v23  ;;  %v3641_v5 = vadd.s32 1, %v21029_v12  ;;  %v14324_v39 = vadd.s32 4294967169, %v6915_v52 }
 0x6e5   : > { %v6879_v27 = vsub.s32 32, %v6878_v26  ;;  %v6883_v13 = vsub.s32 4294967266, %v6878_v26  ;;  %v6896_v33 = vsel %vm21007_vm7, 0, %v6894_v40  ;;  %v3638_v30 = vmul.u32 %v3631_v36, %v3622_v15 }
 0x6e6   : > { %v15147_v18 = vpop.eup %15146  ;;  %v6880_v11 = vshll.u32 %v20994_v45, %v6878_v26  ;;  %vm3640_vm0 = vc.u32 %v21036_v7, %v21028_v32  ;;  %v6921_v44 = vadd.s32 1, %v14324_v39  ;;  %v6900_v60 = vadd.s32 3, %v6896_v33 }
 0x6e7   : > { %v15149_v31 = vpop.eup %15148  ;;  %v3579_v1 = vxor.u32 2147483648, %v15147_v18  ;;  %v6881_v57 = vshrl.u32 %v6863_v62, %v6879_v27  ;;  %v6884_v16 = vadd.s32 127, %v6883_v13  ;;  %v3642_v38 = vsel %vm3640_vm0, %v3641_v5, %v21029_v12 }
 0x6e8   : > { %v3576_v61 = vxor.u32 2147483648, %v15149_v31  ;;  %v3643_v48 = vadd.s32 %v3642_v38, %v3638_v30  ;;  %vm6922_vm1 = vcmp.gt.s32.totalorder %v6921_v44, 0  ;;  %v6918_v55 = vand.u32 8388607, %v6911_v21 }
 0x6e9   : > { %v3580_v3 = vsel %vm3578_vm14, %v3579_v1, %v15149_v31  ;;  %v10271_v20 = vsel %vm10269_vm11, %v3579_v1, %v15149_v31  ;;  %v6882_v49 = vor.u32 %v6881_v57, %v6880_v11  ;;  %v6885_v50 = vshll.u32 %v6884_v16, 23 }
 0x6ea   : > { %v3577_v45 = vsel %vm3575_vm13, %v15147_v18, %v3576_v61  ;;  %v10268_v42 = vsel %vm10266_vm9, %v15147_v18, %v3576_v61  ;;  %v3644_v43 = vadd.s32 536870912, %v3643_v48  ;;  %v6923_v34 = vsel %vm6922_vm1, %v6921_v44, 0 }
 0x6eb   : > { %v3581_v63 = vsel %vm3574_vm12, %v3577_v45, %v3580_v3  ;;  %v10272_v28 = vsel %vm10265_vm8, %v10268_v42, %v10271_v20  ;;  %v6886_v56 = vor.u32 4788187, %v6885_v50  ;;  %v6925_v2 = vand.u32 31, %v6923_v34 }
 0x6ec   : > { %v3582_v46 = vsel %vm3571_vm10, nan, %v3581_v63  ;;  %v10273_v19 = vsel %vm3571_vm10, nan, %v10272_v28  ;;  %v21068_v53 = vshrl.u32 %v3644_v43, 30  ;;  %v6889_v36 = vcvt.s32.f32 %v6882_v49 }
 0x6ed   : > { %7251 = vst [vmem:[%s15815_s20 + $0xe0] sm:$0xff] %v3582_v46  ;;  %13907 = vst [vmem:[%s15815_s20 + $0x2e0] sm:$0xff] %v10273_v19  ;;  %v6887_v51 = vand.u32 2147483647, %v6886_v56  ;;  %v6926_v41 = vsub.s32 32, %v6925_v2  ;;  %v21075_v54 = vand.u32 3, %v6896_v33  ;;  %v3639_v62 = vadd.s32 %v21028_v32, %v21036_v7 }
 0x6ee   : > { %v3646_v58 = vshll.u32 %v21068_v53, 30  ;;  %v21077_v22 = vand.u32 3, %v6900_v60  ;;  %v6919_v24 = vor.u32 8388608, %v6918_v55  ;;  %v3687_v23 = vand.u32 2147483647, %v21072_v37 }
 0x6ef   : > { %v6890_v29 = vmul.f32 %v6889_v36, %v6887_v51  ;;  %v6929_v40 = vshrl.u32 %v15258_v4, %v6926_v41  ;;  %v6932_v15 = vshrl.u32 %v15259_v6, %v6926_v41  ;;  %v6935_v52 = vshrl.u32 %v15260_v8, %v6926_v41 }
 0x6f0   : > { %v21079_v12 = vsub.s32 %v3643_v48, %v3646_v58  ;;  %v6928_v5 = vshll.u32 %v15257_v0, %v6925_v2  ;;  %v3690_v39 = vand.u32 2139095040, %v21072_v37  ;;  %v6931_v27 = vshll.u32 %v15258_v4, %v6925_v2 }
 0x6f1   : > { %v6891_v9 = vxor.u32 2147483648, %v6890_v29  ;;  %v6934_v13 = vshll.u32 %v15259_v6, %v6925_v2  ;;  %v6938_v33 = vshrl.u32 %v15261_v10, %v6926_v41  ;;  %v6924_v7 = vshrl.u32 %v6923_v34, 5 }
 0x6f2   : > { %v3649_v26 = vsub.s32 0, %v21079_v12  ;;  %v6937_v31 = vshll.u32 %v15260_v8, %v6925_v2  ;;  %v6930_v1 = vor.u32 %v6929_v40, %v6928_v5  ;;  %v6933_v11 = vor.u32 %v6932_v15, %v6931_v27 }
 0x6f3   : > { %v6892_v18 = vsel %vm6809_vm4, %v6891_v9, %v6890_v29  ;;  %v6936_v44 = vor.u32 %v6935_v52, %v6934_v13  ;;  %v21100_v16 = vshll.u32 %v6919_v24, 8  ;;  %v3669_v38 = vsub.s32 4, %v21068_v53 }
 0x6f4   : > { %v6895_v30 = vsel %vm21007_vm7, %v20816_v59, %v6892_v18  ;;  %v14197_v32 = vmin.u32 %v3649_v26, %v21079_v12  ;;  %v6939_v57 = vor.u32 %v6938_v33, %v6937_v31  ;;  %v6940_v3 = vshll.u32 %v15261_v10, %v6925_v2 }
 0x6f5   : > { %15150 = vcosq.f32 %v6895_v30  ;;  %v6941_v35 = vshrl.u32 %v15262_v17, %v6926_v41  ;;  %v3691_v20 = vshrl.u32 %v3690_v39, 23  ;;  %v6927_v45 = vshrl.u32 %v15257_v0, %v6926_v41 }
 0x6f6   : > { %15152 = vsinq.f32 %v6895_v30  ;;  %v3651_v61 = vclz %v14197_v32  ;;  %vm6943_vm4 = vcmp.lt.s32.totalorder %v6924_v7, 1  ;;  %vm6946_vm3 = vcmp.lt.s32.totalorder %v6924_v7, 4 }
 0x6f7   : > { %vm3585_vm5 = vcmp.lt.s32.totalorder %v20871_v47, 0  ;;  %v6942_v42 = vor.u32 %v6941_v35, %v6940_v3  ;;  %vm6944_vm2 = vcmp.lt.s32.totalorder %v6924_v7, 2  ;;  %v6948_v49 = vsel %vm6946_vm3, %v6936_v44, 2102212464 }
 0x6f8   : > { %v14198_v48 = vadd.s32 4294967294, %v3651_v61  ;;  %v6951_v50 = vsel %vm6943_vm4, %v6930_v1, %v6933_v11  ;;  %vm6945_vm6 = vcmp.lt.s32.totalorder %v6924_v7, 3  ;;  %v6947_v63 = vsel %vm6943_vm4, %v6927_v45, %v6930_v1 }
 0x6f9   : > { %v6952_v28 = vsel %vm6946_vm3, %v6939_v57, 920167782  ;;  %v6955_v46 = vsel %vm6943_vm4, %v6933_v11, %v6936_v44  ;;  %v6956_v19 = vsel %vm6946_vm3, %v6942_v42, 1326507024  ;;  %v6949_v55 = vsel %vm6945_vm6, %v6933_v11, %v6948_v49 }
 0x6fa   : > { %vm14199_vm7 = vcmp.lt.s32.totalorder %v14198_v48, 0  ;;  %v6953_v34 = vsel %vm6945_vm6, %v6936_v44, %v6952_v28  ;;  %vm21110_vm8 = vcmp.le.f32.partialorder %v3583_v25, 0.7853982  ;;  %v6957_v58 = vsel %vm6945_vm6, %v6939_v57, %v6956_v19 }
 0x6fb   : > { %v3654_v43 = vsel %vm14199_vm7, 0, %v14198_v48  ;;  %v6954_v2 = vsel %vm6944_vm2, %v6951_v50, %v6953_v34  ;;  %vm13561_vm9 = vcmp.lt.s32.totalorder %v21075_v54, 2  ;;  %v6958_v40 = vsel %vm6944_vm2, %v6955_v46, %v6957_v58 }
 0x6fc   : > { %v3655_v56 = vsub.s32 32, %v3654_v43  ;;  %v3659_v60 = vsub.s32 4294967266, %v3654_v43  ;;  %v3656_v36 = vshll.u32 %v21079_v12, %v3654_v43  ;;  %v14200_v15 = vadd.s32 4294967169, %v3691_v20 }
 0x6fd   : > { %v21116_v41 = vmul.u32.u64.low %v21100_v16, %v6954_v2  ;;  %v21117_v29 = vmul.u32.u64.high %v21100_v16, %v6954_v2, %v21116_v41  ;;  %vm6899_vm10 = vweird.f32 %v20816_v59  ;;  %vm13562_vm11 = vcmp.eq.s32.totalorder %v21075_v54, 0 }
 0x6fe   : > { %v3657_v24 = vshrl.u32 %v3639_v62, %v3655_v56  ;;  %v3660_v9 = vadd.s32 127, %v3659_v60  ;;  %vm13565_vm12 = vcmp.eq.s32.totalorder %v21075_v54, 2  ;;  %v6950_v5 = vsel %vm6944_vm2, %v6947_v63, %v6949_v55 }
 0x6ff   : > { %v21126_v25 = vmul.u32.u64.low %v21100_v16, %v6958_v40  ;;  %v21127_v12 = vmul.u32.u64.high %v21100_v16, %v6958_v40, %v21126_v25  ;;  %v3697_v39 = vadd.s32 1, %v14200_v15  ;;  %vm6902_vm13 = vcmp.lt.s32.totalorder %v21077_v22, 2 }
 0x700   : > { %v3658_v52 = vor.u32 %v3657_v24, %v3656_v36  ;;  %v3661_v26 = vshll.u32 %v3660_v9, 23  ;;  %vm6903_vm14 = vcmp.eq.s32.totalorder %v21077_v22, 0  ;;  %vm6906_vm15 = vcmp.eq.s32.totalorder %v21077_v22, 2  ;;  %v21177_v9 = vpop.f32.mrf.mxu1 }
 0x701   : > { %v6969_v62 = vadd.s32 1, %v21117_v29  ;;  %v3670_v13 = vsel %vm3585_vm5, %v3669_v38, %v21068_v53  ;;  %v3694_v33 = vand.u32 8388607, %v3687_v23  ;;  %vm3698_vm0 = vcmp.gt.s32.totalorder %v3697_v39, 0 }
 0x702   : > { %v15151_v18 = vpop.eup %15150  ;;  %v3662_v27 = vor.u32 4788187, %v3661_v26  ;;  %v6966_v7 = vmul.u32 %v21100_v16, %v6950_v5  ;;  %vm6968_vm1 = vc.u32 %v21127_v12, %v21116_v41  ;;  %v3699_v31 = vsel %vm3698_vm0, %v3697_v39, 0 }
 0x703   : > { %v15153_v30 = vpop.eup %15152  ;;  %v6907_v32 = vxor.u32 2147483648, %v15151_v18  ;;  %v3665_v44 = vcvt.s32.f32 %v3658_v52  ;;  %v6970_v61 = vsel %vm6968_vm1, %v6969_v62, %v21117_v29  ;;  %v3701_v3 = vand.u32 31, %v3699_v31 }
 0x704   : > { %v6904_v1 = vxor.u32 2147483648, %v15153_v30  ;;  %v3663_v11 = vand.u32 2147483647, %v3662_v27  ;;  %v6971_v38 = vadd.s32 %v6970_v61, %v6966_v7  ;;  %v3672_v48 = vsel %vm21110_vm8, 0, %v3670_v13 }
 0x705   : > { %v6908_v53 = vsel %vm6906_vm15, %v6907_v32, %v15153_v30  ;;  %v13567_v57 = vsel %vm13565_vm12, %v6907_v32, %v15153_v30  ;;  %v3702_v50 = vsub.s32 32, %v3701_v3  ;;  %v3676_v34 = vadd.s32 3, %v3672_v48 }
 0x706   : > { %v6905_v16 = vsel %vm6903_vm14, %v15151_v18, %v6904_v1  ;;  %v13564_v35 = vsel %vm13562_vm11, %v15151_v18, %v6904_v1  ;;  %v3666_v20 = vmul.f32 %v3665_v44, %v3663_v11  ;;  %v6972_v49 = vadd.s32 536870912, %v6971_v38 }
 0x707   : > { %v6909_v45 = vsel %vm6902_vm13, %v6905_v16, %v6908_v53  ;;  %v13568_v42 = vsel %vm13561_vm9, %v13564_v35, %v13567_v57  ;;  %v3705_v22 = vshrl.u32 %v15258_v4, %v3702_v50  ;;  %v3704_v19 = vshll.u32 %v15257_v0, %v3701_v3 }
 0x708   : > { %v6910_v63 = vsel %vm6899_vm10, nan, %v6909_v45  ;;  %v13569_v28 = vsel %vm6899_vm10, nan, %v13568_v42  ;;  %v3667_v43 = vxor.u32 2147483648, %v3666_v20  ;;  %v21163_v46 = vshrl.u32 %v6972_v49, 30 }
 0x709   : > { %7283 = vst [vmem:[%s15815_s20 + $0x1e0] sm:$0xff] %v6910_v63  ;;  %13939 = vst [vmem:[%s15815_s20 + $0x3e0] sm:$0xff] %v13569_v28  ;;  %v3708_v56 = vshrl.u32 %v15259_v6, %v3702_v50  ;;  %v3711_v60 = vshrl.u32 %v15260_v8, %v3702_v50  ;;  %v3695_v2 = vor.u32 8388608, %v3694_v33  ;;  %v3700_v36 = vshrl.u32 %v3699_v31, 5 }
 0x70a   : > { %v3668_v54 = vsel %vm3585_vm5, %v3667_v43, %v3666_v20  ;;  %v6974_v55 = vshll.u32 %v21163_v46, 30  ;;  %v3706_v58 = vor.u32 %v3705_v22, %v3704_v19  ;;  %v3707_v29 = vshll.u32 %v15258_v4, %v3701_v3 }
 0x70b   : > { %v3671_v59 = vsel %vm21110_vm8, %v20871_v47, %v3668_v54  ;;  %v3710_v24 = vshll.u32 %v15259_v6, %v3701_v3  ;;  %v3713_v15 = vshll.u32 %v15260_v8, %v3701_v3  ;;  %v3714_v51 = vshrl.u32 %v15261_v10, %v3702_v50 }
 0x70c   : > { %15154 = vcosq.f32 %v3671_v59  ;;  %v21179_v40 = vsub.s32 %v6971_v38, %v6974_v55  ;;  %v3709_v25 = vor.u32 %v3708_v56, %v3707_v29  ;;  %v3716_v26 = vshll.u32 %v15261_v10, %v3701_v3 }
 0x70d   : > { %15156 = vsinq.f32 %v3671_v59  ;;  %v3712_v52 = vor.u32 %v3711_v60, %v3710_v24  ;;  %v3717_v5 = vshrl.u32 %v15262_v17, %v3702_v50  ;;  %v3715_v62 = vor.u32 %v3714_v51, %v3713_v15 }
 0x70e   : > { %v6977_v39 = vsub.s32 0, %v21179_v40  ;;  %v7015_v18 = vand.u32 2147483647, %v21177_v9  ;;  %v21187_v27 = vand.u32 3, %v3676_v34  ;;  %v21189_v13 = vand.u32 3, %v3672_v48 }
 0x70f   : > { %v3718_v33 = vor.u32 %v3717_v5, %v3716_v26  ;;  %v21191_v30 = vshll.u32 %v3695_v2, 8  ;;  %v3703_v7 = vshrl.u32 %v15257_v0, %v3702_v50  ;;  %vm3719_vm4 = vcmp.lt.s32.totalorder %v3700_v36, 1 }
 0x710   : > { %v14325_v32 = vmin.u32 %v6977_v39, %v21179_v40  ;;  %vm3722_vm3 = vcmp.lt.s32.totalorder %v3700_v36, 4  ;;  %v3727_v1 = vsel %vm3719_vm4, %v3706_v58, %v3709_v25  ;;  %v7018_v44 = vand.u32 2139095040, %v21177_v9 }
 0x711   : > { %v3724_v31 = vsel %vm3722_vm3, %v3712_v52, 2102212464  ;;  %v3728_v11 = vsel %vm3722_vm3, %v3715_v62, 920167782  ;;  %vm3720_vm5 = vcmp.lt.s32.totalorder %v3700_v36, 2  ;;  %vm3721_vm2 = vcmp.lt.s32.totalorder %v3700_v36, 3 }
 0x712   : > { %v6979_v61 = vclz %v14325_v32  ;;  %v3723_v53 = vsel %vm3719_vm4, %v3703_v7, %v3706_v58  ;;  %vm10369_vm7 = vcmp.eq.s32.totalorder %v21189_v13, 0  ;;  %v3725_v57 = vsel %vm3721_vm2, %v3709_v25, %v3724_v31 }
 0x713   : > { %v3729_v38 = vsel %vm3721_vm2, %v3712_v52, %v3728_v11  ;;  %v3731_v3 = vsel %vm3719_vm4, %v3709_v25, %v3712_v52  ;;  %v3732_v16 = vsel %vm3722_vm3, %v3718_v33, 1326507024  ;;  %vm10368_vm6 = vcmp.lt.s32.totalorder %v21189_v13, 2 }
 0x714   : > { %vm10372_vm8 = vcmp.eq.s32.totalorder %v21189_v13, 2  ;;  %v14326_v35 = vadd.s32 4294967294, %v6979_v61  ;;  %v3730_v20 = vsel %vm3720_vm5, %v3727_v1, %v3729_v38  ;;  %v3733_v48 = vsel %vm3721_vm2, %v3715_v62, %v3732_v16 }
 0x715   : > { %vm3675_vm9 = vweird.f32 %v20871_v47  ;;  %vm6913_vm10 = vcmp.lt.s32.totalorder %v20991_v14, 0  ;;  %v3726_v45 = vsel %vm3720_vm5, %v3723_v53, %v3725_v57  ;;  %v3734_v42 = vsel %vm3720_vm5, %v3731_v3, %v3733_v48 }
 0x716   : > { %v21205_v49 = vmul.u32.u64.low %v21191_v30, %v3730_v20  ;;  %v21206_v50 = vmul.u32.u64.high %v21191_v30, %v3730_v20, %v21205_v49  ;;  %vm14327_vm11 = vcmp.lt.s32.totalorder %v14326_v35, 0  ;;  %v7019_v43 = vshrl.u32 %v7018_v44, 23 }
 0x717   : > { %v21210_v63 = vmul.u32.u64.low %v21191_v30, %v3734_v42  ;;  %v21211_v28 = vmul.u32.u64.high %v21191_v30, %v3734_v42, %v21210_v63  ;;  %vm3678_vm12 = vcmp.lt.s32.totalorder %v21187_v27, 2  ;;  %vm3679_vm13 = vcmp.eq.s32.totalorder %v21187_v27, 0 }
 0x718   : > { %vm3682_vm14 = vcmp.eq.s32.totalorder %v21187_v27, 2  ;;  %v6982_v34 = vsel %vm14327_vm11, 0, %v14326_v35  ;;  %v6967_v54 = vadd.s32 %v21116_v41, %v21127_v12  ;;  %v14328_v60 = vadd.s32 4294967169, %v7019_v43 }
 0x719   : > { %v15155_v22 = vpop.eup %15154  ;;  %v6983_v19 = vsub.s32 32, %v6982_v34  ;;  %v6987_v56 = vsub.s32 4294967266, %v6982_v34  ;;  %v6997_v2 = vsub.s32 4, %v21163_v46  ;;  %v3742_v36 = vmul.u32 %v21191_v30, %v3726_v45  ;;  %v21237_v30 = vpop.f32.mrf.mxu0 }
 0x71a   : > { %v15157_v59 = vpop.eup %15156  ;;  %v3683_v55 = vxor.u32 2147483648, %v15155_v22  ;;  %v3745_v58 = vadd.s32 1, %v21206_v50  ;;  %v6984_v24 = vshll.u32 %v21179_v40, %v6982_v34  ;;  %vm3744_vm15 = vc.u32 %v21211_v28, %v21205_v49 }
 0x71b   : > { %v3680_v29 = vxor.u32 2147483648, %v15157_v59  ;;  %v6985_v15 = vshrl.u32 %v6967_v54, %v6983_v19  ;;  %v6988_v51 = vadd.s32 127, %v6987_v56  ;;  %v7025_v12 = vadd.s32 1, %v14328_v60 }
 0x71c   : > { %v3684_v25 = vsel %vm3682_vm14, %v3683_v55, %v15157_v59  ;;  %v10374_v41 = vsel %vm10372_vm8, %v3683_v55, %v15157_v59  ;;  %v3746_v33 = vsel %vm3744_vm15, %v3745_v58, %v21206_v50  ;;  %v6998_v27 = vsel %vm6913_vm10, %v6997_v2, %v21163_v46 }
 0x71d   : > { %v3681_v52 = vsel %vm3679_vm13, %v15155_v22, %v3680_v29  ;;  %v10371_v40 = vsel %vm10369_vm7, %v15155_v22, %v3680_v29  ;;  %v6986_v26 = vor.u32 %v6985_v15, %v6984_v24  ;;  %v6989_v5 = vshll.u32 %v6988_v51, 23 }
 0x71e   : > { %v3685_v39 = vsel %vm3678_vm12, %v3681_v52, %v3684_v25  ;;  %v10375_v62 = vsel %vm10368_vm6, %v10371_v40, %v10374_v41  ;;  %vm7026_vm0 = vcmp.gt.s32.totalorder %v7025_v12, 0  ;;  %vm21250_vm1 = vcmp.le.f32.partialorder %v6911_v21, 0.7853982 }
 0x71f   : > { %v3686_v32 = vsel %vm3675_vm9, nan, %v3685_v39  ;;  %v10376_v7 = vsel %vm3675_vm9, nan, %v10375_v62  ;;  %v6990_v31 = vor.u32 4788187, %v6989_v5  ;;  %v3747_v1 = vadd.s32 %v3746_v33, %v3742_v36 }
 0x720   : > { %7252 = vst [vmem:[%s15815_s20 + $0xe8] sm:$0xff] %v3686_v32  ;;  %13908 = vst [vmem:[%s15815_s20 + $0x2e8] sm:$0xff] %v10376_v7  ;;  %v7022_v11 = vand.u32 8388607, %v7015_v18  ;;  %v7027_v44 = vsel %vm7026_vm0, %v7025_v12, 0  ;;  %v6993_v61 = vcvt.s32.f32 %v6986_v26  ;;  %v3794_v57 = vand.u32 2139095040, %v21237_v30 }
 0x721   : > { %v6991_v47 = vand.u32 2147483647, %v6990_v31  ;;  %v7029_v53 = vand.u32 31, %v7027_v44  ;;  %v7000_v46 = vsel %vm21250_vm1, 0, %v6998_v27  ;;  %v3748_v38 = vadd.s32 536870912, %v3747_v1 }
 0x722   : > { %v7004_v20 = vadd.s32 3, %v7000_v46  ;;  %v7023_v48 = vor.u32 8388608, %v7022_v11  ;;  %v3795_v45 = vshrl.u32 %v3794_v57, 23  ;;  %v21262_v50 = vshrl.u32 %v7027_v44, 5 }
 0x723   : > { %v6994_v3 = vmul.f32 %v6993_v61, %v6991_v47  ;;  %v7030_v16 = vsub.s32 32, %v7029_v53  ;;  %v21259_v21 = vshrl.u32 %v3748_v38, 30  ;;  %v7032_v59 = vshll.u32 %v15257_v0, %v7029_v53 }
 0x724   : > { %v7035_v55 = vshll.u32 %v15258_v4, %v7029_v53  ;;  %v7038_v2 = vshll.u32 %v15259_v6, %v7029_v53  ;;  %v7041_v36 = vshll.u32 %v15260_v8, %v7029_v53  ;;  %v7044_v58 = vshll.u32 %v15261_v10, %v7029_v53 }
 0x725   : > { %v6995_v35 = vxor.u32 2147483648, %v6994_v3  ;;  %v3750_v42 = vshll.u32 %v21259_v21, 30  ;;  %v7033_v63 = vshrl.u32 %v15258_v4, %v7030_v16  ;;  %v7036_v43 = vshrl.u32 %v15259_v6, %v7030_v16 }
 0x726   : > { %v7039_v22 = vshrl.u32 %v15260_v8, %v7030_v16  ;;  %v7042_v54 = vshrl.u32 %v15261_v10, %v7030_v16  ;;  %v7045_v19 = vshrl.u32 %v15262_v17, %v7030_v16  ;;  %v21282_v12 = vand.u32 3, %v7004_v20 }
 0x727   : > { %v6996_v34 = vsel %vm6913_vm10, %v6995_v35, %v6994_v3  ;;  %v21274_v60 = vsub.s32 %v3747_v1, %v3750_v42  ;;  %v7034_v24 = vor.u32 %v7033_v63, %v7032_v59  ;;  %v7037_v15 = vor.u32 %v7036_v43, %v7035_v55 }
 0x728   : > { %v6999_v56 = vsel %vm21250_vm1, %v20991_v14, %v6996_v34  ;;  %v7040_v51 = vor.u32 %v7039_v22, %v7038_v2  ;;  %v7043_v25 = vor.u32 %v7042_v54, %v7041_v36  ;;  %v7046_v41 = vor.u32 %v7045_v19, %v7044_v58 }
 0x729   : > { %15158 = vcosq.f32 %v6999_v56  ;;  %v3753_v29 = vsub.s32 0, %v21274_v60  ;;  %v21284_v52 = vand.u32 3, %v7000_v46  ;;  %v3791_v26 = vand.u32 2147483647, %v21237_v30 }
 0x72a   : > { %15160 = vsinq.f32 %v6999_v56  ;;  %v7031_v5 = vshrl.u32 %v15257_v0, %v7030_v16  ;;  %vm7047_vm4 = vcmp.lt.s32.totalorder %v21262_v50, 1  ;;  %v21290_v39 = vshll.u32 %v7023_v48, 8 }
 0x72b   : > { %v14201_v40 = vmin.u32 %v3753_v29, %v21274_v60  ;;  %v14204_v62 = vadd.s32 4294967169, %v3795_v45  ;;  %vm7049_vm3 = vcmp.lt.s32.totalorder %v21262_v50, 3  ;;  %vm7050_vm5 = vcmp.lt.s32.totalorder %v21262_v50, 4 }
 0x72c   : > { %v7055_v32 = vsel %vm7047_vm4, %v7034_v24, %v7037_v15  ;;  %v7052_v7 = vsel %vm7050_vm5, %v7040_v51, 2102212464  ;;  %v7056_v31 = vsel %vm7050_vm5, %v7043_v25, 920167782  ;;  %v7059_v27 = vsel %vm7047_vm4, %v7037_v15, %v7040_v51 }
 0x72d   : > { %v3755_v33 = vclz %v14201_v40  ;;  %v7060_v13 = vsel %vm7050_vm5, %v7046_v41, 1326507024  ;;  %vm13668_vm2 = vcmp.eq.s32.totalorder %v21284_v52, 2  ;;  %vm7048_vm7 = vcmp.lt.s32.totalorder %v21262_v50, 2 }
 0x72e   : > { %v7057_v11 = vsel %vm7049_vm3, %v7040_v51, %v7056_v31  ;;  %v7061_v44 = vsel %vm7049_vm3, %v7043_v25, %v7060_v13  ;;  %vm13665_vm6 = vcmp.eq.s32.totalorder %v21284_v52, 0  ;;  %v7051_v47 = vsel %vm7047_vm4, %v7031_v5, %v7034_v24 }
 0x72f   : > { %v14202_v1 = vadd.s32 4294967294, %v3755_v33  ;;  %v7058_v61 = vsel %vm7048_vm7, %v7055_v32, %v7057_v11  ;;  %v7062_v53 = vsel %vm7048_vm7, %v7059_v27, %v7061_v44  ;;  %v3801_v57 = vadd.s32 1, %v14204_v62 }
 0x730   : > { %vm13664_vm8 = vcmp.lt.s32.totalorder %v21284_v52, 2  ;;  %vm3689_vm9 = vcmp.lt.s32.totalorder %v21072_v37, 0  ;;  %v7053_v46 = vsel %vm7049_vm3, %v7037_v15, %v7052_v7  ;;  %vm7003_vm11 = vweird.f32 %v20991_v14 }
 0x731   : > { %vm14203_vm10 = vcmp.lt.s32.totalorder %v14202_v1, 0  ;;  %v21316_v38 = vmul.u32.u64.low %v21290_v39, %v7062_v53  ;;  %v21317_v3 = vmul.u32.u64.high %v21290_v39, %v7062_v53, %v21316_v38  ;;  %vm3802_vm12 = vcmp.gt.s32.totalorder %v3801_v57, 0 }
 0x732   : > { %v3758_v16 = vsel %vm14203_vm10, 0, %v14202_v1  ;;  %v21321_v35 = vmul.u32.u64.low %v21290_v39, %v7058_v61  ;;  %v21322_v20 = vmul.u32.u64.high %v21290_v39, %v7058_v61, %v21321_v35  ;;  %v3743_v48 = vadd.s32 %v21205_v49, %v21211_v28 }
 0x733   : > { %v3759_v45 = vsub.s32 32, %v3758_v16  ;;  %v3763_v42 = vsub.s32 4294967266, %v3758_v16  ;;  %v3803_v63 = vsel %vm3802_vm12, %v3801_v57, 0  ;;  %vm7006_vm13 = vcmp.lt.s32.totalorder %v21282_v12, 2 }
 0x734   : > { %vm7007_vm14 = vcmp.eq.s32.totalorder %v21282_v12, 0  ;;  %v7054_v43 = vsel %vm7048_vm7, %v7051_v47, %v7053_v46  ;;  %v3805_v34 = vand.u32 31, %v3803_v63  ;;  %v3760_v54 = vshll.u32 %v21274_v60, %v3758_v16 }
 0x735   : > { %v3761_v19 = vshrl.u32 %v3743_v48, %v3759_v45  ;;  %v3764_v56 = vadd.s32 127, %v3763_v42  ;;  %vm7072_vm15 = vc.u32 %v21317_v3, %v21321_v35  ;;  %vm7010_vm0 = vcmp.eq.s32.totalorder %v21282_v12, 2 }
 0x736   : > { %v15159_v22 = vpop.eup %15158  ;;  %v3773_v59 = vsub.s32 4, %v21259_v21  ;;  %v7073_v55 = vadd.s32 1, %v21322_v20  ;;  %vm21339_vm1 = vcmp.le.f32.partialorder %v3687_v23, 0.7853982  ;;  %v7070_v58 = vmul.u32 %v21290_v39, %v7054_v43 }
 0x737   : > { %v15161_v49 = vpop.eup %15160  ;;  %v7011_v28 = vxor.u32 2147483648, %v15159_v22  ;;  %v3762_v60 = vor.u32 %v3761_v19, %v3760_v54  ;;  %v3765_v36 = vshll.u32 %v3764_v56, 23  ;;  %v3806_v51 = vsub.s32 32, %v3805_v34 }
 0x738   : > { %v7008_v2 = vxor.u32 2147483648, %v15161_v49  ;;  %v7074_v15 = vsel %vm7072_vm15, %v7073_v55, %v21322_v20  ;;  %v3798_v40 = vand.u32 8388607, %v3791_v26  ;;  %v3774_v62 = vsel %vm3689_vm9, %v3773_v59, %v21259_v21 }
 0x739   : > { %v7012_v29 = vsel %vm7010_vm0, %v7011_v28, %v15161_v49  ;;  %v13670_v24 = vsel %vm13668_vm2, %v7011_v28, %v15161_v49  ;;  %v3766_v41 = vor.u32 4788187, %v3765_v36  ;;  %v7075_v33 = vadd.s32 %v7074_v15, %v7070_v58 }
 0x73a   : > { %v7009_v25 = vsel %vm7007_vm14, %v15159_v22, %v7008_v2  ;;  %v13667_v23 = vsel %vm13665_vm6, %v15159_v22, %v7008_v2  ;;  %v3769_v27 = vcvt.s32.f32 %v3762_v60  ;;  %v21366_v13 = vshrl.u32 %v3803_v63, 5 }
 0x73b   : > { %v7013_v5 = vsel %vm7006_vm13, %v7009_v25, %v7012_v29  ;;  %v13671_v39 = vsel %vm13664_vm8, %v13667_v23, %v13670_v24  ;;  %v3767_v31 = vand.u32 2147483647, %v3766_v41  ;;  %v7076_v12 = vadd.s32 536870912, %v7075_v33  ;;  %v21403_v24 = vpop.f32.mrf.mxu1 }
 0x73c   : > { %v7014_v32 = vsel %vm7003_vm11, nan, %v7013_v5  ;;  %v13672_v7 = vsel %vm7003_vm11, nan, %v13671_v39  ;;  %v3809_v52 = vshrl.u32 %v15258_v4, %v3806_v51  ;;  %v3812_v1 = vshrl.u32 %v15259_v6, %v3806_v51 }
 0x73d   : > { %7284 = vst [vmem:[%s15815_s20 + $0x1e8] sm:$0xff] %v7014_v32  ;;  %13940 = vst [vmem:[%s15815_s20 + $0x3e8] sm:$0xff] %v13672_v7  ;;  %v3770_v11 = vmul.f32 %v3769_v27, %v3767_v31  ;;  %v3815_v21 = vshrl.u32 %v15260_v8, %v3806_v51  ;;  %v3817_v44 = vshll.u32 %v15260_v8, %v3805_v34  ;;  %v21373_v14 = vshrl.u32 %v7076_v12, 30 }
 0x73e   : > { %v3818_v47 = vshrl.u32 %v15261_v10, %v3806_v51  ;;  %v3808_v61 = vshll.u32 %v15257_v0, %v3805_v34  ;;  %v3811_v53 = vshll.u32 %v15258_v4, %v3805_v34  ;;  %v3821_v57 = vshrl.u32 %v15262_v17, %v3806_v51 }
 0x73f   : > { %v3771_v46 = vxor.u32 2147483648, %v3770_v11  ;;  %v3814_v38 = vshll.u32 %v15259_v6, %v3805_v34  ;;  %v3820_v20 = vshll.u32 %v15261_v10, %v3805_v34  ;;  %v3776_v48 = vsel %vm21339_vm1, 0, %v3774_v62 }
 0x740   : > { %v3819_v16 = vor.u32 %v3818_v47, %v3817_v44  ;;  %v7078_v45 = vshll.u32 %v21373_v14, 30  ;;  %v3810_v42 = vor.u32 %v3809_v52, %v3808_v61  ;;  %v3813_v63 = vor.u32 %v3812_v1, %v3811_v53 }
 0x741   : > { %v3772_v43 = vsel %vm3689_vm9, %v3771_v46, %v3770_v11  ;;  %v3816_v22 = vor.u32 %v3815_v21, %v3814_v38  ;;  %v3822_v54 = vor.u32 %v3821_v57, %v3820_v20  ;;  %v3799_v49 = vor.u32 8388608, %v3798_v40 }
 0x742   : > { %v3775_v19 = vsel %vm21339_vm1, %v21072_v37, %v3772_v43  ;;  %v21388_v56 = vsub.s32 %v7075_v33, %v7078_v45  ;;  %vm3826_vm4 = vcmp.lt.s32.totalorder %v21366_v13, 4  ;;  %v3780_v34 = vadd.s32 3, %v3776_v48 }
 0x743   : > { %15162 = vcosq.f32 %v3775_v19  ;;  %vm3823_vm3 = vcmp.lt.s32.totalorder %v21366_v13, 1  ;;  %v3832_v28 = vsel %vm3826_vm4, %v3819_v16, 920167782  ;;  %vm3825_vm5 = vcmp.lt.s32.totalorder %v21366_v13, 3 }
 0x744   : > { %15164 = vsinq.f32 %v3775_v19  ;;  %v7081_v59 = vsub.s32 0, %v21388_v56  ;;  %v3831_v55 = vsel %vm3823_vm3, %v3810_v42, %v3813_v63  ;;  %v3828_v2 = vsel %vm3826_vm4, %v3816_v22, 2102212464 }
 0x745   : > { %v3833_v50 = vsel %vm3825_vm5, %v3816_v22, %v3832_v28  ;;  %v3836_v60 = vsel %vm3826_vm4, %v3822_v54, 1326507024  ;;  %v3807_v58 = vshrl.u32 %v15257_v0, %v3806_v51  ;;  %vm3824_vm2 = vcmp.lt.s32.totalorder %v21366_v13, 2 }
 0x746   : > { %v14329_v36 = vmin.u32 %v7081_v59, %v21388_v56  ;;  %v3835_v29 = vsel %vm3823_vm3, %v3813_v63, %v3816_v22  ;;  %v10470_v15 = vand.u32 3, %v3776_v48  ;;  %v3834_v25 = vsel %vm3824_vm2, %v3831_v55, %v3833_v50 }
 0x747   : > { %v3837_v23 = vsel %vm3825_vm5, %v3819_v16, %v3836_v60  ;;  %v3839_v41 = vshll.u32 %v3799_v49, 8  ;;  %v3781_v40 = vand.u32 3, %v3780_v34  ;;  %v3827_v51 = vsel %vm3823_vm3, %v3807_v58, %v3810_v42 }
 0x748   : > { %v7083_v5 = vclz %v14329_v36  ;;  %v3829_v39 = vsel %vm3825_vm5, %v3813_v63, %v3828_v2  ;;  %v3838_v62 = vsel %vm3824_vm2, %v3835_v29, %v3837_v23  ;;  %v7122_v7 = vand.u32 2139095040, %v21403_v24 }
 0x749   : > { %v21415_v33 = vmul.u32.u64.low %v3839_v41, %v3834_v25  ;;  %v21416_v32 = vmul.u32.u64.high %v3839_v41, %v3834_v25, %v21415_v33  ;;  %v21420_v27 = vmul.u32.u64.low %v3839_v41, %v3838_v62  ;;  %v21421_v12 = vmul.u32.u64.high %v3839_v41, %v3838_v62, %v21420_v27 }
 0x74a   : > { %v14330_v31 = vadd.s32 4294967294, %v7083_v5  ;;  %vm7017_vm7 = vcmp.lt.s32.totalorder %v21177_v9, 0  ;;  %v7119_v52 = vand.u32 2147483647, %v21403_v24  ;;  %v7123_v1 = vshrl.u32 %v7122_v7, 23 }
 0x74b   : > { %vm10471_vm6 = vcmp.lt.s32.totalorder %v10470_v15, 2  ;;  %vm10472_vm8 = vcmp.eq.s32.totalorder %v10470_v15, 0  ;;  %vm10475_vm9 = vcmp.eq.s32.totalorder %v10470_v15, 2  ;;  %v3830_v11 = vsel %vm3824_vm2, %v3827_v51, %v3829_v39 }
 0x74c   : > { %vm14331_vm10 = vcmp.lt.s32.totalorder %v14330_v31, 0  ;;  %vm3779_vm11 = vweird.f32 %v21072_v37  ;;  %vm3782_vm12 = vcmp.lt.s32.totalorder %v3781_v40, 2  ;;  %v3849_v44 = vadd.s32 1, %v21416_v32 }
 0x74d   : > { %v7086_v21 = vsel %vm14331_vm10, 0, %v14330_v31  ;;  %v14332_v47 = vadd.s32 4294967169, %v7123_v1  ;;  %vm3783_vm13 = vcmp.eq.s32.totalorder %v3781_v40, 0  ;;  %v7071_v61 = vadd.s32 %v21321_v35, %v21317_v3 }
 0x74e   : > { %v7087_v53 = vsub.s32 32, %v7086_v21  ;;  %v7091_v57 = vsub.s32 4294967266, %v7086_v21  ;;  %v7101_v46 = vsub.s32 4, %v21373_v14  ;;  %v3846_v38 = vmul.u32 %v3839_v41, %v3830_v11 }
 0x74f   : > { %vm3848_vm14 = vc.u32 %v21421_v12, %v21415_v33  ;;  %v7129_v13 = vadd.s32 1, %v14332_v47  ;;  %v7088_v20 = vshll.u32 %v21388_v56, %v7086_v21  ;;  %vm3786_vm15 = vcmp.eq.s32.totalorder %v3781_v40, 2 }
 0x750   : > { %v15163_v16 = vpop.eup %15162  ;;  %v7089_v48 = vshrl.u32 %v7071_v61, %v7087_v53  ;;  %v7092_v45 = vadd.s32 127, %v7091_v57  ;;  %v3850_v42 = vsel %vm3848_vm14, %v3849_v44, %v21416_v32  ;;  %v7102_v56 = vsel %vm7017_vm7, %v7101_v46, %v21373_v14 }
 0x751   : > { %v15165_v63 = vpop.eup %15164  ;;  %v3787_v43 = vxor.u32 2147483648, %v15163_v16  ;;  %v3851_v3 = vadd.s32 %v3850_v42, %v3846_v38  ;;  %vm7130_vm0 = vcmp.gt.s32.totalorder %v7129_v13, 0  ;;  %v7126_v50 = vand.u32 8388607, %v7119_v52 }
 0x752   : > { %v3784_v35 = vxor.u32 2147483648, %v15165_v63  ;;  %v7090_v22 = vor.u32 %v7089_v48, %v7088_v20  ;;  %v7093_v54 = vshll.u32 %v7092_v45, 23  ;;  %v7131_v19 = vsel %vm7130_vm0, %v7129_v13, 0 }
 0x753   : > { %v3788_v49 = vsel %vm3786_vm15, %v3787_v43, %v15165_v63  ;;  %v10477_v34 = vsel %vm10475_vm9, %v3787_v43, %v15165_v63  ;;  %v3852_v28 = vadd.s32 536870912, %v3851_v3  ;;  %v7133_v29 = vand.u32 31, %v7131_v19 }
 0x754   : > { %v3785_v59 = vsel %vm3783_vm13, %v15163_v16, %v3784_v35  ;;  %v10474_v55 = vsel %vm10472_vm8, %v15163_v16, %v3784_v35  ;;  %v7094_v2 = vor.u32 4788187, %v7093_v54  ;;  %v7097_v41 = vcvt.s32.f32 %v7090_v22 }
 0x755   : > { %v3789_v60 = vsel %vm3782_vm12, %v3785_v59, %v3788_v49  ;;  %v10478_v36 = vsel %vm10471_vm6, %v10474_v55, %v10477_v34  ;;  %v21446_v58 = vshrl.u32 %v3852_v28, 30  ;;  %v7134_v51 = vsub.s32 32, %v7133_v29 }
 0x756   : > { %v3790_v25 = vsel %vm3779_vm11, nan, %v3789_v60  ;;  %v10479_v14 = vsel %vm3779_vm11, nan, %v10478_v36  ;;  %v7095_v23 = vand.u32 2147483647, %v7094_v2  ;;  %vm21457_vm1 = vcmp.le.f32.partialorder %v7015_v18, 0.7853982 }
 0x757   : > { %7253 = vst [vmem:[%s15815_s20 + $0xf0] sm:$0xff] %v3790_v25  ;;  %13909 = vst [vmem:[%s15815_s20 + $0x2f0] sm:$0xff] %v10479_v14  ;;  %v3854_v5 = vshll.u32 %v21446_v58, 30  ;;  %v7104_v39 = vsel %vm21457_vm1, 0, %v7102_v56  ;;  %v7137_v37 = vshrl.u32 %v15258_v4, %v7134_v51  ;;  %v7127_v7 = vor.u32 8388608, %v7126_v50 }
 0x758   : > { %v7098_v40 = vmul.f32 %v7097_v41, %v7095_v23  ;;  %v7140_v31 = vshrl.u32 %v15259_v6, %v7134_v51  ;;  %v7143_v27 = vshrl.u32 %v15260_v8, %v7134_v51  ;;  %v7132_v11 = vshrl.u32 %v7131_v19, 5 }
 0x759   : > { %v3855_v62 = vsub.s32 %v3851_v3, %v3854_v5  ;;  %v7136_v18 = vshll.u32 %v15257_v0, %v7133_v29  ;;  %v7139_v21 = vshll.u32 %v15258_v4, %v7133_v29  ;;  %v7142_v47 = vshll.u32 %v15259_v6, %v7133_v29 }
 0x75a   : > { %v7099_v32 = vxor.u32 2147483648, %v7098_v40  ;;  %v7145_v61 = vshll.u32 %v15260_v8, %v7133_v29  ;;  %v7146_v53 = vshrl.u32 %v15261_v10, %v7134_v51  ;;  %v7108_v46 = vadd.s32 3, %v7104_v39 }
 0x75b   : > { %v3857_v1 = vsub.s32 0, %v3855_v62  ;;  %v7138_v13 = vor.u32 %v7137_v37, %v7136_v18  ;;  %v7141_v16 = vor.u32 %v7140_v31, %v7139_v21  ;;  %v7144_v20 = vor.u32 %v7143_v27, %v7142_v47 }
 0x75c   : > { %v7100_v44 = vsel %vm7017_vm7, %v7099_v32, %v7098_v40  ;;  %v7147_v4 = vor.u32 %v7146_v53, %v7145_v61  ;;  %v21476_v48 = vand.u32 3, %v7104_v39  ;;  %v3847_v6 = vadd.s32 %v21415_v33, %v21421_v12 }
 0x75d   : > { %v7103_v57 = vsel %vm21457_vm1, %v21177_v9, %v7100_v44  ;;  %v14205_v38 = vmin.u32 %v3857_v1, %v3855_v62  ;;  %v7148_v45 = vshll.u32 %v15261_v10, %v7133_v29  ;;  %v7149_v42 = vshrl.u32 %v15262_v17, %v7134_v51 }
 0x75e   : > { %15166 = vcosq.f32 %v7103_v57  ;;  %vm7151_vm4 = vcmp.lt.s32.totalorder %v7132_v11, 1  ;;  %v7167_v63 = vshll.u32 %v7127_v7, 8  ;;  %v7135_v3 = vshrl.u32 %v15257_v0, %v7134_v51 }
 0x75f   : > { %15168 = vsinq.f32 %v7103_v57  ;;  %v3859_v8 = vclz %v14205_v38  ;;  %vm7153_vm3 = vcmp.lt.s32.totalorder %v7132_v11, 3  ;;  %vm7154_vm5 = vcmp.lt.s32.totalorder %v7132_v11, 4 }
 0x760   : > { %v7150_v35 = vor.u32 %v7149_v42, %v7148_v45  ;;  %v7156_v22 = vsel %vm7154_vm5, %v7144_v20, 2102212464  ;;  %v7159_v54 = vsel %vm7151_vm4, %v7138_v13, %v7141_v16  ;;  %v7160_v19 = vsel %vm7154_vm5, %v7147_v4, 920167782 }
 0x761   : > { %v14206_v43 = vadd.s32 4294967294, %v3859_v8  ;;  %vm7152_vm7 = vcmp.lt.s32.totalorder %v7132_v11, 2  ;;  %v7161_v33 = vsel %vm7153_vm3, %v7144_v20, %v7160_v19  ;;  %v7163_v12 = vsel %vm7151_vm4, %v7141_v16, %v7144_v20 }
 0x762   : > { %v7155_v10 = vsel %vm7151_vm4, %v7135_v3, %v7138_v13  ;;  %v7162_v17 = vsel %vm7152_vm7, %v7159_v54, %v7161_v33  ;;  %v7164_v34 = vsel %vm7154_vm5, %v7150_v35, 1326507024  ;;  %v7157_v0 = vsel %vm7153_vm3, %v7141_v16, %v7156_v22 }
 0x763   : > { %vm14207_vm2 = vcmp.lt.s32.totalorder %v14206_v43, 0  ;;  %v7165_v59 = vsel %vm7153_vm3, %v7147_v4, %v7164_v34  ;;  %v21488_v50 = vmul.u32.u64.low %v7167_v63, %v7162_v17  ;;  %v21489_v60 = vmul.u32.u64.high %v7167_v63, %v7162_v17, %v21488_v50 }
 0x764   : > { %v3862_v49 = vsel %vm14207_vm2, 0, %v14206_v43  ;;  %v7166_v2 = vsel %vm7152_vm7, %v7163_v12, %v7165_v59  ;;  %v7109_v23 = vand.u32 3, %v7108_v46  ;;  %v7158_v41 = vsel %vm7152_vm7, %v7155_v10, %v7157_v0 }
 0x765   : > { %v3863_v56 = vsub.s32 32, %v3862_v49  ;;  %v3867_v28 = vsub.s32 4294967266, %v3862_v49  ;;  %v3864_v55 = vshll.u32 %v3855_v62, %v3862_v49  ;;  %vm13767_vm6 = vcmp.lt.s32.totalorder %v21476_v48, 2 }
 0x766   : > { %v21492_v25 = vmul.u32.u64.low %v7167_v63, %v7166_v2  ;;  %v21493_v14 = vmul.u32.u64.high %v7167_v63, %v7166_v2, %v21492_v25  ;;  %v7177_v15 = vadd.s32 1, %v21489_v60  ;;  %vm13768_vm8 = vcmp.eq.s32.totalorder %v21476_v48, 0 }
 0x767   : > { %v3865_v36 = vshrl.u32 %v3847_v6, %v3863_v56  ;;  %v3868_v29 = vadd.s32 127, %v3867_v28  ;;  %v7174_v62 = vmul.u32 %v7167_v63, %v7158_v41  ;;  %vm7114_vm10 = vcmp.eq.s32.totalorder %v7109_v23, 2 }
 0x768   : > { %vm7176_vm9 = vc.u32 %v21493_v14, %v21488_v50  ;;  %vm13771_vm11 = vcmp.eq.s32.totalorder %v21476_v48, 2  ;;  %vm7110_vm12 = vcmp.lt.s32.totalorder %v7109_v23, 2  ;;  %vm7111_vm13 = vcmp.eq.s32.totalorder %v7109_v23, 0 }
 0x769   : > { %v3866_v5 = vor.u32 %v3865_v36, %v3864_v55  ;;  %v3869_v51 = vshll.u32 %v3868_v29, 23  ;;  %v7178_v7 = vsel %vm7176_vm9, %v7177_v15, %v21489_v60  ;;  %vm7107_vm14 = vweird.f32 %v21177_v9 }
 0x76a   : > { %v7179_v11 = vadd.s32 %v7178_v7, %v7174_v62  ;;  %vm3793_vm15 = vcmp.lt.s32.totalorder %v21237_v30, 0  ;;  %v3877_v4 = vsub.s32 4, %v21446_v58  ;;  %vm3792_vm0 = vcmp.le.f32.partialorder %v3791_v26, 0.7853982 }
 0x76b   : > { %v15167_v40 = vpop.eup %15166  ;;  %v3870_v39 = vor.u32 4788187, %v3869_v51  ;;  %v3873_v1 = vcvt.s32.f32 %v3866_v5  ;;  %v7175_v33 = vadd.s32 %v21488_v50, %v21493_v14  ;;  %vm7121_vm9 = vcmp.lt.s32.totalorder %v21403_v24, 0 }
 0x76c   : > { %v15169_v37 = vpop.eup %15168  ;;  %v7115_v32 = vxor.u32 2147483648, %v15167_v40  ;;  %v7180_v53 = vadd.s32 536870912, %v7179_v11  ;;  %v3878_v45 = vsel %vm3793_vm15, %v3877_v4, %v21446_v58 }
 0x76d   : > { %v7112_v31 = vxor.u32 2147483648, %v15169_v37  ;;  %v3871_v27 = vand.u32 2147483647, %v3870_v39  ;;  %v3880_v63 = vsel %vm3792_vm0, 0, %v3878_v45 }
 0x76e   : > { %v7116_v18 = vsel %vm7114_vm10, %v7115_v32, %v15169_v37  ;;  %v13773_v21 = vsel %vm13771_vm11, %v7115_v32, %v15169_v37  ;;  %v21508_v20 = vshrl.u32 %v7180_v53, 30  ;;  %v3884_v35 = vadd.s32 3, %v3880_v63 }
 0x76f   : > { %v7113_v44 = vsel %vm7111_vm13, %v15167_v40, %v7112_v31  ;;  %v13770_v47 = vsel %vm13768_vm8, %v15167_v40, %v7112_v31  ;;  %v3874_v61 = vmul.f32 %v3873_v1, %v3871_v27  ;;  %v10573_v54 = vand.u32 3, %v3880_v63 }
 0x770   : > { %v7117_v57 = vsel %vm7110_vm12, %v7113_v44, %v7116_v18  ;;  %v13774_v46 = vsel %vm13767_vm6, %v13770_v47, %v13773_v21  ;;  %v7182_v9 = vshll.u32 %v21508_v20, 30  ;;  %v3885_v19 = vand.u32 3, %v3884_v35 }
 0x771   : > { %v7118_v38 = vsel %vm7107_vm14, nan, %v7117_v57  ;;  %v13775_v13 = vsel %vm7107_vm14, nan, %v13774_v46  ;;  %v3875_v16 = vxor.u32 2147483648, %v3874_v61  ;;  %vm10575_vm4 = vcmp.eq.s32.totalorder %v10573_v54, 0 }
 0x772   : > { %7285 = vst [vmem:[%s15815_s20 + $0x1f0] sm:$0xff] %v7118_v38  ;;  %13941 = vst [vmem:[%s15815_s20 + $0x3f0] sm:$0xff] %v13775_v13  ;;  %v7183_v8 = vsub.s32 %v7179_v11, %v7182_v9  ;;  %vm3887_vm3 = vcmp.eq.s32.totalorder %v3885_v19, 0  ;;  %vm3890_vm5 = vcmp.eq.s32.totalorder %v3885_v19, 2  ;;  %vm10578_vm2 = vcmp.eq.s32.totalorder %v10573_v54, 2 }
 0x773   : > { %v3876_v6 = vsel %vm3793_vm15, %v3875_v16, %v3874_v61  ;;  %vm3886_vm7 = vcmp.lt.s32.totalorder %v3885_v19, 2  ;;  %vm10574_vm6 = vcmp.lt.s32.totalorder %v10573_v54, 2  ;;  %vm3883_vm8 = vweird.f32 %v21237_v30 }
 0x774   : > { %v3879_v48 = vsel %vm3792_vm0, %v21237_v30, %v3876_v6  ;;  %v7185_v42 = vsub.s32 0, %v7183_v8  ;;  %v7205_v39 = vsub.s32 4, %v21508_v20  ;;  %vm7120_vm10 = vcmp.le.f32.partialorder %v7119_v52, 0.7853982 }
 0x775   : > { %15170 = vcosq.f32 %v3879_v48 }
 0x776   : > { %15172 = vsinq.f32 %v3879_v48  ;;  %v14333_v43 = vmin.u32 %v7185_v42, %v7183_v8  ;;  %v7206_v37 = vsel %vm7121_vm9, %v7205_v39, %v21508_v20 }
 0x777   : > { %v7208_v32 = vsel %vm7120_vm10, 0, %v7206_v37 }
 0x778   : > { %v7187_v3 = vclz %v14333_v43  ;;  %v7212_v7 = vadd.s32 3, %v7208_v32  ;;  %v13869_v27 = vand.u32 3, %v7208_v32 }
 0x77a   : > { %v14334_v22 = vadd.s32 4294967294, %v7187_v3  ;;  %v7213_v31 = vand.u32 3, %v7212_v7  ;;  %vm13874_vm12 = vcmp.eq.s32.totalorder %v13869_v27, 2  ;;  %vm13871_vm14 = vcmp.eq.s32.totalorder %v13869_v27, 0 }
 0x77b   : > { %vm13870_vm0 = vcmp.lt.s32.totalorder %v13869_v27, 2 }
 0x77c   : > { %vm14335_vm1 = vcmp.lt.s32.totalorder %v14334_v22, 0  ;;  %vm7218_vm11 = vcmp.eq.s32.totalorder %v7213_v31, 2  ;;  %vm7215_vm13 = vcmp.eq.s32.totalorder %v7213_v31, 0  ;;  %vm7214_vm15 = vcmp.lt.s32.totalorder %v7213_v31, 2 }
 0x77d   : > { %v7190_v26 = vsel %vm14335_vm1, 0, %v14334_v22  ;;  %vm7211_vm1 = vweird.f32 %v21403_v24 }
 0x77e   : > { %v7191_v12 = vsub.s32 32, %v7190_v26  ;;  %v7195_v49 = vsub.s32 4294967266, %v7190_v26  ;;  %v7192_v34 = vshll.u32 %v7183_v8, %v7190_v26 }
 0x780   : > { %v7193_v56 = vshrl.u32 %v7175_v33, %v7191_v12  ;;  %v7196_v28 = vadd.s32 127, %v7195_v49 }
 0x782   : > { %v15171_v10 = vpop.eup %15170  ;;  %v7194_v2 = vor.u32 %v7193_v56, %v7192_v34  ;;  %v7197_v60 = vshll.u32 %v7196_v28, 23 }
 0x783   : > { %v15173_v17 = vpop.eup %15172  ;;  %v3891_v58 = vxor.u32 2147483648, %v15171_v10 }
 0x784   : > { %v3888_v0 = vxor.u32 2147483648, %v15173_v17  ;;  %v7198_v14 = vor.u32 4788187, %v7197_v60  ;;  %v7201_v51 = vcvt.s32.f32 %v7194_v2 }
 0x785   : > { %v3892_v59 = vsel %vm3890_vm5, %v3891_v58, %v15173_v17  ;;  %v10580_v55 = vsel %vm10578_vm2, %v3891_v58, %v15173_v17 }
 0x786   : > { %v3889_v50 = vsel %vm3887_vm3, %v15171_v10, %v3888_v0  ;;  %v10577_v36 = vsel %vm10575_vm4, %v15171_v10, %v3888_v0  ;;  %v7199_v5 = vand.u32 2147483647, %v7198_v14 }
 0x787   : > { %v3893_v29 = vsel %vm3886_vm7, %v3889_v50, %v3892_v59  ;;  %v10581_v25 = vsel %vm10574_vm6, %v10577_v36, %v10580_v55 }
 0x788   : > { %v3894_v23 = vsel %vm3883_vm8, nan, %v3893_v29  ;;  %v10582_v41 = vsel %vm3883_vm8, nan, %v10581_v25  ;;  %v7202_v15 = vmul.f32 %v7201_v51, %v7199_v5 }
 0x789   : > { %7254 = vst [vmem:[%s15815_s20 + $0xf8] sm:$0xff] %v3894_v23  ;;  %13910 = vst [vmem:[%s15815_s20 + $0x2f8] sm:$0xff] %v10582_v41 }
 0x78a   : > { %v7203_v40 = vxor.u32 2147483648, %v7202_v15 }
 0x78c   : > { %v7204_v30 = vsel %vm7121_vm9, %v7203_v40, %v7202_v15 }
 0x78d   : > { %v7207_v62 = vsel %vm7120_vm10, %v21403_v24, %v7204_v30 }
 0x78e   : > { %15174 = vcosq.f32 %v7207_v62 }
 0x78f   : > { %15176 = vsinq.f32 %v7207_v62 }
 0x79b   : > { %v15175_v1 = vpop.eup %15174 }
 0x79c   : > { %v15177_v11 = vpop.eup %15176  ;;  %v7219_v18 = vxor.u32 2147483648, %v15175_v1 }
 0x79d   : > { %v7216_v21 = vxor.u32 2147483648, %v15177_v11 }
 0x79e   : > { %v7220_v52 = vsel %vm7218_vm11, %v7219_v18, %v15177_v11  ;;  %v13876_v44 = vsel %vm13874_vm12, %v7219_v18, %v15177_v11 }
 0x79f   : > { %v7217_v47 = vsel %vm7215_vm13, %v15175_v1, %v7216_v21  ;;  %v13873_v61 = vsel %vm13871_vm14, %v15175_v1, %v7216_v21 }
 0x7a0   : > { %v7221_v53 = vsel %vm7214_vm15, %v7217_v47, %v7220_v52  ;;  %v13877_v57 = vsel %vm13870_vm0, %v13873_v61, %v13876_v44 }
 0x7a1   : > { %v7222_v46 = vsel %vm7211_vm1, nan, %v7221_v53  ;;  %v13878_v38 = vsel %vm7211_vm1, nan, %v13877_v57 }
 0x7a2   : > { %7286 = vst [vmem:[%s15815_s20 + $0x1f8] sm:$0xff] %v7222_v46  ;;  %13942 = vst [vmem:[%s15815_s20 + $0x3f8] sm:$0xff] %v13878_v38 }
 0x7a3   : > { %15191 = shalt.err (!%p15188_p5)
}
 0x7a4   : > { %s15192_s4 = scalar_lea.hbm %s21536_s12, 16384  ;;  %s15196_s7 = scalar_lea.hbm %s21592_s2, 32768 }
 0x7a5   : > { %p15193_p6 = scmp.ne.s32.totalorder %s21536_s12, %s15192_s4  ;;  %p15197_p10 = scmp.lt.s32.totalorder %s21536_s12, %s21592_s2 }
 0x7a6   : > { %p15198_p11 = scmp.lt.s32.totalorder %s15196_s7, %s15192_s4 }
 0x7a7   : > { %p15194_p7 = pnand %p15193_p6, %p15321_p4 }
 0x7a8   : > { %p15199_p12 = por %p15198_p11, %p15197_p10 }
 0x7a9   : > { %p15195_p9 = pneg %p15194_p7 }
 0x7ab   : > { %p15200_p13 = pnand %p15199_p12, %p15195_p9 }
 0x7ad   : > { %15203 = shalt.err (!%p15200_p13)
}
 0x7ae   : > { %s15264_s16 = smov 256   ;;  %s15265_s18 = smov 16  }
 0x7af   : > { %14857 = dma.vmem_to_hbm [thread:$0]  (%p15321_p4), %s21538_s24, 16384, %s21536_s12, %s21545_s27, %s15264_s16, %s15264_s16, %s15265_s18  }
 0x7b0 PF: > { %p14863_p0 = scmp.ge.s32.totalorder %s15254_s14, 2  ;;  %s13974_s20 = sand.u32 1, %s15234_s9  }
 0x7b1   : > { %s13975_s23 = scalar_lea.sflag [#allocation3], %s13974_s20 }
 0x7b2   : > { %p14860_p1 = pnand %p14863_p0, %p15328_p8 }
 0x7b4   : > { %p14861_p2 = pneg %p14860_p1 }
 0x7b6   : > { %15229 = dma.done.wait (%p14861_p2), %s13975_s23, 16384  }
 0x7b7   : > { %15231 = vsyncadd (%p14861_p2), %s13975_s23, 4294950912  ;;  %s15_s14 = sadd.s32 1, %s15254_s14   ;;  %s21717_s9 = smov %s15238_s10 }
 0x7b8   : > { %p12_p3 = scmp.ge.s32.totalorder %s15_s14, 4   ;;  %s21718_s10 = smov %s15242_s11 }
 0x7b9   : > { %s21719_s11 = smov %s15334_s22  ;;  %s21720_s12 = smov %s15250_s13 }
 0x7ba   : > { %s21721_s13 = smov %s21723_s17  ;;  %14 = sbr.rel (!%p12_p3) target bundleno = 4 (0x4), region = 63 }
 0x7bf   :  { %13980 = vsyncpa [#allocation3], 1 }
 0x7c0   :  { %13982 = vsyncpa [#allocation3 + $0x1], 1 }

</bundles_post_ra>
